<compile_context>
chip_gen: v7x
topology: tpu7x:2x2x1
jax: 0.10.0
libtpu: 0.0.40
codegen_flags: <defaults>
</compile_context>

<pallas_src>
import functools
import math

import jax
import jax.numpy as jnp
from jax.experimental import pallas as pl
from jax.experimental.pallas import tpu as pltpu


# ------------------------------ model config -------------------------------
IMG_SIZE = 32
IN_CHANS = 3
PATCH_SIZE = (4, 2, 2)
EMBED_DIM = (16, 32, 64)
DEPTH = (1, 1, 2)
NUM_HEADS = 4
MLP_RATIO = 4
PRETRAIN_IMG_SIZE = 32           # -> pos_embed grid 2x2 (+1 cls token)
OUT_INDICES = (1, 2, 3)
LN_EPS = 1e-5


# --------------------------- in-kernel math helpers -------------------------

def _select_gelu():
    """Exact erf-GELU if lax.erf lowers in this Mosaic build, else an f32-accurate poly."""
    inv_sqrt2 = 1.0 / math.sqrt(2.0)

    def _erf_gelu(x):
        return 0.5 * x * (1.0 + jax.lax.erf(x * inv_sqrt2))

    def _poly_gelu(x):
        # TODO(synk): lax.erf did not lower in this Mosaic build; Abramowitz&Stegun 7.1.26
        #             polynomial (|err| < 1.5e-7, ~f32 eps) used instead of exact erf.
        z = x * inv_sqrt2
        a = jnp.abs(z)
        t = 1.0 / (1.0 + 0.3275911 * a)
        poly = t * (0.254829592 + t * (-0.284496736 + t * (1.421413741
               + t * (-1.453152027 + t * 1.061405429))))
        erf_a = 1.0 - poly * jnp.exp(-a * a)
        return 0.5 * x * (1.0 + jnp.where(z >= 0.0, erf_a, -erf_a))

    try:
        def _probe(x_ref, o_ref):
            o_ref[...] = _erf_gelu(x_ref[...])
        out = pl.pallas_call(
            _probe, out_shape=jax.ShapeDtypeStruct((8, 128), jnp.float32),
        )(jnp.zeros((8, 128), jnp.float32))
        jax.block_until_ready(out)
        return _erf_gelu
    except Exception:            # fall back on any lowering/compile failure
        return _poly_gelu


_gelu = _select_gelu()


def _ln(x, g, b, eps):
    """LayerNorm over the last dim of a 2D (rows, C) f32 value; g, b are (1, C)."""
    mu = jnp.mean(x, axis=-1, keepdims=True)
    xc = x - mu
    var = jnp.mean(xc * xc, axis=-1, keepdims=True)
    return xc * jax.lax.rsqrt(var + eps) * g + b


# ------------------------- fused per-stage Pallas kernels -------------------

def _cblock_stage_kernel(patches_ref,
                         pe_w_ref, pe_b_ref, pe_g_ref, pe_bt_ref,
                         n1g_ref, n1b_ref, c1w_ref, c1b_ref, dww_ref, dwb_ref,
                         c2w_ref, c2b_ref, n2g_ref, n2b_ref,
                         m1w_ref, m1b_ref, m2w_ref, m2b_ref,
                         out_ref, pad_ref, *, H, W, C, depth, eps):
    """PatchEmbed (conv as matmul over im2col patches -> LN -> GELU) followed by
    `depth` CBlocks, entirely VMEM-resident, for ONE sample (grid is over batch)."""
    patches = patches_ref[0]                                            # (H*W, k*k*Cin)
    y = jnp.dot(patches, pe_w_ref[...],
                preferred_element_type=jnp.float32) + pe_b_ref[...]
    x = _gelu(_ln(y, pe_g_ref[...], pe_bt_ref[...], eps))               # (H*W, C)

    for blk in range(depth):
        # --- x = x + conv2(dwconv5x5(conv1(LN(x)))) ---
        t = _ln(x, n1g_ref[blk], n1b_ref[blk], eps)
        t = jnp.dot(t, c1w_ref[blk],
                    preferred_element_type=jnp.float32) + c1b_ref[blk]
        # depthwise 5x5, stride 1, padding 2 via a zero-padded VMEM scratch
        pad_ref[...] = jnp.zeros(pad_ref.shape, pad_ref.dtype)
        pad_ref[2:2 + H, 2:2 + W, :] = t.reshape(H, W, C)
        xp = pad_ref[...]
        wdw = dww_ref[blk]                                              # (25, C)
        acc = jnp.zeros((H, W, C), jnp.float32)
        for di in range(5):
            for dj in range(5):
                acc = acc + xp[di:di + H, dj:dj + W, :] * wdw[di * 5 + dj, :]
        t = (acc + dwb_ref[blk, 0, :]).reshape(H * W, C)
        t = jnp.dot(t, c2w_ref[blk],
                    preferred_element_type=jnp.float32) + c2b_ref[blk]
        x = x + t
        # --- x = x + CMlp(LN(x)) ---
        t = _ln(x, n2g_ref[blk], n2b_ref[blk], eps)
        t = jnp.dot(t, m1w_ref[blk],
                    preferred_element_type=jnp.float32) + m1b_ref[blk]
        t = _gelu(t)
        t = jnp.dot(t, m2w_ref[blk],
                    preferred_element_type=jnp.float32) + m2b_ref[blk]
        x = x + t

    out_ref[0] = x.reshape(H, W, C)


def _vit_stage_kernel(patches_ref,
                      pe_w_ref, pe_b_ref, pe_g_ref, pe_bt_ref,
                      pe4_w_ref, pe4_b_ref, pos_ref,
                      n1g_ref, n1b_ref, qkvw_ref, qkvb_ref, projw_ref, projb_ref,
                      n2g_ref, n2b_ref, f1w_ref, f1b_ref, f2w_ref, f2b_ref,
                      n3g_ref, n3b_ref, n4g_ref, n4b_ref,
                      out2_ref, out3_ref, *, H, W, C, num_heads, depth, eps):
    """patch_embed3 -> patch_embed4 -> +abs_pos -> `depth` ViT blocks (all heads in one
    step) -> norm3 / norm4+maxpool, for ONE sample (grid is over batch)."""
    S = H * W
    hd = C // num_heads
    scale = hd ** (-0.5)

    patches = patches_ref[0]                                            # (S, k*k*Cin)
    y = jnp.dot(patches, pe_w_ref[...],
                preferred_element_type=jnp.float32) + pe_b_ref[...]
    y = _gelu(_ln(y, pe_g_ref[...], pe_bt_ref[...], eps))
    x = jnp.dot(y, pe4_w_ref[...],
                preferred_element_type=jnp.float32) + pe4_b_ref[...]
    x = x + pos_ref[...]                                                # (S, C)

    for blk in range(depth):
        # --- attention (all heads, one sample) ---
        t = _ln(x, n1g_ref[blk], n1b_ref[blk], eps)
        qkv = jnp.dot(t, qkvw_ref[blk],
                      preferred_element_type=jnp.float32) + qkvb_ref[blk]   # (S, 3C)
        attn_out = jnp.zeros((S, C), jnp.float32)
        for h in range(num_heads):
            q = qkv[:, h * hd:(h + 1) * hd] * scale
            k = qkv[:, C + h * hd:C + (h + 1) * hd]
            v = qkv[:, 2 * C + h * hd:2 * C + (h + 1) * hd]
            s = jax.lax.dot_general(q, k, (((1,), (1,)), ((), ())),
                                    preferred_element_type=jnp.float32)     # (S, S)
            s = s - jnp.max(s, axis=-1, keepdims=True)
            e = jnp.exp(s)
            p = e * pl.reciprocal(jnp.sum(e, axis=-1, keepdims=True), approx=True)
            o_h = jnp.dot(p, v, preferred_element_type=jnp.float32)         # (S, hd)
            # fold head h straight into the output projection (concat-free)
            attn_out = attn_out + jnp.dot(
                o_h, projw_ref[blk, h * hd:(h + 1) * hd, :],
                preferred_element_type=jnp.float32)
        x = x + attn_out + projb_ref[blk]
        # --- MLP ---
        t = _ln(x, n2g_ref[blk], n2b_ref[blk], eps)
        t = jnp.dot(t, f1w_ref[blk],
                    preferred_element_type=jnp.float32) + f1b_ref[blk]
        t = _gelu(t)
        t = jnp.dot(t, f2w_ref[blk],
                    preferred_element_type=jnp.float32) + f2b_ref[blk]
        x = x + t

    out2_ref[0] = _ln(x, n3g_ref[...], n3b_ref[...], eps).reshape(H, W, C)
    # norm4 + MaxPool2d(2)
    y4 = _ln(x, n4g_ref[...], n4b_ref[...], eps).reshape(H // 2, 2, W // 2, 2, C)
    m = jnp.maximum(y4[:, 0], y4[:, 1])                 # (H//2, W//2, 2, C)
    out3_ref[0] = jnp.maximum(m[:, :, 0], m[:, :, 1])   # (H//2, W//2, C)


# ------------------------------ stage wrappers ------------------------------

def _im2col(x_nhwc, k):
    """Non-overlapping k x k patches: (B,H,W,C) -> (B, (H/k)*(W/k), k*k*C)."""
    B, H, W, C = x_nhwc.shape
    Ho, Wo = H // k, W // k
    return (x_nhwc.reshape(B, Ho, k, Wo, k, C)
            .transpose(0, 1, 3, 2, 4, 5)
            .reshape(B, Ho * Wo, k * k * C))


def _row(v):
    return v.reshape(1, -1)


def _stack_rows(blocks, key):
    return jnp.stack([b[key].reshape(1, -1) for b in blocks], axis=0)


def _stack_mats(blocks, key):
    return jnp.stack([b[key] for b in blocks], axis=0)


def _full_spec(a):
    nd = a.ndim
    return pl.BlockSpec(a.shape, lambda b, nd=nd: (0,) * nd)


def cblock_stage(x_nhwc, pe, blocks, k):
    """One ConvMAE stage: PatchEmbed(k) + CBlocks. x_nhwc: (B,H,W,Cin) f32."""
    B, H, W, Cin = x_nhwc.shape
    Ho, Wo = H // k, W // k
    C = pe["w"].shape[1]
    depth = len(blocks)
    patches = _im2col(x_nhwc, k)

    args = (patches,
            pe["w"], _row(pe["b"]), _row(pe["g"]), _row(pe["beta"]),
            _stack_rows(blocks, "n1_g"), _stack_rows(blocks, "n1_b"),
            _stack_mats(blocks, "c1_w"), _stack_rows(blocks, "c1_b"),
            _stack_mats(blocks, "dw_w"), _stack_rows(blocks, "dw_b"),
            _stack_mats(blocks, "c2_w"), _stack_rows(blocks, "c2_b"),
            _stack_rows(blocks, "n2_g"), _stack_rows(blocks, "n2_b"),
            _stack_mats(blocks, "m1_w"), _stack_rows(blocks, "m1_b"),
            _stack_mats(blocks, "m2_w"), _stack_rows(blocks, "m2_b"))
    in_specs = ([pl.BlockSpec((1, Ho * Wo, k * k * Cin), lambda b: (b, 0, 0))]
                + [_full_spec(a) for a in args[1:]])
    return pl.pallas_call(
        functools.partial(_cblock_stage_kernel, H=Ho, W=Wo, C=C, depth=depth, eps=LN_EPS),
        out_shape=jax.ShapeDtypeStruct((B, Ho, Wo, C), jnp.float32),
        grid=(B,),
        in_specs=in_specs,
        out_specs=pl.BlockSpec((1, Ho, Wo, C), lambda b: (b, 0, 0, 0)),
        scratch_shapes=[pltpu.VMEM((Ho + 4, Wo + 4, C), jnp.float32)],
        compiler_params=pltpu.CompilerParams(dimension_semantics=("parallel",)),
    )(*args)


def vit_stage(x_nhwc, params):
    """Stage 3: patch_embed3/4 + abs pos + ViT blocks + norm3 / norm4+maxpool."""
    B, H, W, Cin = x_nhwc.shape
    k = PATCH_SIZE[2]
    Ho, Wo = H // k, W // k
    pe = params["pe3"]
    C = pe["w"].shape[1]
    blocks = params["blocks3"]
    depth = len(blocks)
    patches = _im2col(x_nhwc, k)

    pos = params["pos_embed"][:, 1:]                     # strip cls token
    size = int(math.sqrt(pos.shape[1]))
    # TODO(synk): bicubic-resize branch of get_abs_pos (grid mismatch) not needed here.
    assert size == Ho and size == Wo
    pos = pos.reshape(Ho * Wo, C)

    args = (patches,
            pe["w"], _row(pe["b"]), _row(pe["g"]), _row(pe["beta"]),
            params["pe4_w"], _row(params["pe4_b"]), pos,
            _stack_rows(blocks, "n1_g"), _stack_rows(blocks, "n1_b"),
            _stack_mats(blocks, "qkv_w"), _stack_rows(blocks, "qkv_b"),
            _stack_mats(blocks, "proj_w"), _stack_rows(blocks, "proj_b"),
            _stack_rows(blocks, "n2_g"), _stack_rows(blocks, "n2_b"),
            _stack_mats(blocks, "fc1_w"), _stack_rows(blocks, "fc1_b"),
            _stack_mats(blocks, "fc2_w"), _stack_rows(blocks, "fc2_b"),
            _row(params["n3_g"]), _row(params["n3_b"]),
            _row(params["n4_g"]), _row(params["n4_b"]))
    in_specs = ([pl.BlockSpec((1, Ho * Wo, k * k * Cin), lambda b: (b, 0, 0))]
                + [_full_spec(a) for a in args[1:]])
    return pl.pallas_call(
        functools.partial(_vit_stage_kernel, H=Ho, W=Wo, C=C,
                          num_heads=NUM_HEADS, depth=depth, eps=LN_EPS),
        out_shape=(jax.ShapeDtypeStruct((B, Ho, Wo, C), jnp.float32),
                   jax.ShapeDtypeStruct((B, Ho // 2, Wo // 2, C), jnp.float32)),
        grid=(B,),
        in_specs=in_specs,
        out_specs=(pl.BlockSpec((1, Ho, Wo, C), lambda b: (b, 0, 0, 0)),
                   pl.BlockSpec((1, Ho // 2, Wo // 2, C), lambda b: (b, 0, 0, 0))),
        compiler_params=pltpu.CompilerParams(dimension_semantics=("parallel",)),
    )(*args)


# ------------------------------ forward pass -------------------------------

def convvit_forward(params, x_nchw):
    x = jnp.transpose(x_nchw, (0, 2, 3, 1))                                # NHWC

    x = cblock_stage(x, params["pe1"], params["blocks1"], PATCH_SIZE[0])   # stride 4
    outputs = {}                                                           # stage 0 not requested

    x = cblock_stage(x, params["pe2"], params["blocks2"], PATCH_SIZE[1])   # stride 8
    if 1 in OUT_INDICES:
        outputs[1] = jnp.transpose(x, (0, 3, 1, 2))                        # NCHW like torch

    out2, out3 = vit_stage(x, params)                                      # stride 16 (+maxpool)
    if 2 in OUT_INDICES:
        outputs[2] = jnp.transpose(out2, (0, 3, 1, 2))
    if 3 in OUT_INDICES:
        outputs[3] = jnp.transpose(out3, (0, 3, 1, 2))
    return outputs


# --------------------------- parameter initializers -------------------------

def init_params(key):
    keys = iter(jax.random.split(key, 512))

    def nrm(shape, std=0.02):
        return jax.random.normal(next(keys), shape, jnp.float32) * std

    def patch_embed_params(cin, cout, k):
        wt = nrm((cout, cin, k, k))                          # torch Conv2d layout
        w_flat = jnp.transpose(wt, (2, 3, 1, 0)).reshape(k * k * cin, cout)
        return dict(w=w_flat, b=nrm((cout,)),
                    g=jnp.ones((cout,), jnp.float32), beta=jnp.zeros((cout,), jnp.float32))

    def conv1x1_params(cin, cout):
        wt = nrm((cout, cin, 1, 1))
        return wt[:, :, 0, 0].T, nrm((cout,))                # (cin, cout), (cout,)

    def linear_params(cin, cout):
        wt = nrm((cout, cin))                                # torch Linear layout
        return wt.T, nrm((cout,))

    def cblock_params(dim, hidden):
        c1w, c1b = conv1x1_params(dim, dim)
        c2w, c2b = conv1x1_params(dim, dim)
        dwt = nrm((dim, 1, 5, 5))                            # torch depthwise layout
        dw_flat = jnp.transpose(dwt[:, 0], (1, 2, 0)).reshape(25, dim)
        m1w, m1b = conv1x1_params(dim, hidden)
        m2w, m2b = conv1x1_params(hidden, dim)
        return dict(n1_g=jnp.ones((dim,)), n1_b=jnp.zeros((dim,)),
                    c1_w=c1w, c1_b=c1b, dw_w=dw_flat, dw_b=nrm((dim,)),
                    c2_w=c2w, c2_b=c2b,
                    n2_g=jnp.ones((dim,)), n2_b=jnp.zeros((dim,)),
                    m1_w=m1w, m1_b=m1b, m2_w=m2w, m2_b=m2b)

    def vit_block_params(dim, hidden):
        qkvw, qkvb = linear_params(dim, 3 * dim)
        pw, pb = linear_params(dim, dim)
        f1w, f1b = linear_params(dim, hidden)
        f2w, f2b = linear_params(hidden, dim)
        return dict(n1_g=jnp.ones((dim,)), n1_b=jnp.zeros((dim,)),
                    qkv_w=qkvw, qkv_b=qkvb, proj_w=pw, proj_b=pb,
                    n2_g=jnp.ones((dim,)), n2_b=jnp.zeros((dim,)),
                    fc1_w=f1w, fc1_b=f1b, fc2_w=f2w, fc2_b=f2b)

    e0, e1, e2 = EMBED_DIM
    num_positions = (PRETRAIN_IMG_SIZE // 16) ** 2 + 1       # +1 cls token
    pe4_w, pe4_b = linear_params(e2, e2)
    return dict(
        pe1=patch_embed_params(IN_CHANS, e0, PATCH_SIZE[0]),
        blocks1=[cblock_params(e0, e0 * MLP_RATIO) for _ in range(DEPTH[0])],
        pe2=patch_embed_params(e0, e1, PATCH_SIZE[1]),
        blocks2=[cblock_params(e1, e1 * MLP_RATIO) for _ in range(DEPTH[1])],
        pe3=patch_embed_params(e1, e2, PATCH_SIZE[2]),
        pe4_w=pe4_w, pe4_b=pe4_b,
        pos_embed=nrm((1, num_positions, e2)),
        blocks3=[vit_block_params(e2, e2 * MLP_RATIO) for _ in range(DEPTH[2])],
        n3_g=jnp.ones((e2,)), n3_b=jnp.zeros((e2,)),
        n4_g=jnp.ones((e2,)), n4_b=jnp.zeros((e2,)),
    )


# ----------------------------------- main -----------------------------------

if __name__ == "__main__":
    root = jax.random.PRNGKey(0)
    kp, kx = jax.random.split(root)
    params = init_params(kp)
    x = jax.random.normal(kx, (2, IN_CHANS, IMG_SIZE, IMG_SIZE), jnp.float32)  # NCHW input

    outs = jax.jit(convvit_forward)(params, x)
    for leaf in jax.tree_util.tree_leaves(outs):
        jax.block_until_ready(leaf)

    # sanity on shapes (NCHW outputs, strides 8/16/32 relative to the input)
    assert outs[1].shape == (2, EMBED_DIM[1], 4, 4)
    assert outs[2].shape == (2, EMBED_DIM[2], 2, 2)
    assert outs[3].shape == (2, EMBED_DIM[2], 1, 1)
    print("KERNEL_OK")
</pallas_src>

<mosaic_0001>
module attributes {stable_mosaic.version = 11 : i64} {
  func.func @_probe(%arg0: memref<8x128xf32, #tpu.memory_space<vmem>>, %arg1: memref<8x128xf32, #tpu.memory_space<vmem>>) attributes {dimension_semantics = [], scalar_prefetch = 0 : i64, scratch_operands = 0 : i64, tpu.core_type = #tpu.core_type<tc>} {
    %c0 = arith.constant 0 : index
    %c0_0 = arith.constant 0 : index
    %0 = vector.load %arg0[%c0, %c0_0] : memref<8x128xf32, #tpu.memory_space<vmem>>, vector<8x128xf32>
    %cst = arith.constant 5.000000e-01 : f32
    %1 = vector.broadcast %cst : f32 to vector<8x128xf32>
    %2 = arith.mulf %1, %0 : vector<8x128xf32>
    %cst_1 = arith.constant 0.707106769 : f32
    %3 = vector.broadcast %cst_1 : f32 to vector<8x128xf32>
    %4 = arith.mulf %0, %3 : vector<8x128xf32>
    %5 = math.erf %4 : vector<8x128xf32>
    %cst_2 = arith.constant 1.000000e+00 : f32
    %6 = vector.broadcast %cst_2 : f32 to vector<8x128xf32>
    %7 = arith.addf %6, %5 : vector<8x128xf32>
    %8 = arith.mulf %2, %7 : vector<8x128xf32>
    %c0_3 = arith.constant 0 : index
    %c0_4 = arith.constant 0 : index
    %9 = vector.load %arg1[%c0_3, %c0_4] : memref<8x128xf32, #tpu.memory_space<vmem>>, vector<8x128xf32>
    tpu.vector_store %arg1[%c0_3, %c0_4], %8 {strides = array<i32>} : memref<8x128xf32, #tpu.memory_space<vmem>>, vector<8x128xf32>,
    return
  }
}

module attributes {stable_mosaic.version = 11 : i64} {
  func.func @_cblock_stage_kernel(%arg0: i32, %arg1: memref<1x64x48xf32, #tpu.memory_space<vmem>>, %arg2: memref<48x16xf32, #tpu.memory_space<vmem>>, %arg3: memref<1x16xf32, #tpu.memory_space<vmem>>, %arg4: memref<1x16xf32, #tpu.memory_space<vmem>>, %arg5: memref<1x16xf32, #tpu.memory_space<vmem>>, %arg6: memref<1x1x16xf32, #tpu.memory_space<vmem>>, %arg7: memref<1x1x16xf32, #tpu.memory_space<vmem>>, %arg8: memref<1x16x16xf32, #tpu.memory_space<vmem>>, %arg9: memref<1x1x16xf32, #tpu.memory_space<vmem>>, %arg10: memref<1x25x16xf32, #tpu.memory_space<vmem>>, %arg11: memref<1x1x16xf32, #tpu.memory_space<vmem>>, %arg12: memref<1x16x16xf32, #tpu.memory_space<vmem>>, %arg13: memref<1x1x16xf32, #tpu.memory_space<vmem>>, %arg14: memref<1x1x16xf32, #tpu.memory_space<vmem>>, %arg15: memref<1x1x16xf32, #tpu.memory_space<vmem>>, %arg16: memref<1x16x64xf32, #tpu.memory_space<vmem>>, %arg17: memref<1x1x64xf32, #tpu.memory_space<vmem>>, %arg18: memref<1x64x16xf32, #tpu.memory_space<vmem>>, %arg19: memref<1x1x16xf32, #tpu.memory_space<vmem>>, %arg20: memref<1x8x8x16xf32, #tpu.memory_space<vmem>>, %arg21: memref<12x12x16xf32, #tpu.memory_space<vmem>>) attributes {dimension_semantics = [#tpu.dimension_semantics<parallel>], iteration_bounds = array<i64: 2>, scalar_prefetch = 0 : i64, scratch_operands = 1 : i64, tpu.core_type = #tpu.core_type<tc>, window_params = [{transform_indices = @transform_0, window_bounds = array<i64: 1, 64, 48>}, {pipeline_mode = #tpu.pipeline_mode<synchronous>, transform_indices = @transform_1, window_bounds = array<i64: 48, 16>}, {pipeline_mode = #tpu.pipeline_mode<synchronous>, transform_indices = @transform_2, window_bounds = array<i64: 1, 16>}, {pipeline_mode = #tpu.pipeline_mode<synchronous>, transform_indices = @transform_3, window_bounds = array<i64: 1, 16>}, {pipeline_mode = #tpu.pipeline_mode<synchronous>, transform_indices = @transform_4, window_bounds = array<i64: 1, 16>}, {pipeline_mode = #tpu.pipeline_mode<synchronous>, transform_indices = @transform_5, window_bounds = array<i64: 1, 1, 16>}, {pipeline_mode = #tpu.pipeline_mode<synchronous>, transform_indices = @transform_6, window_bounds = array<i64: 1, 1, 16>}, {pipeline_mode = #tpu.pipeline_mode<synchronous>, transform_indices = @transform_7, window_bounds = array<i64: 1, 16, 16>}, {pipeline_mode = #tpu.pipeline_mode<synchronous>, transform_indices = @transform_8, window_bounds = array<i64: 1, 1, 16>}, {pipeline_mode = #tpu.pipeline_mode<synchronous>, transform_indices = @transform_9, window_bounds = array<i64: 1, 25, 16>}, {pipeline_mode = #tpu.pipeline_mode<synchronous>, transform_indices = @transform_10, window_bounds = array<i64: 1, 1, 16>}, {pipeline_mode = #tpu.pipeline_mode<synchronous>, transform_indices = @transform_11, window_bounds = array<i64: 1, 16, 16>}, {pipeline_mode = #tpu.pipeline_mode<synchronous>, transform_indices = @transform_12, window_bounds = array<i64: 1, 1, 16>}, {pipeline_mode = #tpu.pipeline_mode<synchronous>, transform_indices = @transform_13, window_bounds = array<i64: 1, 1, 16>}, {pipeline_mode = #tpu.pipeline_mode<synchronous>, transform_indices = @transform_14, window_bounds = array<i64: 1, 1, 16>}, {pipeline_mode = #tpu.pipeline_mode<synchronous>, transform_indices = @transform_15, window_bounds = array<i64: 1, 16, 64>}, {pipeline_mode = #tpu.pipeline_mode<synchronous>, transform_indices = @transform_16, window_bounds = array<i64: 1, 1, 64>}, {pipeline_mode = #tpu.pipeline_mode<synchronous>, transform_indices = @transform_17, window_bounds = array<i64: 1, 64, 16>}, {pipeline_mode = #tpu.pipeline_mode<synchronous>, transform_indices = @transform_18, window_bounds = array<i64: 1, 1, 16>}, {transform_indices = @transform_19, window_bounds = array<i64: 1, 8, 8, 16>}]} {
    %c0 = arith.constant 0 : index
    %c0_0 = arith.constant 0 : index
    %c0_1 = arith.constant 0 : index
    %0 = vector.load %arg1[%c0, %c0_0, %c0_1] : memref<1x64x48xf32, #tpu.memory_space<vmem>>, vector<1x64x48xf32>
    %1 = vector.shape_cast %0 : vector<1x64x48xf32> to vector<64x48xf32>
    %c0_2 = arith.constant 0 : index
    %c0_3 = arith.constant 0 : index
    %2 = vector.load %arg2[%c0_2, %c0_3] : memref<48x16xf32, #tpu.memory_space<vmem>>, vector<48x16xf32>
    %cst = arith.constant dense<0.000000e+00> : vector<64x16xf32>
    %3 = tpu.matmul %1, %2, %cst {dimension_numbers = #tpu.dot_dimension_numbers<[1], [0], [0], [1], [0, 0, 1, 1], [], []>} : vector<64x48xf32>, vector<48x16xf32>, vector<64x16xf32> -> vector<64x16xf32>
    %c0_4 = arith.constant 0 : index
    %c0_5 = arith.constant 0 : index
    %4 = vector.load %arg3[%c0_4, %c0_5] : memref<1x16xf32, #tpu.memory_space<vmem>>, vector<1x16xf32>
    %5 = vector.broadcast %4 : vector<1x16xf32> to vector<64x16xf32>
    %6 = arith.addf %3, %5 : vector<64x16xf32>
    %c0_6 = arith.constant 0 : index
    %c0_7 = arith.constant 0 : index
    %7 = vector.load %arg4[%c0_6, %c0_7] : memref<1x16xf32, #tpu.memory_space<vmem>>, vector<1x16xf32>
    %c0_8 = arith.constant 0 : index
    %c0_9 = arith.constant 0 : index
    %8 = vector.load %arg5[%c0_8, %c0_9] : memref<1x16xf32, #tpu.memory_space<vmem>>, vector<1x16xf32>
    %cst_10 = arith.constant dense<0.000000e+00> : vector<64xf32>
    %9 = vector.multi_reduction <add>, %6, %cst_10 [1] : vector<64x16xf32> to vector<64xf32>
    %10 = vector.shape_cast %9 : vector<64xf32> to vector<64x1xf32>
    %cst_11 = arith.constant 1.600000e+01 : f32
    %11 = vector.broadcast %cst_11 : f32 to vector<64x1xf32>
    %12 = arith.divf %10, %11 : vector<64x1xf32>
    %13 = vector.broadcast %12 : vector<64x1xf32> to vector<64x16xf32>
    %14 = arith.subf %6, %13 : vector<64x16xf32>
    %15 = arith.mulf %14, %14 : vector<64x16xf32>
    %cst_12 = arith.constant dense<0.000000e+00> : vector<64xf32>
    %16 = vector.multi_reduction <add>, %15, %cst_12 [1] : vector<64x16xf32> to vector<64xf32>
    %17 = vector.shape_cast %16 : vector<64xf32> to vector<64x1xf32>
    %cst_13 = arith.constant 1.600000e+01 : f32
    %18 = vector.broadcast %cst_13 : f32 to vector<64x1xf32>
    %19 = arith.divf %17, %18 : vector<64x1xf32>
    %cst_14 = arith.constant 9.99999974E-6 : f32
    %20 = vector.broadcast %cst_14 : f32 to vector<64x1xf32>
    %21 = arith.addf %19, %20 : vector<64x1xf32>
    %22 = math.rsqrt %21 : vector<64x1xf32>
    %23 = vector.broadcast %22 : vector<64x1xf32> to vector<64x16xf32>
    %24 = arith.mulf %14, %23 : vector<64x16xf32>
    %25 = vector.broadcast %7 : vector<1x16xf32> to vector<64x16xf32>
    %26 = arith.mulf %24, %25 : vector<64x16xf32>
    %27 = vector.broadcast %8 : vector<1x16xf32> to vector<64x16xf32>
    %28 = arith.addf %26, %27 : vector<64x16xf32>
    %cst_15 = arith.constant 0.707106769 : f32
    %29 = vector.broadcast %cst_15 : f32 to vector<64x16xf32>
    %30 = arith.mulf %28, %29 : vector<64x16xf32>
    %31 = math.absf %30 : vector<64x16xf32>
    %cst_16 = arith.constant 0.327591091 : f32
    %32 = vector.broadcast %cst_16 : f32 to vector<64x16xf32>
    %33 = arith.mulf %32, %31 : vector<64x16xf32>
    %cst_17 = arith.constant 1.000000e+00 : f32
    %34 = vector.broadcast %cst_17 : f32 to vector<64x16xf32>
    %35 = arith.addf %34, %33 : vector<64x16xf32>
    %cst_18 = arith.constant 1.000000e+00 : f32
    %36 = vector.broadcast %cst_18 : f32 to vector<64x16xf32>
    %37 = arith.divf %36, %35 : vector<64x16xf32>
    %cst_19 = arith.constant 1.06140542 : f32
    %38 = vector.broadcast %cst_19 : f32 to vector<64x16xf32>
    %39 = arith.mulf %37, %38 : vector<64x16xf32>
    %cst_20 = arith.constant -1.45315206 : f32
    %40 = vector.broadcast %cst_20 : f32 to vector<64x16xf32>
    %41 = arith.addf %40, %39 : vector<64x16xf32>
    %42 = arith.mulf %37, %41 : vector<64x16xf32>
    %cst_21 = arith.constant 1.42141378 : f32
    %43 = vector.broadcast %cst_21 : f32 to vector<64x16xf32>
    %44 = arith.addf %43, %42 : vector<64x16xf32>
    %45 = arith.mulf %37, %44 : vector<64x16xf32>
    %cst_22 = arith.constant -0.284496725 : f32
    %46 = vector.broadcast %cst_22 : f32 to vector<64x16xf32>
    %47 = arith.addf %46, %45 : vector<64x16xf32>
    %48 = arith.mulf %37, %47 : vector<64x16xf32>
    %cst_23 = arith.constant 0.254829586 : f32
    %49 = vector.broadcast %cst_23 : f32 to vector<64x16xf32>
    %50 = arith.addf %49, %48 : vector<64x16xf32>
    %51 = arith.mulf %37, %50 : vector<64x16xf32>
    %cst_24 = arith.constant 0.000000e+00 : f32
    %52 = vector.broadcast %cst_24 : f32 to vector<64x16xf32>
    %53 = arith.subf %52, %31 : vector<64x16xf32>
    %54 = arith.mulf %53, %31 : vector<64x16xf32>
    %55 = math.exp %54 : vector<64x16xf32>
    %56 = arith.mulf %51, %55 : vector<64x16xf32>
    %cst_25 = arith.constant 1.000000e+00 : f32
    %57 = vector.broadcast %cst_25 : f32 to vector<64x16xf32>
    %58 = arith.subf %57, %56 : vector<64x16xf32>
    %cst_26 = arith.constant 5.000000e-01 : f32
    %59 = vector.broadcast %cst_26 : f32 to vector<64x16xf32>
    %60 = arith.mulf %59, %28 : vector<64x16xf32>
    %cst_27 = arith.constant 0.000000e+00 : f32
    %61 = vector.broadcast %cst_27 : f32 to vector<64x16xf32>
    %62 = arith.cmpf oge, %30, %61 : vector<64x16xf32>
    %cst_28 = arith.constant 0.000000e+00 : f32
    %63 = vector.broadcast %cst_28 : f32 to vector<64x16xf32>
    %64 = arith.subf %63, %58 : vector<64x16xf32>
    %65 = arith.select %62, %58, %64 : vector<64x16xi1>, vector<64x16xf32>
    %cst_29 = arith.constant 1.000000e+00 : f32
    %66 = vector.broadcast %cst_29 : f32 to vector<64x16xf32>
    %67 = arith.addf %66, %65 : vector<64x16xf32>
    %68 = arith.mulf %60, %67 : vector<64x16xf32>
    %c0_30 = arith.constant 0 : index
    %c0_31 = arith.constant 0 : index
    %c0_32 = arith.constant 0 : index
    %69 = vector.load %arg6[%c0_30, %c0_31, %c0_32] : memref<1x1x16xf32, #tpu.memory_space<vmem>>, vector<1x1x16xf32>
    %70 = vector.shape_cast %69 : vector<1x1x16xf32> to vector<1x16xf32>
    %c0_33 = arith.constant 0 : index
    %c0_34 = arith.constant 0 : index
    %c0_35 = arith.constant 0 : index
    %71 = vector.load %arg7[%c0_33, %c0_34, %c0_35] : memref<1x1x16xf32, #tpu.memory_space<vmem>>, vector<1x1x16xf32>
    %72 = vector.shape_cast %71 : vector<1x1x16xf32> to vector<1x16xf32>
    %cst_36 = arith.constant dense<0.000000e+00> : vector<64xf32>
    %73 = vector.multi_reduction <add>, %68, %cst_36 [1] : vector<64x16xf32> to vector<64xf32>
    %74 = vector.shape_cast %73 : vector<64xf32> to vector<64x1xf32>
    %cst_37 = arith.constant 1.600000e+01 : f32
    %75 = vector.broadcast %cst_37 : f32 to vector<64x1xf32>
    %76 = arith.divf %74, %75 : vector<64x1xf32>
    %77 = vector.broadcast %76 : vector<64x1xf32> to vector<64x16xf32>
    %78 = arith.subf %68, %77 : vector<64x16xf32>
    %79 = arith.mulf %78, %78 : vector<64x16xf32>
    %cst_38 = arith.constant dense<0.000000e+00> : vector<64xf32>
    %80 = vector.multi_reduction <add>, %79, %cst_38 [1] : vector<64x16xf32> to vector<64xf32>
    %81 = vector.shape_cast %80 : vector<64xf32> to vector<64x1xf32>
    %cst_39 = arith.constant 1.600000e+01 : f32
    %82 = vector.broadcast %cst_39 : f32 to vector<64x1xf32>
    %83 = arith.divf %81, %82 : vector<64x1xf32>
    %cst_40 = arith.constant 9.99999974E-6 : f32
    %84 = vector.broadcast %cst_40 : f32 to vector<64x1xf32>
    %85 = arith.addf %83, %84 : vector<64x1xf32>
    %86 = math.rsqrt %85 : vector<64x1xf32>
    %87 = vector.broadcast %86 : vector<64x1xf32> to vector<64x16xf32>
    %88 = arith.mulf %78, %87 : vector<64x16xf32>
    %89 = vector.broadcast %70 : vector<1x16xf32> to vector<64x16xf32>
    %90 = arith.mulf %88, %89 : vector<64x16xf32>
    %91 = vector.broadcast %72 : vector<1x16xf32> to vector<64x16xf32>
    %92 = arith.addf %90, %91 : vector<64x16xf32>
    %c0_41 = arith.constant 0 : index
    %c0_42 = arith.constant 0 : index
    %c0_43 = arith.constant 0 : index
    %93 = vector.load %arg8[%c0_41, %c0_42, %c0_43] : memref<1x16x16xf32, #tpu.memory_space<vmem>>, vector<1x16x16xf32>
    %94 = vector.shape_cast %93 : vector<1x16x16xf32> to vector<16x16xf32>
    %cst_44 = arith.constant dense<0.000000e+00> : vector<64x16xf32>
    %95 = tpu.matmul %92, %94, %cst_44 {dimension_numbers = #tpu.dot_dimension_numbers<[1], [0], [0], [1], [0, 0, 1, 1], [], []>} : vector<64x16xf32>, vector<16x16xf32>, vector<64x16xf32> -> vector<64x16xf32>
    %c0_45 = arith.constant 0 : index
    %c0_46 = arith.constant 0 : index
    %c0_47 = arith.constant 0 : index
    %96 = vector.load %arg9[%c0_45, %c0_46, %c0_47] : memref<1x1x16xf32, #tpu.memory_space<vmem>>, vector<1x1x16xf32>
    %97 = vector.shape_cast %96 : vector<1x1x16xf32> to vector<1x16xf32>
    %98 = vector.broadcast %97 : vector<1x16xf32> to vector<64x16xf32>
    %99 = arith.addf %95, %98 : vector<64x16xf32>
    %cst_48 = arith.constant 0.000000e+00 : f32
    %100 = vector.broadcast %cst_48 : f32 to vector<12x12x16xf32>
    %c0_49 = arith.constant 0 : index
    %c0_50 = arith.constant 0 : index
    %c0_51 = arith.constant 0 : index
    %101 = vector.load %arg21[%c0_49, %c0_50, %c0_51] : memref<12x12x16xf32, #tpu.memory_space<vmem>>, vector<12x12x16xf32>
    tpu.vector_store %arg21[%c0_49, %c0_50, %c0_51], %100 {strides = array<i32>} : memref<12x12x16xf32, #tpu.memory_space<vmem>>, vector<12x12x16xf32>,
    %102 = vector.shape_cast %99 : vector<64x16xf32> to vector<8x8x16xf32>
    %c2 = arith.constant 2 : index
    %c2_52 = arith.constant 2 : index
    %c0_53 = arith.constant 0 : index
    %103 = vector.load %arg21[%c2, %c2_52, %c0_53] : memref<12x12x16xf32, #tpu.memory_space<vmem>>, vector<8x8x16xf32>
    tpu.vector_store %arg21[%c2, %c2_52, %c0_53], %102 {strides = array<i32>} : memref<12x12x16xf32, #tpu.memory_space<vmem>>, vector<8x8x16xf32>,
    %c0_54 = arith.constant 0 : index
    %c0_55 = arith.constant 0 : index
    %c0_56 = arith.constant 0 : index
    %104 = vector.load %arg21[%c0_54, %c0_55, %c0_56] : memref<12x12x16xf32, #tpu.memory_space<vmem>>, vector<12x12x16xf32>
    %c0_57 = arith.constant 0 : index
    %c0_58 = arith.constant 0 : index
    %c0_59 = arith.constant 0 : index
    %105 = vector.load %arg10[%c0_57, %c0_58, %c0_59] : memref<1x25x16xf32, #tpu.memory_space<vmem>>, vector<1x25x16xf32>
    %106 = vector.shape_cast %105 : vector<1x25x16xf32> to vector<25x16xf32>
    %cst_60 = arith.constant 0.000000e+00 : f32
    %107 = vector.broadcast %cst_60 : f32 to vector<8x8x16xf32>
    %108 = vector.extract_strided_slice %104 {offsets = [0, 0, 0], sizes = [8, 8, 16], strides = [1, 1, 1]} : vector<12x12x16xf32> to vector<8x8x16xf32>
    %109 = vector.extract_strided_slice %106 {offsets = [0, 0], sizes = [1, 16], strides = [1, 1]} : vector<25x16xf32> to vector<1x16xf32>
    %110 = vector.shape_cast %109 : vector<1x16xf32> to vector<16xf32>
    %111 = vector.shape_cast %110 : vector<16xf32> to vector<1x1x16xf32>
    %112 = vector.broadcast %111 : vector<1x1x16xf32> to vector<8x8x16xf32>
    %113 = arith.mulf %108, %112 : vector<8x8x16xf32>
    %114 = arith.addf %107, %113 : vector<8x8x16xf32>
    %115 = vector.extract_strided_slice %104 {offsets = [0, 1, 0], sizes = [8, 8, 16], strides = [1, 1, 1]} : vector<12x12x16xf32> to vector<8x8x16xf32>
    %116 = vector.extract_strided_slice %106 {offsets = [1, 0], sizes = [1, 16], strides = [1, 1]} : vector<25x16xf32> to vector<1x16xf32>
    %117 = vector.shape_cast %116 : vector<1x16xf32> to vector<16xf32>
    %118 = vector.shape_cast %117 : vector<16xf32> to vector<1x1x16xf32>
    %119 = vector.broadcast %118 : vector<1x1x16xf32> to vector<8x8x16xf32>
    %120 = arith.mulf %115, %119 : vector<8x8x16xf32>
    %121 = arith.addf %114, %120 : vector<8x8x16xf32>
    %122 = vector.extract_strided_slice %104 {offsets = [0, 2, 0], sizes = [8, 8, 16], strides = [1, 1, 1]} : vector<12x12x16xf32> to vector<8x8x16xf32>
    %123 = vector.extract_strided_slice %106 {offsets = [2, 0], sizes = [1, 16], strides = [1, 1]} : vector<25x16xf32> to vector<1x16xf32>
    %124 = vector.shape_cast %123 : vector<1x16xf32> to vector<16xf32>
    %125 = vector.shape_cast %124 : vector<16xf32> to vector<1x1x16xf32>
    %126 = vector.broadcast %125 : vector<1x1x16xf32> to vector<8x8x16xf32>
    %127 = arith.mulf %122, %126 : vector<8x8x16xf32>
    %128 = arith.addf %121, %127 : vector<8x8x16xf32>
    %129 = vector.extract_strided_slice %104 {offsets = [0, 3, 0], sizes = [8, 8, 16], strides = [1, 1, 1]} : vector<12x12x16xf32> to vector<8x8x16xf32>
    %130 = vector.extract_strided_slice %106 {offsets = [3, 0], sizes = [1, 16], strides = [1, 1]} : vector<25x16xf32> to vector<1x16xf32>
    %131 = vector.shape_cast %130 : vector<1x16xf32> to vector<16xf32>
    %132 = vector.shape_cast %131 : vector<16xf32> to vector<1x1x16xf32>
    %133 = vector.broadcast %132 : vector<1x1x16xf32> to vector<8x8x16xf32>
    %134 = arith.mulf %129, %133 : vector<8x8x16xf32>
    %135 = arith.addf %128, %134 : vector<8x8x16xf32>
    %136 = vector.extract_strided_slice %104 {offsets = [0, 4, 0], sizes = [8, 8, 16], strides = [1, 1, 1]} : vector<12x12x16xf32> to vector<8x8x16xf32>
    %137 = vector.extract_strided_slice %106 {offsets = [4, 0], sizes = [1, 16], strides = [1, 1]} : vector<25x16xf32> to vector<1x16xf32>
    %138 = vector.shape_cast %137 : vector<1x16xf32> to vector<16xf32>
    %139 = vector.shape_cast %138 : vector<16xf32> to vector<1x1x16xf32>
    %140 = vector.broadcast %139 : vector<1x1x16xf32> to vector<8x8x16xf32>
    %141 = arith.mulf %136, %140 : vector<8x8x16xf32>
    %142 = arith.addf %135, %141 : vector<8x8x16xf32>
    %143 = vector.extract_strided_slice %104 {offsets = [1, 0, 0], sizes = [8, 8, 16], strides = [1, 1, 1]} : vector<12x12x16xf32> to vector<8x8x16xf32>
    %144 = vector.extract_strided_slice %106 {offsets = [5, 0], sizes = [1, 16], strides = [1, 1]} : vector<25x16xf32> to vector<1x16xf32>
    %145 = vector.shape_cast %144 : vector<1x16xf32> to vector<16xf32>
    %146 = vector.shape_cast %145 : vector<16xf32> to vector<1x1x16xf32>
    %147 = vector.broadcast %146 : vector<1x1x16xf32> to vector<8x8x16xf32>
    %148 = arith.mulf %143, %147 : vector<8x8x16xf32>
    %149 = arith.addf %142, %148 : vector<8x8x16xf32>
    %150 = vector.extract_strided_slice %104 {offsets = [1, 1, 0], sizes = [8, 8, 16], strides = [1, 1, 1]} : vector<12x12x16xf32> to vector<8x8x16xf32>
    %151 = vector.extract_strided_slice %106 {offsets = [6, 0], sizes = [1, 16], strides = [1, 1]} : vector<25x16xf32> to vector<1x16xf32>
    %152 = vector.shape_cast %151 : vector<1x16xf32> to vector<16xf32>
    %153 = vector.shape_cast %152 : vector<16xf32> to vector<1x1x16xf32>
    %154 = vector.broadcast %153 : vector<1x1x16xf32> to vector<8x8x16xf32>
    %155 = arith.mulf %150, %154 : vector<8x8x16xf32>
    %156 = arith.addf %149, %155 : vector<8x8x16xf32>
    %157 = vector.extract_strided_slice %104 {offsets = [1, 2, 0], sizes = [8, 8, 16], strides = [1, 1, 1]} : vector<12x12x16xf32> to vector<8x8x16xf32>
    %158 = vector.extract_strided_slice %106 {offsets = [7, 0], sizes = [1, 16], strides = [1, 1]} : vector<25x16xf32> to vector<1x16xf32>
    %159 = vector.shape_cast %158 : vector<1x16xf32> to vector<16xf32>
    %160 = vector.shape_cast %159 : vector<16xf32> to vector<1x1x16xf32>
    %161 = vector.broadcast %160 : vector<1x1x16xf32> to vector<8x8x16xf32>
    %162 = arith.mulf %157, %161 : vector<8x8x16xf32>
    %163 = arith.addf %156, %162 : vector<8x8x16xf32>
    %164 = vector.extract_strided_slice %104 {offsets = [1, 3, 0], sizes = [8, 8, 16], strides = [1, 1, 1]} : vector<12x12x16xf32> to vector<8x8x16xf32>
    %165 = vector.extract_strided_slice %106 {offsets = [8, 0], sizes = [1, 16], strides = [1, 1]} : vector<25x16xf32> to vector<1x16xf32>
    %166 = vector.shape_cast %165 : vector<1x16xf32> to vector<16xf32>
    %167 = vector.shape_cast %166 : vector<16xf32> to vector<1x1x16xf32>
    %168 = vector.broadcast %167 : vector<1x1x16xf32> to vector<8x8x16xf32>
    %169 = arith.mulf %164, %168 : vector<8x8x16xf32>
    %170 = arith.addf %163, %169 : vector<8x8x16xf32>
    %171 = vector.extract_strided_slice %104 {offsets = [1, 4, 0], sizes = [8, 8, 16], strides = [1, 1, 1]} : vector<12x12x16xf32> to vector<8x8x16xf32>
    %172 = vector.extract_strided_slice %106 {offsets = [9, 0], sizes = [1, 16], strides = [1, 1]} : vector<25x16xf32> to vector<1x16xf32>
    %173 = vector.shape_cast %172 : vector<1x16xf32> to vector<16xf32>
    %174 = vector.shape_cast %173 : vector<16xf32> to vector<1x1x16xf32>
    %175 = vector.broadcast %174 : vector<1x1x16xf32> to vector<8x8x16xf32>
    %176 = arith.mulf %171, %175 : vector<8x8x16xf32>
    %177 = arith.addf %170, %176 : vector<8x8x16xf32>
    %178 = vector.extract_strided_slice %104 {offsets = [2, 0, 0], sizes = [8, 8, 16], strides = [1, 1, 1]} : vector<12x12x16xf32> to vector<8x8x16xf32>
    %179 = vector.extract_strided_slice %106 {offsets = [10, 0], sizes = [1, 16], strides = [1, 1]} : vector<25x16xf32> to vector<1x16xf32>
    %180 = vector.shape_cast %179 : vector<1x16xf32> to vector<16xf32>
    %181 = vector.shape_cast %180 : vector<16xf32> to vector<1x1x16xf32>
    %182 = vector.broadcast %181 : vector<1x1x16xf32> to vector<8x8x16xf32>
    %183 = arith.mulf %178, %182 : vector<8x8x16xf32>
    %184 = arith.addf %177, %183 : vector<8x8x16xf32>
    %185 = vector.extract_strided_slice %104 {offsets = [2, 1, 0], sizes = [8, 8, 16], strides = [1, 1, 1]} : vector<12x12x16xf32> to vector<8x8x16xf32>
    %186 = vector.extract_strided_slice %106 {offsets = [11, 0], sizes = [1, 16], strides = [1, 1]} : vector<25x16xf32> to vector<1x16xf32>
    %187 = vector.shape_cast %186 : vector<1x16xf32> to vector<16xf32>
    %188 = vector.shape_cast %187 : vector<16xf32> to vector<1x1x16xf32>
    %189 = vector.broadcast %188 : vector<1x1x16xf32> to vector<8x8x16xf32>
    %190 = arith.mulf %185, %189 : vector<8x8x16xf32>
    %191 = arith.addf %184, %190 : vector<8x8x16xf32>
    %192 = vector.extract_strided_slice %104 {offsets = [2, 2, 0], sizes = [8, 8, 16], strides = [1, 1, 1]} : vector<12x12x16xf32> to vector<8x8x16xf32>
    %193 = vector.extract_strided_slice %106 {offsets = [12, 0], sizes = [1, 16], strides = [1, 1]} : vector<25x16xf32> to vector<1x16xf32>
    %194 = vector.shape_cast %193 : vector<1x16xf32> to vector<16xf32>
    %195 = vector.shape_cast %194 : vector<16xf32> to vector<1x1x16xf32>
    %196 = vector.broadcast %195 : vector<1x1x16xf32> to vector<8x8x16xf32>
    %197 = arith.mulf %192, %196 : vector<8x8x16xf32>
    %198 = arith.addf %191, %197 : vector<8x8x16xf32>
    %199 = vector.extract_strided_slice %104 {offsets = [2, 3, 0], sizes = [8, 8, 16], strides = [1, 1, 1]} : vector<12x12x16xf32> to vector<8x8x16xf32>
    %200 = vector.extract_strided_slice %106 {offsets = [13, 0], sizes = [1, 16], strides = [1, 1]} : vector<25x16xf32> to vector<1x16xf32>
    %201 = vector.shape_cast %200 : vector<1x16xf32> to vector<16xf32>
    %202 = vector.shape_cast %201 : vector<16xf32> to vector<1x1x16xf32>
    %203 = vector.broadcast %202 : vector<1x1x16xf32> to vector<8x8x16xf32>
    %204 = arith.mulf %199, %203 : vector<8x8x16xf32>
    %205 = arith.addf %198, %204 : vector<8x8x16xf32>
    %206 = vector.extract_strided_slice %104 {offsets = [2, 4, 0], sizes = [8, 8, 16], strides = [1, 1, 1]} : vector<12x12x16xf32> to vector<8x8x16xf32>
    %207 = vector.extract_strided_slice %106 {offsets = [14, 0], sizes = [1, 16], strides = [1, 1]} : vector<25x16xf32> to vector<1x16xf32>
    %208 = vector.shape_cast %207 : vector<1x16xf32> to vector<16xf32>
    %209 = vector.shape_cast %208 : vector<16xf32> to vector<1x1x16xf32>
    %210 = vector.broadcast %209 : vector<1x1x16xf32> to vector<8x8x16xf32>
    %211 = arith.mulf %206, %210 : vector<8x8x16xf32>
    %212 = arith.addf %205, %211 : vector<8x8x16xf32>
    %213 = vector.extract_strided_slice %104 {offsets = [3, 0, 0], sizes = [8, 8, 16], strides = [1, 1, 1]} : vector<12x12x16xf32> to vector<8x8x16xf32>
    %214 = vector.extract_strided_slice %106 {offsets = [15, 0], sizes = [1, 16], strides = [1, 1]} : vector<25x16xf32> to vector<1x16xf32>
    %215 = vector.shape_cast %214 : vector<1x16xf32> to vector<16xf32>
    %216 = vector.shape_cast %215 : vector<16xf32> to vector<1x1x16xf32>
    %217 = vector.broadcast %216 : vector<1x1x16xf32> to vector<8x8x16xf32>
    %218 = arith.mulf %213, %217 : vector<8x8x16xf32>
    %219 = arith.addf %212, %218 : vector<8x8x16xf32>
    %220 = vector.extract_strided_slice %104 {offsets = [3, 1, 0], sizes = [8, 8, 16], strides = [1, 1, 1]} : vector<12x12x16xf32> to vector<8x8x16xf32>
    %221 = vector.extract_strided_slice %106 {offsets = [16, 0], sizes = [1, 16], strides = [1, 1]} : vector<25x16xf32> to vector<1x16xf32>
    %222 = vector.shape_cast %221 : vector<1x16xf32> to vector<16xf32>
    %223 = vector.shape_cast %222 : vector<16xf32> to vector<1x1x16xf32>
    %224 = vector.broadcast %223 : vector<1x1x16xf32> to vector<8x8x16xf32>
    %225 = arith.mulf %220, %224 : vector<8x8x16xf32>
    %226 = arith.addf %219, %225 : vector<8x8x16xf32>
    %227 = vector.extract_strided_slice %104 {offsets = [3, 2, 0], sizes = [8, 8, 16], strides = [1, 1, 1]} : vector<12x12x16xf32> to vector<8x8x16xf32>
    %228 = vector.extract_strided_slice %106 {offsets = [17, 0], sizes = [1, 16], strides = [1, 1]} : vector<25x16xf32> to vector<1x16xf32>
    %229 = vector.shape_cast %228 : vector<1x16xf32> to vector<16xf32>
    %230 = vector.shape_cast %229 : vector<16xf32> to vector<1x1x16xf32>
    %231 = vector.broadcast %230 : vector<1x1x16xf32> to vector<8x8x16xf32>
    %232 = arith.mulf %227, %231 : vector<8x8x16xf32>
    %233 = arith.addf %226, %232 : vector<8x8x16xf32>
    %234 = vector.extract_strided_slice %104 {offsets = [3, 3, 0], sizes = [8, 8, 16], strides = [1, 1, 1]} : vector<12x12x16xf32> to vector<8x8x16xf32>
    %235 = vector.extract_strided_slice %106 {offsets = [18, 0], sizes = [1, 16], strides = [1, 1]} : vector<25x16xf32> to vector<1x16xf32>
    %236 = vector.shape_cast %235 : vector<1x16xf32> to vector<16xf32>
    %237 = vector.shape_cast %236 : vector<16xf32> to vector<1x1x16xf32>
    %238 = vector.broadcast %237 : vector<1x1x16xf32> to vector<8x8x16xf32>
    %239 = arith.mulf %234, %238 : vector<8x8x16xf32>
    %240 = arith.addf %233, %239 : vector<8x8x16xf32>
    %241 = vector.extract_strided_slice %104 {offsets = [3, 4, 0], sizes = [8, 8, 16], strides = [1, 1, 1]} : vector<12x12x16xf32> to vector<8x8x16xf32>
    %242 = vector.extract_strided_slice %106 {offsets = [19, 0], sizes = [1, 16], strides = [1, 1]} : vector<25x16xf32> to vector<1x16xf32>
    %243 = vector.shape_cast %242 : vector<1x16xf32> to vector<16xf32>
    %244 = vector.shape_cast %243 : vector<16xf32> to vector<1x1x16xf32>
    %245 = vector.broadcast %244 : vector<1x1x16xf32> to vector<8x8x16xf32>
    %246 = arith.mulf %241, %245 : vector<8x8x16xf32>
    %247 = arith.addf %240, %246 : vector<8x8x16xf32>
    %248 = vector.extract_strided_slice %104 {offsets = [4, 0, 0], sizes = [8, 8, 16], strides = [1, 1, 1]} : vector<12x12x16xf32> to vector<8x8x16xf32>
    %249 = vector.extract_strided_slice %106 {offsets = [20, 0], sizes = [1, 16], strides = [1, 1]} : vector<25x16xf32> to vector<1x16xf32>
    %250 = vector.shape_cast %249 : vector<1x16xf32> to vector<16xf32>
    %251 = vector.shape_cast %250 : vector<16xf32> to vector<1x1x16xf32>
    %252 = vector.broadcast %251 : vector<1x1x16xf32> to vector<8x8x16xf32>
    %253 = arith.mulf %248, %252 : vector<8x8x16xf32>
    %254 = arith.addf %247, %253 : vector<8x8x16xf32>
    %255 = vector.extract_strided_slice %104 {offsets = [4, 1, 0], sizes = [8, 8, 16], strides = [1, 1, 1]} : vector<12x12x16xf32> to vector<8x8x16xf32>
    %256 = vector.extract_strided_slice %106 {offsets = [21, 0], sizes = [1, 16], strides = [1, 1]} : vector<25x16xf32> to vector<1x16xf32>
    %257 = vector.shape_cast %256 : vector<1x16xf32> to vector<16xf32>
    %258 = vector.shape_cast %257 : vector<16xf32> to vector<1x1x16xf32>
    %259 = vector.broadcast %258 : vector<1x1x16xf32> to vector<8x8x16xf32>
    %260 = arith.mulf %255, %259 : vector<8x8x16xf32>
    %261 = arith.addf %254, %260 : vector<8x8x16xf32>
    %262 = vector.extract_strided_slice %104 {offsets = [4, 2, 0], sizes = [8, 8, 16], strides = [1, 1, 1]} : vector<12x12x16xf32> to vector<8x8x16xf32>
    %263 = vector.extract_strided_slice %106 {offsets = [22, 0], sizes = [1, 16], strides = [1, 1]} : vector<25x16xf32> to vector<1x16xf32>
    %264 = vector.shape_cast %263 : vector<1x16xf32> to vector<16xf32>
    %265 = vector.shape_cast %264 : vector<16xf32> to vector<1x1x16xf32>
    %266 = vector.broadcast %265 : vector<1x1x16xf32> to vector<8x8x16xf32>
    %267 = arith.mulf %262, %266 : vector<8x8x16xf32>
    %268 = arith.addf %261, %267 : vector<8x8x16xf32>
    %269 = vector.extract_strided_slice %104 {offsets = [4, 3, 0], sizes = [8, 8, 16], strides = [1, 1, 1]} : vector<12x12x16xf32> to vector<8x8x16xf32>
    %270 = vector.extract_strided_slice %106 {offsets = [23, 0], sizes = [1, 16], strides = [1, 1]} : vector<25x16xf32> to vector<1x16xf32>
    %271 = vector.shape_cast %270 : vector<1x16xf32> to vector<16xf32>
    %272 = vector.shape_cast %271 : vector<16xf32> to vector<1x1x16xf32>
    %273 = vector.broadcast %272 : vector<1x1x16xf32> to vector<8x8x16xf32>
    %274 = arith.mulf %269, %273 : vector<8x8x16xf32>
    %275 = arith.addf %268, %274 : vector<8x8x16xf32>
    %276 = vector.extract_strided_slice %104 {offsets = [4, 4, 0], sizes = [8, 8, 16], strides = [1, 1, 1]} : vector<12x12x16xf32> to vector<8x8x16xf32>
    %277 = vector.extract_strided_slice %106 {offsets = [24, 0], sizes = [1, 16], strides = [1, 1]} : vector<25x16xf32> to vector<1x16xf32>
    %278 = vector.shape_cast %277 : vector<1x16xf32> to vector<16xf32>
    %279 = vector.shape_cast %278 : vector<16xf32> to vector<1x1x16xf32>
    %280 = vector.broadcast %279 : vector<1x1x16xf32> to vector<8x8x16xf32>
    %281 = arith.mulf %276, %280 : vector<8x8x16xf32>
    %282 = arith.addf %275, %281 : vector<8x8x16xf32>
    %c0_61 = arith.constant 0 : index
    %c0_62 = arith.constant 0 : index
    %c0_63 = arith.constant 0 : index
    %283 = vector.load %arg11[%c0_61, %c0_62, %c0_63] : memref<1x1x16xf32, #tpu.memory_space<vmem>>, vector<1x1x16xf32>
    %284 = vector.shape_cast %283 : vector<1x1x16xf32> to vector<16xf32>
    %285 = vector.shape_cast %284 : vector<16xf32> to vector<1x1x16xf32>
    %286 = vector.broadcast %285 : vector<1x1x16xf32> to vector<8x8x16xf32>
    %287 = arith.addf %282, %286 : vector<8x8x16xf32>
    %288 = vector.shape_cast %287 : vector<8x8x16xf32> to vector<64x16xf32>
    %c0_64 = arith.constant 0 : index
    %c0_65 = arith.constant 0 : index
    %c0_66 = arith.constant 0 : index
    %289 = vector.load %arg12[%c0_64, %c0_65, %c0_66] : memref<1x16x16xf32, #tpu.memory_space<vmem>>, vector<1x16x16xf32>
    %290 = vector.shape_cast %289 : vector<1x16x16xf32> to vector<16x16xf32>
    %cst_67 = arith.constant dense<0.000000e+00> : vector<64x16xf32>
    %291 = tpu.matmul %288, %290, %cst_67 {dimension_numbers = #tpu.dot_dimension_numbers<[1], [0], [0], [1], [0, 0, 1, 1], [], []>} : vector<64x16xf32>, vector<16x16xf32>, vector<64x16xf32> -> vector<64x16xf32>
    %c0_68 = arith.constant 0 : index
    %c0_69 = arith.constant 0 : index
    %c0_70 = arith.constant 0 : index
    %292 = vector.load %arg13[%c0_68, %c0_69, %c0_70] : memref<1x1x16xf32, #tpu.memory_space<vmem>>, vector<1x1x16xf32>
    %293 = vector.shape_cast %292 : vector<1x1x16xf32> to vector<1x16xf32>
    %294 = vector.broadcast %293 : vector<1x16xf32> to vector<64x16xf32>
    %295 = arith.addf %291, %294 : vector<64x16xf32>
    %296 = arith.addf %68, %295 : vector<64x16xf32>
    %c0_71 = arith.constant 0 : index
    %c0_72 = arith.constant 0 : index
    %c0_73 = arith.constant 0 : index
    %297 = vector.load %arg14[%c0_71, %c0_72, %c0_73] : memref<1x1x16xf32, #tpu.memory_space<vmem>>, vector<1x1x16xf32>
    %298 = vector.shape_cast %297 : vector<1x1x16xf32> to vector<1x16xf32>
    %c0_74 = arith.constant 0 : index
    %c0_75 = arith.constant 0 : index
    %c0_76 = arith.constant 0 : index
    %299 = vector.load %arg15[%c0_74, %c0_75, %c0_76] : memref<1x1x16xf32, #tpu.memory_space<vmem>>, vector<1x1x16xf32>
    %300 = vector.shape_cast %299 : vector<1x1x16xf32> to vector<1x16xf32>
    %cst_77 = arith.constant dense<0.000000e+00> : vector<64xf32>
    %301 = vector.multi_reduction <add>, %296, %cst_77 [1] : vector<64x16xf32> to vector<64xf32>
    %302 = vector.shape_cast %301 : vector<64xf32> to vector<64x1xf32>
    %cst_78 = arith.constant 1.600000e+01 : f32
    %303 = vector.broadcast %cst_78 : f32 to vector<64x1xf32>
    %304 = arith.divf %302, %303 : vector<64x1xf32>
    %305 = vector.broadcast %304 : vector<64x1xf32> to vector<64x16xf32>
    %306 = arith.subf %296, %305 : vector<64x16xf32>
    %307 = arith.mulf %306, %306 : vector<64x16xf32>
    %cst_79 = arith.constant dense<0.000000e+00> : vector<64xf32>
    %308 = vector.multi_reduction <add>, %307, %cst_79 [1] : vector<64x16xf32> to vector<64xf32>
    %309 = vector.shape_cast %308 : vector<64xf32> to vector<64x1xf32>
    %cst_80 = arith.constant 1.600000e+01 : f32
    %310 = vector.broadcast %cst_80 : f32 to vector<64x1xf32>
    %311 = arith.divf %309, %310 : vector<64x1xf32>
    %cst_81 = arith.constant 9.99999974E-6 : f32
    %312 = vector.broadcast %cst_81 : f32 to vector<64x1xf32>
    %313 = arith.addf %311, %312 : vector<64x1xf32>
    %314 = math.rsqrt %313 : vector<64x1xf32>
    %315 = vector.broadcast %314 : vector<64x1xf32> to vector<64x16xf32>
    %316 = arith.mulf %306, %315 : vector<64x16xf32>
    %317 = vector.broadcast %298 : vector<1x16xf32> to vector<64x16xf32>
    %318 = arith.mulf %316, %317 : vector<64x16xf32>
    %319 = vector.broadcast %300 : vector<1x16xf32> to vector<64x16xf32>
    %320 = arith.addf %318, %319 : vector<64x16xf32>
    %c0_82 = arith.constant 0 : index
    %c0_83 = arith.constant 0 : index
    %c0_84 = arith.constant 0 : index
    %321 = vector.load %arg16[%c0_82, %c0_83, %c0_84] : memref<1x16x64xf32, #tpu.memory_space<vmem>>, vector<1x16x64xf32>
    %322 = vector.shape_cast %321 : vector<1x16x64xf32> to vector<16x64xf32>
    %cst_85 = arith.constant dense<0.000000e+00> : vector<64x64xf32>
    %323 = tpu.matmul %320, %322, %cst_85 {dimension_numbers = #tpu.dot_dimension_numbers<[1], [0], [0], [1], [0, 0, 1, 1], [], []>} : vector<64x16xf32>, vector<16x64xf32>, vector<64x64xf32> -> vector<64x64xf32>
    %c0_86 = arith.constant 0 : index
    %c0_87 = arith.constant 0 : index
    %c0_88 = arith.constant 0 : index
    %324 = vector.load %arg17[%c0_86, %c0_87, %c0_88] : memref<1x1x64xf32, #tpu.memory_space<vmem>>, vector<1x1x64xf32>
    %325 = vector.shape_cast %324 : vector<1x1x64xf32> to vector<1x64xf32>
    %326 = vector.broadcast %325 : vector<1x64xf32> to vector<64x64xf32>
    %327 = arith.addf %323, %326 : vector<64x64xf32>
    %cst_89 = arith.constant 0.707106769 : f32
    %328 = vector.broadcast %cst_89 : f32 to vector<64x64xf32>
    %329 = arith.mulf %327, %328 : vector<64x64xf32>
    %330 = math.absf %329 : vector<64x64xf32>
    %cst_90 = arith.constant 0.327591091 : f32
    %331 = vector.broadcast %cst_90 : f32 to vector<64x64xf32>
    %332 = arith.mulf %331, %330 : vector<64x64xf32>
    %cst_91 = arith.constant 1.000000e+00 : f32
    %333 = vector.broadcast %cst_91 : f32 to vector<64x64xf32>
    %334 = arith.addf %333, %332 : vector<64x64xf32>
    %cst_92 = arith.constant 1.000000e+00 : f32
    %335 = vector.broadcast %cst_92 : f32 to vector<64x64xf32>
    %336 = arith.divf %335, %334 : vector<64x64xf32>
    %cst_93 = arith.constant 1.06140542 : f32
    %337 = vector.broadcast %cst_93 : f32 to vector<64x64xf32>
    %338 = arith.mulf %336, %337 : vector<64x64xf32>
    %cst_94 = arith.constant -1.45315206 : f32
    %339 = vector.broadcast %cst_94 : f32 to vector<64x64xf32>
    %340 = arith.addf %339, %338 : vector<64x64xf32>
    %341 = arith.mulf %336, %340 : vector<64x64xf32>
    %cst_95 = arith.constant 1.42141378 : f32
    %342 = vector.broadcast %cst_95 : f32 to vector<64x64xf32>
    %343 = arith.addf %342, %341 : vector<64x64xf32>
    %344 = arith.mulf %336, %343 : vector<64x64xf32>
    %cst_96 = arith.constant -0.284496725 : f32
    %345 = vector.broadcast %cst_96 : f32 to vector<64x64xf32>
    %346 = arith.addf %345, %344 : vector<64x64xf32>
    %347 = arith.mulf %336, %346 : vector<64x64xf32>
    %cst_97 = arith.constant 0.254829586 : f32
    %348 = vector.broadcast %cst_97 : f32 to vector<64x64xf32>
    %349 = arith.addf %348, %347 : vector<64x64xf32>
    %350 = arith.mulf %336, %349 : vector<64x64xf32>
    %cst_98 = arith.constant 0.000000e+00 : f32
    %351 = vector.broadcast %cst_98 : f32 to vector<64x64xf32>
    %352 = arith.subf %351, %330 : vector<64x64xf32>
    %353 = arith.mulf %352, %330 : vector<64x64xf32>
    %354 = math.exp %353 : vector<64x64xf32>
    %355 = arith.mulf %350, %354 : vector<64x64xf32>
    %cst_99 = arith.constant 1.000000e+00 : f32
    %356 = vector.broadcast %cst_99 : f32 to vector<64x64xf32>
    %357 = arith.subf %356, %355 : vector<64x64xf32>
    %cst_100 = arith.constant 5.000000e-01 : f32
    %358 = vector.broadcast %cst_100 : f32 to vector<64x64xf32>
    %359 = arith.mulf %358, %327 : vector<64x64xf32>
    %cst_101 = arith.constant 0.000000e+00 : f32
    %360 = vector.broadcast %cst_101 : f32 to vector<64x64xf32>
    %361 = arith.cmpf oge, %329, %360 : vector<64x64xf32>
    %cst_102 = arith.constant 0.000000e+00 : f32
    %362 = vector.broadcast %cst_102 : f32 to vector<64x64xf32>
    %363 = arith.subf %362, %357 : vector<64x64xf32>
    %364 = arith.select %361, %357, %363 : vector<64x64xi1>, vector<64x64xf32>
    %cst_103 = arith.constant 1.000000e+00 : f32
    %365 = vector.broadcast %cst_103 : f32 to vector<64x64xf32>
    %366 = arith.addf %365, %364 : vector<64x64xf32>
    %367 = arith.mulf %359, %366 : vector<64x64xf32>
    %c0_104 = arith.constant 0 : index
    %c0_105 = arith.constant 0 : index
    %c0_106 = arith.constant 0 : index
    %368 = vector.load %arg18[%c0_104, %c0_105, %c0_106] : memref<1x64x16xf32, #tpu.memory_space<vmem>>, vector<1x64x16xf32>
    %369 = vector.shape_cast %368 : vector<1x64x16xf32> to vector<64x16xf32>
    %cst_107 = arith.constant dense<0.000000e+00> : vector<64x16xf32>
    %370 = tpu.matmul %367, %369, %cst_107 {dimension_numbers = #tpu.dot_dimension_numbers<[1], [0], [0], [1], [0, 0, 1, 1], [], []>} : vector<64x64xf32>, vector<64x16xf32>, vector<64x16xf32> -> vector<64x16xf32>
    %c0_108 = arith.constant 0 : index
    %c0_109 = arith.constant 0 : index
    %c0_110 = arith.constant 0 : index
    %371 = vector.load %arg19[%c0_108, %c0_109, %c0_110] : memref<1x1x16xf32, #tpu.memory_space<vmem>>, vector<1x1x16xf32>
    %372 = vector.shape_cast %371 : vector<1x1x16xf32> to vector<1x16xf32>
    %373 = vector.broadcast %372 : vector<1x16xf32> to vector<64x16xf32>
    %374 = arith.addf %370, %373 : vector<64x16xf32>
    %375 = arith.addf %296, %374 : vector<64x16xf32>
    %376 = vector.shape_cast %375 : vector<64x16xf32> to vector<8x8x16xf32>
    %c0_111 = arith.constant 0 : index
    %c0_112 = arith.constant 0 : index
    %c0_113 = arith.constant 0 : index
    %c0_114 = arith.constant 0 : index
    %377 = vector.load %arg20[%c0_111, %c0_112, %c0_113, %c0_114] : memref<1x8x8x16xf32, #tpu.memory_space<vmem>>, vector<1x8x8x16xf32>
    %378 = vector.shape_cast %377 : vector<1x8x8x16xf32> to vector<8x8x16xf32>
    %379 = vector.shape_cast %376 : vector<8x8x16xf32> to vector<1x8x8x16xf32>
    tpu.vector_store %arg20[%c0_111, %c0_112, %c0_113, %c0_114], %379 {strides = array<i32>} : memref<1x8x8x16xf32, #tpu.memory_space<vmem>>, vector<1x8x8x16xf32>,
    return
  }
  func.func @transform_0(%arg0: i32) -> (i32, i32, i32) {
    %c0_i32 = arith.constant 0 : i32
    %c0_i32_0 = arith.constant 0 : i32
    %c0_i32_1 = arith.constant 0 : i32
    return %arg0, %c0_i32, %c0_i32_0 : i32, i32, i32
  }
  func.func @transform_1(%arg0: i32) -> (i32, i32) {
    %c0_i32 = arith.constant 0 : i32
    %c0_i32_0 = arith.constant 0 : i32
    %c0_i32_1 = arith.constant 0 : i32
    return %c0_i32, %c0_i32_0 : i32, i32
  }
  func.func @transform_2(%arg0: i32) -> (i32, i32) {
    %c0_i32 = arith.constant 0 : i32
    %c0_i32_0 = arith.constant 0 : i32
    %c0_i32_1 = arith.constant 0 : i32
    return %c0_i32, %c0_i32_0 : i32, i32
  }
  func.func @transform_3(%arg0: i32) -> (i32, i32) {
    %c0_i32 = arith.constant 0 : i32
    %c0_i32_0 = arith.constant 0 : i32
    %c0_i32_1 = arith.constant 0 : i32
    return %c0_i32, %c0_i32_0 : i32, i32
  }
  func.func @transform_4(%arg0: i32) -> (i32, i32) {
    %c0_i32 = arith.constant 0 : i32
    %c0_i32_0 = arith.constant 0 : i32
    %c0_i32_1 = arith.constant 0 : i32
    return %c0_i32, %c0_i32_0 : i32, i32
  }
  func.func @transform_5(%arg0: i32) -> (i32, i32, i32) {
    %c0_i32 = arith.constant 0 : i32
    %c0_i32_0 = arith.constant 0 : i32
    %c0_i32_1 = arith.constant 0 : i32
    %c0_i32_2 = arith.constant 0 : i32
    return %c0_i32, %c0_i32_0, %c0_i32_1 : i32, i32, i32
  }
  func.func @transform_6(%arg0: i32) -> (i32, i32, i32) {
    %c0_i32 = arith.constant 0 : i32
    %c0_i32_0 = arith.constant 0 : i32
    %c0_i32_1 = arith.constant 0 : i32
    %c0_i32_2 = arith.constant 0 : i32
    return %c0_i32, %c0_i32_0, %c0_i32_1 : i32, i32, i32
  }
  func.func @transform_7(%arg0: i32) -> (i32, i32, i32) {
    %c0_i32 = arith.constant 0 : i32
    %c0_i32_0 = arith.constant 0 : i32
    %c0_i32_1 = arith.constant 0 : i32
    %c0_i32_2 = arith.constant 0 : i32
    return %c0_i32, %c0_i32_0, %c0_i32_1 : i32, i32, i32
  }
  func.func @transform_8(%arg0: i32) -> (i32, i32, i32) {
    %c0_i32 = arith.constant 0 : i32
    %c0_i32_0 = arith.constant 0 : i32
    %c0_i32_1 = arith.constant 0 : i32
    %c0_i32_2 = arith.constant 0 : i32
    return %c0_i32, %c0_i32_0, %c0_i32_1 : i32, i32, i32
  }
  func.func @transform_9(%arg0: i32) -> (i32, i32, i32) {
    %c0_i32 = arith.constant 0 : i32
    %c0_i32_0 = arith.constant 0 : i32
    %c0_i32_1 = arith.constant 0 : i32
    %c0_i32_2 = arith.constant 0 : i32
    return %c0_i32, %c0_i32_0, %c0_i32_1 : i32, i32, i32
  }
  func.func @transform_10(%arg0: i32) -> (i32, i32, i32) {
    %c0_i32 = arith.constant 0 : i32
    %c0_i32_0 = arith.constant 0 : i32
    %c0_i32_1 = arith.constant 0 : i32
    %c0_i32_2 = arith.constant 0 : i32
    return %c0_i32, %c0_i32_0, %c0_i32_1 : i32, i32, i32
  }
  func.func @transform_11(%arg0: i32) -> (i32, i32, i32) {
    %c0_i32 = arith.constant 0 : i32
    %c0_i32_0 = arith.constant 0 : i32
    %c0_i32_1 = arith.constant 0 : i32
    %c0_i32_2 = arith.constant 0 : i32
    return %c0_i32, %c0_i32_0, %c0_i32_1 : i32, i32, i32
  }
  func.func @transform_12(%arg0: i32) -> (i32, i32, i32) {
    %c0_i32 = arith.constant 0 : i32
    %c0_i32_0 = arith.constant 0 : i32
    %c0_i32_1 = arith.constant 0 : i32
    %c0_i32_2 = arith.constant 0 : i32
    return %c0_i32, %c0_i32_0, %c0_i32_1 : i32, i32, i32
  }
  func.func @transform_13(%arg0: i32) -> (i32, i32, i32) {
    %c0_i32 = arith.constant 0 : i32
    %c0_i32_0 = arith.constant 0 : i32
    %c0_i32_1 = arith.constant 0 : i32
    %c0_i32_2 = arith.constant 0 : i32
    return %c0_i32, %c0_i32_0, %c0_i32_1 : i32, i32, i32
  }
  func.func @transform_14(%arg0: i32) -> (i32, i32, i32) {
    %c0_i32 = arith.constant 0 : i32
    %c0_i32_0 = arith.constant 0 : i32
    %c0_i32_1 = arith.constant 0 : i32
    %c0_i32_2 = arith.constant 0 : i32
    return %c0_i32, %c0_i32_0, %c0_i32_1 : i32, i32, i32
  }
  func.func @transform_15(%arg0: i32) -> (i32, i32, i32) {
    %c0_i32 = arith.constant 0 : i32
    %c0_i32_0 = arith.constant 0 : i32
    %c0_i32_1 = arith.constant 0 : i32
    %c0_i32_2 = arith.constant 0 : i32
    return %c0_i32, %c0_i32_0, %c0_i32_1 : i32, i32, i32
  }
  func.func @transform_16(%arg0: i32) -> (i32, i32, i32) {
    %c0_i32 = arith.constant 0 : i32
    %c0_i32_0 = arith.constant 0 : i32
    %c0_i32_1 = arith.constant 0 : i32
    %c0_i32_2 = arith.constant 0 : i32
    return %c0_i32, %c0_i32_0, %c0_i32_1 : i32, i32, i32
  }
  func.func @transform_17(%arg0: i32) -> (i32, i32, i32) {
    %c0_i32 = arith.constant 0 : i32
    %c0_i32_0 = arith.constant 0 : i32
    %c0_i32_1 = arith.constant 0 : i32
    %c0_i32_2 = arith.constant 0 : i32
    return %c0_i32, %c0_i32_0, %c0_i32_1 : i32, i32, i32
  }
  func.func @transform_18(%arg0: i32) -> (i32, i32, i32) {
    %c0_i32 = arith.constant 0 : i32
    %c0_i32_0 = arith.constant 0 : i32
    %c0_i32_1 = arith.constant 0 : i32
    %c0_i32_2 = arith.constant 0 : i32
    return %c0_i32, %c0_i32_0, %c0_i32_1 : i32, i32, i32
  }
  func.func @transform_19(%arg0: i32) -> (i32, i32, i32, i32) {
    %c0_i32 = arith.constant 0 : i32
    %c0_i32_0 = arith.constant 0 : i32
    %c0_i32_1 = arith.constant 0 : i32
    %c0_i32_2 = arith.constant 0 : i32
    return %arg0, %c0_i32, %c0_i32_0, %c0_i32_1 : i32, i32, i32, i32
  }
}

module attributes {stable_mosaic.version = 11 : i64} {
  func.func @_cblock_stage_kernel(%arg0: i32, %arg1: memref<1x16x64xf32, #tpu.memory_space<vmem>>, %arg2: memref<64x32xf32, #tpu.memory_space<vmem>>, %arg3: memref<1x32xf32, #tpu.memory_space<vmem>>, %arg4: memref<1x32xf32, #tpu.memory_space<vmem>>, %arg5: memref<1x32xf32, #tpu.memory_space<vmem>>, %arg6: memref<1x1x32xf32, #tpu.memory_space<vmem>>, %arg7: memref<1x1x32xf32, #tpu.memory_space<vmem>>, %arg8: memref<1x32x32xf32, #tpu.memory_space<vmem>>, %arg9: memref<1x1x32xf32, #tpu.memory_space<vmem>>, %arg10: memref<1x25x32xf32, #tpu.memory_space<vmem>>, %arg11: memref<1x1x32xf32, #tpu.memory_space<vmem>>, %arg12: memref<1x32x32xf32, #tpu.memory_space<vmem>>, %arg13: memref<1x1x32xf32, #tpu.memory_space<vmem>>, %arg14: memref<1x1x32xf32, #tpu.memory_space<vmem>>, %arg15: memref<1x1x32xf32, #tpu.memory_space<vmem>>, %arg16: memref<1x32x128xf32, #tpu.memory_space<vmem>>, %arg17: memref<1x1x128xf32, #tpu.memory_space<vmem>>, %arg18: memref<1x128x32xf32, #tpu.memory_space<vmem>>, %arg19: memref<1x1x32xf32, #tpu.memory_space<vmem>>, %arg20: memref<1x4x4x32xf32, #tpu.memory_space<vmem>>, %arg21: memref<8x8x32xf32, #tpu.memory_space<vmem>>) attributes {dimension_semantics = [#tpu.dimension_semantics<parallel>], iteration_bounds = array<i64: 2>, scalar_prefetch = 0 : i64, scratch_operands = 1 : i64, tpu.core_type = #tpu.core_type<tc>, window_params = [{transform_indices = @transform_0, window_bounds = array<i64: 1, 16, 64>}, {pipeline_mode = #tpu.pipeline_mode<synchronous>, transform_indices = @transform_1, window_bounds = array<i64: 64, 32>}, {pipeline_mode = #tpu.pipeline_mode<synchronous>, transform_indices = @transform_2, window_bounds = array<i64: 1, 32>}, {pipeline_mode = #tpu.pipeline_mode<synchronous>, transform_indices = @transform_3, window_bounds = array<i64: 1, 32>}, {pipeline_mode = #tpu.pipeline_mode<synchronous>, transform_indices = @transform_4, window_bounds = array<i64: 1, 32>}, {pipeline_mode = #tpu.pipeline_mode<synchronous>, transform_indices = @transform_5, window_bounds = array<i64: 1, 1, 32>}, {pipeline_mode = #tpu.pipeline_mode<synchronous>, transform_indices = @transform_6, window_bounds = array<i64: 1, 1, 32>}, {pipeline_mode = #tpu.pipeline_mode<synchronous>, transform_indices = @transform_7, window_bounds = array<i64: 1, 32, 32>}, {pipeline_mode = #tpu.pipeline_mode<synchronous>, transform_indices = @transform_8, window_bounds = array<i64: 1, 1, 32>}, {pipeline_mode = #tpu.pipeline_mode<synchronous>, transform_indices = @transform_9, window_bounds = array<i64: 1, 25, 32>}, {pipeline_mode = #tpu.pipeline_mode<synchronous>, transform_indices = @transform_10, window_bounds = array<i64: 1, 1, 32>}, {pipeline_mode = #tpu.pipeline_mode<synchronous>, transform_indices = @transform_11, window_bounds = array<i64: 1, 32, 32>}, {pipeline_mode = #tpu.pipeline_mode<synchronous>, transform_indices = @transform_12, window_bounds = array<i64: 1, 1, 32>}, {pipeline_mode = #tpu.pipeline_mode<synchronous>, transform_indices = @transform_13, window_bounds = array<i64: 1, 1, 32>}, {pipeline_mode = #tpu.pipeline_mode<synchronous>, transform_indices = @transform_14, window_bounds = array<i64: 1, 1, 32>}, {pipeline_mode = #tpu.pipeline_mode<synchronous>, transform_indices = @transform_15, window_bounds = array<i64: 1, 32, 128>}, {pipeline_mode = #tpu.pipeline_mode<synchronous>, transform_indices = @transform_16, window_bounds = array<i64: 1, 1, 128>}, {pipeline_mode = #tpu.pipeline_mode<synchronous>, transform_indices = @transform_17, window_bounds = array<i64: 1, 128, 32>}, {pipeline_mode = #tpu.pipeline_mode<synchronous>, transform_indices = @transform_18, window_bounds = array<i64: 1, 1, 32>}, {transform_indices = @transform_19, window_bounds = array<i64: 1, 4, 4, 32>}]} {
    %c0 = arith.constant 0 : index
    %c0_0 = arith.constant 0 : index
    %c0_1 = arith.constant 0 : index
    %0 = vector.load %arg1[%c0, %c0_0, %c0_1] : memref<1x16x64xf32, #tpu.memory_space<vmem>>, vector<1x16x64xf32>
    %1 = vector.shape_cast %0 : vector<1x16x64xf32> to vector<16x64xf32>
    %c0_2 = arith.constant 0 : index
    %c0_3 = arith.constant 0 : index
    %2 = vector.load %arg2[%c0_2, %c0_3] : memref<64x32xf32, #tpu.memory_space<vmem>>, vector<64x32xf32>
    %cst = arith.constant dense<0.000000e+00> : vector<16x32xf32>
    %3 = tpu.matmul %1, %2, %cst {dimension_numbers = #tpu.dot_dimension_numbers<[1], [0], [0], [1], [0, 0, 1, 1], [], []>} : vector<16x64xf32>, vector<64x32xf32>, vector<16x32xf32> -> vector<16x32xf32>
    %c0_4 = arith.constant 0 : index
    %c0_5 = arith.constant 0 : index
    %4 = vector.load %arg3[%c0_4, %c0_5] : memref<1x32xf32, #tpu.memory_space<vmem>>, vector<1x32xf32>
    %5 = vector.broadcast %4 : vector<1x32xf32> to vector<16x32xf32>
    %6 = arith.addf %3, %5 : vector<16x32xf32>
    %c0_6 = arith.constant 0 : index
    %c0_7 = arith.constant 0 : index
    %7 = vector.load %arg4[%c0_6, %c0_7] : memref<1x32xf32, #tpu.memory_space<vmem>>, vector<1x32xf32>
    %c0_8 = arith.constant 0 : index
    %c0_9 = arith.constant 0 : index
    %8 = vector.load %arg5[%c0_8, %c0_9] : memref<1x32xf32, #tpu.memory_space<vmem>>, vector<1x32xf32>
    %cst_10 = arith.constant dense<0.000000e+00> : vector<16xf32>
    %9 = vector.multi_reduction <add>, %6, %cst_10 [1] : vector<16x32xf32> to vector<16xf32>
    %10 = vector.shape_cast %9 : vector<16xf32> to vector<16x1xf32>
    %cst_11 = arith.constant 3.200000e+01 : f32
    %11 = vector.broadcast %cst_11 : f32 to vector<16x1xf32>
    %12 = arith.divf %10, %11 : vector<16x1xf32>
    %13 = vector.broadcast %12 : vector<16x1xf32> to vector<16x32xf32>
    %14 = arith.subf %6, %13 : vector<16x32xf32>
    %15 = arith.mulf %14, %14 : vector<16x32xf32>
    %cst_12 = arith.constant dense<0.000000e+00> : vector<16xf32>
    %16 = vector.multi_reduction <add>, %15, %cst_12 [1] : vector<16x32xf32> to vector<16xf32>
    %17 = vector.shape_cast %16 : vector<16xf32> to vector<16x1xf32>
    %cst_13 = arith.constant 3.200000e+01 : f32
    %18 = vector.broadcast %cst_13 : f32 to vector<16x1xf32>
    %19 = arith.divf %17, %18 : vector<16x1xf32>
    %cst_14 = arith.constant 9.99999974E-6 : f32
    %20 = vector.broadcast %cst_14 : f32 to vector<16x1xf32>
    %21 = arith.addf %19, %20 : vector<16x1xf32>
    %22 = math.rsqrt %21 : vector<16x1xf32>
    %23 = vector.broadcast %22 : vector<16x1xf32> to vector<16x32xf32>
    %24 = arith.mulf %14, %23 : vector<16x32xf32>
    %25 = vector.broadcast %7 : vector<1x32xf32> to vector<16x32xf32>
    %26 = arith.mulf %24, %25 : vector<16x32xf32>
    %27 = vector.broadcast %8 : vector<1x32xf32> to vector<16x32xf32>
    %28 = arith.addf %26, %27 : vector<16x32xf32>
    %cst_15 = arith.constant 0.707106769 : f32
    %29 = vector.broadcast %cst_15 : f32 to vector<16x32xf32>
    %30 = arith.mulf %28, %29 : vector<16x32xf32>
    %31 = math.absf %30 : vector<16x32xf32>
    %cst_16 = arith.constant 0.327591091 : f32
    %32 = vector.broadcast %cst_16 : f32 to vector<16x32xf32>
    %33 = arith.mulf %32, %31 : vector<16x32xf32>
    %cst_17 = arith.constant 1.000000e+00 : f32
    %34 = vector.broadcast %cst_17 : f32 to vector<16x32xf32>
    %35 = arith.addf %34, %33 : vector<16x32xf32>
    %cst_18 = arith.constant 1.000000e+00 : f32
    %36 = vector.broadcast %cst_18 : f32 to vector<16x32xf32>
    %37 = arith.divf %36, %35 : vector<16x32xf32>
    %cst_19 = arith.constant 1.06140542 : f32
    %38 = vector.broadcast %cst_19 : f32 to vector<16x32xf32>
    %39 = arith.mulf %37, %38 : vector<16x32xf32>
    %cst_20 = arith.constant -1.45315206 : f32
    %40 = vector.broadcast %cst_20 : f32 to vector<16x32xf32>
    %41 = arith.addf %40, %39 : vector<16x32xf32>
    %42 = arith.mulf %37, %41 : vector<16x32xf32>
    %cst_21 = arith.constant 1.42141378 : f32
    %43 = vector.broadcast %cst_21 : f32 to vector<16x32xf32>
    %44 = arith.addf %43, %42 : vector<16x32xf32>
    %45 = arith.mulf %37, %44 : vector<16x32xf32>
    %cst_22 = arith.constant -0.284496725 : f32
    %46 = vector.broadcast %cst_22 : f32 to vector<16x32xf32>
    %47 = arith.addf %46, %45 : vector<16x32xf32>
    %48 = arith.mulf %37, %47 : vector<16x32xf32>
    %cst_23 = arith.constant 0.254829586 : f32
    %49 = vector.broadcast %cst_23 : f32 to vector<16x32xf32>
    %50 = arith.addf %49, %48 : vector<16x32xf32>
    %51 = arith.mulf %37, %50 : vector<16x32xf32>
    %cst_24 = arith.constant 0.000000e+00 : f32
    %52 = vector.broadcast %cst_24 : f32 to vector<16x32xf32>
    %53 = arith.subf %52, %31 : vector<16x32xf32>
    %54 = arith.mulf %53, %31 : vector<16x32xf32>
    %55 = math.exp %54 : vector<16x32xf32>
    %56 = arith.mulf %51, %55 : vector<16x32xf32>
    %cst_25 = arith.constant 1.000000e+00 : f32
    %57 = vector.broadcast %cst_25 : f32 to vector<16x32xf32>
    %58 = arith.subf %57, %56 : vector<16x32xf32>
    %cst_26 = arith.constant 5.000000e-01 : f32
    %59 = vector.broadcast %cst_26 : f32 to vector<16x32xf32>
    %60 = arith.mulf %59, %28 : vector<16x32xf32>
    %cst_27 = arith.constant 0.000000e+00 : f32
    %61 = vector.broadcast %cst_27 : f32 to vector<16x32xf32>
    %62 = arith.cmpf oge, %30, %61 : vector<16x32xf32>
    %cst_28 = arith.constant 0.000000e+00 : f32
    %63 = vector.broadcast %cst_28 : f32 to vector<16x32xf32>
    %64 = arith.subf %63, %58 : vector<16x32xf32>
    %65 = arith.select %62, %58, %64 : vector<16x32xi1>, vector<16x32xf32>
    %cst_29 = arith.constant 1.000000e+00 : f32
    %66 = vector.broadcast %cst_29 : f32 to vector<16x32xf32>
    %67 = arith.addf %66, %65 : vector<16x32xf32>
    %68 = arith.mulf %60, %67 : vector<16x32xf32>
    %c0_30 = arith.constant 0 : index
    %c0_31 = arith.constant 0 : index
    %c0_32 = arith.constant 0 : index
    %69 = vector.load %arg6[%c0_30, %c0_31, %c0_32] : memref<1x1x32xf32, #tpu.memory_space<vmem>>, vector<1x1x32xf32>
    %70 = vector.shape_cast %69 : vector<1x1x32xf32> to vector<1x32xf32>
    %c0_33 = arith.constant 0 : index
    %c0_34 = arith.constant 0 : index
    %c0_35 = arith.constant 0 : index
    %71 = vector.load %arg7[%c0_33, %c0_34, %c0_35] : memref<1x1x32xf32, #tpu.memory_space<vmem>>, vector<1x1x32xf32>
    %72 = vector.shape_cast %71 : vector<1x1x32xf32> to vector<1x32xf32>
    %cst_36 = arith.constant dense<0.000000e+00> : vector<16xf32>
    %73 = vector.multi_reduction <add>, %68, %cst_36 [1] : vector<16x32xf32> to vector<16xf32>
    %74 = vector.shape_cast %73 : vector<16xf32> to vector<16x1xf32>
    %cst_37 = arith.constant 3.200000e+01 : f32
    %75 = vector.broadcast %cst_37 : f32 to vector<16x1xf32>
    %76 = arith.divf %74, %75 : vector<16x1xf32>
    %77 = vector.broadcast %76 : vector<16x1xf32> to vector<16x32xf32>
    %78 = arith.subf %68, %77 : vector<16x32xf32>
    %79 = arith.mulf %78, %78 : vector<16x32xf32>
    %cst_38 = arith.constant dense<0.000000e+00> : vector<16xf32>
    %80 = vector.multi_reduction <add>, %79, %cst_38 [1] : vector<16x32xf32> to vector<16xf32>
    %81 = vector.shape_cast %80 : vector<16xf32> to vector<16x1xf32>
    %cst_39 = arith.constant 3.200000e+01 : f32
    %82 = vector.broadcast %cst_39 : f32 to vector<16x1xf32>
    %83 = arith.divf %81, %82 : vector<16x1xf32>
    %cst_40 = arith.constant 9.99999974E-6 : f32
    %84 = vector.broadcast %cst_40 : f32 to vector<16x1xf32>
    %85 = arith.addf %83, %84 : vector<16x1xf32>
    %86 = math.rsqrt %85 : vector<16x1xf32>
    %87 = vector.broadcast %86 : vector<16x1xf32> to vector<16x32xf32>
    %88 = arith.mulf %78, %87 : vector<16x32xf32>
    %89 = vector.broadcast %70 : vector<1x32xf32> to vector<16x32xf32>
    %90 = arith.mulf %88, %89 : vector<16x32xf32>
    %91 = vector.broadcast %72 : vector<1x32xf32> to vector<16x32xf32>
    %92 = arith.addf %90, %91 : vector<16x32xf32>
    %c0_41 = arith.constant 0 : index
    %c0_42 = arith.constant 0 : index
    %c0_43 = arith.constant 0 : index
    %93 = vector.load %arg8[%c0_41, %c0_42, %c0_43] : memref<1x32x32xf32, #tpu.memory_space<vmem>>, vector<1x32x32xf32>
    %94 = vector.shape_cast %93 : vector<1x32x32xf32> to vector<32x32xf32>
    %cst_44 = arith.constant dense<0.000000e+00> : vector<16x32xf32>
    %95 = tpu.matmul %92, %94, %cst_44 {dimension_numbers = #tpu.dot_dimension_numbers<[1], [0], [0], [1], [0, 0, 1, 1], [], []>} : vector<16x32xf32>, vector<32x32xf32>, vector<16x32xf32> -> vector<16x32xf32>
    %c0_45 = arith.constant 0 : index
    %c0_46 = arith.constant 0 : index
    %c0_47 = arith.constant 0 : index
    %96 = vector.load %arg9[%c0_45, %c0_46, %c0_47] : memref<1x1x32xf32, #tpu.memory_space<vmem>>, vector<1x1x32xf32>
    %97 = vector.shape_cast %96 : vector<1x1x32xf32> to vector<1x32xf32>
    %98 = vector.broadcast %97 : vector<1x32xf32> to vector<16x32xf32>
    %99 = arith.addf %95, %98 : vector<16x32xf32>
    %cst_48 = arith.constant 0.000000e+00 : f32
    %100 = vector.broadcast %cst_48 : f32 to vector<8x8x32xf32>
    %c0_49 = arith.constant 0 : index
    %c0_50 = arith.constant 0 : index
    %c0_51 = arith.constant 0 : index
    %101 = vector.load %arg21[%c0_49, %c0_50, %c0_51] : memref<8x8x32xf32, #tpu.memory_space<vmem>>, vector<8x8x32xf32>
    tpu.vector_store %arg21[%c0_49, %c0_50, %c0_51], %100 {strides = array<i32>} : memref<8x8x32xf32, #tpu.memory_space<vmem>>, vector<8x8x32xf32>,
    %102 = vector.shape_cast %99 : vector<16x32xf32> to vector<4x4x32xf32>
    %c2 = arith.constant 2 : index
    %c2_52 = arith.constant 2 : index
    %c0_53 = arith.constant 0 : index
    %103 = vector.load %arg21[%c2, %c2_52, %c0_53] : memref<8x8x32xf32, #tpu.memory_space<vmem>>, vector<4x4x32xf32>
    tpu.vector_store %arg21[%c2, %c2_52, %c0_53], %102 {strides = array<i32>} : memref<8x8x32xf32, #tpu.memory_space<vmem>>, vector<4x4x32xf32>,
    %c0_54 = arith.constant 0 : index
    %c0_55 = arith.constant 0 : index
    %c0_56 = arith.constant 0 : index
    %104 = vector.load %arg21[%c0_54, %c0_55, %c0_56] : memref<8x8x32xf32, #tpu.memory_space<vmem>>, vector<8x8x32xf32>
    %c0_57 = arith.constant 0 : index
    %c0_58 = arith.constant 0 : index
    %c0_59 = arith.constant 0 : index
    %105 = vector.load %arg10[%c0_57, %c0_58, %c0_59] : memref<1x25x32xf32, #tpu.memory_space<vmem>>, vector<1x25x32xf32>
    %106 = vector.shape_cast %105 : vector<1x25x32xf32> to vector<25x32xf32>
    %cst_60 = arith.constant 0.000000e+00 : f32
    %107 = vector.broadcast %cst_60 : f32 to vector<4x4x32xf32>
    %108 = vector.extract_strided_slice %104 {offsets = [0, 0, 0], sizes = [4, 4, 32], strides = [1, 1, 1]} : vector<8x8x32xf32> to vector<4x4x32xf32>
    %109 = vector.extract_strided_slice %106 {offsets = [0, 0], sizes = [1, 32], strides = [1, 1]} : vector<25x32xf32> to vector<1x32xf32>
    %110 = vector.shape_cast %109 : vector<1x32xf32> to vector<32xf32>
    %111 = vector.shape_cast %110 : vector<32xf32> to vector<1x1x32xf32>
    %112 = vector.broadcast %111 : vector<1x1x32xf32> to vector<4x4x32xf32>
    %113 = arith.mulf %108, %112 : vector<4x4x32xf32>
    %114 = arith.addf %107, %113 : vector<4x4x32xf32>
    %115 = vector.extract_strided_slice %104 {offsets = [0, 1, 0], sizes = [4, 4, 32], strides = [1, 1, 1]} : vector<8x8x32xf32> to vector<4x4x32xf32>
    %116 = vector.extract_strided_slice %106 {offsets = [1, 0], sizes = [1, 32], strides = [1, 1]} : vector<25x32xf32> to vector<1x32xf32>
    %117 = vector.shape_cast %116 : vector<1x32xf32> to vector<32xf32>
    %118 = vector.shape_cast %117 : vector<32xf32> to vector<1x1x32xf32>
    %119 = vector.broadcast %118 : vector<1x1x32xf32> to vector<4x4x32xf32>
    %120 = arith.mulf %115, %119 : vector<4x4x32xf32>
    %121 = arith.addf %114, %120 : vector<4x4x32xf32>
    %122 = vector.extract_strided_slice %104 {offsets = [0, 2, 0], sizes = [4, 4, 32], strides = [1, 1, 1]} : vector<8x8x32xf32> to vector<4x4x32xf32>
    %123 = vector.extract_strided_slice %106 {offsets = [2, 0], sizes = [1, 32], strides = [1, 1]} : vector<25x32xf32> to vector<1x32xf32>
    %124 = vector.shape_cast %123 : vector<1x32xf32> to vector<32xf32>
    %125 = vector.shape_cast %124 : vector<32xf32> to vector<1x1x32xf32>
    %126 = vector.broadcast %125 : vector<1x1x32xf32> to vector<4x4x32xf32>
    %127 = arith.mulf %122, %126 : vector<4x4x32xf32>
    %128 = arith.addf %121, %127 : vector<4x4x32xf32>
    %129 = vector.extract_strided_slice %104 {offsets = [0, 3, 0], sizes = [4, 4, 32], strides = [1, 1, 1]} : vector<8x8x32xf32> to vector<4x4x32xf32>
    %130 = vector.extract_strided_slice %106 {offsets = [3, 0], sizes = [1, 32], strides = [1, 1]} : vector<25x32xf32> to vector<1x32xf32>
    %131 = vector.shape_cast %130 : vector<1x32xf32> to vector<32xf32>
    %132 = vector.shape_cast %131 : vector<32xf32> to vector<1x1x32xf32>
    %133 = vector.broadcast %132 : vector<1x1x32xf32> to vector<4x4x32xf32>
    %134 = arith.mulf %129, %133 : vector<4x4x32xf32>
    %135 = arith.addf %128, %134 : vector<4x4x32xf32>
    %136 = vector.extract_strided_slice %104 {offsets = [0, 4, 0], sizes = [4, 4, 32], strides = [1, 1, 1]} : vector<8x8x32xf32> to vector<4x4x32xf32>
    %137 = vector.extract_strided_slice %106 {offsets = [4, 0], sizes = [1, 32], strides = [1, 1]} : vector<25x32xf32> to vector<1x32xf32>
    %138 = vector.shape_cast %137 : vector<1x32xf32> to vector<32xf32>
    %139 = vector.shape_cast %138 : vector<32xf32> to vector<1x1x32xf32>
    %140 = vector.broadcast %139 : vector<1x1x32xf32> to vector<4x4x32xf32>
    %141 = arith.mulf %136, %140 : vector<4x4x32xf32>
    %142 = arith.addf %135, %141 : vector<4x4x32xf32>
    %143 = vector.extract_strided_slice %104 {offsets = [1, 0, 0], sizes = [4, 4, 32], strides = [1, 1, 1]} : vector<8x8x32xf32> to vector<4x4x32xf32>
    %144 = vector.extract_strided_slice %106 {offsets = [5, 0], sizes = [1, 32], strides = [1, 1]} : vector<25x32xf32> to vector<1x32xf32>
    %145 = vector.shape_cast %144 : vector<1x32xf32> to vector<32xf32>
    %146 = vector.shape_cast %145 : vector<32xf32> to vector<1x1x32xf32>
    %147 = vector.broadcast %146 : vector<1x1x32xf32> to vector<4x4x32xf32>
    %148 = arith.mulf %143, %147 : vector<4x4x32xf32>
    %149 = arith.addf %142, %148 : vector<4x4x32xf32>
    %150 = vector.extract_strided_slice %104 {offsets = [1, 1, 0], sizes = [4, 4, 32], strides = [1, 1, 1]} : vector<8x8x32xf32> to vector<4x4x32xf32>
    %151 = vector.extract_strided_slice %106 {offsets = [6, 0], sizes = [1, 32], strides = [1, 1]} : vector<25x32xf32> to vector<1x32xf32>
    %152 = vector.shape_cast %151 : vector<1x32xf32> to vector<32xf32>
    %153 = vector.shape_cast %152 : vector<32xf32> to vector<1x1x32xf32>
    %154 = vector.broadcast %153 : vector<1x1x32xf32> to vector<4x4x32xf32>
    %155 = arith.mulf %150, %154 : vector<4x4x32xf32>
    %156 = arith.addf %149, %155 : vector<4x4x32xf32>
    %157 = vector.extract_strided_slice %104 {offsets = [1, 2, 0], sizes = [4, 4, 32], strides = [1, 1, 1]} : vector<8x8x32xf32> to vector<4x4x32xf32>
    %158 = vector.extract_strided_slice %106 {offsets = [7, 0], sizes = [1, 32], strides = [1, 1]} : vector<25x32xf32> to vector<1x32xf32>
    %159 = vector.shape_cast %158 : vector<1x32xf32> to vector<32xf32>
    %160 = vector.shape_cast %159 : vector<32xf32> to vector<1x1x32xf32>
    %161 = vector.broadcast %160 : vector<1x1x32xf32> to vector<4x4x32xf32>
    %162 = arith.mulf %157, %161 : vector<4x4x32xf32>
    %163 = arith.addf %156, %162 : vector<4x4x32xf32>
    %164 = vector.extract_strided_slice %104 {offsets = [1, 3, 0], sizes = [4, 4, 32], strides = [1, 1, 1]} : vector<8x8x32xf32> to vector<4x4x32xf32>
    %165 = vector.extract_strided_slice %106 {offsets = [8, 0], sizes = [1, 32], strides = [1, 1]} : vector<25x32xf32> to vector<1x32xf32>
    %166 = vector.shape_cast %165 : vector<1x32xf32> to vector<32xf32>
    %167 = vector.shape_cast %166 : vector<32xf32> to vector<1x1x32xf32>
    %168 = vector.broadcast %167 : vector<1x1x32xf32> to vector<4x4x32xf32>
    %169 = arith.mulf %164, %168 : vector<4x4x32xf32>
    %170 = arith.addf %163, %169 : vector<4x4x32xf32>
    %171 = vector.extract_strided_slice %104 {offsets = [1, 4, 0], sizes = [4, 4, 32], strides = [1, 1, 1]} : vector<8x8x32xf32> to vector<4x4x32xf32>
    %172 = vector.extract_strided_slice %106 {offsets = [9, 0], sizes = [1, 32], strides = [1, 1]} : vector<25x32xf32> to vector<1x32xf32>
    %173 = vector.shape_cast %172 : vector<1x32xf32> to vector<32xf32>
    %174 = vector.shape_cast %173 : vector<32xf32> to vector<1x1x32xf32>
    %175 = vector.broadcast %174 : vector<1x1x32xf32> to vector<4x4x32xf32>
    %176 = arith.mulf %171, %175 : vector<4x4x32xf32>
    %177 = arith.addf %170, %176 : vector<4x4x32xf32>
    %178 = vector.extract_strided_slice %104 {offsets = [2, 0, 0], sizes = [4, 4, 32], strides = [1, 1, 1]} : vector<8x8x32xf32> to vector<4x4x32xf32>
    %179 = vector.extract_strided_slice %106 {offsets = [10, 0], sizes = [1, 32], strides = [1, 1]} : vector<25x32xf32> to vector<1x32xf32>
    %180 = vector.shape_cast %179 : vector<1x32xf32> to vector<32xf32>
    %181 = vector.shape_cast %180 : vector<32xf32> to vector<1x1x32xf32>
    %182 = vector.broadcast %181 : vector<1x1x32xf32> to vector<4x4x32xf32>
    %183 = arith.mulf %178, %182 : vector<4x4x32xf32>
    %184 = arith.addf %177, %183 : vector<4x4x32xf32>
    %185 = vector.extract_strided_slice %104 {offsets = [2, 1, 0], sizes = [4, 4, 32], strides = [1, 1, 1]} : vector<8x8x32xf32> to vector<4x4x32xf32>
    %186 = vector.extract_strided_slice %106 {offsets = [11, 0], sizes = [1, 32], strides = [1, 1]} : vector<25x32xf32> to vector<1x32xf32>
    %187 = vector.shape_cast %186 : vector<1x32xf32> to vector<32xf32>
    %188 = vector.shape_cast %187 : vector<32xf32> to vector<1x1x32xf32>
    %189 = vector.broadcast %188 : vector<1x1x32xf32> to vector<4x4x32xf32>
    %190 = arith.mulf %185, %189 : vector<4x4x32xf32>
    %191 = arith.addf %184, %190 : vector<4x4x32xf32>
    %192 = vector.extract_strided_slice %104 {offsets = [2, 2, 0], sizes = [4, 4, 32], strides = [1, 1, 1]} : vector<8x8x32xf32> to vector<4x4x32xf32>
    %193 = vector.extract_strided_slice %106 {offsets = [12, 0], sizes = [1, 32], strides = [1, 1]} : vector<25x32xf32> to vector<1x32xf32>
    %194 = vector.shape_cast %193 : vector<1x32xf32> to vector<32xf32>
    %195 = vector.shape_cast %194 : vector<32xf32> to vector<1x1x32xf32>
    %196 = vector.broadcast %195 : vector<1x1x32xf32> to vector<4x4x32xf32>
    %197 = arith.mulf %192, %196 : vector<4x4x32xf32>
    %198 = arith.addf %191, %197 : vector<4x4x32xf32>
    %199 = vector.extract_strided_slice %104 {offsets = [2, 3, 0], sizes = [4, 4, 32], strides = [1, 1, 1]} : vector<8x8x32xf32> to vector<4x4x32xf32>
    %200 = vector.extract_strided_slice %106 {offsets = [13, 0], sizes = [1, 32], strides = [1, 1]} : vector<25x32xf32> to vector<1x32xf32>
    %201 = vector.shape_cast %200 : vector<1x32xf32> to vector<32xf32>
    %202 = vector.shape_cast %201 : vector<32xf32> to vector<1x1x32xf32>
    %203 = vector.broadcast %202 : vector<1x1x32xf32> to vector<4x4x32xf32>
    %204 = arith.mulf %199, %203 : vector<4x4x32xf32>
    %205 = arith.addf %198, %204 : vector<4x4x32xf32>
    %206 = vector.extract_strided_slice %104 {offsets = [2, 4, 0], sizes = [4, 4, 32], strides = [1, 1, 1]} : vector<8x8x32xf32> to vector<4x4x32xf32>
    %207 = vector.extract_strided_slice %106 {offsets = [14, 0], sizes = [1, 32], strides = [1, 1]} : vector<25x32xf32> to vector<1x32xf32>
    %208 = vector.shape_cast %207 : vector<1x32xf32> to vector<32xf32>
    %209 = vector.shape_cast %208 : vector<32xf32> to vector<1x1x32xf32>
    %210 = vector.broadcast %209 : vector<1x1x32xf32> to vector<4x4x32xf32>
    %211 = arith.mulf %206, %210 : vector<4x4x32xf32>
    %212 = arith.addf %205, %211 : vector<4x4x32xf32>
    %213 = vector.extract_strided_slice %104 {offsets = [3, 0, 0], sizes = [4, 4, 32], strides = [1, 1, 1]} : vector<8x8x32xf32> to vector<4x4x32xf32>
    %214 = vector.extract_strided_slice %106 {offsets = [15, 0], sizes = [1, 32], strides = [1, 1]} : vector<25x32xf32> to vector<1x32xf32>
    %215 = vector.shape_cast %214 : vector<1x32xf32> to vector<32xf32>
    %216 = vector.shape_cast %215 : vector<32xf32> to vector<1x1x32xf32>
    %217 = vector.broadcast %216 : vector<1x1x32xf32> to vector<4x4x32xf32>
    %218 = arith.mulf %213, %217 : vector<4x4x32xf32>
    %219 = arith.addf %212, %218 : vector<4x4x32xf32>
    %220 = vector.extract_strided_slice %104 {offsets = [3, 1, 0], sizes = [4, 4, 32], strides = [1, 1, 1]} : vector<8x8x32xf32> to vector<4x4x32xf32>
    %221 = vector.extract_strided_slice %106 {offsets = [16, 0], sizes = [1, 32], strides = [1, 1]} : vector<25x32xf32> to vector<1x32xf32>
    %222 = vector.shape_cast %221 : vector<1x32xf32> to vector<32xf32>
    %223 = vector.shape_cast %222 : vector<32xf32> to vector<1x1x32xf32>
    %224 = vector.broadcast %223 : vector<1x1x32xf32> to vector<4x4x32xf32>
    %225 = arith.mulf %220, %224 : vector<4x4x32xf32>
    %226 = arith.addf %219, %225 : vector<4x4x32xf32>
    %227 = vector.extract_strided_slice %104 {offsets = [3, 2, 0], sizes = [4, 4, 32], strides = [1, 1, 1]} : vector<8x8x32xf32> to vector<4x4x32xf32>
    %228 = vector.extract_strided_slice %106 {offsets = [17, 0], sizes = [1, 32], strides = [1, 1]} : vector<25x32xf32> to vector<1x32xf32>
    %229 = vector.shape_cast %228 : vector<1x32xf32> to vector<32xf32>
    %230 = vector.shape_cast %229 : vector<32xf32> to vector<1x1x32xf32>
    %231 = vector.broadcast %230 : vector<1x1x32xf32> to vector<4x4x32xf32>
    %232 = arith.mulf %227, %231 : vector<4x4x32xf32>
    %233 = arith.addf %226, %232 : vector<4x4x32xf32>
    %234 = vector.extract_strided_slice %104 {offsets = [3, 3, 0], sizes = [4, 4, 32], strides = [1, 1, 1]} : vector<8x8x32xf32> to vector<4x4x32xf32>
    %235 = vector.extract_strided_slice %106 {offsets = [18, 0], sizes = [1, 32], strides = [1, 1]} : vector<25x32xf32> to vector<1x32xf32>
    %236 = vector.shape_cast %235 : vector<1x32xf32> to vector<32xf32>
    %237 = vector.shape_cast %236 : vector<32xf32> to vector<1x1x32xf32>
    %238 = vector.broadcast %237 : vector<1x1x32xf32> to vector<4x4x32xf32>
    %239 = arith.mulf %234, %238 : vector<4x4x32xf32>
    %240 = arith.addf %233, %239 : vector<4x4x32xf32>
    %241 = vector.extract_strided_slice %104 {offsets = [3, 4, 0], sizes = [4, 4, 32], strides = [1, 1, 1]} : vector<8x8x32xf32> to vector<4x4x32xf32>
    %242 = vector.extract_strided_slice %106 {offsets = [19, 0], sizes = [1, 32], strides = [1, 1]} : vector<25x32xf32> to vector<1x32xf32>
    %243 = vector.shape_cast %242 : vector<1x32xf32> to vector<32xf32>
    %244 = vector.shape_cast %243 : vector<32xf32> to vector<1x1x32xf32>
    %245 = vector.broadcast %244 : vector<1x1x32xf32> to vector<4x4x32xf32>
    %246 = arith.mulf %241, %245 : vector<4x4x32xf32>
    %247 = arith.addf %240, %246 : vector<4x4x32xf32>
    %248 = vector.extract_strided_slice %104 {offsets = [4, 0, 0], sizes = [4, 4, 32], strides = [1, 1, 1]} : vector<8x8x32xf32> to vector<4x4x32xf32>
    %249 = vector.extract_strided_slice %106 {offsets = [20, 0], sizes = [1, 32], strides = [1, 1]} : vector<25x32xf32> to vector<1x32xf32>
    %250 = vector.shape_cast %249 : vector<1x32xf32> to vector<32xf32>
    %251 = vector.shape_cast %250 : vector<32xf32> to vector<1x1x32xf32>
    %252 = vector.broadcast %251 : vector<1x1x32xf32> to vector<4x4x32xf32>
    %253 = arith.mulf %248, %252 : vector<4x4x32xf32>
    %254 = arith.addf %247, %253 : vector<4x4x32xf32>
    %255 = vector.extract_strided_slice %104 {offsets = [4, 1, 0], sizes = [4, 4, 32], strides = [1, 1, 1]} : vector<8x8x32xf32> to vector<4x4x32xf32>
    %256 = vector.extract_strided_slice %106 {offsets = [21, 0], sizes = [1, 32], strides = [1, 1]} : vector<25x32xf32> to vector<1x32xf32>
    %257 = vector.shape_cast %256 : vector<1x32xf32> to vector<32xf32>
    %258 = vector.shape_cast %257 : vector<32xf32> to vector<1x1x32xf32>
    %259 = vector.broadcast %258 : vector<1x1x32xf32> to vector<4x4x32xf32>
    %260 = arith.mulf %255, %259 : vector<4x4x32xf32>
    %261 = arith.addf %254, %260 : vector<4x4x32xf32>
    %262 = vector.extract_strided_slice %104 {offsets = [4, 2, 0], sizes = [4, 4, 32], strides = [1, 1, 1]} : vector<8x8x32xf32> to vector<4x4x32xf32>
    %263 = vector.extract_strided_slice %106 {offsets = [22, 0], sizes = [1, 32], strides = [1, 1]} : vector<25x32xf32> to vector<1x32xf32>
    %264 = vector.shape_cast %263 : vector<1x32xf32> to vector<32xf32>
    %265 = vector.shape_cast %264 : vector<32xf32> to vector<1x1x32xf32>
    %266 = vector.broadcast %265 : vector<1x1x32xf32> to vector<4x4x32xf32>
    %267 = arith.mulf %262, %266 : vector<4x4x32xf32>
    %268 = arith.addf %261, %267 : vector<4x4x32xf32>
    %269 = vector.extract_strided_slice %104 {offsets = [4, 3, 0], sizes = [4, 4, 32], strides = [1, 1, 1]} : vector<8x8x32xf32> to vector<4x4x32xf32>
    %270 = vector.extract_strided_slice %106 {offsets = [23, 0], sizes = [1, 32], strides = [1, 1]} : vector<25x32xf32> to vector<1x32xf32>
    %271 = vector.shape_cast %270 : vector<1x32xf32> to vector<32xf32>
    %272 = vector.shape_cast %271 : vector<32xf32> to vector<1x1x32xf32>
    %273 = vector.broadcast %272 : vector<1x1x32xf32> to vector<4x4x32xf32>
    %274 = arith.mulf %269, %273 : vector<4x4x32xf32>
    %275 = arith.addf %268, %274 : vector<4x4x32xf32>
    %276 = vector.extract_strided_slice %104 {offsets = [4, 4, 0], sizes = [4, 4, 32], strides = [1, 1, 1]} : vector<8x8x32xf32> to vector<4x4x32xf32>
    %277 = vector.extract_strided_slice %106 {offsets = [24, 0], sizes = [1, 32], strides = [1, 1]} : vector<25x32xf32> to vector<1x32xf32>
    %278 = vector.shape_cast %277 : vector<1x32xf32> to vector<32xf32>
    %279 = vector.shape_cast %278 : vector<32xf32> to vector<1x1x32xf32>
    %280 = vector.broadcast %279 : vector<1x1x32xf32> to vector<4x4x32xf32>
    %281 = arith.mulf %276, %280 : vector<4x4x32xf32>
    %282 = arith.addf %275, %281 : vector<4x4x32xf32>
    %c0_61 = arith.constant 0 : index
    %c0_62 = arith.constant 0 : index
    %c0_63 = arith.constant 0 : index
    %283 = vector.load %arg11[%c0_61, %c0_62, %c0_63] : memref<1x1x32xf32, #tpu.memory_space<vmem>>, vector<1x1x32xf32>
    %284 = vector.shape_cast %283 : vector<1x1x32xf32> to vector<32xf32>
    %285 = vector.shape_cast %284 : vector<32xf32> to vector<1x1x32xf32>
    %286 = vector.broadcast %285 : vector<1x1x32xf32> to vector<4x4x32xf32>
    %287 = arith.addf %282, %286 : vector<4x4x32xf32>
    %288 = vector.shape_cast %287 : vector<4x4x32xf32> to vector<16x32xf32>
    %c0_64 = arith.constant 0 : index
    %c0_65 = arith.constant 0 : index
    %c0_66 = arith.constant 0 : index
    %289 = vector.load %arg12[%c0_64, %c0_65, %c0_66] : memref<1x32x32xf32, #tpu.memory_space<vmem>>, vector<1x32x32xf32>
    %290 = vector.shape_cast %289 : vector<1x32x32xf32> to vector<32x32xf32>
    %cst_67 = arith.constant dense<0.000000e+00> : vector<16x32xf32>
    %291 = tpu.matmul %288, %290, %cst_67 {dimension_numbers = #tpu.dot_dimension_numbers<[1], [0], [0], [1], [0, 0, 1, 1], [], []>} : vector<16x32xf32>, vector<32x32xf32>, vector<16x32xf32> -> vector<16x32xf32>
    %c0_68 = arith.constant 0 : index
    %c0_69 = arith.constant 0 : index
    %c0_70 = arith.constant 0 : index
    %292 = vector.load %arg13[%c0_68, %c0_69, %c0_70] : memref<1x1x32xf32, #tpu.memory_space<vmem>>, vector<1x1x32xf32>
    %293 = vector.shape_cast %292 : vector<1x1x32xf32> to vector<1x32xf32>
    %294 = vector.broadcast %293 : vector<1x32xf32> to vector<16x32xf32>
    %295 = arith.addf %291, %294 : vector<16x32xf32>
    %296 = arith.addf %68, %295 : vector<16x32xf32>
    %c0_71 = arith.constant 0 : index
    %c0_72 = arith.constant 0 : index
    %c0_73 = arith.constant 0 : index
    %297 = vector.load %arg14[%c0_71, %c0_72, %c0_73] : memref<1x1x32xf32, #tpu.memory_space<vmem>>, vector<1x1x32xf32>
    %298 = vector.shape_cast %297 : vector<1x1x32xf32> to vector<1x32xf32>
    %c0_74 = arith.constant 0 : index
    %c0_75 = arith.constant 0 : index
    %c0_76 = arith.constant 0 : index
    %299 = vector.load %arg15[%c0_74, %c0_75, %c0_76] : memref<1x1x32xf32, #tpu.memory_space<vmem>>, vector<1x1x32xf32>
    %300 = vector.shape_cast %299 : vector<1x1x32xf32> to vector<1x32xf32>
    %cst_77 = arith.constant dense<0.000000e+00> : vector<16xf32>
    %301 = vector.multi_reduction <add>, %296, %cst_77 [1] : vector<16x32xf32> to vector<16xf32>
    %302 = vector.shape_cast %301 : vector<16xf32> to vector<16x1xf32>
    %cst_78 = arith.constant 3.200000e+01 : f32
    %303 = vector.broadcast %cst_78 : f32 to vector<16x1xf32>
    %304 = arith.divf %302, %303 : vector<16x1xf32>
    %305 = vector.broadcast %304 : vector<16x1xf32> to vector<16x32xf32>
    %306 = arith.subf %296, %305 : vector<16x32xf32>
    %307 = arith.mulf %306, %306 : vector<16x32xf32>
    %cst_79 = arith.constant dense<0.000000e+00> : vector<16xf32>
    %308 = vector.multi_reduction <add>, %307, %cst_79 [1] : vector<16x32xf32> to vector<16xf32>
    %309 = vector.shape_cast %308 : vector<16xf32> to vector<16x1xf32>
    %cst_80 = arith.constant 3.200000e+01 : f32
    %310 = vector.broadcast %cst_80 : f32 to vector<16x1xf32>
    %311 = arith.divf %309, %310 : vector<16x1xf32>
    %cst_81 = arith.constant 9.99999974E-6 : f32
    %312 = vector.broadcast %cst_81 : f32 to vector<16x1xf32>
    %313 = arith.addf %311, %312 : vector<16x1xf32>
    %314 = math.rsqrt %313 : vector<16x1xf32>
    %315 = vector.broadcast %314 : vector<16x1xf32> to vector<16x32xf32>
    %316 = arith.mulf %306, %315 : vector<16x32xf32>
    %317 = vector.broadcast %298 : vector<1x32xf32> to vector<16x32xf32>
    %318 = arith.mulf %316, %317 : vector<16x32xf32>
    %319 = vector.broadcast %300 : vector<1x32xf32> to vector<16x32xf32>
    %320 = arith.addf %318, %319 : vector<16x32xf32>
    %c0_82 = arith.constant 0 : index
    %c0_83 = arith.constant 0 : index
    %c0_84 = arith.constant 0 : index
    %321 = vector.load %arg16[%c0_82, %c0_83, %c0_84] : memref<1x32x128xf32, #tpu.memory_space<vmem>>, vector<1x32x128xf32>
    %322 = vector.shape_cast %321 : vector<1x32x128xf32> to vector<32x128xf32>
    %cst_85 = arith.constant dense<0.000000e+00> : vector<16x128xf32>
    %323 = tpu.matmul %320, %322, %cst_85 {dimension_numbers = #tpu.dot_dimension_numbers<[1], [0], [0], [1], [0, 0, 1, 1], [], []>} : vector<16x32xf32>, vector<32x128xf32>, vector<16x128xf32> -> vector<16x128xf32>
    %c0_86 = arith.constant 0 : index
    %c0_87 = arith.constant 0 : index
    %c0_88 = arith.constant 0 : index
    %324 = vector.load %arg17[%c0_86, %c0_87, %c0_88] : memref<1x1x128xf32, #tpu.memory_space<vmem>>, vector<1x1x128xf32>
    %325 = vector.shape_cast %324 : vector<1x1x128xf32> to vector<1x128xf32>
    %326 = vector.broadcast %325 : vector<1x128xf32> to vector<16x128xf32>
    %327 = arith.addf %323, %326 : vector<16x128xf32>
    %cst_89 = arith.constant 0.707106769 : f32
    %328 = vector.broadcast %cst_89 : f32 to vector<16x128xf32>
    %329 = arith.mulf %327, %328 : vector<16x128xf32>
    %330 = math.absf %329 : vector<16x128xf32>
    %cst_90 = arith.constant 0.327591091 : f32
    %331 = vector.broadcast %cst_90 : f32 to vector<16x128xf32>
    %332 = arith.mulf %331, %330 : vector<16x128xf32>
    %cst_91 = arith.constant 1.000000e+00 : f32
    %333 = vector.broadcast %cst_91 : f32 to vector<16x128xf32>
    %334 = arith.addf %333, %332 : vector<16x128xf32>
    %cst_92 = arith.constant 1.000000e+00 : f32
    %335 = vector.broadcast %cst_92 : f32 to vector<16x128xf32>
    %336 = arith.divf %335, %334 : vector<16x128xf32>
    %cst_93 = arith.constant 1.06140542 : f32
    %337 = vector.broadcast %cst_93 : f32 to vector<16x128xf32>
    %338 = arith.mulf %336, %337 : vector<16x128xf32>
    %cst_94 = arith.constant -1.45315206 : f32
    %339 = vector.broadcast %cst_94 : f32 to vector<16x128xf32>
    %340 = arith.addf %339, %338 : vector<16x128xf32>
    %341 = arith.mulf %336, %340 : vector<16x128xf32>
    %cst_95 = arith.constant 1.42141378 : f32
    %342 = vector.broadcast %cst_95 : f32 to vector<16x128xf32>
    %343 = arith.addf %342, %341 : vector<16x128xf32>
    %344 = arith.mulf %336, %343 : vector<16x128xf32>
    %cst_96 = arith.constant -0.284496725 : f32
    %345 = vector.broadcast %cst_96 : f32 to vector<16x128xf32>
    %346 = arith.addf %345, %344 : vector<16x128xf32>
    %347 = arith.mulf %336, %346 : vector<16x128xf32>
    %cst_97 = arith.constant 0.254829586 : f32
    %348 = vector.broadcast %cst_97 : f32 to vector<16x128xf32>
    %349 = arith.addf %348, %347 : vector<16x128xf32>
    %350 = arith.mulf %336, %349 : vector<16x128xf32>
    %cst_98 = arith.constant 0.000000e+00 : f32
    %351 = vector.broadcast %cst_98 : f32 to vector<16x128xf32>
    %352 = arith.subf %351, %330 : vector<16x128xf32>
    %353 = arith.mulf %352, %330 : vector<16x128xf32>
    %354 = math.exp %353 : vector<16x128xf32>
    %355 = arith.mulf %350, %354 : vector<16x128xf32>
    %cst_99 = arith.constant 1.000000e+00 : f32
    %356 = vector.broadcast %cst_99 : f32 to vector<16x128xf32>
    %357 = arith.subf %356, %355 : vector<16x128xf32>
    %cst_100 = arith.constant 5.000000e-01 : f32
    %358 = vector.broadcast %cst_100 : f32 to vector<16x128xf32>
    %359 = arith.mulf %358, %327 : vector<16x128xf32>
    %cst_101 = arith.constant 0.000000e+00 : f32
    %360 = vector.broadcast %cst_101 : f32 to vector<16x128xf32>
    %361 = arith.cmpf oge, %329, %360 : vector<16x128xf32>
    %cst_102 = arith.constant 0.000000e+00 : f32
    %362 = vector.broadcast %cst_102 : f32 to vector<16x128xf32>
    %363 = arith.subf %362, %357 : vector<16x128xf32>
    %364 = arith.select %361, %357, %363 : vector<16x128xi1>, vector<16x128xf32>
    %cst_103 = arith.constant 1.000000e+00 : f32
    %365 = vector.broadcast %cst_103 : f32 to vector<16x128xf32>
    %366 = arith.addf %365, %364 : vector<16x128xf32>
    %367 = arith.mulf %359, %366 : vector<16x128xf32>
    %c0_104 = arith.constant 0 : index
    %c0_105 = arith.constant 0 : index
    %c0_106 = arith.constant 0 : index
    %368 = vector.load %arg18[%c0_104, %c0_105, %c0_106] : memref<1x128x32xf32, #tpu.memory_space<vmem>>, vector<1x128x32xf32>
    %369 = vector.shape_cast %368 : vector<1x128x32xf32> to vector<128x32xf32>
    %cst_107 = arith.constant dense<0.000000e+00> : vector<16x32xf32>
    %370 = tpu.matmul %367, %369, %cst_107 {dimension_numbers = #tpu.dot_dimension_numbers<[1], [0], [0], [1], [0, 0, 1, 1], [], []>} : vector<16x128xf32>, vector<128x32xf32>, vector<16x32xf32> -> vector<16x32xf32>
    %c0_108 = arith.constant 0 : index
    %c0_109 = arith.constant 0 : index
    %c0_110 = arith.constant 0 : index
    %371 = vector.load %arg19[%c0_108, %c0_109, %c0_110] : memref<1x1x32xf32, #tpu.memory_space<vmem>>, vector<1x1x32xf32>
    %372 = vector.shape_cast %371 : vector<1x1x32xf32> to vector<1x32xf32>
    %373 = vector.broadcast %372 : vector<1x32xf32> to vector<16x32xf32>
    %374 = arith.addf %370, %373 : vector<16x32xf32>
    %375 = arith.addf %296, %374 : vector<16x32xf32>
    %376 = vector.shape_cast %375 : vector<16x32xf32> to vector<4x4x32xf32>
    %c0_111 = arith.constant 0 : index
    %c0_112 = arith.constant 0 : index
    %c0_113 = arith.constant 0 : index
    %c0_114 = arith.constant 0 : index
    %377 = vector.load %arg20[%c0_111, %c0_112, %c0_113, %c0_114] : memref<1x4x4x32xf32, #tpu.memory_space<vmem>>, vector<1x4x4x32xf32>
    %378 = vector.shape_cast %377 : vector<1x4x4x32xf32> to vector<4x4x32xf32>
    %379 = vector.shape_cast %376 : vector<4x4x32xf32> to vector<1x4x4x32xf32>
    tpu.vector_store %arg20[%c0_111, %c0_112, %c0_113, %c0_114], %379 {strides = array<i32>} : memref<1x4x4x32xf32, #tpu.memory_space<vmem>>, vector<1x4x4x32xf32>,
    return
  }
  func.func @transform_0(%arg0: i32) -> (i32, i32, i32) {
    %c0_i32 = arith.constant 0 : i32
    %c0_i32_0 = arith.constant 0 : i32
    %c0_i32_1 = arith.constant 0 : i32
    return %arg0, %c0_i32, %c0_i32_0 : i32, i32, i32
  }
  func.func @transform_1(%arg0: i32) -> (i32, i32) {
    %c0_i32 = arith.constant 0 : i32
    %c0_i32_0 = arith.constant 0 : i32
    %c0_i32_1 = arith.constant 0 : i32
    return %c0_i32, %c0_i32_0 : i32, i32
  }
  func.func @transform_2(%arg0: i32) -> (i32, i32) {
    %c0_i32 = arith.constant 0 : i32
    %c0_i32_0 = arith.constant 0 : i32
    %c0_i32_1 = arith.constant 0 : i32
    return %c0_i32, %c0_i32_0 : i32, i32
  }
  func.func @transform_3(%arg0: i32) -> (i32, i32) {
    %c0_i32 = arith.constant 0 : i32
    %c0_i32_0 = arith.constant 0 : i32
    %c0_i32_1 = arith.constant 0 : i32
    return %c0_i32, %c0_i32_0 : i32, i32
  }
  func.func @transform_4(%arg0: i32) -> (i32, i32) {
    %c0_i32 = arith.constant 0 : i32
    %c0_i32_0 = arith.constant 0 : i32
    %c0_i32_1 = arith.constant 0 : i32
    return %c0_i32, %c0_i32_0 : i32, i32
  }
  func.func @transform_5(%arg0: i32) -> (i32, i32, i32) {
    %c0_i32 = arith.constant 0 : i32
    %c0_i32_0 = arith.constant 0 : i32
    %c0_i32_1 = arith.constant 0 : i32
    %c0_i32_2 = arith.constant 0 : i32
    return %c0_i32, %c0_i32_0, %c0_i32_1 : i32, i32, i32
  }
  func.func @transform_6(%arg0: i32) -> (i32, i32, i32) {
    %c0_i32 = arith.constant 0 : i32
    %c0_i32_0 = arith.constant 0 : i32
    %c0_i32_1 = arith.constant 0 : i32
    %c0_i32_2 = arith.constant 0 : i32
    return %c0_i32, %c0_i32_0, %c0_i32_1 : i32, i32, i32
  }
  func.func @transform_7(%arg0: i32) -> (i32, i32, i32) {
    %c0_i32 = arith.constant 0 : i32
    %c0_i32_0 = arith.constant 0 : i32
    %c0_i32_1 = arith.constant 0 : i32
    %c0_i32_2 = arith.constant 0 : i32
    return %c0_i32, %c0_i32_0, %c0_i32_1 : i32, i32, i32
  }
  func.func @transform_8(%arg0: i32) -> (i32, i32, i32) {
    %c0_i32 = arith.constant 0 : i32
    %c0_i32_0 = arith.constant 0 : i32
    %c0_i32_1 = arith.constant 0 : i32
    %c0_i32_2 = arith.constant 0 : i32
    return %c0_i32, %c0_i32_0, %c0_i32_1 : i32, i32, i32
  }
  func.func @transform_9(%arg0: i32) -> (i32, i32, i32) {
    %c0_i32 = arith.constant 0 : i32
    %c0_i32_0 = arith.constant 0 : i32
    %c0_i32_1 = arith.constant 0 : i32
    %c0_i32_2 = arith.constant 0 : i32
    return %c0_i32, %c0_i32_0, %c0_i32_1 : i32, i32, i32
  }
  func.func @transform_10(%arg0: i32) -> (i32, i32, i32) {
    %c0_i32 = arith.constant 0 : i32
    %c0_i32_0 = arith.constant 0 : i32
    %c0_i32_1 = arith.constant 0 : i32
    %c0_i32_2 = arith.constant 0 : i32
    return %c0_i32, %c0_i32_0, %c0_i32_1 : i32, i32, i32
  }
  func.func @transform_11(%arg0: i32) -> (i32, i32, i32) {
    %c0_i32 = arith.constant 0 : i32
    %c0_i32_0 = arith.constant 0 : i32
    %c0_i32_1 = arith.constant 0 : i32
    %c0_i32_2 = arith.constant 0 : i32
    return %c0_i32, %c0_i32_0, %c0_i32_1 : i32, i32, i32
  }
  func.func @transform_12(%arg0: i32) -> (i32, i32, i32) {
    %c0_i32 = arith.constant 0 : i32
    %c0_i32_0 = arith.constant 0 : i32
    %c0_i32_1 = arith.constant 0 : i32
    %c0_i32_2 = arith.constant 0 : i32
    return %c0_i32, %c0_i32_0, %c0_i32_1 : i32, i32, i32
  }
  func.func @transform_13(%arg0: i32) -> (i32, i32, i32) {
    %c0_i32 = arith.constant 0 : i32
    %c0_i32_0 = arith.constant 0 : i32
    %c0_i32_1 = arith.constant 0 : i32
    %c0_i32_2 = arith.constant 0 : i32
    return %c0_i32, %c0_i32_0, %c0_i32_1 : i32, i32, i32
  }
  func.func @transform_14(%arg0: i32) -> (i32, i32, i32) {
    %c0_i32 = arith.constant 0 : i32
    %c0_i32_0 = arith.constant 0 : i32
    %c0_i32_1 = arith.constant 0 : i32
    %c0_i32_2 = arith.constant 0 : i32
    return %c0_i32, %c0_i32_0, %c0_i32_1 : i32, i32, i32
  }
  func.func @transform_15(%arg0: i32) -> (i32, i32, i32) {
    %c0_i32 = arith.constant 0 : i32
    %c0_i32_0 = arith.constant 0 : i32
    %c0_i32_1 = arith.constant 0 : i32
    %c0_i32_2 = arith.constant 0 : i32
    return %c0_i32, %c0_i32_0, %c0_i32_1 : i32, i32, i32
  }
  func.func @transform_16(%arg0: i32) -> (i32, i32, i32) {
    %c0_i32 = arith.constant 0 : i32
    %c0_i32_0 = arith.constant 0 : i32
    %c0_i32_1 = arith.constant 0 : i32
    %c0_i32_2 = arith.constant 0 : i32
    return %c0_i32, %c0_i32_0, %c0_i32_1 : i32, i32, i32
  }
  func.func @transform_17(%arg0: i32) -> (i32, i32, i32) {
    %c0_i32 = arith.constant 0 : i32
    %c0_i32_0 = arith.constant 0 : i32
    %c0_i32_1 = arith.constant 0 : i32
    %c0_i32_2 = arith.constant 0 : i32
    return %c0_i32, %c0_i32_0, %c0_i32_1 : i32, i32, i32
  }
  func.func @transform_18(%arg0: i32) -> (i32, i32, i32) {
    %c0_i32 = arith.constant 0 : i32
    %c0_i32_0 = arith.constant 0 : i32
    %c0_i32_1 = arith.constant 0 : i32
    %c0_i32_2 = arith.constant 0 : i32
    return %c0_i32, %c0_i32_0, %c0_i32_1 : i32, i32, i32
  }
  func.func @transform_19(%arg0: i32) -> (i32, i32, i32, i32) {
    %c0_i32 = arith.constant 0 : i32
    %c0_i32_0 = arith.constant 0 : i32
    %c0_i32_1 = arith.constant 0 : i32
    %c0_i32_2 = arith.constant 0 : i32
    return %arg0, %c0_i32, %c0_i32_0, %c0_i32_1 : i32, i32, i32, i32
  }
}

module attributes {stable_mosaic.version = 11 : i64} {
  func.func @_vit_stage_kernel(%arg0: i32, %arg1: memref<1x4x128xf32, #tpu.memory_space<vmem>>, %arg2: memref<128x64xf32, #tpu.memory_space<vmem>>, %arg3: memref<1x64xf32, #tpu.memory_space<vmem>>, %arg4: memref<1x64xf32, #tpu.memory_space<vmem>>, %arg5: memref<1x64xf32, #tpu.memory_space<vmem>>, %arg6: memref<64x64xf32, #tpu.memory_space<vmem>>, %arg7: memref<1x64xf32, #tpu.memory_space<vmem>>, %arg8: memref<4x64xf32, #tpu.memory_space<vmem>>, %arg9: memref<2x1x64xf32, #tpu.memory_space<vmem>>, %arg10: memref<2x1x64xf32, #tpu.memory_space<vmem>>, %arg11: memref<2x64x192xf32, #tpu.memory_space<vmem>>, %arg12: memref<2x1x192xf32, #tpu.memory_space<vmem>>, %arg13: memref<2x64x64xf32, #tpu.memory_space<vmem>>, %arg14: memref<2x1x64xf32, #tpu.memory_space<vmem>>, %arg15: memref<2x1x64xf32, #tpu.memory_space<vmem>>, %arg16: memref<2x1x64xf32, #tpu.memory_space<vmem>>, %arg17: memref<2x64x256xf32, #tpu.memory_space<vmem>>, %arg18: memref<2x1x256xf32, #tpu.memory_space<vmem>>, %arg19: memref<2x256x64xf32, #tpu.memory_space<vmem>>, %arg20: memref<2x1x64xf32, #tpu.memory_space<vmem>>, %arg21: memref<1x64xf32, #tpu.memory_space<vmem>>, %arg22: memref<1x64xf32, #tpu.memory_space<vmem>>, %arg23: memref<1x64xf32, #tpu.memory_space<vmem>>, %arg24: memref<1x64xf32, #tpu.memory_space<vmem>>, %arg25: memref<1x2x2x64xf32, #tpu.memory_space<vmem>>, %arg26: memref<1x1x1x64xf32, #tpu.memory_space<vmem>>) attributes {dimension_semantics = [#tpu.dimension_semantics<parallel>], iteration_bounds = array<i64: 2>, scalar_prefetch = 0 : i64, scratch_operands = 0 : i64, tpu.core_type = #tpu.core_type<tc>, window_params = [{transform_indices = @transform_0, window_bounds = array<i64: 1, 4, 128>}, {pipeline_mode = #tpu.pipeline_mode<synchronous>, transform_indices = @transform_1, window_bounds = array<i64: 128, 64>}, {pipeline_mode = #tpu.pipeline_mode<synchronous>, transform_indices = @transform_2, window_bounds = array<i64: 1, 64>}, {pipeline_mode = #tpu.pipeline_mode<synchronous>, transform_indices = @transform_3, window_bounds = array<i64: 1, 64>}, {pipeline_mode = #tpu.pipeline_mode<synchronous>, transform_indices = @transform_4, window_bounds = array<i64: 1, 64>}, {pipeline_mode = #tpu.pipeline_mode<synchronous>, transform_indices = @transform_5, window_bounds = array<i64: 64, 64>}, {pipeline_mode = #tpu.pipeline_mode<synchronous>, transform_indices = @transform_6, window_bounds = array<i64: 1, 64>}, {pipeline_mode = #tpu.pipeline_mode<synchronous>, transform_indices = @transform_7, window_bounds = array<i64: 4, 64>}, {pipeline_mode = #tpu.pipeline_mode<synchronous>, transform_indices = @transform_8, window_bounds = array<i64: 2, 1, 64>}, {pipeline_mode = #tpu.pipeline_mode<synchronous>, transform_indices = @transform_9, window_bounds = array<i64: 2, 1, 64>}, {pipeline_mode = #tpu.pipeline_mode<synchronous>, transform_indices = @transform_10, window_bounds = array<i64: 2, 64, 192>}, {pipeline_mode = #tpu.pipeline_mode<synchronous>, transform_indices = @transform_11, window_bounds = array<i64: 2, 1, 192>}, {pipeline_mode = #tpu.pipeline_mode<synchronous>, transform_indices = @transform_12, window_bounds = array<i64: 2, 64, 64>}, {pipeline_mode = #tpu.pipeline_mode<synchronous>, transform_indices = @transform_13, window_bounds = array<i64: 2, 1, 64>}, {pipeline_mode = #tpu.pipeline_mode<synchronous>, transform_indices = @transform_14, window_bounds = array<i64: 2, 1, 64>}, {pipeline_mode = #tpu.pipeline_mode<synchronous>, transform_indices = @transform_15, window_bounds = array<i64: 2, 1, 64>}, {pipeline_mode = #tpu.pipeline_mode<synchronous>, transform_indices = @transform_16, window_bounds = array<i64: 2, 64, 256>}, {pipeline_mode = #tpu.pipeline_mode<synchronous>, transform_indices = @transform_17, window_bounds = array<i64: 2, 1, 256>}, {pipeline_mode = #tpu.pipeline_mode<synchronous>, transform_indices = @transform_18, window_bounds = array<i64: 2, 256, 64>}, {pipeline_mode = #tpu.pipeline_mode<synchronous>, transform_indices = @transform_19, window_bounds = array<i64: 2, 1, 64>}, {pipeline_mode = #tpu.pipeline_mode<synchronous>, transform_indices = @transform_20, window_bounds = array<i64: 1, 64>}, {pipeline_mode = #tpu.pipeline_mode<synchronous>, transform_indices = @transform_21, window_bounds = array<i64: 1, 64>}, {pipeline_mode = #tpu.pipeline_mode<synchronous>, transform_indices = @transform_22, window_bounds = array<i64: 1, 64>}, {pipeline_mode = #tpu.pipeline_mode<synchronous>, transform_indices = @transform_23, window_bounds = array<i64: 1, 64>}, {transform_indices = @transform_24, window_bounds = array<i64: 1, 2, 2, 64>}, {transform_indices = @transform_25, window_bounds = array<i64: 1, 1, 1, 64>}]} {
    %c0 = arith.constant 0 : index
    %c0_0 = arith.constant 0 : index
    %c0_1 = arith.constant 0 : index
    %0 = vector.load %arg1[%c0, %c0_0, %c0_1] : memref<1x4x128xf32, #tpu.memory_space<vmem>>, vector<1x4x128xf32>
    %1 = vector.shape_cast %0 : vector<1x4x128xf32> to vector<4x128xf32>
    %c0_2 = arith.constant 0 : index
    %c0_3 = arith.constant 0 : index
    %2 = vector.load %arg2[%c0_2, %c0_3] : memref<128x64xf32, #tpu.memory_space<vmem>>, vector<128x64xf32>
    %cst = arith.constant dense<0.000000e+00> : vector<4x64xf32>
    %3 = tpu.matmul %1, %2, %cst {dimension_numbers = #tpu.dot_dimension_numbers<[1], [0], [0], [1], [0, 0, 1, 1], [], []>} : vector<4x128xf32>, vector<128x64xf32>, vector<4x64xf32> -> vector<4x64xf32>
    %c0_4 = arith.constant 0 : index
    %c0_5 = arith.constant 0 : index
    %4 = vector.load %arg3[%c0_4, %c0_5] : memref<1x64xf32, #tpu.memory_space<vmem>>, vector<1x64xf32>
    %5 = vector.broadcast %4 : vector<1x64xf32> to vector<4x64xf32>
    %6 = arith.addf %3, %5 : vector<4x64xf32>
    %c0_6 = arith.constant 0 : index
    %c0_7 = arith.constant 0 : index
    %7 = vector.load %arg4[%c0_6, %c0_7] : memref<1x64xf32, #tpu.memory_space<vmem>>, vector<1x64xf32>
    %c0_8 = arith.constant 0 : index
    %c0_9 = arith.constant 0 : index
    %8 = vector.load %arg5[%c0_8, %c0_9] : memref<1x64xf32, #tpu.memory_space<vmem>>, vector<1x64xf32>
    %cst_10 = arith.constant dense<0.000000e+00> : vector<4xf32>
    %9 = vector.multi_reduction <add>, %6, %cst_10 [1] : vector<4x64xf32> to vector<4xf32>
    %10 = vector.shape_cast %9 : vector<4xf32> to vector<4x1xf32>
    %cst_11 = arith.constant 6.400000e+01 : f32
    %11 = vector.broadcast %cst_11 : f32 to vector<4x1xf32>
    %12 = arith.divf %10, %11 : vector<4x1xf32>
    %13 = vector.broadcast %12 : vector<4x1xf32> to vector<4x64xf32>
    %14 = arith.subf %6, %13 : vector<4x64xf32>
    %15 = arith.mulf %14, %14 : vector<4x64xf32>
    %cst_12 = arith.constant dense<0.000000e+00> : vector<4xf32>
    %16 = vector.multi_reduction <add>, %15, %cst_12 [1] : vector<4x64xf32> to vector<4xf32>
    %17 = vector.shape_cast %16 : vector<4xf32> to vector<4x1xf32>
    %cst_13 = arith.constant 6.400000e+01 : f32
    %18 = vector.broadcast %cst_13 : f32 to vector<4x1xf32>
    %19 = arith.divf %17, %18 : vector<4x1xf32>
    %cst_14 = arith.constant 9.99999974E-6 : f32
    %20 = vector.broadcast %cst_14 : f32 to vector<4x1xf32>
    %21 = arith.addf %19, %20 : vector<4x1xf32>
    %22 = math.rsqrt %21 : vector<4x1xf32>
    %23 = vector.broadcast %22 : vector<4x1xf32> to vector<4x64xf32>
    %24 = arith.mulf %14, %23 : vector<4x64xf32>
    %25 = vector.broadcast %7 : vector<1x64xf32> to vector<4x64xf32>
    %26 = arith.mulf %24, %25 : vector<4x64xf32>
    %27 = vector.broadcast %8 : vector<1x64xf32> to vector<4x64xf32>
    %28 = arith.addf %26, %27 : vector<4x64xf32>
    %cst_15 = arith.constant 0.707106769 : f32
    %29 = vector.broadcast %cst_15 : f32 to vector<4x64xf32>
    %30 = arith.mulf %28, %29 : vector<4x64xf32>
    %31 = math.absf %30 : vector<4x64xf32>
    %cst_16 = arith.constant 0.327591091 : f32
    %32 = vector.broadcast %cst_16 : f32 to vector<4x64xf32>
    %33 = arith.mulf %32, %31 : vector<4x64xf32>
    %cst_17 = arith.constant 1.000000e+00 : f32
    %34 = vector.broadcast %cst_17 : f32 to vector<4x64xf32>
    %35 = arith.addf %34, %33 : vector<4x64xf32>
    %cst_18 = arith.constant 1.000000e+00 : f32
    %36 = vector.broadcast %cst_18 : f32 to vector<4x64xf32>
    %37 = arith.divf %36, %35 : vector<4x64xf32>
    %cst_19 = arith.constant 1.06140542 : f32
    %38 = vector.broadcast %cst_19 : f32 to vector<4x64xf32>
    %39 = arith.mulf %37, %38 : vector<4x64xf32>
    %cst_20 = arith.constant -1.45315206 : f32
    %40 = vector.broadcast %cst_20 : f32 to vector<4x64xf32>
    %41 = arith.addf %40, %39 : vector<4x64xf32>
    %42 = arith.mulf %37, %41 : vector<4x64xf32>
    %cst_21 = arith.constant 1.42141378 : f32
    %43 = vector.broadcast %cst_21 : f32 to vector<4x64xf32>
    %44 = arith.addf %43, %42 : vector<4x64xf32>
    %45 = arith.mulf %37, %44 : vector<4x64xf32>
    %cst_22 = arith.constant -0.284496725 : f32
    %46 = vector.broadcast %cst_22 : f32 to vector<4x64xf32>
    %47 = arith.addf %46, %45 : vector<4x64xf32>
    %48 = arith.mulf %37, %47 : vector<4x64xf32>
    %cst_23 = arith.constant 0.254829586 : f32
    %49 = vector.broadcast %cst_23 : f32 to vector<4x64xf32>
    %50 = arith.addf %49, %48 : vector<4x64xf32>
    %51 = arith.mulf %37, %50 : vector<4x64xf32>
    %cst_24 = arith.constant 0.000000e+00 : f32
    %52 = vector.broadcast %cst_24 : f32 to vector<4x64xf32>
    %53 = arith.subf %52, %31 : vector<4x64xf32>
    %54 = arith.mulf %53, %31 : vector<4x64xf32>
    %55 = math.exp %54 : vector<4x64xf32>
    %56 = arith.mulf %51, %55 : vector<4x64xf32>
    %cst_25 = arith.constant 1.000000e+00 : f32
    %57 = vector.broadcast %cst_25 : f32 to vector<4x64xf32>
    %58 = arith.subf %57, %56 : vector<4x64xf32>
    %cst_26 = arith.constant 5.000000e-01 : f32
    %59 = vector.broadcast %cst_26 : f32 to vector<4x64xf32>
    %60 = arith.mulf %59, %28 : vector<4x64xf32>
    %cst_27 = arith.constant 0.000000e+00 : f32
    %61 = vector.broadcast %cst_27 : f32 to vector<4x64xf32>
    %62 = arith.cmpf oge, %30, %61 : vector<4x64xf32>
    %cst_28 = arith.constant 0.000000e+00 : f32
    %63 = vector.broadcast %cst_28 : f32 to vector<4x64xf32>
    %64 = arith.subf %63, %58 : vector<4x64xf32>
    %65 = arith.select %62, %58, %64 : vector<4x64xi1>, vector<4x64xf32>
    %cst_29 = arith.constant 1.000000e+00 : f32
    %66 = vector.broadcast %cst_29 : f32 to vector<4x64xf32>
    %67 = arith.addf %66, %65 : vector<4x64xf32>
    %68 = arith.mulf %60, %67 : vector<4x64xf32>
    %c0_30 = arith.constant 0 : index
    %c0_31 = arith.constant 0 : index
    %69 = vector.load %arg6[%c0_30, %c0_31] : memref<64x64xf32, #tpu.memory_space<vmem>>, vector<64x64xf32>
    %cst_32 = arith.constant dense<0.000000e+00> : vector<4x64xf32>
    %70 = tpu.matmul %68, %69, %cst_32 {dimension_numbers = #tpu.dot_dimension_numbers<[1], [0], [0], [1], [0, 0, 1, 1], [], []>} : vector<4x64xf32>, vector<64x64xf32>, vector<4x64xf32> -> vector<4x64xf32>
    %c0_33 = arith.constant 0 : index
    %c0_34 = arith.constant 0 : index
    %71 = vector.load %arg7[%c0_33, %c0_34] : memref<1x64xf32, #tpu.memory_space<vmem>>, vector<1x64xf32>
    %72 = vector.broadcast %71 : vector<1x64xf32> to vector<4x64xf32>
    %73 = arith.addf %70, %72 : vector<4x64xf32>
    %c0_35 = arith.constant 0 : index
    %c0_36 = arith.constant 0 : index
    %74 = vector.load %arg8[%c0_35, %c0_36] : memref<4x64xf32, #tpu.memory_space<vmem>>, vector<4x64xf32>
    %75 = arith.addf %73, %74 : vector<4x64xf32>
    %c0_37 = arith.constant 0 : index
    %c0_38 = arith.constant 0 : index
    %c0_39 = arith.constant 0 : index
    %76 = vector.load %arg9[%c0_37, %c0_38, %c0_39] : memref<2x1x64xf32, #tpu.memory_space<vmem>>, vector<1x1x64xf32>
    %77 = vector.shape_cast %76 : vector<1x1x64xf32> to vector<1x64xf32>
    %c0_40 = arith.constant 0 : index
    %c0_41 = arith.constant 0 : index
    %c0_42 = arith.constant 0 : index
    %78 = vector.load %arg10[%c0_40, %c0_41, %c0_42] : memref<2x1x64xf32, #tpu.memory_space<vmem>>, vector<1x1x64xf32>
    %79 = vector.shape_cast %78 : vector<1x1x64xf32> to vector<1x64xf32>
    %cst_43 = arith.constant dense<0.000000e+00> : vector<4xf32>
    %80 = vector.multi_reduction <add>, %75, %cst_43 [1] : vector<4x64xf32> to vector<4xf32>
    %81 = vector.shape_cast %80 : vector<4xf32> to vector<4x1xf32>
    %cst_44 = arith.constant 6.400000e+01 : f32
    %82 = vector.broadcast %cst_44 : f32 to vector<4x1xf32>
    %83 = arith.divf %81, %82 : vector<4x1xf32>
    %84 = vector.broadcast %83 : vector<4x1xf32> to vector<4x64xf32>
    %85 = arith.subf %75, %84 : vector<4x64xf32>
    %86 = arith.mulf %85, %85 : vector<4x64xf32>
    %cst_45 = arith.constant dense<0.000000e+00> : vector<4xf32>
    %87 = vector.multi_reduction <add>, %86, %cst_45 [1] : vector<4x64xf32> to vector<4xf32>
    %88 = vector.shape_cast %87 : vector<4xf32> to vector<4x1xf32>
    %cst_46 = arith.constant 6.400000e+01 : f32
    %89 = vector.broadcast %cst_46 : f32 to vector<4x1xf32>
    %90 = arith.divf %88, %89 : vector<4x1xf32>
    %cst_47 = arith.constant 9.99999974E-6 : f32
    %91 = vector.broadcast %cst_47 : f32 to vector<4x1xf32>
    %92 = arith.addf %90, %91 : vector<4x1xf32>
    %93 = math.rsqrt %92 : vector<4x1xf32>
    %94 = vector.broadcast %93 : vector<4x1xf32> to vector<4x64xf32>
    %95 = arith.mulf %85, %94 : vector<4x64xf32>
    %96 = vector.broadcast %77 : vector<1x64xf32> to vector<4x64xf32>
    %97 = arith.mulf %95, %96 : vector<4x64xf32>
    %98 = vector.broadcast %79 : vector<1x64xf32> to vector<4x64xf32>
    %99 = arith.addf %97, %98 : vector<4x64xf32>
    %c0_48 = arith.constant 0 : index
    %c0_49 = arith.constant 0 : index
    %c0_50 = arith.constant 0 : index
    %100 = vector.load %arg11[%c0_48, %c0_49, %c0_50] : memref<2x64x192xf32, #tpu.memory_space<vmem>>, vector<1x64x192xf32>
    %101 = vector.shape_cast %100 : vector<1x64x192xf32> to vector<64x192xf32>
    %cst_51 = arith.constant dense<0.000000e+00> : vector<4x192xf32>
    %102 = tpu.matmul %99, %101, %cst_51 {dimension_numbers = #tpu.dot_dimension_numbers<[1], [0], [0], [1], [0, 0, 1, 1], [], []>} : vector<4x64xf32>, vector<64x192xf32>, vector<4x192xf32> -> vector<4x192xf32>
    %c0_52 = arith.constant 0 : index
    %c0_53 = arith.constant 0 : index
    %c0_54 = arith.constant 0 : index
    %103 = vector.load %arg12[%c0_52, %c0_53, %c0_54] : memref<2x1x192xf32, #tpu.memory_space<vmem>>, vector<1x1x192xf32>
    %104 = vector.shape_cast %103 : vector<1x1x192xf32> to vector<1x192xf32>
    %105 = vector.broadcast %104 : vector<1x192xf32> to vector<4x192xf32>
    %106 = arith.addf %102, %105 : vector<4x192xf32>
    %cst_55 = arith.constant 0.000000e+00 : f32
    %107 = vector.broadcast %cst_55 : f32 to vector<4x64xf32>
    %108 = vector.extract_strided_slice %106 {offsets = [0, 0], sizes = [4, 16], strides = [1, 1]} : vector<4x192xf32> to vector<4x16xf32>
    %cst_56 = arith.constant 2.500000e-01 : f32
    %109 = vector.broadcast %cst_56 : f32 to vector<4x16xf32>
    %110 = arith.mulf %108, %109 : vector<4x16xf32>
    %111 = vector.extract_strided_slice %106 {offsets = [0, 64], sizes = [4, 16], strides = [1, 1]} : vector<4x192xf32> to vector<4x16xf32>
    %112 = vector.extract_strided_slice %106 {offsets = [0, 128], sizes = [4, 16], strides = [1, 1]} : vector<4x192xf32> to vector<4x16xf32>
    %cst_57 = arith.constant dense<0.000000e+00> : vector<4x4xf32>
    %113 = tpu.matmul %110, %111, %cst_57 {dimension_numbers = #tpu.dot_dimension_numbers<[1], [1], [0], [0], [0, 0, 1, 0], [], []>} : vector<4x16xf32>, vector<4x16xf32>, vector<4x4xf32> -> vector<4x4xf32>
    %cst_58 = arith.constant dense<0xFF800000> : vector<4xf32>
    %114 = vector.multi_reduction <maximumf>, %113, %cst_58 [1] : vector<4x4xf32> to vector<4xf32>
    %115 = vector.shape_cast %114 : vector<4xf32> to vector<4x1xf32>
    %116 = vector.broadcast %115 : vector<4x1xf32> to vector<4x4xf32>
    %117 = arith.subf %113, %116 : vector<4x4xf32>
    %118 = math.exp %117 : vector<4x4xf32>
    %cst_59 = arith.constant dense<0.000000e+00> : vector<4xf32>
    %119 = vector.multi_reduction <add>, %118, %cst_59 [1] : vector<4x4xf32> to vector<4xf32>
    %120 = vector.shape_cast %119 : vector<4xf32> to vector<4x1xf32>
    %121 = tpu.reciprocal %120 {approx = true} : vector<4x1xf32> -> vector<4x1xf32>
    %122 = vector.broadcast %121 : vector<4x1xf32> to vector<4x4xf32>
    %123 = arith.mulf %118, %122 : vector<4x4xf32>
    %cst_60 = arith.constant dense<0.000000e+00> : vector<4x16xf32>
    %124 = tpu.matmul %123, %112, %cst_60 {dimension_numbers = #tpu.dot_dimension_numbers<[1], [0], [0], [1], [0, 0, 1, 1], [], []>} : vector<4x4xf32>, vector<4x16xf32>, vector<4x16xf32> -> vector<4x16xf32>
    %c0_61 = arith.constant 0 : index
    %c0_62 = arith.constant 0 : index
    %c0_63 = arith.constant 0 : index
    %125 = vector.load %arg13[%c0_61, %c0_62, %c0_63] : memref<2x64x64xf32, #tpu.memory_space<vmem>>, vector<1x16x64xf32>
    %126 = vector.shape_cast %125 : vector<1x16x64xf32> to vector<16x64xf32>
    %cst_64 = arith.constant dense<0.000000e+00> : vector<4x64xf32>
    %127 = tpu.matmul %124, %126, %cst_64 {dimension_numbers = #tpu.dot_dimension_numbers<[1], [0], [0], [1], [0, 0, 1, 1], [], []>} : vector<4x16xf32>, vector<16x64xf32>, vector<4x64xf32> -> vector<4x64xf32>
    %128 = arith.addf %107, %127 : vector<4x64xf32>
    %129 = vector.extract_strided_slice %106 {offsets = [0, 16], sizes = [4, 16], strides = [1, 1]} : vector<4x192xf32> to vector<4x16xf32>
    %cst_65 = arith.constant 2.500000e-01 : f32
    %130 = vector.broadcast %cst_65 : f32 to vector<4x16xf32>
    %131 = arith.mulf %129, %130 : vector<4x16xf32>
    %132 = vector.extract_strided_slice %106 {offsets = [0, 80], sizes = [4, 16], strides = [1, 1]} : vector<4x192xf32> to vector<4x16xf32>
    %133 = vector.extract_strided_slice %106 {offsets = [0, 144], sizes = [4, 16], strides = [1, 1]} : vector<4x192xf32> to vector<4x16xf32>
    %cst_66 = arith.constant dense<0.000000e+00> : vector<4x4xf32>
    %134 = tpu.matmul %131, %132, %cst_66 {dimension_numbers = #tpu.dot_dimension_numbers<[1], [1], [0], [0], [0, 0, 1, 0], [], []>} : vector<4x16xf32>, vector<4x16xf32>, vector<4x4xf32> -> vector<4x4xf32>
    %cst_67 = arith.constant dense<0xFF800000> : vector<4xf32>
    %135 = vector.multi_reduction <maximumf>, %134, %cst_67 [1] : vector<4x4xf32> to vector<4xf32>
    %136 = vector.shape_cast %135 : vector<4xf32> to vector<4x1xf32>
    %137 = vector.broadcast %136 : vector<4x1xf32> to vector<4x4xf32>
    %138 = arith.subf %134, %137 : vector<4x4xf32>
    %139 = math.exp %138 : vector<4x4xf32>
    %cst_68 = arith.constant dense<0.000000e+00> : vector<4xf32>
    %140 = vector.multi_reduction <add>, %139, %cst_68 [1] : vector<4x4xf32> to vector<4xf32>
    %141 = vector.shape_cast %140 : vector<4xf32> to vector<4x1xf32>
    %142 = tpu.reciprocal %141 {approx = true} : vector<4x1xf32> -> vector<4x1xf32>
    %143 = vector.broadcast %142 : vector<4x1xf32> to vector<4x4xf32>
    %144 = arith.mulf %139, %143 : vector<4x4xf32>
    %cst_69 = arith.constant dense<0.000000e+00> : vector<4x16xf32>
    %145 = tpu.matmul %144, %133, %cst_69 {dimension_numbers = #tpu.dot_dimension_numbers<[1], [0], [0], [1], [0, 0, 1, 1], [], []>} : vector<4x4xf32>, vector<4x16xf32>, vector<4x16xf32> -> vector<4x16xf32>
    %c0_70 = arith.constant 0 : index
    %c16 = arith.constant 16 : index
    %c0_71 = arith.constant 0 : index
    %146 = vector.load %arg13[%c0_70, %c16, %c0_71] : memref<2x64x64xf32, #tpu.memory_space<vmem>>, vector<1x16x64xf32>
    %147 = vector.shape_cast %146 : vector<1x16x64xf32> to vector<16x64xf32>
    %cst_72 = arith.constant dense<0.000000e+00> : vector<4x64xf32>
    %148 = tpu.matmul %145, %147, %cst_72 {dimension_numbers = #tpu.dot_dimension_numbers<[1], [0], [0], [1], [0, 0, 1, 1], [], []>} : vector<4x16xf32>, vector<16x64xf32>, vector<4x64xf32> -> vector<4x64xf32>
    %149 = arith.addf %128, %148 : vector<4x64xf32>
    %150 = vector.extract_strided_slice %106 {offsets = [0, 32], sizes = [4, 16], strides = [1, 1]} : vector<4x192xf32> to vector<4x16xf32>
    %cst_73 = arith.constant 2.500000e-01 : f32
    %151 = vector.broadcast %cst_73 : f32 to vector<4x16xf32>
    %152 = arith.mulf %150, %151 : vector<4x16xf32>
    %153 = vector.extract_strided_slice %106 {offsets = [0, 96], sizes = [4, 16], strides = [1, 1]} : vector<4x192xf32> to vector<4x16xf32>
    %154 = vector.extract_strided_slice %106 {offsets = [0, 160], sizes = [4, 16], strides = [1, 1]} : vector<4x192xf32> to vector<4x16xf32>
    %cst_74 = arith.constant dense<0.000000e+00> : vector<4x4xf32>
    %155 = tpu.matmul %152, %153, %cst_74 {dimension_numbers = #tpu.dot_dimension_numbers<[1], [1], [0], [0], [0, 0, 1, 0], [], []>} : vector<4x16xf32>, vector<4x16xf32>, vector<4x4xf32> -> vector<4x4xf32>
    %cst_75 = arith.constant dense<0xFF800000> : vector<4xf32>
    %156 = vector.multi_reduction <maximumf>, %155, %cst_75 [1] : vector<4x4xf32> to vector<4xf32>
    %157 = vector.shape_cast %156 : vector<4xf32> to vector<4x1xf32>
    %158 = vector.broadcast %157 : vector<4x1xf32> to vector<4x4xf32>
    %159 = arith.subf %155, %158 : vector<4x4xf32>
    %160 = math.exp %159 : vector<4x4xf32>
    %cst_76 = arith.constant dense<0.000000e+00> : vector<4xf32>
    %161 = vector.multi_reduction <add>, %160, %cst_76 [1] : vector<4x4xf32> to vector<4xf32>
    %162 = vector.shape_cast %161 : vector<4xf32> to vector<4x1xf32>
    %163 = tpu.reciprocal %162 {approx = true} : vector<4x1xf32> -> vector<4x1xf32>
    %164 = vector.broadcast %163 : vector<4x1xf32> to vector<4x4xf32>
    %165 = arith.mulf %160, %164 : vector<4x4xf32>
    %cst_77 = arith.constant dense<0.000000e+00> : vector<4x16xf32>
    %166 = tpu.matmul %165, %154, %cst_77 {dimension_numbers = #tpu.dot_dimension_numbers<[1], [0], [0], [1], [0, 0, 1, 1], [], []>} : vector<4x4xf32>, vector<4x16xf32>, vector<4x16xf32> -> vector<4x16xf32>
    %c0_78 = arith.constant 0 : index
    %c32 = arith.constant 32 : index
    %c0_79 = arith.constant 0 : index
    %167 = vector.load %arg13[%c0_78, %c32, %c0_79] : memref<2x64x64xf32, #tpu.memory_space<vmem>>, vector<1x16x64xf32>
    %168 = vector.shape_cast %167 : vector<1x16x64xf32> to vector<16x64xf32>
    %cst_80 = arith.constant dense<0.000000e+00> : vector<4x64xf32>
    %169 = tpu.matmul %166, %168, %cst_80 {dimension_numbers = #tpu.dot_dimension_numbers<[1], [0], [0], [1], [0, 0, 1, 1], [], []>} : vector<4x16xf32>, vector<16x64xf32>, vector<4x64xf32> -> vector<4x64xf32>
    %170 = arith.addf %149, %169 : vector<4x64xf32>
    %171 = vector.extract_strided_slice %106 {offsets = [0, 48], sizes = [4, 16], strides = [1, 1]} : vector<4x192xf32> to vector<4x16xf32>
    %cst_81 = arith.constant 2.500000e-01 : f32
    %172 = vector.broadcast %cst_81 : f32 to vector<4x16xf32>
    %173 = arith.mulf %171, %172 : vector<4x16xf32>
    %174 = vector.extract_strided_slice %106 {offsets = [0, 112], sizes = [4, 16], strides = [1, 1]} : vector<4x192xf32> to vector<4x16xf32>
    %175 = vector.extract_strided_slice %106 {offsets = [0, 176], sizes = [4, 16], strides = [1, 1]} : vector<4x192xf32> to vector<4x16xf32>
    %cst_82 = arith.constant dense<0.000000e+00> : vector<4x4xf32>
    %176 = tpu.matmul %173, %174, %cst_82 {dimension_numbers = #tpu.dot_dimension_numbers<[1], [1], [0], [0], [0, 0, 1, 0], [], []>} : vector<4x16xf32>, vector<4x16xf32>, vector<4x4xf32> -> vector<4x4xf32>
    %cst_83 = arith.constant dense<0xFF800000> : vector<4xf32>
    %177 = vector.multi_reduction <maximumf>, %176, %cst_83 [1] : vector<4x4xf32> to vector<4xf32>
    %178 = vector.shape_cast %177 : vector<4xf32> to vector<4x1xf32>
    %179 = vector.broadcast %178 : vector<4x1xf32> to vector<4x4xf32>
    %180 = arith.subf %176, %179 : vector<4x4xf32>
    %181 = math.exp %180 : vector<4x4xf32>
    %cst_84 = arith.constant dense<0.000000e+00> : vector<4xf32>
    %182 = vector.multi_reduction <add>, %181, %cst_84 [1] : vector<4x4xf32> to vector<4xf32>
    %183 = vector.shape_cast %182 : vector<4xf32> to vector<4x1xf32>
    %184 = tpu.reciprocal %183 {approx = true} : vector<4x1xf32> -> vector<4x1xf32>
    %185 = vector.broadcast %184 : vector<4x1xf32> to vector<4x4xf32>
    %186 = arith.mulf %181, %185 : vector<4x4xf32>
    %cst_85 = arith.constant dense<0.000000e+00> : vector<4x16xf32>
    %187 = tpu.matmul %186, %175, %cst_85 {dimension_numbers = #tpu.dot_dimension_numbers<[1], [0], [0], [1], [0, 0, 1, 1], [], []>} : vector<4x4xf32>, vector<4x16xf32>, vector<4x16xf32> -> vector<4x16xf32>
    %c0_86 = arith.constant 0 : index
    %c48 = arith.constant 48 : index
    %c0_87 = arith.constant 0 : index
    %188 = vector.load %arg13[%c0_86, %c48, %c0_87] : memref<2x64x64xf32, #tpu.memory_space<vmem>>, vector<1x16x64xf32>
    %189 = vector.shape_cast %188 : vector<1x16x64xf32> to vector<16x64xf32>
    %cst_88 = arith.constant dense<0.000000e+00> : vector<4x64xf32>
    %190 = tpu.matmul %187, %189, %cst_88 {dimension_numbers = #tpu.dot_dimension_numbers<[1], [0], [0], [1], [0, 0, 1, 1], [], []>} : vector<4x16xf32>, vector<16x64xf32>, vector<4x64xf32> -> vector<4x64xf32>
    %191 = arith.addf %170, %190 : vector<4x64xf32>
    %192 = arith.addf %75, %191 : vector<4x64xf32>
    %c0_89 = arith.constant 0 : index
    %c0_90 = arith.constant 0 : index
    %c0_91 = arith.constant 0 : index
    %193 = vector.load %arg14[%c0_89, %c0_90, %c0_91] : memref<2x1x64xf32, #tpu.memory_space<vmem>>, vector<1x1x64xf32>
    %194 = vector.shape_cast %193 : vector<1x1x64xf32> to vector<1x64xf32>
    %195 = vector.broadcast %194 : vector<1x64xf32> to vector<4x64xf32>
    %196 = arith.addf %192, %195 : vector<4x64xf32>
    %c0_92 = arith.constant 0 : index
    %c0_93 = arith.constant 0 : index
    %c0_94 = arith.constant 0 : index
    %197 = vector.load %arg15[%c0_92, %c0_93, %c0_94] : memref<2x1x64xf32, #tpu.memory_space<vmem>>, vector<1x1x64xf32>
    %198 = vector.shape_cast %197 : vector<1x1x64xf32> to vector<1x64xf32>
    %c0_95 = arith.constant 0 : index
    %c0_96 = arith.constant 0 : index
    %c0_97 = arith.constant 0 : index
    %199 = vector.load %arg16[%c0_95, %c0_96, %c0_97] : memref<2x1x64xf32, #tpu.memory_space<vmem>>, vector<1x1x64xf32>
    %200 = vector.shape_cast %199 : vector<1x1x64xf32> to vector<1x64xf32>
    %cst_98 = arith.constant dense<0.000000e+00> : vector<4xf32>
    %201 = vector.multi_reduction <add>, %196, %cst_98 [1] : vector<4x64xf32> to vector<4xf32>
    %202 = vector.shape_cast %201 : vector<4xf32> to vector<4x1xf32>
    %cst_99 = arith.constant 6.400000e+01 : f32
    %203 = vector.broadcast %cst_99 : f32 to vector<4x1xf32>
    %204 = arith.divf %202, %203 : vector<4x1xf32>
    %205 = vector.broadcast %204 : vector<4x1xf32> to vector<4x64xf32>
    %206 = arith.subf %196, %205 : vector<4x64xf32>
    %207 = arith.mulf %206, %206 : vector<4x64xf32>
    %cst_100 = arith.constant dense<0.000000e+00> : vector<4xf32>
    %208 = vector.multi_reduction <add>, %207, %cst_100 [1] : vector<4x64xf32> to vector<4xf32>
    %209 = vector.shape_cast %208 : vector<4xf32> to vector<4x1xf32>
    %cst_101 = arith.constant 6.400000e+01 : f32
    %210 = vector.broadcast %cst_101 : f32 to vector<4x1xf32>
    %211 = arith.divf %209, %210 : vector<4x1xf32>
    %cst_102 = arith.constant 9.99999974E-6 : f32
    %212 = vector.broadcast %cst_102 : f32 to vector<4x1xf32>
    %213 = arith.addf %211, %212 : vector<4x1xf32>
    %214 = math.rsqrt %213 : vector<4x1xf32>
    %215 = vector.broadcast %214 : vector<4x1xf32> to vector<4x64xf32>
    %216 = arith.mulf %206, %215 : vector<4x64xf32>
    %217 = vector.broadcast %198 : vector<1x64xf32> to vector<4x64xf32>
    %218 = arith.mulf %216, %217 : vector<4x64xf32>
    %219 = vector.broadcast %200 : vector<1x64xf32> to vector<4x64xf32>
    %220 = arith.addf %218, %219 : vector<4x64xf32>
    %c0_103 = arith.constant 0 : index
    %c0_104 = arith.constant 0 : index
    %c0_105 = arith.constant 0 : index
    %221 = vector.load %arg17[%c0_103, %c0_104, %c0_105] : memref<2x64x256xf32, #tpu.memory_space<vmem>>, vector<1x64x256xf32>
    %222 = vector.shape_cast %221 : vector<1x64x256xf32> to vector<64x256xf32>
    %cst_106 = arith.constant dense<0.000000e+00> : vector<4x256xf32>
    %223 = tpu.matmul %220, %222, %cst_106 {dimension_numbers = #tpu.dot_dimension_numbers<[1], [0], [0], [1], [0, 0, 1, 1], [], []>} : vector<4x64xf32>, vector<64x256xf32>, vector<4x256xf32> -> vector<4x256xf32>
    %c0_107 = arith.constant 0 : index
    %c0_108 = arith.constant 0 : index
    %c0_109 = arith.constant 0 : index
    %224 = vector.load %arg18[%c0_107, %c0_108, %c0_109] : memref<2x1x256xf32, #tpu.memory_space<vmem>>, vector<1x1x256xf32>
    %225 = vector.shape_cast %224 : vector<1x1x256xf32> to vector<1x256xf32>
    %226 = vector.broadcast %225 : vector<1x256xf32> to vector<4x256xf32>
    %227 = arith.addf %223, %226 : vector<4x256xf32>
    %cst_110 = arith.constant 0.707106769 : f32
    %228 = vector.broadcast %cst_110 : f32 to vector<4x256xf32>
    %229 = arith.mulf %227, %228 : vector<4x256xf32>
    %230 = math.absf %229 : vector<4x256xf32>
    %cst_111 = arith.constant 0.327591091 : f32
    %231 = vector.broadcast %cst_111 : f32 to vector<4x256xf32>
    %232 = arith.mulf %231, %230 : vector<4x256xf32>
    %cst_112 = arith.constant 1.000000e+00 : f32
    %233 = vector.broadcast %cst_112 : f32 to vector<4x256xf32>
    %234 = arith.addf %233, %232 : vector<4x256xf32>
    %cst_113 = arith.constant 1.000000e+00 : f32
    %235 = vector.broadcast %cst_113 : f32 to vector<4x256xf32>
    %236 = arith.divf %235, %234 : vector<4x256xf32>
    %cst_114 = arith.constant 1.06140542 : f32
    %237 = vector.broadcast %cst_114 : f32 to vector<4x256xf32>
    %238 = arith.mulf %236, %237 : vector<4x256xf32>
    %cst_115 = arith.constant -1.45315206 : f32
    %239 = vector.broadcast %cst_115 : f32 to vector<4x256xf32>
    %240 = arith.addf %239, %238 : vector<4x256xf32>
    %241 = arith.mulf %236, %240 : vector<4x256xf32>
    %cst_116 = arith.constant 1.42141378 : f32
    %242 = vector.broadcast %cst_116 : f32 to vector<4x256xf32>
    %243 = arith.addf %242, %241 : vector<4x256xf32>
    %244 = arith.mulf %236, %243 : vector<4x256xf32>
    %cst_117 = arith.constant -0.284496725 : f32
    %245 = vector.broadcast %cst_117 : f32 to vector<4x256xf32>
    %246 = arith.addf %245, %244 : vector<4x256xf32>
    %247 = arith.mulf %236, %246 : vector<4x256xf32>
    %cst_118 = arith.constant 0.254829586 : f32
    %248 = vector.broadcast %cst_118 : f32 to vector<4x256xf32>
    %249 = arith.addf %248, %247 : vector<4x256xf32>
    %250 = arith.mulf %236, %249 : vector<4x256xf32>
    %cst_119 = arith.constant 0.000000e+00 : f32
    %251 = vector.broadcast %cst_119 : f32 to vector<4x256xf32>
    %252 = arith.subf %251, %230 : vector<4x256xf32>
    %253 = arith.mulf %252, %230 : vector<4x256xf32>
    %254 = math.exp %253 : vector<4x256xf32>
    %255 = arith.mulf %250, %254 : vector<4x256xf32>
    %cst_120 = arith.constant 1.000000e+00 : f32
    %256 = vector.broadcast %cst_120 : f32 to vector<4x256xf32>
    %257 = arith.subf %256, %255 : vector<4x256xf32>
    %cst_121 = arith.constant 5.000000e-01 : f32
    %258 = vector.broadcast %cst_121 : f32 to vector<4x256xf32>
    %259 = arith.mulf %258, %227 : vector<4x256xf32>
    %cst_122 = arith.constant 0.000000e+00 : f32
    %260 = vector.broadcast %cst_122 : f32 to vector<4x256xf32>
    %261 = arith.cmpf oge, %229, %260 : vector<4x256xf32>
    %cst_123 = arith.constant 0.000000e+00 : f32
    %262 = vector.broadcast %cst_123 : f32 to vector<4x256xf32>
    %263 = arith.subf %262, %257 : vector<4x256xf32>
    %264 = arith.select %261, %257, %263 : vector<4x256xi1>, vector<4x256xf32>
    %cst_124 = arith.constant 1.000000e+00 : f32
    %265 = vector.broadcast %cst_124 : f32 to vector<4x256xf32>
    %266 = arith.addf %265, %264 : vector<4x256xf32>
    %267 = arith.mulf %259, %266 : vector<4x256xf32>
    %c0_125 = arith.constant 0 : index
    %c0_126 = arith.constant 0 : index
    %c0_127 = arith.constant 0 : index
    %268 = vector.load %arg19[%c0_125, %c0_126, %c0_127] : memref<2x256x64xf32, #tpu.memory_space<vmem>>, vector<1x256x64xf32>
    %269 = vector.shape_cast %268 : vector<1x256x64xf32> to vector<256x64xf32>
    %cst_128 = arith.constant dense<0.000000e+00> : vector<4x64xf32>
    %270 = tpu.matmul %267, %269, %cst_128 {dimension_numbers = #tpu.dot_dimension_numbers<[1], [0], [0], [1], [0, 0, 1, 1], [], []>} : vector<4x256xf32>, vector<256x64xf32>, vector<4x64xf32> -> vector<4x64xf32>
    %c0_129 = arith.constant 0 : index
    %c0_130 = arith.constant 0 : index
    %c0_131 = arith.constant 0 : index
    %271 = vector.load %arg20[%c0_129, %c0_130, %c0_131] : memref<2x1x64xf32, #tpu.memory_space<vmem>>, vector<1x1x64xf32>
    %272 = vector.shape_cast %271 : vector<1x1x64xf32> to vector<1x64xf32>
    %273 = vector.broadcast %272 : vector<1x64xf32> to vector<4x64xf32>
    %274 = arith.addf %270, %273 : vector<4x64xf32>
    %275 = arith.addf %196, %274 : vector<4x64xf32>
    %c1 = arith.constant 1 : index
    %c0_132 = arith.constant 0 : index
    %c0_133 = arith.constant 0 : index
    %276 = vector.load %arg9[%c1, %c0_132, %c0_133] : memref<2x1x64xf32, #tpu.memory_space<vmem>>, vector<1x1x64xf32>
    %277 = vector.shape_cast %276 : vector<1x1x64xf32> to vector<1x64xf32>
    %c1_134 = arith.constant 1 : index
    %c0_135 = arith.constant 0 : index
    %c0_136 = arith.constant 0 : index
    %278 = vector.load %arg10[%c1_134, %c0_135, %c0_136] : memref<2x1x64xf32, #tpu.memory_space<vmem>>, vector<1x1x64xf32>
    %279 = vector.shape_cast %278 : vector<1x1x64xf32> to vector<1x64xf32>
    %cst_137 = arith.constant dense<0.000000e+00> : vector<4xf32>
    %280 = vector.multi_reduction <add>, %275, %cst_137 [1] : vector<4x64xf32> to vector<4xf32>
    %281 = vector.shape_cast %280 : vector<4xf32> to vector<4x1xf32>
    %cst_138 = arith.constant 6.400000e+01 : f32
    %282 = vector.broadcast %cst_138 : f32 to vector<4x1xf32>
    %283 = arith.divf %281, %282 : vector<4x1xf32>
    %284 = vector.broadcast %283 : vector<4x1xf32> to vector<4x64xf32>
    %285 = arith.subf %275, %284 : vector<4x64xf32>
    %286 = arith.mulf %285, %285 : vector<4x64xf32>
    %cst_139 = arith.constant dense<0.000000e+00> : vector<4xf32>
    %287 = vector.multi_reduction <add>, %286, %cst_139 [1] : vector<4x64xf32> to vector<4xf32>
    %288 = vector.shape_cast %287 : vector<4xf32> to vector<4x1xf32>
    %cst_140 = arith.constant 6.400000e+01 : f32
    %289 = vector.broadcast %cst_140 : f32 to vector<4x1xf32>
    %290 = arith.divf %288, %289 : vector<4x1xf32>
    %cst_141 = arith.constant 9.99999974E-6 : f32
    %291 = vector.broadcast %cst_141 : f32 to vector<4x1xf32>
    %292 = arith.addf %290, %291 : vector<4x1xf32>
    %293 = math.rsqrt %292 : vector<4x1xf32>
    %294 = vector.broadcast %293 : vector<4x1xf32> to vector<4x64xf32>
    %295 = arith.mulf %285, %294 : vector<4x64xf32>
    %296 = vector.broadcast %277 : vector<1x64xf32> to vector<4x64xf32>
    %297 = arith.mulf %295, %296 : vector<4x64xf32>
    %298 = vector.broadcast %279 : vector<1x64xf32> to vector<4x64xf32>
    %299 = arith.addf %297, %298 : vector<4x64xf32>
    %c1_142 = arith.constant 1 : index
    %c0_143 = arith.constant 0 : index
    %c0_144 = arith.constant 0 : index
    %300 = vector.load %arg11[%c1_142, %c0_143, %c0_144] : memref<2x64x192xf32, #tpu.memory_space<vmem>>, vector<1x64x192xf32>
    %301 = vector.shape_cast %300 : vector<1x64x192xf32> to vector<64x192xf32>
    %cst_145 = arith.constant dense<0.000000e+00> : vector<4x192xf32>
    %302 = tpu.matmul %299, %301, %cst_145 {dimension_numbers = #tpu.dot_dimension_numbers<[1], [0], [0], [1], [0, 0, 1, 1], [], []>} : vector<4x64xf32>, vector<64x192xf32>, vector<4x192xf32> -> vector<4x192xf32>
    %c1_146 = arith.constant 1 : index
    %c0_147 = arith.constant 0 : index
    %c0_148 = arith.constant 0 : index
    %303 = vector.load %arg12[%c1_146, %c0_147, %c0_148] : memref<2x1x192xf32, #tpu.memory_space<vmem>>, vector<1x1x192xf32>
    %304 = vector.shape_cast %303 : vector<1x1x192xf32> to vector<1x192xf32>
    %305 = vector.broadcast %304 : vector<1x192xf32> to vector<4x192xf32>
    %306 = arith.addf %302, %305 : vector<4x192xf32>
    %cst_149 = arith.constant 0.000000e+00 : f32
    %307 = vector.broadcast %cst_149 : f32 to vector<4x64xf32>
    %308 = vector.extract_strided_slice %306 {offsets = [0, 0], sizes = [4, 16], strides = [1, 1]} : vector<4x192xf32> to vector<4x16xf32>
    %cst_150 = arith.constant 2.500000e-01 : f32
    %309 = vector.broadcast %cst_150 : f32 to vector<4x16xf32>
    %310 = arith.mulf %308, %309 : vector<4x16xf32>
    %311 = vector.extract_strided_slice %306 {offsets = [0, 64], sizes = [4, 16], strides = [1, 1]} : vector<4x192xf32> to vector<4x16xf32>
    %312 = vector.extract_strided_slice %306 {offsets = [0, 128], sizes = [4, 16], strides = [1, 1]} : vector<4x192xf32> to vector<4x16xf32>
    %cst_151 = arith.constant dense<0.000000e+00> : vector<4x4xf32>
    %313 = tpu.matmul %310, %311, %cst_151 {dimension_numbers = #tpu.dot_dimension_numbers<[1], [1], [0], [0], [0, 0, 1, 0], [], []>} : vector<4x16xf32>, vector<4x16xf32>, vector<4x4xf32> -> vector<4x4xf32>
    %cst_152 = arith.constant dense<0xFF800000> : vector<4xf32>
    %314 = vector.multi_reduction <maximumf>, %313, %cst_152 [1] : vector<4x4xf32> to vector<4xf32>
    %315 = vector.shape_cast %314 : vector<4xf32> to vector<4x1xf32>
    %316 = vector.broadcast %315 : vector<4x1xf32> to vector<4x4xf32>
    %317 = arith.subf %313, %316 : vector<4x4xf32>
    %318 = math.exp %317 : vector<4x4xf32>
    %cst_153 = arith.constant dense<0.000000e+00> : vector<4xf32>
    %319 = vector.multi_reduction <add>, %318, %cst_153 [1] : vector<4x4xf32> to vector<4xf32>
    %320 = vector.shape_cast %319 : vector<4xf32> to vector<4x1xf32>
    %321 = tpu.reciprocal %320 {approx = true} : vector<4x1xf32> -> vector<4x1xf32>
    %322 = vector.broadcast %321 : vector<4x1xf32> to vector<4x4xf32>
    %323 = arith.mulf %318, %322 : vector<4x4xf32>
    %cst_154 = arith.constant dense<0.000000e+00> : vector<4x16xf32>
    %324 = tpu.matmul %323, %312, %cst_154 {dimension_numbers = #tpu.dot_dimension_numbers<[1], [0], [0], [1], [0, 0, 1, 1], [], []>} : vector<4x4xf32>, vector<4x16xf32>, vector<4x16xf32> -> vector<4x16xf32>
    %c1_155 = arith.constant 1 : index
    %c0_156 = arith.constant 0 : index
    %c0_157 = arith.constant 0 : index
    %325 = vector.load %arg13[%c1_155, %c0_156, %c0_157] : memref<2x64x64xf32, #tpu.memory_space<vmem>>, vector<1x16x64xf32>
    %326 = vector.shape_cast %325 : vector<1x16x64xf32> to vector<16x64xf32>
    %cst_158 = arith.constant dense<0.000000e+00> : vector<4x64xf32>
    %327 = tpu.matmul %324, %326, %cst_158 {dimension_numbers = #tpu.dot_dimension_numbers<[1], [0], [0], [1], [0, 0, 1, 1], [], []>} : vector<4x16xf32>, vector<16x64xf32>, vector<4x64xf32> -> vector<4x64xf32>
    %328 = arith.addf %307, %327 : vector<4x64xf32>
    %329 = vector.extract_strided_slice %306 {offsets = [0, 16], sizes = [4, 16], strides = [1, 1]} : vector<4x192xf32> to vector<4x16xf32>
    %cst_159 = arith.constant 2.500000e-01 : f32
    %330 = vector.broadcast %cst_159 : f32 to vector<4x16xf32>
    %331 = arith.mulf %329, %330 : vector<4x16xf32>
    %332 = vector.extract_strided_slice %306 {offsets = [0, 80], sizes = [4, 16], strides = [1, 1]} : vector<4x192xf32> to vector<4x16xf32>
    %333 = vector.extract_strided_slice %306 {offsets = [0, 144], sizes = [4, 16], strides = [1, 1]} : vector<4x192xf32> to vector<4x16xf32>
    %cst_160 = arith.constant dense<0.000000e+00> : vector<4x4xf32>
    %334 = tpu.matmul %331, %332, %cst_160 {dimension_numbers = #tpu.dot_dimension_numbers<[1], [1], [0], [0], [0, 0, 1, 0], [], []>} : vector<4x16xf32>, vector<4x16xf32>, vector<4x4xf32> -> vector<4x4xf32>
    %cst_161 = arith.constant dense<0xFF800000> : vector<4xf32>
    %335 = vector.multi_reduction <maximumf>, %334, %cst_161 [1] : vector<4x4xf32> to vector<4xf32>
    %336 = vector.shape_cast %335 : vector<4xf32> to vector<4x1xf32>
    %337 = vector.broadcast %336 : vector<4x1xf32> to vector<4x4xf32>
    %338 = arith.subf %334, %337 : vector<4x4xf32>
    %339 = math.exp %338 : vector<4x4xf32>
    %cst_162 = arith.constant dense<0.000000e+00> : vector<4xf32>
    %340 = vector.multi_reduction <add>, %339, %cst_162 [1] : vector<4x4xf32> to vector<4xf32>
    %341 = vector.shape_cast %340 : vector<4xf32> to vector<4x1xf32>
    %342 = tpu.reciprocal %341 {approx = true} : vector<4x1xf32> -> vector<4x1xf32>
    %343 = vector.broadcast %342 : vector<4x1xf32> to vector<4x4xf32>
    %344 = arith.mulf %339, %343 : vector<4x4xf32>
    %cst_163 = arith.constant dense<0.000000e+00> : vector<4x16xf32>
    %345 = tpu.matmul %344, %333, %cst_163 {dimension_numbers = #tpu.dot_dimension_numbers<[1], [0], [0], [1], [0, 0, 1, 1], [], []>} : vector<4x4xf32>, vector<4x16xf32>, vector<4x16xf32> -> vector<4x16xf32>
    %c1_164 = arith.constant 1 : index
    %c16_165 = arith.constant 16 : index
    %c0_166 = arith.constant 0 : index
    %346 = vector.load %arg13[%c1_164, %c16_165, %c0_166] : memref<2x64x64xf32, #tpu.memory_space<vmem>>, vector<1x16x64xf32>
    %347 = vector.shape_cast %346 : vector<1x16x64xf32> to vector<16x64xf32>
    %cst_167 = arith.constant dense<0.000000e+00> : vector<4x64xf32>
    %348 = tpu.matmul %345, %347, %cst_167 {dimension_numbers = #tpu.dot_dimension_numbers<[1], [0], [0], [1], [0, 0, 1, 1], [], []>} : vector<4x16xf32>, vector<16x64xf32>, vector<4x64xf32> -> vector<4x64xf32>
    %349 = arith.addf %328, %348 : vector<4x64xf32>
    %350 = vector.extract_strided_slice %306 {offsets = [0, 32], sizes = [4, 16], strides = [1, 1]} : vector<4x192xf32> to vector<4x16xf32>
    %cst_168 = arith.constant 2.500000e-01 : f32
    %351 = vector.broadcast %cst_168 : f32 to vector<4x16xf32>
    %352 = arith.mulf %350, %351 : vector<4x16xf32>
    %353 = vector.extract_strided_slice %306 {offsets = [0, 96], sizes = [4, 16], strides = [1, 1]} : vector<4x192xf32> to vector<4x16xf32>
    %354 = vector.extract_strided_slice %306 {offsets = [0, 160], sizes = [4, 16], strides = [1, 1]} : vector<4x192xf32> to vector<4x16xf32>
    %cst_169 = arith.constant dense<0.000000e+00> : vector<4x4xf32>
    %355 = tpu.matmul %352, %353, %cst_169 {dimension_numbers = #tpu.dot_dimension_numbers<[1], [1], [0], [0], [0, 0, 1, 0], [], []>} : vector<4x16xf32>, vector<4x16xf32>, vector<4x4xf32> -> vector<4x4xf32>
    %cst_170 = arith.constant dense<0xFF800000> : vector<4xf32>
    %356 = vector.multi_reduction <maximumf>, %355, %cst_170 [1] : vector<4x4xf32> to vector<4xf32>
    %357 = vector.shape_cast %356 : vector<4xf32> to vector<4x1xf32>
    %358 = vector.broadcast %357 : vector<4x1xf32> to vector<4x4xf32>
    %359 = arith.subf %355, %358 : vector<4x4xf32>
    %360 = math.exp %359 : vector<4x4xf32>
    %cst_171 = arith.constant dense<0.000000e+00> : vector<4xf32>
    %361 = vector.multi_reduction <add>, %360, %cst_171 [1] : vector<4x4xf32> to vector<4xf32>
    %362 = vector.shape_cast %361 : vector<4xf32> to vector<4x1xf32>
    %363 = tpu.reciprocal %362 {approx = true} : vector<4x1xf32> -> vector<4x1xf32>
    %364 = vector.broadcast %363 : vector<4x1xf32> to vector<4x4xf32>
    %365 = arith.mulf %360, %364 : vector<4x4xf32>
    %cst_172 = arith.constant dense<0.000000e+00> : vector<4x16xf32>
    %366 = tpu.matmul %365, %354, %cst_172 {dimension_numbers = #tpu.dot_dimension_numbers<[1], [0], [0], [1], [0, 0, 1, 1], [], []>} : vector<4x4xf32>, vector<4x16xf32>, vector<4x16xf32> -> vector<4x16xf32>
    %c1_173 = arith.constant 1 : index
    %c32_174 = arith.constant 32 : index
    %c0_175 = arith.constant 0 : index
    %367 = vector.load %arg13[%c1_173, %c32_174, %c0_175] : memref<2x64x64xf32, #tpu.memory_space<vmem>>, vector<1x16x64xf32>
    %368 = vector.shape_cast %367 : vector<1x16x64xf32> to vector<16x64xf32>
    %cst_176 = arith.constant dense<0.000000e+00> : vector<4x64xf32>
    %369 = tpu.matmul %366, %368, %cst_176 {dimension_numbers = #tpu.dot_dimension_numbers<[1], [0], [0], [1], [0, 0, 1, 1], [], []>} : vector<4x16xf32>, vector<16x64xf32>, vector<4x64xf32> -> vector<4x64xf32>
    %370 = arith.addf %349, %369 : vector<4x64xf32>
    %371 = vector.extract_strided_slice %306 {offsets = [0, 48], sizes = [4, 16], strides = [1, 1]} : vector<4x192xf32> to vector<4x16xf32>
    %cst_177 = arith.constant 2.500000e-01 : f32
    %372 = vector.broadcast %cst_177 : f32 to vector<4x16xf32>
    %373 = arith.mulf %371, %372 : vector<4x16xf32>
    %374 = vector.extract_strided_slice %306 {offsets = [0, 112], sizes = [4, 16], strides = [1, 1]} : vector<4x192xf32> to vector<4x16xf32>
    %375 = vector.extract_strided_slice %306 {offsets = [0, 176], sizes = [4, 16], strides = [1, 1]} : vector<4x192xf32> to vector<4x16xf32>
    %cst_178 = arith.constant dense<0.000000e+00> : vector<4x4xf32>
    %376 = tpu.matmul %373, %374, %cst_178 {dimension_numbers = #tpu.dot_dimension_numbers<[1], [1], [0], [0], [0, 0, 1, 0], [], []>} : vector<4x16xf32>, vector<4x16xf32>, vector<4x4xf32> -> vector<4x4xf32>
    %cst_179 = arith.constant dense<0xFF800000> : vector<4xf32>
    %377 = vector.multi_reduction <maximumf>, %376, %cst_179 [1] : vector<4x4xf32> to vector<4xf32>
    %378 = vector.shape_cast %377 : vector<4xf32> to vector<4x1xf32>
    %379 = vector.broadcast %378 : vector<4x1xf32> to vector<4x4xf32>
    %380 = arith.subf %376, %379 : vector<4x4xf32>
    %381 = math.exp %380 : vector<4x4xf32>
    %cst_180 = arith.constant dense<0.000000e+00> : vector<4xf32>
    %382 = vector.multi_reduction <add>, %381, %cst_180 [1] : vector<4x4xf32> to vector<4xf32>
    %383 = vector.shape_cast %382 : vector<4xf32> to vector<4x1xf32>
    %384 = tpu.reciprocal %383 {approx = true} : vector<4x1xf32> -> vector<4x1xf32>
    %385 = vector.broadcast %384 : vector<4x1xf32> to vector<4x4xf32>
    %386 = arith.mulf %381, %385 : vector<4x4xf32>
    %cst_181 = arith.constant dense<0.000000e+00> : vector<4x16xf32>
    %387 = tpu.matmul %386, %375, %cst_181 {dimension_numbers = #tpu.dot_dimension_numbers<[1], [0], [0], [1], [0, 0, 1, 1], [], []>} : vector<4x4xf32>, vector<4x16xf32>, vector<4x16xf32> -> vector<4x16xf32>
    %c1_182 = arith.constant 1 : index
    %c48_183 = arith.constant 48 : index
    %c0_184 = arith.constant 0 : index
    %388 = vector.load %arg13[%c1_182, %c48_183, %c0_184] : memref<2x64x64xf32, #tpu.memory_space<vmem>>, vector<1x16x64xf32>
    %389 = vector.shape_cast %388 : vector<1x16x64xf32> to vector<16x64xf32>
    %cst_185 = arith.constant dense<0.000000e+00> : vector<4x64xf32>
    %390 = tpu.matmul %387, %389, %cst_185 {dimension_numbers = #tpu.dot_dimension_numbers<[1], [0], [0], [1], [0, 0, 1, 1], [], []>} : vector<4x16xf32>, vector<16x64xf32>, vector<4x64xf32> -> vector<4x64xf32>
    %391 = arith.addf %370, %390 : vector<4x64xf32>
    %392 = arith.addf %275, %391 : vector<4x64xf32>
    %c1_186 = arith.constant 1 : index
    %c0_187 = arith.constant 0 : index
    %c0_188 = arith.constant 0 : index
    %393 = vector.load %arg14[%c1_186, %c0_187, %c0_188] : memref<2x1x64xf32, #tpu.memory_space<vmem>>, vector<1x1x64xf32>
    %394 = vector.shape_cast %393 : vector<1x1x64xf32> to vector<1x64xf32>
    %395 = vector.broadcast %394 : vector<1x64xf32> to vector<4x64xf32>
    %396 = arith.addf %392, %395 : vector<4x64xf32>
    %c1_189 = arith.constant 1 : index
    %c0_190 = arith.constant 0 : index
    %c0_191 = arith.constant 0 : index
    %397 = vector.load %arg15[%c1_189, %c0_190, %c0_191] : memref<2x1x64xf32, #tpu.memory_space<vmem>>, vector<1x1x64xf32>
    %398 = vector.shape_cast %397 : vector<1x1x64xf32> to vector<1x64xf32>
    %c1_192 = arith.constant 1 : index
    %c0_193 = arith.constant 0 : index
    %c0_194 = arith.constant 0 : index
    %399 = vector.load %arg16[%c1_192, %c0_193, %c0_194] : memref<2x1x64xf32, #tpu.memory_space<vmem>>, vector<1x1x64xf32>
    %400 = vector.shape_cast %399 : vector<1x1x64xf32> to vector<1x64xf32>
    %cst_195 = arith.constant dense<0.000000e+00> : vector<4xf32>
    %401 = vector.multi_reduction <add>, %396, %cst_195 [1] : vector<4x64xf32> to vector<4xf32>
    %402 = vector.shape_cast %401 : vector<4xf32> to vector<4x1xf32>
    %cst_196 = arith.constant 6.400000e+01 : f32
    %403 = vector.broadcast %cst_196 : f32 to vector<4x1xf32>
    %404 = arith.divf %402, %403 : vector<4x1xf32>
    %405 = vector.broadcast %404 : vector<4x1xf32> to vector<4x64xf32>
    %406 = arith.subf %396, %405 : vector<4x64xf32>
    %407 = arith.mulf %406, %406 : vector<4x64xf32>
    %cst_197 = arith.constant dense<0.000000e+00> : vector<4xf32>
    %408 = vector.multi_reduction <add>, %407, %cst_197 [1] : vector<4x64xf32> to vector<4xf32>
    %409 = vector.shape_cast %408 : vector<4xf32> to vector<4x1xf32>
    %cst_198 = arith.constant 6.400000e+01 : f32
    %410 = vector.broadcast %cst_198 : f32 to vector<4x1xf32>
    %411 = arith.divf %409, %410 : vector<4x1xf32>
    %cst_199 = arith.constant 9.99999974E-6 : f32
    %412 = vector.broadcast %cst_199 : f32 to vector<4x1xf32>
    %413 = arith.addf %411, %412 : vector<4x1xf32>
    %414 = math.rsqrt %413 : vector<4x1xf32>
    %415 = vector.broadcast %414 : vector<4x1xf32> to vector<4x64xf32>
    %416 = arith.mulf %406, %415 : vector<4x64xf32>
    %417 = vector.broadcast %398 : vector<1x64xf32> to vector<4x64xf32>
    %418 = arith.mulf %416, %417 : vector<4x64xf32>
    %419 = vector.broadcast %400 : vector<1x64xf32> to vector<4x64xf32>
    %420 = arith.addf %418, %419 : vector<4x64xf32>
    %c1_200 = arith.constant 1 : index
    %c0_201 = arith.constant 0 : index
    %c0_202 = arith.constant 0 : index
    %421 = vector.load %arg17[%c1_200, %c0_201, %c0_202] : memref<2x64x256xf32, #tpu.memory_space<vmem>>, vector<1x64x256xf32>
    %422 = vector.shape_cast %421 : vector<1x64x256xf32> to vector<64x256xf32>
    %cst_203 = arith.constant dense<0.000000e+00> : vector<4x256xf32>
    %423 = tpu.matmul %420, %422, %cst_203 {dimension_numbers = #tpu.dot_dimension_numbers<[1], [0], [0], [1], [0, 0, 1, 1], [], []>} : vector<4x64xf32>, vector<64x256xf32>, vector<4x256xf32> -> vector<4x256xf32>
    %c1_204 = arith.constant 1 : index
    %c0_205 = arith.constant 0 : index
    %c0_206 = arith.constant 0 : index
    %424 = vector.load %arg18[%c1_204, %c0_205, %c0_206] : memref<2x1x256xf32, #tpu.memory_space<vmem>>, vector<1x1x256xf32>
    %425 = vector.shape_cast %424 : vector<1x1x256xf32> to vector<1x256xf32>
    %426 = vector.broadcast %425 : vector<1x256xf32> to vector<4x256xf32>
    %427 = arith.addf %423, %426 : vector<4x256xf32>
    %cst_207 = arith.constant 0.707106769 : f32
    %428 = vector.broadcast %cst_207 : f32 to vector<4x256xf32>
    %429 = arith.mulf %427, %428 : vector<4x256xf32>
    %430 = math.absf %429 : vector<4x256xf32>
    %cst_208 = arith.constant 0.327591091 : f32
    %431 = vector.broadcast %cst_208 : f32 to vector<4x256xf32>
    %432 = arith.mulf %431, %430 : vector<4x256xf32>
    %cst_209 = arith.constant 1.000000e+00 : f32
    %433 = vector.broadcast %cst_209 : f32 to vector<4x256xf32>
    %434 = arith.addf %433, %432 : vector<4x256xf32>
    %cst_210 = arith.constant 1.000000e+00 : f32
    %435 = vector.broadcast %cst_210 : f32 to vector<4x256xf32>
    %436 = arith.divf %435, %434 : vector<4x256xf32>
    %cst_211 = arith.constant 1.06140542 : f32
    %437 = vector.broadcast %cst_211 : f32 to vector<4x256xf32>
    %438 = arith.mulf %436, %437 : vector<4x256xf32>
    %cst_212 = arith.constant -1.45315206 : f32
    %439 = vector.broadcast %cst_212 : f32 to vector<4x256xf32>
    %440 = arith.addf %439, %438 : vector<4x256xf32>
    %441 = arith.mulf %436, %440 : vector<4x256xf32>
    %cst_213 = arith.constant 1.42141378 : f32
    %442 = vector.broadcast %cst_213 : f32 to vector<4x256xf32>
    %443 = arith.addf %442, %441 : vector<4x256xf32>
    %444 = arith.mulf %436, %443 : vector<4x256xf32>
    %cst_214 = arith.constant -0.284496725 : f32
    %445 = vector.broadcast %cst_214 : f32 to vector<4x256xf32>
    %446 = arith.addf %445, %444 : vector<4x256xf32>
    %447 = arith.mulf %436, %446 : vector<4x256xf32>
    %cst_215 = arith.constant 0.254829586 : f32
    %448 = vector.broadcast %cst_215 : f32 to vector<4x256xf32>
    %449 = arith.addf %448, %447 : vector<4x256xf32>
    %450 = arith.mulf %436, %449 : vector<4x256xf32>
    %cst_216 = arith.constant 0.000000e+00 : f32
    %451 = vector.broadcast %cst_216 : f32 to vector<4x256xf32>
    %452 = arith.subf %451, %430 : vector<4x256xf32>
    %453 = arith.mulf %452, %430 : vector<4x256xf32>
    %454 = math.exp %453 : vector<4x256xf32>
    %455 = arith.mulf %450, %454 : vector<4x256xf32>
    %cst_217 = arith.constant 1.000000e+00 : f32
    %456 = vector.broadcast %cst_217 : f32 to vector<4x256xf32>
    %457 = arith.subf %456, %455 : vector<4x256xf32>
    %cst_218 = arith.constant 5.000000e-01 : f32
    %458 = vector.broadcast %cst_218 : f32 to vector<4x256xf32>
    %459 = arith.mulf %458, %427 : vector<4x256xf32>
    %cst_219 = arith.constant 0.000000e+00 : f32
    %460 = vector.broadcast %cst_219 : f32 to vector<4x256xf32>
    %461 = arith.cmpf oge, %429, %460 : vector<4x256xf32>
    %cst_220 = arith.constant 0.000000e+00 : f32
    %462 = vector.broadcast %cst_220 : f32 to vector<4x256xf32>
    %463 = arith.subf %462, %457 : vector<4x256xf32>
    %464 = arith.select %461, %457, %463 : vector<4x256xi1>, vector<4x256xf32>
    %cst_221 = arith.constant 1.000000e+00 : f32
    %465 = vector.broadcast %cst_221 : f32 to vector<4x256xf32>
    %466 = arith.addf %465, %464 : vector<4x256xf32>
    %467 = arith.mulf %459, %466 : vector<4x256xf32>
    %c1_222 = arith.constant 1 : index
    %c0_223 = arith.constant 0 : index
    %c0_224 = arith.constant 0 : index
    %468 = vector.load %arg19[%c1_222, %c0_223, %c0_224] : memref<2x256x64xf32, #tpu.memory_space<vmem>>, vector<1x256x64xf32>
    %469 = vector.shape_cast %468 : vector<1x256x64xf32> to vector<256x64xf32>
    %cst_225 = arith.constant dense<0.000000e+00> : vector<4x64xf32>
    %470 = tpu.matmul %467, %469, %cst_225 {dimension_numbers = #tpu.dot_dimension_numbers<[1], [0], [0], [1], [0, 0, 1, 1], [], []>} : vector<4x256xf32>, vector<256x64xf32>, vector<4x64xf32> -> vector<4x64xf32>
    %c1_226 = arith.constant 1 : index
    %c0_227 = arith.constant 0 : index
    %c0_228 = arith.constant 0 : index
    %471 = vector.load %arg20[%c1_226, %c0_227, %c0_228] : memref<2x1x64xf32, #tpu.memory_space<vmem>>, vector<1x1x64xf32>
    %472 = vector.shape_cast %471 : vector<1x1x64xf32> to vector<1x64xf32>
    %473 = vector.broadcast %472 : vector<1x64xf32> to vector<4x64xf32>
    %474 = arith.addf %470, %473 : vector<4x64xf32>
    %475 = arith.addf %396, %474 : vector<4x64xf32>
    %c0_229 = arith.constant 0 : index
    %c0_230 = arith.constant 0 : index
    %476 = vector.load %arg21[%c0_229, %c0_230] : memref<1x64xf32, #tpu.memory_space<vmem>>, vector<1x64xf32>
    %c0_231 = arith.constant 0 : index
    %c0_232 = arith.constant 0 : index
    %477 = vector.load %arg22[%c0_231, %c0_232] : memref<1x64xf32, #tpu.memory_space<vmem>>, vector<1x64xf32>
    %cst_233 = arith.constant dense<0.000000e+00> : vector<4xf32>
    %478 = vector.multi_reduction <add>, %475, %cst_233 [1] : vector<4x64xf32> to vector<4xf32>
    %479 = vector.shape_cast %478 : vector<4xf32> to vector<4x1xf32>
    %cst_234 = arith.constant 6.400000e+01 : f32
    %480 = vector.broadcast %cst_234 : f32 to vector<4x1xf32>
    %481 = arith.divf %479, %480 : vector<4x1xf32>
    %482 = vector.broadcast %481 : vector<4x1xf32> to vector<4x64xf32>
    %483 = arith.subf %475, %482 : vector<4x64xf32>
    %484 = arith.mulf %483, %483 : vector<4x64xf32>
    %cst_235 = arith.constant dense<0.000000e+00> : vector<4xf32>
    %485 = vector.multi_reduction <add>, %484, %cst_235 [1] : vector<4x64xf32> to vector<4xf32>
    %486 = vector.shape_cast %485 : vector<4xf32> to vector<4x1xf32>
    %cst_236 = arith.constant 6.400000e+01 : f32
    %487 = vector.broadcast %cst_236 : f32 to vector<4x1xf32>
    %488 = arith.divf %486, %487 : vector<4x1xf32>
    %cst_237 = arith.constant 9.99999974E-6 : f32
    %489 = vector.broadcast %cst_237 : f32 to vector<4x1xf32>
    %490 = arith.addf %488, %489 : vector<4x1xf32>
    %491 = math.rsqrt %490 : vector<4x1xf32>
    %492 = vector.broadcast %491 : vector<4x1xf32> to vector<4x64xf32>
    %493 = arith.mulf %483, %492 : vector<4x64xf32>
    %494 = vector.broadcast %476 : vector<1x64xf32> to vector<4x64xf32>
    %495 = arith.mulf %493, %494 : vector<4x64xf32>
    %496 = vector.broadcast %477 : vector<1x64xf32> to vector<4x64xf32>
    %497 = arith.addf %495, %496 : vector<4x64xf32>
    %498 = vector.shape_cast %497 : vector<4x64xf32> to vector<2x2x64xf32>
    %c0_238 = arith.constant 0 : index
    %c0_239 = arith.constant 0 : index
    %c0_240 = arith.constant 0 : index
    %c0_241 = arith.constant 0 : index
    %499 = vector.load %arg25[%c0_238, %c0_239, %c0_240, %c0_241] : memref<1x2x2x64xf32, #tpu.memory_space<vmem>>, vector<1x2x2x64xf32>
    %500 = vector.shape_cast %499 : vector<1x2x2x64xf32> to vector<2x2x64xf32>
    %501 = vector.shape_cast %498 : vector<2x2x64xf32> to vector<1x2x2x64xf32>
    tpu.vector_store %arg25[%c0_238, %c0_239, %c0_240, %c0_241], %501 {strides = array<i32>} : memref<1x2x2x64xf32, #tpu.memory_space<vmem>>, vector<1x2x2x64xf32>,
    %c0_242 = arith.constant 0 : index
    %c0_243 = arith.constant 0 : index
    %502 = vector.load %arg23[%c0_242, %c0_243] : memref<1x64xf32, #tpu.memory_space<vmem>>, vector<1x64xf32>
    %c0_244 = arith.constant 0 : index
    %c0_245 = arith.constant 0 : index
    %503 = vector.load %arg24[%c0_244, %c0_245] : memref<1x64xf32, #tpu.memory_space<vmem>>, vector<1x64xf32>
    %cst_246 = arith.constant dense<0.000000e+00> : vector<4xf32>
    %504 = vector.multi_reduction <add>, %475, %cst_246 [1] : vector<4x64xf32> to vector<4xf32>
    %505 = vector.shape_cast %504 : vector<4xf32> to vector<4x1xf32>
    %cst_247 = arith.constant 6.400000e+01 : f32
    %506 = vector.broadcast %cst_247 : f32 to vector<4x1xf32>
    %507 = arith.divf %505, %506 : vector<4x1xf32>
    %508 = vector.broadcast %507 : vector<4x1xf32> to vector<4x64xf32>
    %509 = arith.subf %475, %508 : vector<4x64xf32>
    %510 = arith.mulf %509, %509 : vector<4x64xf32>
    %cst_248 = arith.constant dense<0.000000e+00> : vector<4xf32>
    %511 = vector.multi_reduction <add>, %510, %cst_248 [1] : vector<4x64xf32> to vector<4xf32>
    %512 = vector.shape_cast %511 : vector<4xf32> to vector<4x1xf32>
    %cst_249 = arith.constant 6.400000e+01 : f32
    %513 = vector.broadcast %cst_249 : f32 to vector<4x1xf32>
    %514 = arith.divf %512, %513 : vector<4x1xf32>
    %cst_250 = arith.constant 9.99999974E-6 : f32
    %515 = vector.broadcast %cst_250 : f32 to vector<4x1xf32>
    %516 = arith.addf %514, %515 : vector<4x1xf32>
    %517 = math.rsqrt %516 : vector<4x1xf32>
    %518 = vector.broadcast %517 : vector<4x1xf32> to vector<4x64xf32>
    %519 = arith.mulf %509, %518 : vector<4x64xf32>
    %520 = vector.broadcast %502 : vector<1x64xf32> to vector<4x64xf32>
    %521 = arith.mulf %519, %520 : vector<4x64xf32>
    %522 = vector.broadcast %503 : vector<1x64xf32> to vector<4x64xf32>
    %523 = arith.addf %521, %522 : vector<4x64xf32>
    %524 = vector.shape_cast %523 : vector<4x64xf32> to vector<1x2x1x2x64xf32>
    %525 = vector.extract_strided_slice %524 {offsets = [0, 0, 0, 0, 0], sizes = [1, 1, 1, 2, 64], strides = [1, 1, 1, 1, 1]} : vector<1x2x1x2x64xf32> to vector<1x1x1x2x64xf32>
    %526 = vector.shape_cast %525 : vector<1x1x1x2x64xf32> to vector<1x1x2x64xf32>
    %527 = vector.extract_strided_slice %524 {offsets = [0, 1, 0, 0, 0], sizes = [1, 1, 1, 2, 64], strides = [1, 1, 1, 1, 1]} : vector<1x2x1x2x64xf32> to vector<1x1x1x2x64xf32>
    %528 = vector.shape_cast %527 : vector<1x1x1x2x64xf32> to vector<1x1x2x64xf32>
    %529 = arith.maximumf %526, %528 : vector<1x1x2x64xf32>
    %530 = vector.extract_strided_slice %529 {offsets = [0, 0, 0, 0], sizes = [1, 1, 1, 64], strides = [1, 1, 1, 1]} : vector<1x1x2x64xf32> to vector<1x1x1x64xf32>
    %531 = vector.shape_cast %530 : vector<1x1x1x64xf32> to vector<1x1x64xf32>
    %532 = vector.extract_strided_slice %529 {offsets = [0, 0, 1, 0], sizes = [1, 1, 1, 64], strides = [1, 1, 1, 1]} : vector<1x1x2x64xf32> to vector<1x1x1x64xf32>
    %533 = vector.shape_cast %532 : vector<1x1x1x64xf32> to vector<1x1x64xf32>
    %534 = arith.maximumf %531, %533 : vector<1x1x64xf32>
    %c0_251 = arith.constant 0 : index
    %c0_252 = arith.constant 0 : index
    %c0_253 = arith.constant 0 : index
    %c0_254 = arith.constant 0 : index
    %535 = vector.load %arg26[%c0_251, %c0_252, %c0_253, %c0_254] : memref<1x1x1x64xf32, #tpu.memory_space<vmem>>, vector<1x1x1x64xf32>
    %536 = vector.shape_cast %535 : vector<1x1x1x64xf32> to vector<1x1x64xf32>
    %537 = vector.shape_cast %534 : vector<1x1x64xf32> to vector<1x1x1x64xf32>
    tpu.vector_store %arg26[%c0_251, %c0_252, %c0_253, %c0_254], %537 {strides = array<i32>} : memref<1x1x1x64xf32, #tpu.memory_space<vmem>>, vector<1x1x1x64xf32>,
    return
  }
  func.func @transform_0(%arg0: i32) -> (i32, i32, i32) {
    %c0_i32 = arith.constant 0 : i32
    %c0_i32_0 = arith.constant 0 : i32
    %c0_i32_1 = arith.constant 0 : i32
    return %arg0, %c0_i32, %c0_i32_0 : i32, i32, i32
  }
  func.func @transform_1(%arg0: i32) -> (i32, i32) {
    %c0_i32 = arith.constant 0 : i32
    %c0_i32_0 = arith.constant 0 : i32
    %c0_i32_1 = arith.constant 0 : i32
    return %c0_i32, %c0_i32_0 : i32, i32
  }
  func.func @transform_2(%arg0: i32) -> (i32, i32) {
    %c0_i32 = arith.constant 0 : i32
    %c0_i32_0 = arith.constant 0 : i32
    %c0_i32_1 = arith.constant 0 : i32
    return %c0_i32, %c0_i32_0 : i32, i32
  }
  func.func @transform_3(%arg0: i32) -> (i32, i32) {
    %c0_i32 = arith.constant 0 : i32
    %c0_i32_0 = arith.constant 0 : i32
    %c0_i32_1 = arith.constant 0 : i32
    return %c0_i32, %c0_i32_0 : i32, i32
  }
  func.func @transform_4(%arg0: i32) -> (i32, i32) {
    %c0_i32 = arith.constant 0 : i32
    %c0_i32_0 = arith.constant 0 : i32
    %c0_i32_1 = arith.constant 0 : i32
    return %c0_i32, %c0_i32_0 : i32, i32
  }
  func.func @transform_5(%arg0: i32) -> (i32, i32) {
    %c0_i32 = arith.constant 0 : i32
    %c0_i32_0 = arith.constant 0 : i32
    %c0_i32_1 = arith.constant 0 : i32
    return %c0_i32, %c0_i32_0 : i32, i32
  }
  func.func @transform_6(%arg0: i32) -> (i32, i32) {
    %c0_i32 = arith.constant 0 : i32
    %c0_i32_0 = arith.constant 0 : i32
    %c0_i32_1 = arith.constant 0 : i32
    return %c0_i32, %c0_i32_0 : i32, i32
  }
  func.func @transform_7(%arg0: i32) -> (i32, i32) {
    %c0_i32 = arith.constant 0 : i32
    %c0_i32_0 = arith.constant 0 : i32
    %c0_i32_1 = arith.constant 0 : i32
    return %c0_i32, %c0_i32_0 : i32, i32
  }
  func.func @transform_8(%arg0: i32) -> (i32, i32, i32) {
    %c0_i32 = arith.constant 0 : i32
    %c0_i32_0 = arith.constant 0 : i32
    %c0_i32_1 = arith.constant 0 : i32
    %c0_i32_2 = arith.constant 0 : i32
    return %c0_i32, %c0_i32_0, %c0_i32_1 : i32, i32, i32
  }
  func.func @transform_9(%arg0: i32) -> (i32, i32, i32) {
    %c0_i32 = arith.constant 0 : i32
    %c0_i32_0 = arith.constant 0 : i32
    %c0_i32_1 = arith.constant 0 : i32
    %c0_i32_2 = arith.constant 0 : i32
    return %c0_i32, %c0_i32_0, %c0_i32_1 : i32, i32, i32
  }
  func.func @transform_10(%arg0: i32) -> (i32, i32, i32) {
    %c0_i32 = arith.constant 0 : i32
    %c0_i32_0 = arith.constant 0 : i32
    %c0_i32_1 = arith.constant 0 : i32
    %c0_i32_2 = arith.constant 0 : i32
    return %c0_i32, %c0_i32_0, %c0_i32_1 : i32, i32, i32
  }
  func.func @transform_11(%arg0: i32) -> (i32, i32, i32) {
    %c0_i32 = arith.constant 0 : i32
    %c0_i32_0 = arith.constant 0 : i32
    %c0_i32_1 = arith.constant 0 : i32
    %c0_i32_2 = arith.constant 0 : i32
    return %c0_i32, %c0_i32_0, %c0_i32_1 : i32, i32, i32
  }
  func.func @transform_12(%arg0: i32) -> (i32, i32, i32) {
    %c0_i32 = arith.constant 0 : i32
    %c0_i32_0 = arith.constant 0 : i32
    %c0_i32_1 = arith.constant 0 : i32
    %c0_i32_2 = arith.constant 0 : i32
    return %c0_i32, %c0_i32_0, %c0_i32_1 : i32, i32, i32
  }
  func.func @transform_13(%arg0: i32) -> (i32, i32, i32) {
    %c0_i32 = arith.constant 0 : i32
    %c0_i32_0 = arith.constant 0 : i32
    %c0_i32_1 = arith.constant 0 : i32
    %c0_i32_2 = arith.constant 0 : i32
    return %c0_i32, %c0_i32_0, %c0_i32_1 : i32, i32, i32
  }
  func.func @transform_14(%arg0: i32) -> (i32, i32, i32) {
    %c0_i32 = arith.constant 0 : i32
    %c0_i32_0 = arith.constant 0 : i32
    %c0_i32_1 = arith.constant 0 : i32
    %c0_i32_2 = arith.constant 0 : i32
    return %c0_i32, %c0_i32_0, %c0_i32_1 : i32, i32, i32
  }
  func.func @transform_15(%arg0: i32) -> (i32, i32, i32) {
    %c0_i32 = arith.constant 0 : i32
    %c0_i32_0 = arith.constant 0 : i32
    %c0_i32_1 = arith.constant 0 : i32
    %c0_i32_2 = arith.constant 0 : i32
    return %c0_i32, %c0_i32_0, %c0_i32_1 : i32, i32, i32
  }
  func.func @transform_16(%arg0: i32) -> (i32, i32, i32) {
    %c0_i32 = arith.constant 0 : i32
    %c0_i32_0 = arith.constant 0 : i32
    %c0_i32_1 = arith.constant 0 : i32
    %c0_i32_2 = arith.constant 0 : i32
    return %c0_i32, %c0_i32_0, %c0_i32_1 : i32, i32, i32
  }
  func.func @transform_17(%arg0: i32) -> (i32, i32, i32) {
    %c0_i32 = arith.constant 0 : i32
    %c0_i32_0 = arith.constant 0 : i32
    %c0_i32_1 = arith.constant 0 : i32
    %c0_i32_2 = arith.constant 0 : i32
    return %c0_i32, %c0_i32_0, %c0_i32_1 : i32, i32, i32
  }
  func.func @transform_18(%arg0: i32) -> (i32, i32, i32) {
    %c0_i32 = arith.constant 0 : i32
    %c0_i32_0 = arith.constant 0 : i32
    %c0_i32_1 = arith.constant 0 : i32
    %c0_i32_2 = arith.constant 0 : i32
    return %c0_i32, %c0_i32_0, %c0_i32_1 : i32, i32, i32
  }
  func.func @transform_19(%arg0: i32) -> (i32, i32, i32) {
    %c0_i32 = arith.constant 0 : i32
    %c0_i32_0 = arith.constant 0 : i32
    %c0_i32_1 = arith.constant 0 : i32
    %c0_i32_2 = arith.constant 0 : i32
    return %c0_i32, %c0_i32_0, %c0_i32_1 : i32, i32, i32
  }
  func.func @transform_20(%arg0: i32) -> (i32, i32) {
    %c0_i32 = arith.constant 0 : i32
    %c0_i32_0 = arith.constant 0 : i32
    %c0_i32_1 = arith.constant 0 : i32
    return %c0_i32, %c0_i32_0 : i32, i32
  }
  func.func @transform_21(%arg0: i32) -> (i32, i32) {
    %c0_i32 = arith.constant 0 : i32
    %c0_i32_0 = arith.constant 0 : i32
    %c0_i32_1 = arith.constant 0 : i32
    return %c0_i32, %c0_i32_0 : i32, i32
  }
  func.func @transform_22(%arg0: i32) -> (i32, i32) {
    %c0_i32 = arith.constant 0 : i32
    %c0_i32_0 = arith.constant 0 : i32
    %c0_i32_1 = arith.constant 0 : i32
    return %c0_i32, %c0_i32_0 : i32, i32
  }
  func.func @transform_23(%arg0: i32) -> (i32, i32) {
    %c0_i32 = arith.constant 0 : i32
    %c0_i32_0 = arith.constant 0 : i32
    %c0_i32_1 = arith.constant 0 : i32
    return %c0_i32, %c0_i32_0 : i32, i32
  }
  func.func @transform_24(%arg0: i32) -> (i32, i32, i32, i32) {
    %c0_i32 = arith.constant 0 : i32
    %c0_i32_0 = arith.constant 0 : i32
    %c0_i32_1 = arith.constant 0 : i32
    %c0_i32_2 = arith.constant 0 : i32
    return %arg0, %c0_i32, %c0_i32_0, %c0_i32_1 : i32, i32, i32, i32
  }
  func.func @transform_25(%arg0: i32) -> (i32, i32, i32, i32) {
    %c0_i32 = arith.constant 0 : i32
    %c0_i32_0 = arith.constant 0 : i32
    %c0_i32_1 = arith.constant 0 : i32
    %c0_i32_2 = arith.constant 0 : i32
    return %arg0, %c0_i32, %c0_i32_0, %c0_i32_1 : i32, i32, i32, i32
  }
}

</mosaic_0001>

<bundles_post_ra>
// kernel: tpu_custom_call.1
= control target key start
LH: loop header
LB: loop body
LE: loop exit
PB: predicated region body
PF: predicated region fallthrough
CT: control target
= control target key end

     0   :  { %6 = vsyncpa [#allocation3], 0  ;;  %s131_s0 = inlined_call_operand.hbm [shape: f32[8,128], index: 0, kind: input, shape index: {}]   ;;  %s132_s1 = inlined_call_operand.hbm [shape: f32[8,128], index: 1, kind: output, shape index: {}]  }
   0x1   :  { %7 = vsyncpa [#allocation4], 0  ;;  %s95_s6 = smov [#allocation2]   ;;  %s47_s10 = scalar_lea.hbm %s131_s0, 128 }
   0x2   :  { %s14_s7 = sshll.u32 %s95_s6, 4  ;;  %p48_p0 = scmp.ne.s32.totalorder %s131_s0, %s47_s10  ;;  %s15_s7 = int_to_ptr.vmem [resolvable:$true] %s14_s7 }
   0x3   :  { %p51_p1 = scmp.lt.u32.totalorder %s47_s10, %s131_s0 }
   0x5   :  { %p53_p2 = pnand %p51_p1, %p48_p0 }
   0x7   :  { %56 = shalt.err (!%p53_p2)
}
   0x8   :  { %s57_s15 = scalar_lea.vmem %s15_s7, 128  ;;  %p62_p4 = scmp.lt.s32.totalorder %s15_s7, %s15_s7 }
   0x9   :  { %p58_p3 = scmp.ne.s32.totalorder %s15_s7, %s57_s15  ;;  %p63_p5 = scmp.lt.s32.totalorder %s57_s15, %s57_s15 }
   0xb   :  { %p64_p6 = por %p63_p5, %p62_p4 }
   0xd   :  { %p65_p7 = pnand %p64_p6, %p58_p3 }
   0xf   :  { %68 = shalt.err (!%p65_p7)
}
  0x10   :  { %17 = dma.hbm_to_vmem [thread:$0]  %s131_s0, 128, %s15_s7, [#allocation3]  }
  0x11   :  { %91 = dma.done.wait [#allocation3], 128  }
  0x12   :  { %92 = vsyncadd [#allocation3], 4294967168  ;;  %v21_v0 = vld [vmem:[#allocation2] sm:$0xff]  ;;  %s96_s18 = smov [#allocation5]  }
  0x13   :  { %v23_v1 = vmul.f32 0.70710677, %v21_v0  ;;  %v22_v2 = vmul.f32 0.5, %v21_v0  ;;  %s34_s19 = sshll.u32 %s96_s18, 4  ;;  %s35_s19 = int_to_ptr.vmem [resolvable:$true] %s34_s19 }
  0x14   :  { %s69_s20 = scalar_lea.vmem %s35_s19, 128  ;;  %p74_p9 = scmp.lt.s32.totalorder %s35_s19, %s35_s19 }
  0x15   :  { %45 = verf.f32 %v23_v1  ;;  %p70_p8 = scmp.ne.s32.totalorder %s35_s19, %s69_s20  ;;  %p75_p10 = scmp.lt.s32.totalorder %s69_s20, %s69_s20 }
  0x17   :  { %p76_p11 = por %p75_p10, %p74_p9 }
  0x19   :  { %p77_p12 = pnand %p76_p11, %p70_p8 }
  0x1f   :  { %v46_v3 = vpop.eup %45 }
  0x20   :  { %v25_v4 = vadd.f32 1.0, %v46_v3 }
  0x22   :  { %v26_v5 = vmul.f32 %v25_v4, %v22_v2 }
  0x24   :  { %27 = vst [vmem:[#allocation5] sm:$0xff] %v26_v5 }
  0x25   :  { %80 = shalt.err (!%p77_p12)
}
  0x26   :  { %s81_s22 = scalar_lea.hbm %s132_s1, 128 }
  0x27   :  { %p82_p13 = scmp.ne.s32.totalorder %s132_s1, %s81_s22  ;;  %p85_p0 = scmp.lt.u32.totalorder %s81_s22, %s132_s1 }
  0x29   :  { %p87_p1 = pnand %p85_p0, %p82_p13 }
  0x2b   :  { %90 = shalt.err (!%p87_p1)
}
  0x2c   :  { %37 = dma.vmem_to_hbm [thread:$0]  %s35_s19, 128, %s132_s1, [#allocation4]  }
  0x2d   :  { %93 = dma.done.wait [#allocation4], 128  }
  0x2e   :  { %94 = vsyncadd [#allocation4], 4294967168 }
  0x2f   :  { %41 = vsyncpa [#allocation3], 1 }
  0x30   :  { %42 = vsyncpa [#allocation4], 1 }

// kernel: convvit_forward.4
= control target key start
LH: loop header
LB: loop body
LE: loop exit
PB: predicated region body
PF: predicated region fallthrough
CT: control target
= control target key end

     0   :  { %s2897_s0 = inlined_call_operand.vmem [shape: f32[2,16,64], index: 0, kind: input, shape index: {}]   ;;  %s2898_s1 = inlined_call_operand.vmem [shape: f32[64,32], index: 1, kind: input, shape index: {}]   ;;  %s2899_s2 = inlined_call_operand.vmem [shape: f32[1,32], index: 2, kind: input, shape index: {}]   ;;  %s2900_s3 = inlined_call_operand.vmem [shape: f32[1,32], index: 3, kind: input, shape index: {}]   ;;  %s2901_s4 = inlined_call_operand.vmem [shape: f32[1,32], index: 4, kind: input, shape index: {}]   ;;  %s2902_s5 = inlined_call_operand.vmem [shape: f32[1,1,32], index: 5, kind: input, shape index: {}]   ;;  %s2903_s6 = inlined_call_operand.vmem [shape: f32[1,1,32], index: 6, kind: input, shape index: {}]   ;;  %s2904_s7 = inlined_call_operand.vmem [shape: f32[1,32,32], index: 7, kind: input, shape index: {}]   ;;  %s2905_s8 = inlined_call_operand.vmem [shape: f32[1,1,32], index: 8, kind: input, shape index: {}]   ;;  %s2906_s9 = inlined_call_operand.vmem [shape: f32[1,25,32], index: 9, kind: input, shape index: {}]   ;;  %s2907_s10 = inlined_call_operand.vmem [shape: f32[1,1,32], index: 10, kind: input, shape index: {}]   ;;  %s2908_s11 = inlined_call_operand.vmem [shape: f32[1,32,32], index: 11, kind: input, shape index: {}]   ;;  %s2909_s12 = inlined_call_operand.vmem [shape: f32[1,1,32], index: 12, kind: input, shape index: {}]   ;;  %s2910_s13 = inlined_call_operand.vmem [shape: f32[1,1,32], index: 13, kind: input, shape index: {}]   ;;  %s2911_s14 = inlined_call_operand.vmem [shape: f32[1,1,32], index: 14, kind: input, shape index: {}]   ;;  %s2912_s15 = inlined_call_operand.vmem [shape: f32[1,32,128], index: 15, kind: input, shape index: {}]   ;;  %s2913_s16 = inlined_call_operand.vmem [shape: f32[1,1,128], index: 16, kind: input, shape index: {}]   ;;  %s2914_s17 = inlined_call_operand.vmem [shape: f32[1,128,32], index: 17, kind: input, shape index: {}]   ;;  %s2915_s18 = inlined_call_operand.vmem [shape: f32[1,1,32], index: 18, kind: input, shape index: {}]   ;;  %s2916_s19 = inlined_call_operand.vmem [shape: f32[2,4,4,32], index: 19, kind: output, shape index: {}]  }
   0x1   :  { %2918 = sst [smem:[#allocation3_spill]] %s2897_s0  ;;  %s2359_s0 = smov 0  }
   0x2   :  { %2919 = sst [smem:[#allocation4_spill]] %s2898_s1 }
   0x3   :  { %2920 = sst [smem:[#allocation5_spill]] %s2899_s2 }
   0x4   :  { %2921 = sst [smem:[#allocation6_spill]] %s2900_s3 }
   0x5 LB: > { %s1974_s30 = sadd.s32 4294967295, %s2256_s0   ;;  %p1978_p0 = scmp.ge.s32.totalorder %s2256_s0, 1  ;;  %s2256_s0 = sphi %s2359_s0, %s29_s0  }
   0x6   : > { %p537_p1 = scmp.lt.s32.totalorder %s2256_s0, 3 }
   0x8   : > { %p538_p2 = pnand %p1978_p0, %p537_p1 }
   0x9   : > { %s2922_s1 = sld [smem:[#allocation4_spill]] (!%p538_p2)  ;;  %p593_p3 = scmp.lt.s32.totalorder (!%p538_p2), %s1974_s30, 1  ;;  %vm620_vm0 = vcmask (!%p538_p2), 523264   ;;  %vm704_vm1 = vcmask (!%p538_p2), 261120   ;;  %v1987_v40 = vld [vmem:[%s2901_s4] ss:$0 sm:$0xff] (!%p538_p2) }
   0xa   : > { %541 = sbr.rel (%p538_p2) target bundleno = 2236 (0x8bc), region = 96  ;;  %s2923_s2 = sld [smem:[#allocation3_spill]] (!%p538_p2)  ;;  %vm953_vm4 = vcmask (!%p538_p2), 257024  }
   0xb   : > { %s2924_s29 = sld [smem:[#allocation5_spill]] (!%p538_p2) }
   0xf   : > { %v605_v0 = vld [vmem:[%s2922_s1] sm:$0xff] (!%p538_p2)  ;;  %v606_v1 = vld [vmem:[%s2922_s1 + $0x8] sm:$0xff] (!%p538_p2)  ;;  %v607_v2 = vld [vmem:[%s2922_s1 + $0x10] sm:$0xff] (!%p538_p2) }
  0x10   : > { %v2141_v3 = vpack.c.bf16 (!%p538_p2), %v606_v1, %v605_v0  ;;  %v608_v4 = vld [vmem:[%s2922_s1 + $0x18] sm:$0xff] (!%p538_p2)  ;;  %v609_v6 = vld [vmem:[%s2922_s1 + $0x20] sm:$0xff] (!%p538_p2)  ;;  %v610_v7 = vld [vmem:[%s2922_s1 + $0x28] sm:$0xff] (!%p538_p2) }
  0x11   : > { %v2145_v5 = vpack.c.bf16 %v608_v4, %v607_v2  ;;  %s2927_s30 = smov (!%p593_p3, %s1974_s30), 1  ;;  %v2149_v8 = vpack.c.bf16 %v610_v7, %v609_v6  ;;  %v611_v9 = vld [vmem:[%s2922_s1 + $0x30] sm:$0xff]  ;;  %v612_v10 = vld [vmem:[%s2922_s1 + $0x38] sm:$0xff]  ;;  %v1983_v14 = vld [vmem:[%s2924_s29] ss:$0 sm:$0xff] }
  0x12   : > { %2142 = vmatprep.subr.bf16.mxu0 %v2141_v3  ;;  %s2006_s20 = sshll.u32 %s2927_s30, 4  ;;  %v2153_v12 = vpack.c.bf16 %v612_v10, %v611_v9 }
  0x13   : > { %2144 = vmatpush3.bf16.msra.mxu0 %v2141_v3  ;;  %s597_s23 = scalar_lea.vmem %s2923_s2, %s2006_s20  ;;  %s2925_s2 = sld [smem:[#allocation6_spill]] }
  0x14   : > { %2146 = vmatprep.subr.bf16.mxu0 %v2145_v5  ;;  %v603_v11 = vld [vmem:[%s597_s23] sm:$0xff]  ;;  %v604_v13 = vld [vmem:[%s597_s23 + $0x8] sm:$0xff]  ;;  %s602_s22 = scalar_lea.vmem %s2916_s19, %s2006_s20 }
  0x15   : > { %2070 = vmatprep.mubr.msk.f32.mxu0 %vm620_vm0, %v603_v11 }
  0x17   : > { %2148 = vmatpush3.bf16.msra.mxu0 %v2145_v5 }
  0x18   : > { %2150 = vmatprep.subr.bf16.mxu0 %v2149_v8 }
  0x19   : > { %v1986_v38 = vld [vmem:[%s2925_s2] ss:$0 sm:$0xff] }
  0x1b   : > { %2152 = vmatpush3.bf16.msra.mxu0 %v2149_v8 }
  0x1c   : > { %2154 = vmatprep.subr.bf16.mxu0 %v2153_v12 }
  0x1f   : > { %2156 = vmatpush3.bf16.msra.mxu0 %v2153_v12 }
  0x22   : > { %2071 = vmatmul.mubr.msk.f32.vlgmr.msra.gmra.mrb[0].mxu0 %vm620_vm0, %v604_v13 }
  0xf5   : > { %v2072_v15 = vpop.f32.mrb[0].mxu0 }
  0xf6   : > { %v693_v16 = vpop.f32.mrb[1].mxu0  ;;  %v699_v18 = vadd.f32 %v2072_v15, %v1983_v14 }
  0xf7   : > { %v694_v17 = vadd.f32 %v1983_v14, %v693_v16 }
  0xf8   : > { %v708_v20 = vsel %vm704_vm1, %v699_v18, 0.0 }
  0xf9   : > { %v705_v19 = vsel %vm704_vm1, %v694_v17, 0.0 }
  0xfa   : > { %706 = vadd.xlane.f32.xlu0 %v705_v19 }
  0xfe   : > { %709 = vadd.xlane.f32.xlu0 %v708_v20 }
 0x187   : > { %v707_v21 = vpop.xlane.xlu0 %706 }
 0x188   : > { %v712_v22 = vmul.f32 0.03125, %v707_v21 }
 0x18a   : > { %v714_v23 = vsub.f32 %v694_v17, %v712_v22 }
 0x18b   : > { %v710_v24 = vpop.xlane.xlu0 %709 }
 0x18c   : > { %v713_v25 = vmul.f32 0.03125, %v710_v24  ;;  %v716_v26 = vmul.f32 %v714_v23, %v714_v23 }
 0x18e   : > { %v715_v27 = vsub.f32 %v699_v18, %v713_v25  ;;  %v718_v28 = vsel %vm704_vm1, %v716_v26, 0.0 }
 0x18f   : > { %719 = vadd.xlane.f32.xlu1 %v718_v28 }
 0x190   : > { %v717_v29 = vmul.f32 %v715_v27, %v715_v27 }
 0x192   : > { %v721_v30 = vsel %vm704_vm1, %v717_v29, 0.0 }
 0x193   : > { %722 = vadd.xlane.f32.xlu1 %v721_v30 }
 0x21c   : > { %v720_v31 = vpop.xlane.xlu1 %719 }
 0x21d   : > { %v724_v32 = vmul.f32 0.03125, %v720_v31 }
 0x21f   : > { %v726_v33 = vadd.f32 1e-05, %v724_v32 }
 0x220   : > { %v723_v34 = vpop.xlane.xlu1 %722 }
 0x221   : > { %2222 = vrsqrt.f32 %v726_v33  ;;  %v725_v35 = vmul.f32 0.03125, %v723_v34 }
 0x223   : > { %v727_v36 = vadd.f32 1e-05, %v725_v35 }
 0x225   : > { %2224 = vrsqrt.f32 %v727_v36 }
 0x22b   : > { %v2223_v37 = vpop.eup %2222 }
 0x22c   : > { %v730_v39 = vmul.f32 %v2223_v37, %v714_v23 }
 0x22e   : > { %v738_v41 = vmul.f32 %v1986_v38, %v730_v39 }
 0x22f   : > { %v2225_v42 = vpop.eup %2224 }
 0x230   : > { %v731_v43 = vmul.f32 %v2225_v42, %v715_v27  ;;  %v746_v44 = vadd.f32 %v1987_v40, %v738_v41 }
 0x232   : > { %v748_v45 = vmul.f32 0.70710677, %v746_v44  ;;  %v739_v46 = vmul.f32 %v1986_v38, %v731_v43  ;;  %v790_v25 = vmul.f32 0.5, %v746_v44 }
 0x234   : > { %v750_v47 = vand.u32 2147483647, %v748_v45  ;;  %v747_v48 = vadd.f32 %v1987_v40, %v739_v46  ;;  %vm792_vm2 = vcmp.ge.f32.partialorder %v748_v45, 0.0  ;;  %v846_v45 = vld [vmem:[%s2904_s7] sm:$0xff]  ;;  %v847_v46 = vld [vmem:[%s2904_s7 + $0x8] sm:$0xff] }
 0x236   : > { %v752_v49 = vmul.f32 0.3275911, %v750_v47  ;;  %v749_v50 = vmul.f32 0.70710677, %v747_v48  ;;  %v778_v55 = vsub.f32 0.0, %v750_v47  ;;  %v791_v31 = vmul.f32 0.5, %v747_v48 }
 0x237   : > { %v848_v48 = vld [vmem:[%s2904_s7 + $0x10] sm:$0xff] }
 0x238   : > { %v754_v51 = vadd.f32 1.0, %v752_v49  ;;  %v751_v52 = vand.u32 2147483647, %v749_v50  ;;  %v780_v57 = vmul.f32 %v778_v55, %v750_v47  ;;  %vm793_vm3 = vcmp.ge.f32.partialorder %v749_v50, 0.0  ;;  %v849_v49 = vld [vmem:[%s2904_s7 + $0x18] sm:$0xff] }
 0x239   : > { %v2157_v47 = vpack.c.bf16 %v847_v46, %v846_v45  ;;  %v2161_v50 = vpack.c.bf16 %v849_v49, %v848_v48  ;;  %v967_v49 = vld [vmem:[%s2906_s9 + $0x8] sm:$0xff] }
 0x23a   : > { %2226 = vrcp.f32 %v754_v51  ;;  %v753_v53 = vmul.f32 0.3275911, %v751_v52  ;;  %v779_v58 = vsub.f32 0.0, %v751_v52  ;;  %v782_v62 = vmul.f32 1.442695, %v780_v57 }
 0x23b   : > { %2158 = vmatprep.subr.bf16.mxu0 %v2157_v47 }
 0x23c   : > { %v755_v54 = vadd.f32 1.0, %v753_v53  ;;  %v781_v63 = vmul.f32 %v779_v58, %v751_v52  ;;  %2160 = vmatpush3.bf16.msra.mxu0 %v2157_v47  ;;  %v1988_v58 = vld [vmem:[%s2902_s5] ss:$0 sm:$0xff] }
 0x23d   : > { %2162 = vmatprep.subr.bf16.mxu0 %v2161_v50 }
 0x23e   : > { %2228 = vrcp.f32 %v755_v54  ;;  %v784_v4 = vmul.f32 1.442695, %v781_v63 }
 0x23f   : > { %2230 = vpow2.f32 %v782_v62 }
 0x240   : > { %2232 = vpow2.f32 %v784_v4  ;;  %2164 = vmatpush3.bf16.msra.mxu0 %v2161_v50  ;;  %v1521_v4 = vld [vmem:[%s2908_s11] sm:$0xff] }
 0x244   : > { %v2227_v56 = vpop.eup %2226 }
 0x245   : > { %v760_v59 = vmul.f32 1.0614054, %v2227_v56 }
 0x247   : > { %v762_v60 = vadd.f32 -1.4531521, %v760_v59 }
 0x248   : > { %v2229_v61 = vpop.eup %2228 }
 0x249   : > { %v764_v0 = vmul.f32 %v2227_v56, %v762_v60  ;;  %v761_v1 = vmul.f32 1.0614054, %v2229_v61  ;;  %v2231_v15 = vpop.eup %2230  ;;  %v1989_v60 = vld [vmem:[%s2903_s6] ss:$0 sm:$0xff] }
 0x24a   : > { %v2233_v20 = vpop.eup %2232 }
 0x24b   : > { %v766_v2 = vadd.f32 1.4214138, %v764_v0  ;;  %v763_v3 = vadd.f32 -1.4531521, %v761_v1 }
 0x24d   : > { %v768_v5 = vmul.f32 %v2227_v56, %v766_v2  ;;  %v765_v6 = vmul.f32 %v2229_v61, %v763_v3  ;;  %v2258_v3 = vmov 0.0  }
 0x24e   : > { %938 = vst.msk [vmem:[#allocation2] sm:$0xff] %vm704_vm1, %v2258_v3  ;;  %939 = vst.msk [vmem:[#allocation2 + $0x8] sm:$0xff] %vm704_vm1, %v2258_v3 }
 0x24f   : > { %v770_v7 = vadd.f32 -0.28449672, %v768_v5  ;;  %v767_v8 = vadd.f32 1.4214138, %v765_v6  ;;  %942 = vst.msk [vmem:[#allocation2 + $0x20] sm:$0xff] %vm704_vm1, %v2258_v3  ;;  %943 = vst.msk [vmem:[#allocation2 + $0x28] sm:$0xff] %vm704_vm1, %v2258_v3 }
 0x250   : > { %944 = vst.msk [vmem:[#allocation2 + $0x30] sm:$0xff] %vm704_vm1, %v2258_v3  ;;  %945 = vst.msk [vmem:[#allocation2 + $0x38] sm:$0xff] %vm704_vm1, %v2258_v3  ;;  %v1522_v5 = vld [vmem:[%s2908_s11 + $0x8] sm:$0xff]  ;;  %v1523_v6 = vld [vmem:[%s2908_s11 + $0x10] sm:$0xff] }
 0x251   : > { %v772_v9 = vmul.f32 %v2227_v56, %v770_v7  ;;  %v769_v10 = vmul.f32 %v2229_v61, %v767_v8  ;;  %940 = vst.msk [vmem:[#allocation2 + $0x10] sm:$0xff] %vm704_vm1, %v2258_v3  ;;  %941 = vst.msk [vmem:[#allocation2 + $0x18] sm:$0xff] %vm704_vm1, %v2258_v3  ;;  %v2165_v7 = vpack.c.bf16 %v1522_v5, %v1521_v4  ;;  %v1524_v8 = vld [vmem:[%s2908_s11 + $0x18] sm:$0xff] }
 0x253   : > { %v774_v11 = vadd.f32 0.2548296, %v772_v9  ;;  %v771_v12 = vadd.f32 -0.28449672, %v769_v10  ;;  %v2169_v9 = vpack.c.bf16 %v1524_v8, %v1523_v6  ;;  %2166 = vmatprep.subr.bf16.mxu1 %v2165_v7  ;;  %v970_v10 = vlaneseq }
 0x254   : > { %2168 = vmatpush3.bf16.msra.mxu1 %v2165_v7 }
 0x255   : > { %v776_v13 = vmul.f32 %v2227_v56, %v774_v11  ;;  %v773_v14 = vmul.f32 %v2229_v61, %v771_v12  ;;  %2170 = vmatprep.subr.bf16.mxu1 %v2169_v9  ;;  %v971_v11 = vshrl.u32 %v970_v10, 7 }
 0x257   : > { %v786_v16 = vmul.f32 %v2231_v15, %v776_v13  ;;  %v775_v17 = vadd.f32 0.2548296, %v773_v14  ;;  %v2464_v12 = vsub.s32 1, %v971_v11  ;;  %v966_v13 = vld [vmem:[%s2906_s9] sm:$0xff]  ;;  %v2469_v14 = vsub.s32 0, %v971_v11 }
 0x258   : > { %2172 = vmatpush3.bf16.msra.mxu1 %v2169_v9 }
 0x259   : > { %v788_v18 = vsub.f32 1.0, %v786_v16  ;;  %v777_v19 = vmul.f32 %v2229_v61, %v775_v17  ;;  %v2472_v15 = vrot.slane %v966_v13, %v2464_v12  ;;  %v2474_v16 = vsub.s32 2, %v971_v11  ;;  %v958_v17 = vld [vmem:[#allocation2] sm:$0xff] }
 0x25b   : > { %v794_v21 = vsub.f32 0.0, %v788_v18  ;;  %v787_v22 = vmul.f32 %v2233_v20, %v777_v19  ;;  %v986_v19 = vmul.f32 %v2472_v15, %v958_v17  ;;  %v2481_v20 = vrot.slane %v966_v13, %v2474_v16 }
 0x25d   : > { %v796_v23 = vsel %vm792_vm2, %v788_v18, %v794_v21  ;;  %v789_v24 = vsub.f32 1.0, %v787_v22  ;;  %v2477_v18 = vrot.slane %v966_v13, %v2469_v14  ;;  %v2483_v21 = vsub.s32 3, %v971_v11 }
 0x25e   : > { %v798_v26 = vadd.f32 1.0, %v796_v23  ;;  %v994_v23 = vrot.slane %v986_v19, 1 }
 0x25f   : > { %v795_v27 = vsub.f32 0.0, %v789_v24  ;;  %v974_v22 = vmul.f32 %v2477_v18, %v958_v17 }
 0x260   : > { %v2412_v28 = vmul.f32 %v798_v26, %v790_v25  ;;  %v2488_v25 = vrot.slane %v966_v13, %v2483_v21  ;;  %v2490_v26 = vsub.s32 4, %v971_v11 }
 0x261   : > { %v797_v29 = vsel %vm793_vm3, %v789_v24, %v795_v27  ;;  %v1010_v24 = vmul.f32 %v2481_v20, %v958_v17  ;;  %v1002_v27 = vadd.f32 %v994_v23, %v974_v22 }
 0x262   : > { %v804_v30 = vsel %vm704_vm1, %v2412_v28, 0.0  ;;  %v799_v32 = vadd.f32 1.0, %v797_v29 }
 0x263   : > { %805 = vadd.xlane.f32.xlu0 %v804_v30  ;;  %v1018_v29 = vrot.slane %v1010_v24, 2  ;;  %v1034_v30 = vmul.f32 %v2488_v25, %v958_v17  ;;  %v968_v24 = vld [vmem:[%s2906_s9 + $0x10] sm:$0xff] }
 0x264   : > { %v2416_v33 = vmul.f32 %v799_v32, %v791_v31  ;;  %v2494_v31 = vrot.slane %v966_v13, %v2490_v26 }
 0x265   : > { %v1026_v32 = vadd.f32 %v1018_v29, %v1002_v27 }
 0x266   : > { %v807_v34 = vsel %vm704_vm1, %v2416_v33, 0.0 }
 0x267   : > { %808 = vadd.xlane.f32.xlu1 %v807_v34  ;;  %v1042_v34 = vrot.slane %v1034_v30, 3  ;;  %v2544_v30 = vrot.slane %v967_v49, %v2474_v16 }
 0x2f0   : > { %v806_v35 = vpop.xlane.xlu0 %805 }
 0x2f1   : > { %v810_v36 = vmul.f32 0.03125, %v806_v35  ;;  %v1058_v35 = vmul.f32 %v2494_v31, %v958_v17 }
 0x2f3   : > { %v812_v37 = vsub.f32 %v2412_v28, %v810_v36  ;;  %v2497_v36 = vsub.s32 5, %v971_v11 }
 0x2f4   : > { %v809_v38 = vpop.xlane.xlu1 %808 }
 0x2f5   : > { %v811_v39 = vmul.f32 0.03125, %v809_v38  ;;  %v814_v40 = vmul.f32 %v812_v37, %v812_v37  ;;  %v1050_v38 = vadd.f32 %v1042_v34, %v1026_v32  ;;  %v2547_v32 = vrot.slane %v967_v49, %v2483_v21 }
 0x2f6   : > { %v2550_v34 = vrot.slane %v967_v49, %v2490_v26 }
 0x2f7   : > { %v813_v41 = vsub.f32 %v2416_v33, %v811_v39  ;;  %v816_v42 = vsel %vm704_vm1, %v814_v40, 0.0  ;;  %v959_v39 = vld [vmem:[#allocation2 + $0x8] sm:$0xff]  ;;  %v1066_v40 = vrot.slane %v1058_v35, 4  ;;  %v2553_v35 = vrot.slane %v967_v49, %v2497_v36 }
 0x2f8   : > { %817 = vadd.xlane.f32.xlu0 %v816_v42  ;;  %v975_v50 = vmul.f32 %v2477_v18, %v959_v39  ;;  %v1059_v3 = vmul.f32 %v2494_v31, %v959_v39 }
 0x2f9   : > { %v815_v43 = vmul.f32 %v813_v41, %v813_v41  ;;  %v1074_v45 = vadd.f32 %v1066_v40, %v1050_v38  ;;  %v2562_v40 = vrot.slane %v968_v24, %v2469_v14 }
 0x2fa   : > { %v1067_v17 = vrot.slane %v1059_v3, 4 }
 0x2fb   : > { %v819_v44 = vsel %vm704_vm1, %v815_v43, 0.0  ;;  %v2507_v43 = vsub.s32 7, %v971_v11 }
 0x2fc   : > { %820 = vadd.xlane.f32.xlu1 %v819_v44  ;;  %v987_v44 = vmul.f32 %v2472_v15, %v959_v39 }
 0x2fd   : > { %v2513_v48 = vrot.slane %v966_v13, %v2507_v43 }
 0x385   : > { %v818_v51 = vpop.xlane.xlu0 %817 }
 0x386   : > { %v822_v52 = vmul.f32 0.03125, %v818_v51  ;;  %v995_v51 = vrot.slane %v987_v44, 1  ;;  %v2564_v44 = vld [vmem:[#allocation2 + $0x30] sm:$0xff] }
 0x388   : > { %v824_v53 = vadd.f32 1e-05, %v822_v52  ;;  %v1011_v52 = vmul.f32 %v2481_v20, %v959_v39 }
 0x389   : > { %v821_v54 = vpop.xlane.xlu1 %820 }
 0x38a   : > { %2234 = vrsqrt.f32 %v824_v53  ;;  %v823_v55 = vmul.f32 0.03125, %v821_v54 }
 0x38c   : > { %v825_v56 = vadd.f32 1e-05, %v823_v55  ;;  %v1118_v55 = vmul.f32 %v2513_v48, %v959_v39 }
 0x38e   : > { %2236 = vrsqrt.f32 %v825_v56  ;;  %v2522_v56 = vrot.slane %v967_v49, %v2469_v14 }
 0x394   : > { %v2235_v57 = vpop.eup %2234 }
 0x395   : > { %v828_v59 = vmul.f32 %v2235_v57, %v812_v37  ;;  %v2499_v37 = vsub.s32 6, %v971_v11  ;;  %v1003_v57 = vadd.f32 %v995_v51, %v975_v50  ;;  %v2575_v50 = vrot.slane %v968_v24, %v2483_v21 }
 0x396   : > { %v2578_v51 = vrot.slane %v968_v24, %v2490_v26 }
 0x397   : > { %v836_v61 = vmul.f32 %v1988_v58, %v828_v59  ;;  %v2505_v42 = vrot.slane %v966_v13, %v2499_v37  ;;  %v1035_v59 = vmul.f32 %v2488_v25, %v959_v39  ;;  %v2556_v38 = vrot.slane %v967_v49, %v2499_v37 }
 0x398   : > { %v2237_v62 = vpop.eup %2236 }
 0x399   : > { %v829_v63 = vmul.f32 %v2237_v62, %v813_v41  ;;  %v844_v0 = vadd.f32 %v1989_v60, %v836_v61  ;;  %v2502_v41 = vrot.slane %v966_v13, %v2497_v36  ;;  %v1094_v47 = vmul.f32 %v2505_v42, %v959_v39 }
 0x39a   : > { %v1126_v61 = vrot.slane %v1118_v55, 2  ;;  %v1142_v62 = vmul.f32 %v2522_v56, %v959_v39 }
 0x39b   : > { %v837_v1 = vmul.f32 %v1988_v58, %v829_v63  ;;  %2081 = vmatprep.mubr.msk.f32.mxu0 %vm704_vm1, %v844_v0  ;;  %v1082_v46 = vmul.f32 %v2502_v41, %v959_v39  ;;  %v1102_v54 = vrot.slane %v1094_v47, 1  ;;  %v1019_v58 = vrot.slane %v1011_v52, 2  ;;  %v1990_v0 = vld [vmem:[%s2905_s8] ss:$0 sm:$0xff] }
 0x39c   : > { %v2527_v63 = vrot.slane %v967_v49, %v2464_v12  ;;  %v1150_v6 = vrot.slane %v1142_v62, 3  ;;  %v2572_v47 = vrot.slane %v968_v24, %v2474_v16  ;;  %v2587_v52 = vrot.slane %v968_v24, %v2497_v36 }
 0x39d   : > { %v845_v2 = vadd.f32 %v1989_v60, %v837_v1  ;;  %v1086_v53 = vadd.f32 %v1082_v46, %v1074_v45  ;;  %v1027_v1 = vadd.f32 %v1019_v58, %v1003_v57  ;;  %v2569_v46 = vrot.slane %v968_v24, %v2464_v12 }
 0x39e   : > { %v1166_v7 = vmul.f32 %v2527_v63, %v959_v39  ;;  %v2559_v39 = vrot.slane %v967_v49, %v2507_v43  ;;  %v2590_v12 = vrot.slane %v968_v24, %v2499_v37  ;;  %v2593_v16 = vrot.slane %v968_v24, %v2507_v43 }
 0x39f   : > { %2082 = vmatmul.mubr.msk.f32.vlgmr.msra.gmra.mrb[2].mxu0 %vm704_vm1, %v845_v2  ;;  %v1110_v60 = vadd.f32 %v1102_v54, %v1086_v53  ;;  %v1043_v2 = vrot.slane %v1035_v59, 3  ;;  %v2603_v54 = vmul.f32 %v2562_v40, %v2564_v44 }
 0x3a0   : > { %v1174_v23 = vrot.slane %v1166_v7, 4 }
 0x3a1   : > { %v1134_v5 = vadd.f32 %v1126_v61, %v1110_v60  ;;  %v1051_v13 = vadd.f32 %v1043_v2, %v1027_v1 }
 0x3a3   : > { %v1158_v22 = vadd.f32 %v1150_v6, %v1134_v5  ;;  %v1075_v27 = vadd.f32 %v1067_v17, %v1051_v13 }
 0x3a5   : > { %v2541_v29 = vadd.f32 %v1174_v23, %v1158_v22 }
 0x472   : > { %v2083_v4 = vpop.f32.mrb[2].mxu0 }
 0x473   : > { %v935_v8 = vadd.f32 %v2083_v4, %v1990_v0  ;;  %v929_v9 = vpop.f32.mrb[3].mxu0 }
 0x474   : > { %v930_v10 = vadd.f32 %v1990_v0, %v929_v9 }
 0x475   : > { %v949_v11 = vcombine.high %v935_v8, %v935_v8  ;;  %956 = vst.msk [vmem:[#allocation2 + $0x22] sm:$0xf] %vm953_vm4, %v935_v8 }
 0x476   : > { %v948_v19 = vcombine.high %v930_v10, %v930_v10  ;;  %954 = vst.msk [vmem:[#allocation2 + $0x12] sm:$0xf] %vm953_vm4, %v930_v10 }
 0x477   : > { %957 = vst.msk [vmem:[#allocation2 + $0x2a] sm:$0xf] %vm953_vm4, %v949_v11 }
 0x478   : > { %955 = vst.msk [vmem:[#allocation2 + $0x1a] sm:$0xf] %vm953_vm4, %v948_v19 }
 0x47c   : > { %v2566_v45 = vld [vmem:[#allocation2 + $0x20] sm:$0xff] }
 0x47d   : > { %v2580_v49 = vld [vmem:[#allocation2 + $0x10] sm:$0xff]  ;;  %v2584_v14 = vmul.f32 %v2505_v42, %v2566_v45  ;;  %v1085_v53 = vmul.f32 %v2502_v41, %v2566_v45  ;;  %v2615_v57 = vmul.f32 %v2513_v48, %v2566_v45  ;;  %v2630_v2 = vmul.f32 %v2522_v56, %v2566_v45 }
 0x47e   : > { %v988_v21 = vmul.f32 %v2472_v15, %v2580_v49  ;;  %v1012_v26 = vmul.f32 %v2481_v20, %v2580_v49  ;;  %v976_v37 = vmul.f32 %v2477_v18, %v2580_v49  ;;  %v1036_v43 = vmul.f32 %v2488_v25, %v2580_v49 }
 0x47f   : > { %v2605_v36 = vld [vmem:[#allocation2 + $0x18] sm:$0xff]  ;;  %v1083_v55 = vmul.f32 %v2502_v41, %v2580_v49  ;;  %v1095_v61 = vmul.f32 %v2505_v42, %v2580_v49  ;;  %v1060_v0 = vmul.f32 %v2494_v31, %v2580_v49  ;;  %v1105_v1 = vrot.slane %v2584_v14, 1 }
 0x480   : > { %v989_v58 = vmul.f32 %v2472_v15, %v2605_v36  ;;  %v996_v59 = vrot.slane %v988_v21, 1  ;;  %v1013_v60 = vmul.f32 %v2481_v20, %v2605_v36  ;;  %v977_v62 = vmul.f32 %v2477_v18, %v2605_v36 }
 0x481   : > { %v1020_v4 = vrot.slane %v1012_v26, 2  ;;  %v1037_v20 = vmul.f32 %v2488_v25, %v2605_v36  ;;  %v1044_v6 = vrot.slane %v1036_v43, 3  ;;  %v1061_v18 = vmul.f32 %v2494_v31, %v2605_v36 }
 0x482   : > { %v997_v15 = vrot.slane %v989_v58, 1  ;;  %v1004_v3 = vadd.f32 %v996_v59, %v976_v37  ;;  %v1021_v5 = vrot.slane %v1013_v60, 2  ;;  %v1087_v7 = vadd.f32 %v1083_v55, %v1075_v27 }
 0x483   : > { %v1096_v10 = vmul.f32 %v2505_v42, %v2605_v36  ;;  %v1103_v11 = vrot.slane %v1095_v61, 1  ;;  %v1068_v13 = vrot.slane %v1060_v0, 4  ;;  %v1119_v17 = vmul.f32 %v2513_v48, %v2580_v49 }
 0x484   : > { %v1005_v8 = vadd.f32 %v997_v15, %v977_v62  ;;  %v1028_v9 = vadd.f32 %v1020_v4, %v1004_v3  ;;  %v1120_v19 = vmul.f32 %v2513_v48, %v2605_v36  ;;  %v1143_v25 = vmul.f32 %v2522_v56, %v2580_v49 }
 0x485   : > { %v1045_v23 = vrot.slane %v1037_v20, 3  ;;  %v1111_v24 = vadd.f32 %v1103_v11, %v1087_v7  ;;  %v1069_v27 = vrot.slane %v1061_v18, 4  ;;  %v1084_v14 = vmul.f32 %v2502_v41, %v2605_v36 }
 0x486   : > { %v1029_v22 = vadd.f32 %v1021_v5, %v1005_v8  ;;  %v1052_v31 = vadd.f32 %v1044_v6, %v1028_v9  ;;  %v1127_v42 = vrot.slane %v1119_v17, 2  ;;  %v1129_v21 = vrot.slane %v2615_v57, 2 }
 0x487   : > { %v1104_v43 = vrot.slane %v1096_v10, 1  ;;  %v1167_v48 = vmul.f32 %v2527_v63, %v2580_v49  ;;  %v1128_v55 = vrot.slane %v1120_v19, 2  ;;  %v1151_v59 = vrot.slane %v1143_v25, 3 }
 0x488   : > { %v1053_v26 = vadd.f32 %v1045_v23, %v1029_v22  ;;  %v1076_v37 = vadd.f32 %v1068_v13, %v1052_v31  ;;  %v1135_v58 = vadd.f32 %v1127_v42, %v1111_v24  ;;  %v1190_v60 = vmul.f32 %v2544_v30, %v2580_v49 }
 0x489   : > { %v1175_v0 = vrot.slane %v1167_v48, 4  ;;  %v1202_v41 = vmul.f32 %v2547_v32, %v2580_v49  ;;  %v1203_v3 = vmul.f32 %v2547_v32, %v2605_v36  ;;  %v1226_v4 = vmul.f32 %v2550_v34, %v2580_v49 }
 0x48a   : > { %v1077_v61 = vadd.f32 %v1069_v27, %v1053_v26  ;;  %v1088_v62 = vadd.f32 %v1084_v14, %v1076_v37  ;;  %v1159_v15 = vadd.f32 %v1151_v59, %v1135_v58  ;;  %v1194_v57 = vadd.f32 %v1190_v60, %v2541_v29 }
 0x48b   : > { %v1144_v6 = vmul.f32 %v2522_v56, %v2605_v36  ;;  %v1210_v18 = vrot.slane %v1202_v41, 1  ;;  %v1191_v8 = vmul.f32 %v2544_v30, %v2605_v36  ;;  %v1227_v9 = vmul.f32 %v2550_v34, %v2605_v36 }
 0x48c   : > { %v1089_v20 = vadd.f32 %v1085_v53, %v1077_v61  ;;  %v1112_v5 = vadd.f32 %v1104_v43, %v1088_v62  ;;  %v1183_v7 = vadd.f32 %v1175_v0, %v1159_v15  ;;  %v1250_v29 = vmul.f32 %v2553_v35, %v2580_v49  ;;  %v2685_v62 = vld [vmem:[#allocation2 + $0x28] sm:$0xff] }
 0x48d   : > { %v1218_v13 = vadd.f32 %v1210_v18, %v1194_v57  ;;  %v1234_v17 = vrot.slane %v1226_v4, 2  ;;  %v1211_v19 = vrot.slane %v1203_v3, 1  ;;  %v1251_v56 = vmul.f32 %v2553_v35, %v2605_v36 }
 0x48e   : > { %v1113_v10 = vadd.f32 %v1105_v1, %v1089_v20  ;;  %v1136_v11 = vadd.f32 %v1128_v55, %v1112_v5  ;;  %v1195_v53 = vadd.f32 %v1191_v8, %v1183_v7  ;;  %v1274_v25 = vmul.f32 %v2556_v38, %v2580_v49 }
 0x48f   : > { %v1152_v23 = vrot.slane %v1144_v6, 3  ;;  %v1242_v31 = vadd.f32 %v1234_v17, %v1218_v13  ;;  %v1258_v24 = vrot.slane %v1250_v29, 3  ;;  %v1153_v27 = vrot.slane %v2630_v2, 3 }
 0x490   : > { %v1137_v22 = vadd.f32 %v1129_v21, %v1113_v10  ;;  %v1219_v14 = vadd.f32 %v1211_v19, %v1195_v53  ;;  %v1235_v42 = vrot.slane %v1227_v9, 2  ;;  %v1275_v1 = vmul.f32 %v2556_v38, %v2605_v36 }
 0x491   : > { %v2673_v26 = vadd.f32 %v1152_v23, %v1136_v11  ;;  %v1259_v37 = vrot.slane %v1251_v56, 3  ;;  %v1266_v43 = vadd.f32 %v1258_v24, %v1242_v31  ;;  %v1282_v48 = vrot.slane %v1274_v25, 4  ;;  %v2712_v31 = vld [vmem:[%s2906_s9 + $0x18] ss:$0 sm:$0xff] }
 0x492   : > { %v1243_v55 = vadd.f32 %v1235_v42, %v1219_v14  ;;  %v1310_v49 = vmul.f32 %v2562_v40, %v2605_v36  ;;  %v1311_v21 = vmul.f32 %v2562_v40, %v2566_v45  ;;  %v1334_v2 = vmul.f32 %v2569_v46, %v2605_v36 }
 0x493   : > { %v1161_v58 = vadd.f32 %v1153_v27, %v1137_v22  ;;  %v1290_v59 = vadd.f32 %v1282_v48, %v1266_v43  ;;  %v1298_v60 = vmul.f32 %v2559_v39, %v2605_v36  ;;  %v1335_v61 = vmul.f32 %v2569_v46, %v2566_v45 }
 0x494   : > { %v1267_v0 = vadd.f32 %v1259_v37, %v1243_v55  ;;  %v1283_v41 = vrot.slane %v1275_v1, 4  ;;  %v1358_v15 = vmul.f32 %v2572_v47, %v2605_v36  ;;  %v1359_v57 = vmul.f32 %v2572_v47, %v2566_v45 }
 0x495   : > { %v1299_v3 = vmul.f32 %v2559_v39, %v2566_v45  ;;  %v1302_v4 = vadd.f32 %v1298_v60, %v1290_v59  ;;  %v1318_v20 = vrot.slane %v1310_v49, 1  ;;  %v1319_v5 = vrot.slane %v1311_v21, 1 }
 0x496   : > { %v1291_v6 = vadd.f32 %v1283_v41, %v1267_v0  ;;  %v1342_v18 = vrot.slane %v1334_v2, 2  ;;  %v1343_v7 = vrot.slane %v1335_v61, 2  ;;  %v1382_v8 = vmul.f32 %v2575_v50, %v2605_v36 }
 0x497   : > { %v1326_v9 = vadd.f32 %v1318_v20, %v1302_v4  ;;  %v1383_v29 = vmul.f32 %v2575_v50, %v2566_v45  ;;  %v1418_v10 = vmul.f32 %v2587_v52, %v2566_v45  ;;  %v1419_v11 = vmul.f32 %v2587_v52, %v2685_v62 }
 0x498   : > { %v1303_v13 = vadd.f32 %v1299_v3, %v1291_v6  ;;  %v1366_v17 = vrot.slane %v1358_v15, 3  ;;  %v1367_v53 = vrot.slane %v1359_v57, 3  ;;  %v1442_v19 = vmul.f32 %v2590_v12, %v2566_v45 }
 0x499   : > { %v1350_v56 = vadd.f32 %v1342_v18, %v1326_v9  ;;  %v1406_v25 = vmul.f32 %v2578_v51, %v2566_v45  ;;  %v1407_v22 = vmul.f32 %v2578_v51, %v2685_v62  ;;  %v1443_v23 = vmul.f32 %v2590_v12, %v2685_v62 }
 0x49a   : > { %v1327_v24 = vadd.f32 %v1319_v5, %v1303_v13  ;;  %v1390_v27 = vrot.slane %v1382_v8, 4  ;;  %v1466_v14 = vmul.f32 %v2593_v16, %v2566_v45  ;;  %v1467_v42 = vmul.f32 %v2593_v16, %v2685_v62 }
 0x49b   : > { %v1374_v1 = vadd.f32 %v1366_v17, %v1350_v56  ;;  %v1391_v37 = vrot.slane %v1383_v29, 4  ;;  %v1426_v43 = vrot.slane %v1418_v10, 1  ;;  %v1427_v48 = vrot.slane %v1419_v11, 1 }
 0x49c   : > { %v1351_v55 = vadd.f32 %v1343_v7, %v1327_v24  ;;  %v1450_v49 = vrot.slane %v1442_v19, 2  ;;  %v1451_v21 = vrot.slane %v1443_v23, 2  ;;  %v1168_v2 = vmul.f32 %v2527_v63, %v2605_v36 }
 0x49d   : > { %v1398_v59 = vadd.f32 %v1390_v27, %v1374_v1  ;;  %v1490_v60 = vmul.f32 %v2712_v31, %v2566_v45  ;;  %v1491_v61 = vmul.f32 %v2712_v31, %v2685_v62  ;;  %v1169_v0 = vmul.f32 %v2527_v63, %v2566_v45 }
 0x49e   : > { %v1375_v41 = vadd.f32 %v1367_v53, %v1351_v55  ;;  %v1474_v15 = vrot.slane %v1466_v14, 3  ;;  %v1475_v57 = vrot.slane %v1467_v42, 3  ;;  %v1176_v3 = vrot.slane %v1168_v2, 4 }
 0x49f   : > { %v1410_v4 = vadd.f32 %v1406_v25, %v1398_v59  ;;  %v1177_v20 = vrot.slane %v1169_v0, 4  ;;  %v1204_v5 = vmul.f32 %v2547_v32, %v2566_v45  ;;  %v1205_v36 = vmul.f32 %v2547_v32, %v2685_v62  ;;  %v2752_v0 = vld [vmem:[%s2907_s10] ss:$0 sm:$0xff] }
 0x4a0   : > { %v1399_v6 = vadd.f32 %v1391_v37, %v1375_v41  ;;  %v1184_v18 = vadd.f32 %v1176_v3, %v2673_v26  ;;  %v1192_v7 = vmul.f32 %v2544_v30, %v2566_v45  ;;  %v1228_v63 = vmul.f32 %v2550_v34, %v2566_v45 }
 0x4a1   : > { %v1434_v8 = vadd.f32 %v1426_v43, %v1410_v4  ;;  %v1185_v9 = vadd.f32 %v1177_v20, %v1161_v58  ;;  %v1193_v29 = vmul.f32 %v2544_v30, %v2685_v62  ;;  %v1229_v10 = vmul.f32 %v2550_v34, %v2685_v62 }
 0x4a2   : > { %v1411_v11 = vadd.f32 %v1407_v22, %v1399_v6  ;;  %v1196_v13 = vadd.f32 %v1192_v7, %v1184_v18  ;;  %v1212_v32 = vrot.slane %v1204_v5, 1  ;;  %v1213_v17 = vrot.slane %v1205_v36, 1 }
 0x4a3   : > { %v1458_v53 = vadd.f32 %v1450_v49, %v1434_v8  ;;  %v1197_v26 = vadd.f32 %v1193_v29, %v1185_v9  ;;  %v1252_v19 = vmul.f32 %v2553_v35, %v2566_v45  ;;  %v1253_v56 = vmul.f32 %v2553_v35, %v2685_v62  ;;  %v965_v9 = vld [vmem:[#allocation2 + $0x38] sm:$0xff] }
 0x4a4   : > { %v1435_v25 = vadd.f32 %v1427_v48, %v1411_v11  ;;  %v1220_v58 = vadd.f32 %v1212_v32, %v1196_v13  ;;  %v1236_v23 = vrot.slane %v1228_v63, 2  ;;  %v1276_v30 = vmul.f32 %v2556_v38, %v2566_v45 }
 0x4a5   : > { %v1482_v24 = vadd.f32 %v1474_v15, %v1458_v53  ;;  %v1221_v34 = vadd.f32 %v1213_v17, %v1197_v26  ;;  %v1237_v22 = vrot.slane %v1229_v10, 2  ;;  %v1277_v27 = vmul.f32 %v2556_v38, %v2685_v62 }
 0x4a6   : > { %v1459_v14 = vadd.f32 %v1451_v21, %v1435_v25  ;;  %v1498_v42 = vrot.slane %v1490_v60, 4  ;;  %v1244_v1 = vadd.f32 %v1236_v23, %v1220_v58  ;;  %v1260_v37 = vrot.slane %v1252_v19, 3 }
 0x4a7   : > { %v1499_v43 = vrot.slane %v1491_v61, 4  ;;  %v1245_v55 = vadd.f32 %v1237_v22, %v1221_v34  ;;  %v1261_v49 = vrot.slane %v1253_v56, 3  ;;  %v1284_v35 = vrot.slane %v1276_v30, 4 }
 0x4a8   : > { %v1483_v48 = vadd.f32 %v1475_v57, %v1459_v14  ;;  %v1506_v2 = vadd.f32 %v1498_v42, %v1482_v24  ;;  %v1268_v59 = vadd.f32 %v1260_v37, %v1244_v1  ;;  %v1312_v45 = vmul.f32 %v2562_v40, %v2685_v62 }
 0x4a9   : > { %v1269_v38 = vadd.f32 %v1261_v49, %v1245_v55  ;;  %v1285_v21 = vrot.slane %v1277_v27, 4  ;;  %v1301_v60 = vmul.f32 %v2559_v39, %v2564_v44  ;;  %v1337_v61 = vmul.f32 %v2569_v46, %v2564_v44 }
 0x4aa   : > { %v1507_v41 = vadd.f32 %v1499_v43, %v1483_v48  ;;  %v1292_v15 = vadd.f32 %v1284_v35, %v1268_v59  ;;  %v1300_v57 = vmul.f32 %v2559_v39, %v2685_v62  ;;  %v1336_v40 = vmul.f32 %v2569_v46, %v2685_v62 }
 0x4ab   : > { %v1293_v3 = vadd.f32 %v1285_v21, %v1269_v38  ;;  %v1321_v4 = vrot.slane %v2603_v54, 1  ;;  %v1360_v20 = vmul.f32 %v2572_v47, %v2685_v62  ;;  %v1361_v5 = vmul.f32 %v2572_v47, %v2564_v44 }
 0x4ac   : > { %v1517_v36 = vadd.f32 %v2752_v0, %v1506_v2  ;;  %v1518_v6 = vadd.f32 %v2752_v0, %v1507_v41  ;;  %v1304_v18 = vadd.f32 %v1300_v57, %v1292_v15  ;;  %v1320_v7 = vrot.slane %v1312_v45, 1 }
 0x4ad   : > { %v1305_v63 = vadd.f32 %v1301_v60, %v1293_v3  ;;  %v1345_v39 = vrot.slane %v1337_v61, 2  ;;  %v1385_v46 = vmul.f32 %v2575_v50, %v2564_v44  ;;  %v1344_v29 = vrot.slane %v1336_v40, 2 }
 0x4ae   : > { %v1536_v8 = vcombine.low %v1517_v36, %v1518_v6  ;;  %v1328_v54 = vadd.f32 %v1320_v7, %v1304_v18  ;;  %v1384_v10 = vmul.f32 %v2575_v50, %v2685_v62  ;;  %v1369_v47 = vrot.slane %v1361_v5, 3 }
 0x4af   : > { %v1329_v11 = vadd.f32 %v1321_v4, %v1305_v63  ;;  %v1368_v32 = vrot.slane %v1360_v20, 3  ;;  %v1420_v17 = vmul.f32 %v2587_v52, %v2564_v44  ;;  %v1393_v26 = vrot.slane %v1385_v46, 4 }
 0x4b0   : > { %2092 = vmatprep.mubr.msk.f32.mxu1 %vm704_vm1, %v1536_v8  ;;  %v1352_v13 = vadd.f32 %v1344_v29, %v1328_v54  ;;  %v1421_v19 = vmul.f32 %v2587_v52, %v965_v9  ;;  %v1392_v25 = vrot.slane %v1384_v10, 4  ;;  %v1408_v58 = vmul.f32 %v2578_v51, %v2564_v44  ;;  %v1663_v54 = vld [vmem:[%s2912_s15] sm:$0xff]  ;;  %v1664_v29 = vld [vmem:[%s2912_s15 + $0x8] sm:$0xff]  ;;  %v1665_v10 = vld [vmem:[%s2912_s15 + $0x10] sm:$0xff] }
 0x4b1   : > { %v1353_v53 = vadd.f32 %v1345_v39, %v1329_v11  ;;  %v1444_v50 = vmul.f32 %v2590_v12, %v2564_v44  ;;  %v1409_v23 = vmul.f32 %v2578_v51, %v965_v9  ;;  %v1445_v30 = vmul.f32 %v2590_v12, %v965_v9 }
 0x4b2   : > { %v1376_v56 = vadd.f32 %v1368_v32, %v1352_v13  ;;  %v1428_v34 = vrot.slane %v1420_v17, 1  ;;  %v1468_v22 = vmul.f32 %v2593_v16, %v2564_v44  ;;  %v1429_v52 = vrot.slane %v1421_v19, 1 }
 0x4b3   : > { %v1377_v62 = vadd.f32 %v1369_v47, %v1353_v53  ;;  %v1469_v14 = vmul.f32 %v2593_v16, %v965_v9  ;;  %v1452_v1 = vrot.slane %v1444_v50, 2  ;;  %v1492_v37 = vmul.f32 %v2712_v31, %v2564_v44  ;;  %v1666_v47 = vld [vmem:[%s2912_s15 + $0x18] sm:$0xff] }
 0x4b4   : > { %v1400_v24 = vadd.f32 %v1392_v25, %v1376_v56  ;;  %v1453_v55 = vrot.slane %v1445_v30, 2  ;;  %v1493_v51 = vmul.f32 %v2712_v31, %v965_v9  ;;  %v1476_v12 = vrot.slane %v1468_v22, 3  ;;  %v1995_v31 = vld [vmem:[%s2909_s12] ss:$0 sm:$0xff] }
 0x4b5   : > { %v1401_v27 = vadd.f32 %v1393_v26, %v1377_v62  ;;  %v1477_v48 = vrot.slane %v1469_v14, 3  ;;  %v1500_v59 = vrot.slane %v1492_v37, 4  ;;  %v2173_v11 = vpack.c.bf16 %v1664_v29, %v1663_v54  ;;  %v1999_v30 = vld [vmem:[%s2911_s14] ss:$0 sm:$0xff]  ;;  %v1810_v14 = vld [vmem:[%s2914_s17 + $0x8] sm:$0xff]  ;;  %v1812_v37 = vld [vmem:[%s2914_s17 + $0x18] sm:$0xff] }
 0x4b6   : > { %v1412_v42 = vadd.f32 %v1408_v58, %v1400_v24  ;;  %v1501_v38 = vrot.slane %v1493_v51, 4  ;;  %v2177_v13 = vpack.c.bf16 %v1666_v47, %v1665_v10  ;;  %v1998_v58 = vld [vmem:[%s2910_s13] ss:$0 sm:$0xff]  ;;  %v1814_v51 = vld [vmem:[%s2914_s17 + $0x28] sm:$0xff] }
 0x4b7   : > { %v1413_v43 = vadd.f32 %v1409_v23, %v1401_v27  ;;  %2174 = vmatprep.subr.bf16.mxu0 %v2173_v11 }
 0x4b8   : > { %v1436_v49 = vadd.f32 %v1428_v34, %v1412_v42  ;;  %2176 = vmatpush3.bf16.msra.mxu0 %v2173_v11 }
 0x4b9   : > { %v1437_v35 = vadd.f32 %v1429_v52, %v1413_v43  ;;  %2178 = vmatprep.subr.bf16.mxu0 %v2177_v13  ;;  %v1809_v52 = vld [vmem:[%s2914_s17] sm:$0xff] }
 0x4ba   : > { %v1460_v2 = vadd.f32 %v1452_v1, %v1436_v49  ;;  %v2181_v42 = vpack.c.bf16 %v1810_v14, %v1809_v52  ;;  %v1811_v1 = vld [vmem:[%s2914_s17 + $0x10] sm:$0xff]  ;;  %v1813_v43 = vld [vmem:[%s2914_s17 + $0x20] sm:$0xff] }
 0x4bb   : > { %v1461_v45 = vadd.f32 %v1453_v55, %v1437_v35  ;;  %v2185_v55 = vpack.c.bf16 %v1812_v37, %v1811_v1  ;;  %v2189_v49 = vpack.c.bf16 %v1814_v51, %v1813_v43  ;;  %v1816_v35 = vld [vmem:[%s2914_s17 + $0x38] sm:$0xff] }
 0x4bc   : > { %v1484_v21 = vadd.f32 %v1476_v12, %v1460_v2  ;;  %2180 = vmatpush3.bf16.msra.mxu0 %v2177_v13  ;;  %2182 = vmatprep.subr.bf16.mxu1 %v2181_v42  ;;  %v1815_v12 = vld [vmem:[%s2914_s17 + $0x30] sm:$0xff]  ;;  %v1817_v2 = vld [vmem:[%s2914_s17 + $0x40] sm:$0xff] }
 0x4bd   : > { %v1485_v60 = vadd.f32 %v1477_v48, %v1461_v45  ;;  %v2193_v48 = vpack.c.bf16 %v1816_v35, %v1815_v12 }
 0x4be   : > { %v1508_v16 = vadd.f32 %v1500_v59, %v1484_v21  ;;  %v1818_v59 = vld [vmem:[%s2914_s17 + $0x48] sm:$0xff]  ;;  %v1820_v21 = vld [vmem:[%s2914_s17 + $0x58] sm:$0xff] }
 0x4bf   : > { %v1509_v61 = vadd.f32 %v1501_v38, %v1485_v60  ;;  %v2197_v45 = vpack.c.bf16 %v1818_v59, %v1817_v2  ;;  %v1819_v38 = vld [vmem:[%s2914_s17 + $0x50] sm:$0xff] }
 0x4c0   : > { %v1519_v41 = vadd.f32 %v2752_v0, %v1508_v16  ;;  %v2201_v60 = vpack.c.bf16 %v1820_v21, %v1819_v38  ;;  %v1821_v16 = vld [vmem:[%s2914_s17 + $0x60] sm:$0xff] }
 0x4c1   : > { %v1520_v44 = vadd.f32 %v2752_v0, %v1509_v61  ;;  %v1822_v61 = vld [vmem:[%s2914_s17 + $0x68] sm:$0xff] }
 0x4c3   : > { %v1537_v15 = vcombine.low %v1519_v41, %v1520_v44  ;;  %v2205_v41 = vpack.c.bf16 %v1822_v61, %v1821_v16  ;;  %v1823_v44 = vld [vmem:[%s2914_s17 + $0x70] sm:$0xff] }
 0x4c5   : > { %2093 = vmatmul.mubr.msk.f32.vlgmr.msra.gmra.mrb[0].mxu1 %vm704_vm1, %v1537_v15  ;;  %v1824_v15 = vld [vmem:[%s2914_s17 + $0x78] sm:$0xff] }
 0x4c6   : > { %2184 = vmatpush3.bf16.msra.mxu1 %v2181_v42 }
 0x4c7   : > { %2186 = vmatprep.subr.bf16.mxu1 %v2185_v55 }
 0x4ca   : > { %2188 = vmatpush3.bf16.msra.mxu1 %v2185_v55 }
 0x4cb   : > { %2190 = vmatprep.subr.bf16.mxu1 %v2189_v49 }
 0x4ce   : > { %2192 = vmatpush3.bf16.msra.mxu1 %v2189_v49 }
 0x4cf   : > { %2194 = vmatprep.subr.bf16.mxu1 %v2193_v48 }
 0x4d2   : > { %2196 = vmatpush3.bf16.msra.mxu1 %v2193_v48 }
 0x4d3   : > { %2198 = vmatprep.subr.bf16.mxu1 %v2197_v45 }
 0x4d6   : > { %2200 = vmatpush3.bf16.msra.mxu1 %v2197_v45 }
 0x4d7   : > { %2202 = vmatprep.subr.bf16.mxu1 %v2201_v60 }
 0x4da   : > { %2204 = vmatpush3.bf16.msra.mxu1 %v2201_v60  ;;  %v2003_v60 = vld [vmem:[%s2915_s18] ss:$0 sm:$0xff] }
 0x4db   : > { %2206 = vmatprep.subr.bf16.mxu1 %v2205_v41 }
 0x4de   : > { %2208 = vmatpush3.bf16.msra.mxu1 %v2205_v41 }
 0x598   : > { %v2094_v57 = vpop.f32.mrb[0].mxu1 }
 0x599   : > { %v1614_v40 = vadd.f32 %v2094_v57, %v1995_v31  ;;  %v1608_v3 = vpop.f32.mrb[1].mxu1  ;;  %v2000_v57 = vld [vmem:[%s2913_s16] ss:$0 sm:$0xff] }
 0x59a   : > { %v1609_v4 = vadd.f32 %v1995_v31, %v1608_v3  ;;  %v2209_v31 = vpack.c.bf16 %v1824_v15, %v1823_v44 }
 0x59b   : > { %v2796_v20 = vadd.f32 %v1614_v40, %v2416_v33 }
 0x59c   : > { %v2799_v5 = vadd.f32 %v1609_v4, %v2412_v28  ;;  %2210 = vmatprep.subr.bf16.mxu1 %v2209_v31 }
 0x59d   : > { %v1624_v0 = vsel %vm704_vm1, %v2796_v20, 0.0  ;;  %2212 = vmatpush3.bf16.msra.mxu1 %v2209_v31 }
 0x59e   : > { %1625 = vadd.xlane.f32.xlu1 %v1624_v0  ;;  %v1621_v36 = vsel %vm704_vm1, %v2799_v5, 0.0 }
 0x59f   : > { %1622 = vadd.xlane.f32.xlu0 %v1621_v36 }
 0x62b   : > { %v1626_v6 = vpop.xlane.xlu1 %1625 }
 0x62c   : > { %v1628_v18 = vmul.f32 0.03125, %v1626_v6  ;;  %v1623_v7 = vpop.xlane.xlu0 %1622 }
 0x62d   : > { %v1627_v63 = vmul.f32 0.03125, %v1623_v7 }
 0x62e   : > { %v1630_v39 = vsub.f32 %v2796_v20, %v1628_v18 }
 0x62f   : > { %v1629_v33 = vsub.f32 %v2799_v5, %v1627_v63 }
 0x630   : > { %v1632_v46 = vmul.f32 %v1630_v39, %v1630_v39 }
 0x631   : > { %v1631_v8 = vmul.f32 %v1629_v33, %v1629_v33 }
 0x632   : > { %v1636_v28 = vsel %vm704_vm1, %v1632_v46, 0.0 }
 0x633   : > { %1637 = vadd.xlane.f32.xlu1 %v1636_v28  ;;  %v1633_v9 = vsel %vm704_vm1, %v1631_v8, 0.0 }
 0x634   : > { %1634 = vadd.xlane.f32.xlu0 %v1633_v9 }
 0x6c0   : > { %v1638_v32 = vpop.xlane.xlu1 %1637 }
 0x6c1   : > { %v1640_v17 = vmul.f32 0.03125, %v1638_v32  ;;  %v1635_v53 = vpop.xlane.xlu0 %1634 }
 0x6c2   : > { %v1639_v26 = vmul.f32 0.03125, %v1635_v53 }
 0x6c3   : > { %v1642_v19 = vadd.f32 1e-05, %v1640_v17 }
 0x6c4   : > { %v1641_v56 = vadd.f32 1e-05, %v1639_v26 }
 0x6c5   : > { %2238 = vrsqrt.f32 %v1642_v19 }
 0x6c6   : > { %2240 = vrsqrt.f32 %v1641_v56 }
 0x6cf   : > { %v2239_v25 = vpop.eup %2238 }
 0x6d0   : > { %v2241_v50 = vpop.eup %2240  ;;  %v1646_v62 = vmul.f32 %v2239_v25, %v1630_v39 }
 0x6d1   : > { %v1645_v23 = vmul.f32 %v2241_v50, %v1629_v33 }
 0x6d2   : > { %v1654_v24 = vmul.f32 %v1998_v58, %v1646_v62 }
 0x6d3   : > { %v1653_v34 = vmul.f32 %v1998_v58, %v1645_v23 }
 0x6d4   : > { %v1662_v27 = vadd.f32 %v1999_v30, %v1654_v24 }
 0x6d5   : > { %v1661_v22 = vadd.f32 %v1999_v30, %v1653_v34 }
 0x6d7   : > { %2103 = vmatprep.mubr.msk.f32.mxu0 %vm704_vm1, %v1661_v22 }
 0x6d8   : > { %2104 = vmatmul.mubr.msk.f32.vlgmr.msra.gmra.mrb[4].mxu0 %vm704_vm1, %v1662_v27 }
 0x7ab   : > { %v2105_v40 = vpop.f32.mrb[4].mxu0 }
 0x7ac   : > { %v1752_v3 = vadd.f32 %v2105_v40, %v2000_v57  ;;  %v1746_v4 = vpop.f32.mrb[5].mxu0 }
 0x7ad   : > { %v1747_v0 = vadd.f32 %v2000_v57, %v1746_v4 }
 0x7ae   : > { %v1756_v36 = vmul.f32 0.70710677, %v1752_v3  ;;  %v1798_v45 = vmul.f32 0.5, %v1752_v3 }
 0x7af   : > { %v1755_v6 = vmul.f32 0.70710677, %v1747_v0  ;;  %v1797_v2 = vmul.f32 0.5, %v1747_v0 }
 0x7b0   : > { %v1758_v18 = vand.u32 2147483647, %v1756_v36  ;;  %vm1800_vm5 = vcmp.ge.f32.partialorder %v1756_v36, 0.0 }
 0x7b1   : > { %v1757_v7 = vand.u32 2147483647, %v1755_v6  ;;  %vm1799_vm6 = vcmp.ge.f32.partialorder %v1755_v6, 0.0 }
 0x7b2   : > { %v1760_v63 = vmul.f32 0.3275911, %v1758_v18  ;;  %v1786_v8 = vsub.f32 0.0, %v1758_v18 }
 0x7b3   : > { %v1759_v39 = vmul.f32 0.3275911, %v1757_v7  ;;  %v1785_v28 = vsub.f32 0.0, %v1757_v7 }
 0x7b4   : > { %v1762_v33 = vadd.f32 1.0, %v1760_v63  ;;  %v1788_v54 = vmul.f32 %v1786_v8, %v1758_v18 }
 0x7b5   : > { %v1761_v46 = vadd.f32 1.0, %v1759_v39  ;;  %v1787_v11 = vmul.f32 %v1785_v28, %v1757_v7 }
 0x7b6   : > { %2242 = vrcp.f32 %v1762_v33  ;;  %v1791_v32 = vmul.f32 1.442695, %v1788_v54 }
 0x7b7   : > { %2244 = vrcp.f32 %v1761_v46  ;;  %v1789_v26 = vmul.f32 1.442695, %v1787_v11 }
 0x7b8   : > { %2246 = vpow2.f32 %v1791_v32 }
 0x7b9   : > { %2248 = vpow2.f32 %v1789_v26 }
 0x7c0   : > { %v2243_v9 = vpop.eup %2242 }
 0x7c1   : > { %v2245_v29 = vpop.eup %2244  ;;  %v1768_v10 = vmul.f32 1.0614054, %v2243_v9 }
 0x7c2   : > { %v1767_v47 = vmul.f32 1.0614054, %v2245_v29  ;;  %v2247_v52 = vpop.eup %2246 }
 0x7c3   : > { %v1770_v13 = vadd.f32 -1.4531521, %v1768_v10  ;;  %v2249_v42 = vpop.eup %2248 }
 0x7c4   : > { %v1769_v17 = vadd.f32 -1.4531521, %v1767_v47 }
 0x7c5   : > { %v1772_v53 = vmul.f32 %v2243_v9, %v1770_v13 }
 0x7c6   : > { %v1771_v19 = vmul.f32 %v2245_v29, %v1769_v17 }
 0x7c7   : > { %v1774_v56 = vadd.f32 1.4214138, %v1772_v53 }
 0x7c8   : > { %v1773_v25 = vadd.f32 1.4214138, %v1771_v19 }
 0x7c9   : > { %v1776_v58 = vmul.f32 %v2243_v9, %v1774_v56 }
 0x7ca   : > { %v1775_v50 = vmul.f32 %v2245_v29, %v1773_v25 }
 0x7cb   : > { %v1778_v62 = vadd.f32 -0.28449672, %v1776_v58 }
 0x7cc   : > { %v1777_v23 = vadd.f32 -0.28449672, %v1775_v50 }
 0x7cd   : > { %v1780_v30 = vmul.f32 %v2243_v9, %v1778_v62 }
 0x7ce   : > { %v1779_v24 = vmul.f32 %v2245_v29, %v1777_v23 }
 0x7cf   : > { %v1782_v34 = vadd.f32 0.2548296, %v1780_v30 }
 0x7d0   : > { %v1781_v22 = vadd.f32 0.2548296, %v1779_v24 }
 0x7d1   : > { %v1784_v27 = vmul.f32 %v2243_v9, %v1782_v34 }
 0x7d2   : > { %v1783_v14 = vmul.f32 %v2245_v29, %v1781_v22 }
 0x7d3   : > { %v1794_v1 = vmul.f32 %v2247_v52, %v1784_v27 }
 0x7d4   : > { %v1793_v37 = vmul.f32 %v2249_v42, %v1783_v14 }
 0x7d5   : > { %v1796_v43 = vsub.f32 1.0, %v1794_v1 }
 0x7d6   : > { %v1795_v55 = vsub.f32 1.0, %v1793_v37 }
 0x7d7   : > { %v1802_v51 = vsub.f32 0.0, %v1796_v43 }
 0x7d8   : > { %v1801_v49 = vsub.f32 0.0, %v1795_v55 }
 0x7d9   : > { %v1804_v12 = vsel %vm1800_vm5, %v1796_v43, %v1802_v51 }
 0x7da   : > { %v1806_v35 = vadd.f32 1.0, %v1804_v12  ;;  %v1803_v48 = vsel %vm1799_vm6, %v1795_v55, %v1801_v49 }
 0x7db   : > { %v1805_v59 = vadd.f32 1.0, %v1803_v48 }
 0x7dc   : > { %v1808_v21 = vmul.f32 %v1806_v35, %v1798_v45 }
 0x7dd   : > { %v1807_v38 = vmul.f32 %v1805_v59, %v1797_v2 }
 0x7df   : > { %2138 = vmatprep.mubr.f32.mxu1 %v1807_v38 }
 0x7e0   : > { %2139 = vmatmul.mubr.f32.vlgmr.msra.gmra.mrb[2].mxu1 %v1808_v21 }
 0x8b3   : > { %v2140_v16 = vpop.f32.mrb[2].mxu1 }
 0x8b4   : > { %v1904_v61 = vadd.f32 %v2140_v16, %v2003_v60  ;;  %v1898_v41 = vpop.f32.mrb[3].mxu1 }
 0x8b5   : > { %v1899_v44 = vadd.f32 %v2003_v60, %v1898_v41 }
 0x8b6   : > { %v1908_v15 = vadd.f32 %v1904_v61, %v2796_v20 }
 0x8b7   : > { %v1907_v31 = vadd.f32 %v1899_v44, %v2799_v5 }
 0x8b8   : > { %v1912_v57 = vcombine.high %v1908_v15, %v1908_v15  ;;  %1917 = vst.msk [vmem:[%s602_s22 + $0x8] sm:$0xf] %vm953_vm4, %v1908_v15 }
 0x8b9   : > { %v1911_v40 = vcombine.high %v1907_v31, %v1907_v31  ;;  %1915 = vst.msk [vmem:[%s602_s22] sm:$0xf] %vm953_vm4, %v1907_v31 }
 0x8ba   : > { %1918 = vst.msk [vmem:[%s602_s22 + $0xc] sm:$0xf] %vm953_vm4, %v1912_v57 }
 0x8bb   : > { %1916 = vst.msk [vmem:[%s602_s22 + $0x4] sm:$0xf] %vm953_vm4, %v1911_v40 }
 0x8bc PF: > { %s29_s0 = sadd.s32 1, %s2256_s0  }
 0x8bd   : > { %p26_p4 = scmp.ge.s32.totalorder %s29_s0, 4  }
 0x8bf   :  { %28 = sbr.rel (!%p26_p4) target bundleno = 5 (0x5), region = 127 }

// kernel: convvit_forward.3
= control target key start
LH: loop header
LB: loop body
LE: loop exit
PB: predicated region body
PF: predicated region fallthrough
CT: control target
= control target key end

     0   :  { %s6115_s0 = inlined_call_operand.vmem [shape: f32[2,64,48], index: 0, kind: input, shape index: {}]   ;;  %s6116_s1 = inlined_call_operand.vmem [shape: f32[48,16], index: 1, kind: input, shape index: {}]   ;;  %s6117_s2 = inlined_call_operand.vmem [shape: f32[1,16], index: 2, kind: input, shape index: {}]   ;;  %s6118_s3 = inlined_call_operand.vmem [shape: f32[1,16], index: 3, kind: input, shape index: {}]   ;;  %s6119_s4 = inlined_call_operand.vmem [shape: f32[1,16], index: 4, kind: input, shape index: {}]   ;;  %s6120_s5 = inlined_call_operand.vmem [shape: f32[1,1,16], index: 5, kind: input, shape index: {}]   ;;  %s6121_s6 = inlined_call_operand.vmem [shape: f32[1,1,16], index: 6, kind: input, shape index: {}]   ;;  %s6122_s7 = inlined_call_operand.vmem [shape: f32[1,16,16], index: 7, kind: input, shape index: {}]   ;;  %s6123_s8 = inlined_call_operand.vmem [shape: f32[1,1,16], index: 8, kind: input, shape index: {}]   ;;  %s6124_s9 = inlined_call_operand.vmem [shape: f32[1,25,16], index: 9, kind: input, shape index: {}]   ;;  %s6125_s10 = inlined_call_operand.vmem [shape: f32[1,1,16], index: 10, kind: input, shape index: {}]   ;;  %s6126_s11 = inlined_call_operand.vmem [shape: f32[1,16,16], index: 11, kind: input, shape index: {}]   ;;  %s6127_s12 = inlined_call_operand.vmem [shape: f32[1,1,16], index: 12, kind: input, shape index: {}]   ;;  %s6128_s13 = inlined_call_operand.vmem [shape: f32[1,1,16], index: 13, kind: input, shape index: {}]   ;;  %s6129_s14 = inlined_call_operand.vmem [shape: f32[1,1,16], index: 14, kind: input, shape index: {}]   ;;  %s6130_s15 = inlined_call_operand.vmem [shape: f32[1,16,64], index: 15, kind: input, shape index: {}]   ;;  %s6131_s16 = inlined_call_operand.vmem [shape: f32[1,1,64], index: 16, kind: input, shape index: {}]   ;;  %s6132_s17 = inlined_call_operand.vmem [shape: f32[1,64,16], index: 17, kind: input, shape index: {}]   ;;  %s6133_s18 = inlined_call_operand.vmem [shape: f32[1,1,16], index: 18, kind: input, shape index: {}]   ;;  %s6134_s19 = inlined_call_operand.vmem [shape: f32[2,8,8,16], index: 19, kind: output, shape index: {}]  }
   0x1   :  { %6148 = sst [smem:[#allocation13_spill]] %s6115_s0  ;;  %s4429_s0 = smov 0  }
   0x2   :  { %6149 = sst [smem:[#allocation14_spill]] %s6116_s1 }
   0x3   :  { %6150 = sst [smem:[#allocation15_spill]] %s6117_s2 }
   0x4   :  { %6151 = sst [smem:[#allocation16_spill]] %s6118_s3 }
   0x5 LB: > { %s3929_s30 = sadd.s32 4294967295, %s4326_s0   ;;  %p3933_p0 = scmp.ge.s32.totalorder %s4326_s0, 1  ;;  %s4326_s0 = sphi %s4429_s0, %s29_s0  }
   0x6   : > { %p537_p1 = scmp.lt.s32.totalorder %s4326_s0, 3 }
   0x8   : > { %p538_p2 = pnand %p3933_p0, %p537_p1 }
   0xa   : > { %541 = sbr.rel (%p538_p2) target bundleno = 2426 (0x97a), region = 96 }
  0x11   : > { %s6152_s1 = sld [smem:[#allocation14_spill]]  ;;  %p593_p3 = scmp.lt.s32.totalorder %s3929_s30, 1  ;;  %vm624_vm0 = vcmask 392192   ;;  %vm756_vm1 = vcmask 130048   ;;  %vm1379_vm10 = vcmask 125952   ;;  %vm1496_vm11 = vcmask 1046528  }
  0x12   : > { %s6153_s2 = sld [smem:[#allocation13_spill]]  ;;  %s6154_s3 = sld [smem:[#allocation15_spill]]  ;;  %vm1573_vm12 = vcmask 1045504   ;;  %vm1650_vm13 = vcmask 1044480   ;;  %vm1727_vm14 = vcmask 1043456  }
  0x13   : > { %s6177_s30 = smov (!%p593_p3, %s3929_s30), 1  ;;  %s6155_s28 = sld [smem:[#allocation16_spill]] }
  0x14   : > { %s3993_s20 = sshll.u32 %s6177_s30, 6 }
  0x17   : > { %v611_v0 = vld [vmem:[%s6152_s1] sm:$0xff]  ;;  %v612_v1 = vld [vmem:[%s6152_s1 + $0x8] sm:$0xff]  ;;  %v613_v2 = vld [vmem:[%s6152_s1 + $0x10] sm:$0xff] }
  0x18   : > { %v4155_v3 = vpack.c.bf16 %v612_v1, %v611_v0  ;;  %v614_v4 = vld [vmem:[%s6152_s1 + $0x18] sm:$0xff]  ;;  %v615_v6 = vld [vmem:[%s6152_s1 + $0x20] sm:$0xff]  ;;  %v616_v7 = vld [vmem:[%s6152_s1 + $0x28] sm:$0xff]  ;;  %s597_s23 = scalar_lea.vmem %s6153_s2, %s3993_s20 }
  0x19   : > { %v4159_v5 = vpack.c.bf16 %v614_v4, %v613_v2  ;;  %v4163_v8 = vpack.c.bf16 %v616_v7, %v615_v6  ;;  %v603_v9 = vld [vmem:[%s597_s23] sm:$0xff]  ;;  %v604_v10 = vld [vmem:[%s597_s23 + $0x8] sm:$0xff]  ;;  %v605_v11 = vld [vmem:[%s597_s23 + $0x10] sm:$0xff] }
  0x1a   : > { %4156 = vmatprep.subr.bf16.mxu0 %v4155_v3  ;;  %4067 = vmatprep.mubr.msk.f32.mxu0 %vm624_vm0, %v603_v9  ;;  %v606_v12 = vld [vmem:[%s597_s23 + $0x18] sm:$0xff]  ;;  %v607_v13 = vld [vmem:[%s597_s23 + $0x20] sm:$0xff]  ;;  %v608_v14 = vld [vmem:[%s597_s23 + $0x28] sm:$0xff] }
  0x1b   : > { %4158 = vmatpush3.bf16.msra.mxu0 %v4155_v3  ;;  %v609_v15 = vld [vmem:[%s597_s23 + $0x30] sm:$0xff]  ;;  %v610_v16 = vld [vmem:[%s597_s23 + $0x38] sm:$0xff]  ;;  %v3938_v17 = vld [vmem:[%s6154_s3] ss:$0 sm:$0xff]  ;;  %s602_s3 = scalar_lea.vmem %s6134_s19, %s3993_s20 }
  0x1c   : > { %4160 = vmatprep.subr.bf16.mxu0 %v4159_v5 }
  0x1f   : > { %4162 = vmatpush3.bf16.msra.mxu0 %v4159_v5 }
  0x20   : > { %4164 = vmatprep.subr.bf16.mxu0 %v4163_v8 }
  0x23   : > { %4166 = vmatpush3.bf16.msra.mxu0 %v4163_v8 }
  0x26   : > { %4068 = vmatmul.mubr.msk.f32.vlgmr.msra.gmra.mrb[0].mxu0 %vm624_vm0, %v604_v10 }
  0x27   : > { %4070 = vmatprep.mubr.msk.f32.mxu0 %vm624_vm0, %v605_v11 }
  0x2a   : > { %4071 = vmatmul.mubr.msk.f32.gmra.mrb[2].mxu0 %vm624_vm0, %v606_v12 }
  0x2b   : > { %4073 = vmatprep.mubr.msk.f32.mxu0 %vm624_vm0, %v607_v13 }
  0x2e   : > { %4074 = vmatmul.mubr.msk.f32.gmra.mrb[4].mxu0 %vm624_vm0, %v608_v14 }
  0x2f   : > { %4076 = vmatprep.mubr.msk.f32.mxu0 %vm624_vm0, %v609_v15 }
  0x32   : > { %4077 = vmatmul.mubr.msk.f32.gmra.mrb[6].mxu0 %vm624_vm0, %v610_v16 }
  0xf9   : > { %v4069_v18 = vpop.f32.mrb[0].mxu0 }
  0xfa   : > { %v715_v19 = vpop.f32.mrb[1].mxu0  ;;  %v721_v21 = vadd.f32 %v4069_v18, %v3938_v17 }
  0xfb   : > { %v716_v20 = vadd.f32 %v3938_v17, %v715_v19 }
  0xfc   : > { %v760_v29 = vsel %vm756_vm1, %v721_v21, 0.0 }
  0xfd   : > { %v4072_v22 = vpop.f32.mrb[2].mxu0  ;;  %v757_v23 = vsel %vm756_vm1, %v716_v20, 0.0 }
  0xfe   : > { %v725_v24 = vpop.f32.mrb[3].mxu0  ;;  %758 = vadd.xlane.f32.xlu0 %v757_v23  ;;  %v731_v26 = vadd.f32 %v4072_v22, %v3938_v17 }
  0xff   : > { %v726_v25 = vadd.f32 %v3938_v17, %v725_v24 }
 0x100   : > { %v766_v34 = vsel %vm756_vm1, %v731_v26, 0.0 }
 0x101   : > { %v4075_v27 = vpop.f32.mrb[4].mxu0  ;;  %v763_v28 = vsel %vm756_vm1, %v726_v25, 0.0 }
 0x102   : > { %v735_v30 = vpop.f32.mrb[5].mxu0  ;;  %764 = vadd.xlane.f32.xlu1 %v763_v28  ;;  %761 = vadd.xlane.f32.xlu0 %v760_v29  ;;  %v741_v32 = vadd.f32 %v4075_v27, %v3938_v17 }
 0x103   : > { %v736_v31 = vadd.f32 %v3938_v17, %v735_v30 }
 0x104   : > { %v772_v39 = vsel %vm756_vm1, %v741_v32, 0.0 }
 0x105   : > { %v4078_v33 = vpop.f32.mrb[6].mxu0  ;;  %v769_v35 = vsel %vm756_vm1, %v736_v31, 0.0 }
 0x106   : > { %v745_v36 = vpop.f32.mrb[7].mxu0  ;;  %767 = vadd.xlane.f32.xlu1 %v766_v34  ;;  %770 = vadd.xlane.f32.xlu0 %v769_v35  ;;  %v751_v37 = vadd.f32 %v4078_v33, %v3938_v17 }
 0x107   : > { %v746_v38 = vadd.f32 %v3938_v17, %v745_v36 }
 0x108   : > { %v778_v41 = vsel %vm756_vm1, %v751_v37, 0.0 }
 0x109   : > { %v775_v40 = vsel %vm756_vm1, %v746_v38, 0.0 }
 0x10a   : > { %773 = vadd.xlane.f32.xlu1 %v772_v39  ;;  %776 = vadd.xlane.f32.xlu0 %v775_v40  ;;  %v4525_v39 = vld [vmem:[%s6155_s28] ss:$0 sm:$0xff] }
 0x10e   : > { %779 = vadd.xlane.f32.xlu1 %v778_v41 }
 0x18b   : > { %v759_v42 = vpop.xlane.xlu0 %758 }
 0x18c   : > { %v782_v43 = vmul.f32 0.0625, %v759_v42 }
 0x18e   : > { %v4482_v44 = vsub.f32 %v716_v20, %v782_v43 }
 0x18f   : > { %v765_v45 = vpop.xlane.xlu1 %764  ;;  %v762_v46 = vpop.xlane.xlu0 %761 }
 0x190   : > { %v784_v47 = vmul.f32 0.0625, %v765_v45  ;;  %v783_v48 = vmul.f32 0.0625, %v762_v46  ;;  %v798_v49 = vmul.f32 %v4482_v44, %v4482_v44  ;;  %v4531_v45 = vld [vmem:[%s6119_s4] ss:$0 sm:$0xff] }
 0x192   : > { %v4486_v50 = vsub.f32 %v726_v25, %v784_v47  ;;  %v4488_v51 = vsub.f32 %v721_v21, %v783_v48  ;;  %v806_v52 = vsel %vm756_vm1, %v798_v49, 0.0 }
 0x193   : > { %v768_v53 = vpop.xlane.xlu1 %767  ;;  %807 = vadd.xlane.f32.xlu0 %v806_v52  ;;  %v771_v54 = vpop.xlane.xlu0 %770 }
 0x194   : > { %v785_v55 = vmul.f32 0.0625, %v768_v53  ;;  %v786_v56 = vmul.f32 0.0625, %v771_v54  ;;  %v800_v57 = vmul.f32 %v4486_v50, %v4486_v50  ;;  %v799_v58 = vmul.f32 %v4488_v51, %v4488_v51 }
 0x196   : > { %v4495_v59 = vsub.f32 %v731_v26, %v785_v55  ;;  %v4497_v60 = vsub.f32 %v736_v31, %v786_v56  ;;  %v812_v61 = vsel %vm756_vm1, %v800_v57, 0.0  ;;  %v809_v62 = vsel %vm756_vm1, %v799_v58, 0.0 }
 0x197   : > { %v774_v63 = vpop.xlane.xlu1 %773  ;;  %813 = vadd.xlane.f32.xlu0 %v812_v61  ;;  %810 = vadd.xlane.f32.xlu1 %v809_v62  ;;  %v777_v0 = vpop.xlane.xlu0 %776 }
 0x198   : > { %v787_v1 = vmul.f32 0.0625, %v774_v63  ;;  %v788_v2 = vmul.f32 0.0625, %v777_v0  ;;  %v801_v3 = vmul.f32 %v4495_v59, %v4495_v59  ;;  %v802_v4 = vmul.f32 %v4497_v60, %v4497_v60 }
 0x19a   : > { %v4505_v5 = vsub.f32 %v741_v32, %v787_v1  ;;  %v4507_v6 = vsub.f32 %v746_v38, %v788_v2  ;;  %v815_v7 = vsel %vm756_vm1, %v801_v3, 0.0  ;;  %v818_v8 = vsel %vm756_vm1, %v802_v4, 0.0 }
 0x19b   : > { %v780_v9 = vpop.xlane.xlu1 %779  ;;  %816 = vadd.xlane.f32.xlu1 %v815_v7  ;;  %819 = vadd.xlane.f32.xlu0 %v818_v8 }
 0x19c   : > { %v789_v10 = vmul.f32 0.0625, %v780_v9  ;;  %v803_v11 = vmul.f32 %v4505_v5, %v4505_v5  ;;  %v804_v12 = vmul.f32 %v4507_v6, %v4507_v6 }
 0x19e   : > { %v4515_v13 = vsub.f32 %v751_v37, %v789_v10  ;;  %v821_v14 = vsel %vm756_vm1, %v803_v11, 0.0  ;;  %v824_v15 = vsel %vm756_vm1, %v804_v12, 0.0 }
 0x19f   : > { %822 = vadd.xlane.f32.xlu1 %v821_v14  ;;  %825 = vadd.xlane.f32.xlu0 %v824_v15 }
 0x1a0   : > { %v805_v16 = vmul.f32 %v4515_v13, %v4515_v13 }
 0x1a2   : > { %v827_v17 = vsel %vm756_vm1, %v805_v16, 0.0 }
 0x1a3   : > { %828 = vadd.xlane.f32.xlu1 %v827_v17 }
 0x220   : > { %v808_v18 = vpop.xlane.xlu0 %807 }
 0x221   : > { %v830_v19 = vmul.f32 0.0625, %v808_v18 }
 0x223   : > { %v838_v20 = vadd.f32 1e-05, %v830_v19 }
 0x224   : > { %v811_v21 = vpop.xlane.xlu1 %810  ;;  %v814_v22 = vpop.xlane.xlu0 %813 }
 0x225   : > { %4206 = vrsqrt.f32 %v838_v20  ;;  %v831_v23 = vmul.f32 0.0625, %v811_v21  ;;  %v832_v24 = vmul.f32 0.0625, %v814_v22 }
 0x227   : > { %v839_v25 = vadd.f32 1e-05, %v831_v23  ;;  %v840_v26 = vadd.f32 1e-05, %v832_v24 }
 0x228   : > { %v817_v27 = vpop.xlane.xlu1 %816  ;;  %v820_v28 = vpop.xlane.xlu0 %819 }
 0x229   : > { %4208 = vrsqrt.f32 %v839_v25  ;;  %v833_v29 = vmul.f32 0.0625, %v817_v27  ;;  %v834_v30 = vmul.f32 0.0625, %v820_v28 }
 0x22a   : > { %4210 = vrsqrt.f32 %v840_v26 }
 0x22b   : > { %v841_v31 = vadd.f32 1e-05, %v833_v29  ;;  %v842_v32 = vadd.f32 1e-05, %v834_v30 }
 0x22c   : > { %v823_v33 = vpop.xlane.xlu1 %822  ;;  %v826_v34 = vpop.xlane.xlu0 %825 }
 0x22d   : > { %4212 = vrsqrt.f32 %v841_v31  ;;  %v835_v35 = vmul.f32 0.0625, %v823_v33  ;;  %v836_v36 = vmul.f32 0.0625, %v826_v34 }
 0x22e   : > { %4214 = vrsqrt.f32 %v842_v32 }
 0x22f   : > { %v4207_v37 = vpop.eup %4206  ;;  %v843_v38 = vadd.f32 1e-05, %v835_v35  ;;  %v844_v41 = vadd.f32 1e-05, %v836_v36 }
 0x230   : > { %v854_v40 = vmul.f32 %v4207_v37, %v4482_v44  ;;  %v829_v42 = vpop.xlane.xlu1 %828 }
 0x231   : > { %v837_v43 = vmul.f32 0.0625, %v829_v42  ;;  %4216 = vrsqrt.f32 %v843_v38 }
 0x232   : > { %v868_v46 = vmul.f32 %v4525_v39, %v854_v40  ;;  %4218 = vrsqrt.f32 %v844_v41 }
 0x233   : > { %v4209_v47 = vpop.eup %4208  ;;  %v845_v53 = vadd.f32 1e-05, %v837_v43 }
 0x234   : > { %v4211_v48 = vpop.eup %4210  ;;  %v855_v49 = vmul.f32 %v4209_v47, %v4488_v51  ;;  %v882_v52 = vadd.f32 %v4531_v45, %v868_v46 }
 0x235   : > { %v856_v44 = vmul.f32 %v4211_v48, %v4486_v50  ;;  %4220 = vrsqrt.f32 %v845_v53 }
 0x236   : > { %v4537_v54 = vmul.f32 0.70710677, %v882_v52  ;;  %v869_v55 = vmul.f32 %v4525_v39, %v855_v49  ;;  %v4576_v32 = vmul.f32 0.5, %v882_v52 }
 0x237   : > { %v4213_v56 = vpop.eup %4212  ;;  %v870_v57 = vmul.f32 %v4525_v39, %v856_v44 }
 0x238   : > { %v4215_v58 = vpop.eup %4214  ;;  %v857_v61 = vmul.f32 %v4213_v56, %v4495_v59  ;;  %v898_v62 = vand.u32 2147483647, %v4537_v54  ;;  %v883_v51 = vadd.f32 %v4531_v45, %v869_v55  ;;  %vm1066_vm2 = vcmp.ge.f32.partialorder %v4537_v54, 0.0 }
 0x239   : > { %v858_v63 = vmul.f32 %v4215_v58, %v4497_v60  ;;  %v884_v50 = vadd.f32 %v4531_v45, %v870_v57 }
 0x23a   : > { %v906_v0 = vmul.f32 0.3275911, %v898_v62  ;;  %v4546_v1 = vmul.f32 0.70710677, %v883_v51  ;;  %v871_v3 = vmul.f32 %v4525_v39, %v857_v61  ;;  %v1010_v11 = vsub.f32 0.0, %v898_v62 }
 0x23b   : > { %v4548_v2 = vmul.f32 0.70710677, %v884_v50  ;;  %v872_v4 = vmul.f32 %v4525_v39, %v858_v63  ;;  %v4217_v8 = vpop.eup %4216  ;;  %v4590_v43 = vmul.f32 0.5, %v883_v51  ;;  %v4594_v49 = vmul.f32 0.5, %v884_v50 }
 0x23c   : > { %v914_v7 = vadd.f32 1.0, %v906_v0  ;;  %v899_v59 = vand.u32 2147483647, %v4546_v1  ;;  %v4219_v10 = vpop.eup %4218  ;;  %v4555_v14 = vadd.f32 %v4531_v45, %v871_v3  ;;  %v859_v16 = vmul.f32 %v4217_v8, %v4505_v5 }
 0x23d   : > { %v900_v9 = vand.u32 2147483647, %v4548_v2  ;;  %v4558_v15 = vadd.f32 %v4531_v45, %v872_v4  ;;  %v860_v18 = vmul.f32 %v4219_v10, %v4507_v6  ;;  %v1018_v23 = vmul.f32 %v1010_v11, %v898_v62 }
 0x23e   : > { %4222 = vrcp.f32 %v914_v7  ;;  %v907_v60 = vmul.f32 0.3275911, %v899_v59  ;;  %v4563_v20 = vmul.f32 0.70710677, %v4555_v14  ;;  %v1011_v25 = vsub.f32 0.0, %v899_v59 }
 0x23f   : > { %v908_v12 = vmul.f32 0.3275911, %v900_v9  ;;  %v4566_v21 = vmul.f32 0.70710677, %v4558_v15  ;;  %v4221_v22 = vpop.eup %4220  ;;  %v873_v5 = vmul.f32 %v4525_v39, %v859_v16  ;;  %v874_v6 = vmul.f32 %v4525_v39, %v860_v18 }
 0x240   : > { %v915_v17 = vadd.f32 1.0, %v907_v60  ;;  %v901_v24 = vand.u32 2147483647, %v4563_v20  ;;  %v861_v28 = vmul.f32 %v4221_v22, %v4515_v13  ;;  %v1026_v31 = vmul.f32 1.442695, %v1018_v23 }
 0x241   : > { %v916_v19 = vadd.f32 1.0, %v908_v12  ;;  %v902_v26 = vand.u32 2147483647, %v4566_v21  ;;  %v4574_v30 = vadd.f32 %v4531_v45, %v873_v5  ;;  %v4579_v34 = vadd.f32 %v4531_v45, %v874_v6 }
 0x242   : > { %4224 = vrcp.f32 %v915_v17  ;;  %v909_v27 = vmul.f32 0.3275911, %v901_v24  ;;  %v1019_v36 = vmul.f32 %v1011_v25, %v899_v59  ;;  %v1012_v37 = vsub.f32 0.0, %v900_v9 }
 0x243   : > { %4226 = vrcp.f32 %v916_v19  ;;  %v910_v29 = vmul.f32 0.3275911, %v902_v26  ;;  %v4584_v40 = vmul.f32 0.70710677, %v4574_v30  ;;  %v1013_v41 = vsub.f32 0.0, %v901_v24 }
 0x244   : > { %v917_v33 = vadd.f32 1.0, %v909_v27  ;;  %v4588_v42 = vmul.f32 0.70710677, %v4579_v34  ;;  %v875_v47 = vmul.f32 %v4525_v39, %v861_v28  ;;  %v1014_v52 = vsub.f32 0.0, %v902_v26 }
 0x245   : > { %v918_v38 = vadd.f32 1.0, %v910_v29  ;;  %v903_v46 = vand.u32 2147483647, %v4584_v40  ;;  %v1028_v55 = vmul.f32 1.442695, %v1019_v36  ;;  %v1020_v56 = vmul.f32 %v1012_v37, %v900_v9 }
 0x246   : > { %4228 = vrcp.f32 %v917_v33  ;;  %v904_v44 = vand.u32 2147483647, %v4588_v42  ;;  %v1021_v51 = vmul.f32 %v1013_v41, %v901_v24  ;;  %v4605_v3 = vadd.f32 %v4531_v45, %v875_v47 }
 0x247   : > { %4230 = vrcp.f32 %v918_v38  ;;  %v911_v57 = vmul.f32 0.3275911, %v903_v46  ;;  %v1015_v0 = vsub.f32 0.0, %v903_v46  ;;  %v1022_v59 = vmul.f32 %v1014_v52, %v902_v26 }
 0x248   : > { %v4581_v35 = vpop.eup %4222  ;;  %4232 = vpow2.f32 %v1026_v31  ;;  %v912_v39 = vmul.f32 0.3275911, %v904_v44  ;;  %v1030_v10 = vmul.f32 1.442695, %v1020_v56  ;;  %v4608_v60 = vmul.f32 0.70710677, %v4605_v3 }
 0x249   : > { %v938_v13 = vmul.f32 1.0614054, %v4581_v35  ;;  %v919_v50 = vadd.f32 1.0, %v911_v57  ;;  %v1016_v16 = vsub.f32 0.0, %v904_v44  ;;  %v1032_v45 = vmul.f32 1.442695, %v1021_v51 }
 0x24a   : > { %v920_v8 = vadd.f32 1.0, %v912_v39  ;;  %v1023_v18 = vmul.f32 %v1015_v0, %v903_v46  ;;  %v905_v19 = vand.u32 2147483647, %v4608_v60  ;;  %v1034_v25 = vmul.f32 1.442695, %v1022_v59 }
 0x24b   : > { %v946_v48 = vadd.f32 -1.4531521, %v938_v13  ;;  %4234 = vrcp.f32 %v919_v50  ;;  %v1024_v33 = vmul.f32 %v1016_v16, %v904_v44  ;;  %vm1067_vm3 = vcmp.ge.f32.partialorder %v4546_v1, 0.0 }
 0x24c   : > { %v4597_v53 = vpop.eup %4224  ;;  %4236 = vrcp.f32 %v920_v8  ;;  %v913_v6 = vmul.f32 0.3275911, %v905_v19  ;;  %v1036_v13 = vmul.f32 1.442695, %v1023_v18  ;;  %v1017_v56 = vsub.f32 0.0, %v905_v19 }
 0x24d   : > { %v4599_v58 = vpop.eup %4226  ;;  %v954_v61 = vmul.f32 %v4581_v35, %v946_v48  ;;  %v939_v62 = vmul.f32 1.0614054, %v4597_v53  ;;  %4238 = vpow2.f32 %v1028_v55  ;;  %vm1068_vm4 = vcmp.ge.f32.partialorder %v4548_v2, 0.0 }
 0x24e   : > { %v940_v63 = vmul.f32 1.0614054, %v4599_v58  ;;  %4240 = vpow2.f32 %v1030_v10  ;;  %v921_v41 = vadd.f32 1.0, %v913_v6  ;;  %v1025_v10 = vmul.f32 %v1017_v56, %v905_v19 }
 0x24f   : > { %v962_v4 = vadd.f32 1.4214138, %v954_v61  ;;  %v947_v7 = vadd.f32 -1.4531521, %v939_v62  ;;  %4242 = vpow2.f32 %v1032_v45  ;;  %vm1069_vm5 = vcmp.ge.f32.partialorder %v4563_v20, 0.0 }
 0x250   : > { %v948_v9 = vadd.f32 -1.4531521, %v940_v63  ;;  %v4614_v22 = vpop.eup %4228  ;;  %4244 = vrcp.f32 %v921_v41  ;;  %v1038_v63 = vmul.f32 1.442695, %v1024_v33  ;;  %vm1070_vm6 = vcmp.ge.f32.partialorder %v4566_v21, 0.0 }
 0x251   : > { %v970_v11 = vmul.f32 %v4581_v35, %v962_v4  ;;  %v955_v12 = vmul.f32 %v4597_v53, %v947_v7  ;;  %v4616_v26 = vpop.eup %4230  ;;  %v941_v27 = vmul.f32 1.0614054, %v4614_v22  ;;  %4246 = vpow2.f32 %v1034_v25 }
 0x252   : > { %v956_v17 = vmul.f32 %v4599_v58, %v948_v9  ;;  %v942_v31 = vmul.f32 1.0614054, %v4616_v26  ;;  %v4233_v36 = vpop.eup %4232  ;;  %4248 = vpow2.f32 %v1036_v13  ;;  %vm1071_vm7 = vcmp.ge.f32.partialorder %v4584_v40, 0.0 }
 0x253   : > { %v978_v23 = vadd.f32 -0.28449672, %v970_v11  ;;  %v963_v24 = vadd.f32 1.4214138, %v955_v12  ;;  %v949_v38 = vadd.f32 -1.4531521, %v941_v27  ;;  %4250 = vpow2.f32 %v1038_v63 }
 0x254   : > { %v964_v5 = vadd.f32 1.4214138, %v956_v17  ;;  %v950_v48 = vadd.f32 -1.4531521, %v942_v31  ;;  %v1040_v31 = vmul.f32 1.442695, %v1025_v10 }
 0x255   : > { %v986_v28 = vmul.f32 %v4581_v35, %v978_v23  ;;  %v971_v29 = vmul.f32 %v4597_v53, %v963_v24  ;;  %v957_v55 = vmul.f32 %v4614_v22, %v949_v38  ;;  %v4628_v62 = vpop.eup %4234  ;;  %vm1072_vm8 = vcmp.ge.f32.partialorder %v4588_v42, 0.0 }
 0x256   : > { %v972_v37 = vmul.f32 %v4599_v58, %v964_v5  ;;  %v958_v61 = vmul.f32 %v4616_v26, %v950_v48  ;;  %v4631_v50 = vpop.eup %4236  ;;  %v943_v59 = vmul.f32 1.0614054, %v4628_v62  ;;  %4252 = vpow2.f32 %v1040_v31 }
 0x257   : > { %v994_v46 = vadd.f32 0.2548296, %v986_v28  ;;  %v979_v47 = vadd.f32 -0.28449672, %v971_v29  ;;  %v965_v39 = vadd.f32 1.4214138, %v957_v55  ;;  %v4239_v11 = vpop.eup %4238 }
 0x258   : > { %v980_v52 = vadd.f32 -0.28449672, %v972_v37  ;;  %v966_v7 = vadd.f32 1.4214138, %v958_v61  ;;  %v944_v9 = vmul.f32 1.0614054, %v4631_v50  ;;  %v4241_v18 = vpop.eup %4240 }
 0x259   : > { %v1002_v57 = vmul.f32 %v4581_v35, %v994_v46  ;;  %v987_v44 = vmul.f32 %v4597_v53, %v979_v47  ;;  %v973_v8 = vmul.f32 %v4614_v22, %v965_v39  ;;  %v951_v45 = vadd.f32 -1.4531521, %v943_v59  ;;  %v4243_v33 = vpop.eup %4242 }
 0x25a   : > { %v988_v51 = vmul.f32 %v4599_v58, %v980_v52  ;;  %v974_v17 = vmul.f32 %v4616_v26, %v966_v7  ;;  %v952_v25 = vadd.f32 -1.4531521, %v944_v9  ;;  %v4647_v13 = vpop.eup %4244  ;;  %vm1073_vm9 = vcmp.ge.f32.partialorder %v4608_v60, 0.0 }
 0x25b   : > { %v1042_v0 = vmul.f32 %v4233_v36, %v1002_v57  ;;  %v995_v4 = vadd.f32 0.2548296, %v987_v44  ;;  %v981_v24 = vadd.f32 -0.28449672, %v973_v8  ;;  %v959_v19 = vmul.f32 %v4628_v62, %v951_v45  ;;  %v4247_v52 = vpop.eup %4246 }
 0x25c   : > { %v996_v35 = vadd.f32 0.2548296, %v988_v51  ;;  %v982_v6 = vadd.f32 -0.28449672, %v974_v17  ;;  %v945_v44 = vmul.f32 1.0614054, %v4647_v13  ;;  %v4249_v61 = vpop.eup %4248 }
 0x25d   : > { %v1050_v12 = vsub.f32 1.0, %v1042_v0  ;;  %v1003_v16 = vmul.f32 %v4597_v53, %v995_v4  ;;  %v989_v29 = vmul.f32 %v4614_v22, %v981_v24  ;;  %v960_v53 = vmul.f32 %v4631_v50, %v952_v25  ;;  %v4251_v1 = vpop.eup %4250 }
 0x25e   : > { %v1004_v23 = vmul.f32 %v4599_v58, %v996_v35  ;;  %v990_v58 = vmul.f32 %v4616_v26, %v982_v6  ;;  %v967_v38 = vadd.f32 1.4214138, %v959_v19  ;;  %v953_v59 = vadd.f32 -1.4531521, %v945_v44 }
 0x25f   : > { %v1074_v5 = vsub.f32 0.0, %v1050_v12  ;;  %v1043_v27 = vmul.f32 %v4239_v11, %v1003_v16  ;;  %v997_v47 = vadd.f32 0.2548296, %v989_v29  ;;  %v968_v48 = vadd.f32 1.4214138, %v960_v53 }
 0x260   : > { %v1044_v28 = vmul.f32 %v4241_v18, %v1004_v23  ;;  %v998_v56 = vadd.f32 0.2548296, %v990_v58  ;;  %v975_v57 = vmul.f32 %v4628_v62, %v967_v38  ;;  %v961_v17 = vmul.f32 %v4647_v13, %v953_v59 }
 0x261   : > { %v1082_v36 = vsel %vm1066_vm2, %v1050_v12, %v1074_v5  ;;  %v1051_v37 = vsub.f32 1.0, %v1043_v27  ;;  %v1005_v39 = vmul.f32 %v4614_v22, %v997_v47  ;;  %v976_v63 = vmul.f32 %v4631_v50, %v968_v48 }
 0x262   : > { %v1090_v41 = vadd.f32 1.0, %v1082_v36  ;;  %v1052_v46 = vsub.f32 1.0, %v1044_v28  ;;  %v1006_v4 = vmul.f32 %v4616_v26, %v998_v56  ;;  %v983_v7 = vadd.f32 -0.28449672, %v975_v57  ;;  %v4253_v56 = vpop.eup %4252 }
 0x263   : > { %v1075_v55 = vsub.f32 0.0, %v1051_v37  ;;  %v1045_v9 = vmul.f32 %v4243_v33, %v1005_v39  ;;  %v984_v12 = vadd.f32 -0.28449672, %v976_v63  ;;  %v969_v5 = vadd.f32 1.4214138, %v961_v17 }
 0x264   : > { %v4652_v54 = vmul.f32 %v1090_v41, %v4576_v32  ;;  %v1076_v51 = vsub.f32 0.0, %v1052_v46  ;;  %v1046_v22 = vmul.f32 %v4247_v52, %v1006_v4  ;;  %v991_v11 = vmul.f32 %v4628_v62, %v983_v7 }
 0x265   : > { %v1083_v0 = vsel %vm1067_vm3, %v1051_v37, %v1075_v55  ;;  %v1053_v26 = vsub.f32 1.0, %v1045_v9  ;;  %v992_v23 = vmul.f32 %v4631_v50, %v984_v12  ;;  %v977_v29 = vmul.f32 %v4647_v13, %v969_v5 }
 0x266   : > { %6156 = vst [vmem:[#allocation3_spill] sm:$0xff] %v4652_v54  ;;  %v1108_v35 = vsel %vm756_vm1, %v4652_v54, 0.0  ;;  %v1091_v8 = vadd.f32 1.0, %v1083_v0  ;;  %v1084_v32 = vsel %vm1068_vm4, %v1052_v46, %v1076_v51  ;;  %v1054_v2 = vsub.f32 1.0, %v1046_v22 }
 0x267   : > { %1109 = vadd.xlane.f32.xlu0 %v1108_v35  ;;  %v1092_v10 = vadd.f32 1.0, %v1084_v32  ;;  %v999_v18 = vadd.f32 0.2548296, %v991_v11  ;;  %v1077_v25 = vsub.f32 0.0, %v1053_v26  ;;  %v1000_v19 = vadd.f32 0.2548296, %v992_v23 }
 0x268   : > { %v4665_v16 = vmul.f32 %v1091_v8, %v4590_v43  ;;  %v1078_v27 = vsub.f32 0.0, %v1054_v2  ;;  %v1062_v37 = vmul.f32 0.5, %v4558_v15  ;;  %v1063_v57 = vmul.f32 0.5, %v4574_v30 }
 0x269   : > { %v4670_v45 = vmul.f32 %v1092_v10, %v4594_v49  ;;  %v1007_v6 = vmul.f32 %v4628_v62, %v999_v18  ;;  %v1061_v49 = vmul.f32 0.5, %v4555_v14  ;;  %v1085_v28 = vsel %vm1069_vm5, %v1053_v26, %v1077_v25 }
 0x26a   : > { %6157 = vst [vmem:[#allocation4_spill] sm:$0xff] %v4665_v16  ;;  %v1111_v24 = vsel %vm756_vm1, %v4665_v16, 0.0  ;;  %v1093_v53 = vadd.f32 1.0, %v1085_v28  ;;  %v1086_v31 = vsel %vm1070_vm6, %v1054_v2, %v1078_v27  ;;  %v1008_v36 = vmul.f32 %v4631_v50, %v1000_v19 }
 0x26b   : > { %6158 = vst [vmem:[#allocation5_spill] sm:$0xff] %v4670_v45  ;;  %1112 = vadd.xlane.f32.xlu1 %v1111_v24  ;;  %v1114_v43 = vsel %vm756_vm1, %v4670_v45, 0.0  ;;  %v1047_v33 = vmul.f32 %v4249_v61, %v1007_v6  ;;  %v1094_v58 = vadd.f32 1.0, %v1086_v31  ;;  %v985_v62 = vadd.f32 -0.28449672, %v977_v29 }
 0x26c   : > { %1115 = vadd.xlane.f32.xlu0 %v1114_v43  ;;  %v4685_v38 = vmul.f32 %v1093_v53, %v1061_v49  ;;  %v1048_v14 = vmul.f32 %v4251_v1, %v1008_v36  ;;  %v1064_v63 = vmul.f32 0.5, %v4579_v34  ;;  %v1065_v35 = vmul.f32 0.5, %v4605_v3 }
 0x26d   : > { %v1055_v41 = vsub.f32 1.0, %v1047_v33  ;;  %v4687_v46 = vmul.f32 %v1094_v58, %v1062_v37  ;;  %v993_v20 = vmul.f32 %v4647_v13, %v985_v62  ;;  %vm3728_vm4 = vcmask 523264  }
 0x26e   : > { %6159 = vst [vmem:[#allocation6_spill] sm:$0xff] %v4685_v38  ;;  %v1117_v21 = vsel %vm756_vm1, %v4685_v38, 0.0  ;;  %v1056_v48 = vsub.f32 1.0, %v1048_v14 }
 0x26f   : > { %6160 = vst [vmem:[#allocation7_spill] sm:$0xff] %v4687_v46  ;;  %v1079_v47 = vsub.f32 0.0, %v1055_v41  ;;  %1118 = vadd.xlane.f32.xlu1 %v1117_v21  ;;  %v1120_v50 = vsel %vm756_vm1, %v4687_v46, 0.0  ;;  %v1001_v15 = vadd.f32 0.2548296, %v993_v20 }
 0x270   : > { %1121 = vadd.xlane.f32.xlu0 %v1120_v50  ;;  %v1080_v55 = vsub.f32 0.0, %v1056_v48 }
 0x271   : > { %v1087_v52 = vsel %vm1071_vm7, %v1055_v41, %v1079_v47  ;;  %v1009_v61 = vmul.f32 %v4647_v13, %v1001_v15 }
 0x272   : > { %v1095_v44 = vadd.f32 1.0, %v1087_v52  ;;  %v1088_v51 = vsel %vm1072_vm8, %v1056_v48, %v1080_v55 }
 0x273   : > { %v1096_v0 = vadd.f32 1.0, %v1088_v51  ;;  %v1049_v4 = vmul.f32 %v4253_v56, %v1009_v61  ;;  %v1240_v56 = vld [vmem:[%s6122_s7] sm:$0xff] }
 0x274   : > { %v4698_v39 = vmul.f32 %v1095_v44, %v1063_v57  ;;  %v1241_v57 = vld [vmem:[%s6122_s7 + $0x8] sm:$0xff] }
 0x275   : > { %v4703_v7 = vmul.f32 %v1096_v0, %v1064_v63  ;;  %v1057_v59 = vsub.f32 1.0, %v1049_v4  ;;  %v4167_v44 = vpack.c.bf16 %v1241_v57, %v1240_v56 }
 0x276   : > { %6161 = vst [vmem:[#allocation8_spill] sm:$0xff] %v4698_v39  ;;  %v1123_v40 = vsel %vm756_vm1, %v4698_v39, 0.0 }
 0x277   : > { %6162 = vst [vmem:[#allocation9_spill] sm:$0xff] %v4703_v7  ;;  %1124 = vadd.xlane.f32.xlu1 %v1123_v40  ;;  %v1126_v30 = vsel %vm756_vm1, %v4703_v7, 0.0  ;;  %v1081_v42 = vsub.f32 0.0, %v1057_v59  ;;  %4168 = vmatprep.subr.bf16.mxu0 %v4167_v44 }
 0x278   : > { %1127 = vadd.xlane.f32.xlu0 %v1126_v30  ;;  %4195 = vmatprep.subr.bf16.mxu1 %v4167_v44 }
 0x279   : > { %v1089_v13 = vsel %vm1073_vm9, %v1057_v59, %v1081_v42  ;;  %4170 = vmatpush3.bf16.msra.mxu0 %v4167_v44  ;;  %4196 = vmatpush3.bf16.msra.mxu1 %v4167_v44 }
 0x27a   : > { %v1097_v34 = vadd.f32 1.0, %v1089_v13 }
 0x27c   : > { %v4709_v8 = vmul.f32 %v1097_v34, %v1065_v35 }
 0x27e   : > { %6163 = vst [vmem:[#allocation10_spill] sm:$0xff] %v4709_v8  ;;  %v1129_v32 = vsel %vm756_vm1, %v4709_v8, 0.0 }
 0x27f   : > { %1130 = vadd.xlane.f32.xlu1 %v1129_v32 }
 0x2f4   : > { %v1110_v9 = vpop.xlane.xlu0 %1109 }
 0x2f5   : > { %v1132_v10 = vmul.f32 0.0625, %v1110_v9 }
 0x2f7   : > { %v4714_v22 = vsub.f32 %v4652_v54, %v1132_v10 }
 0x2f8   : > { %v1113_v11 = vpop.xlane.xlu1 %1112 }
 0x2f9   : > { %v1133_v12 = vmul.f32 0.0625, %v1113_v11  ;;  %v1116_v1 = vpop.xlane.xlu0 %1115  ;;  %v1148_v60 = vmul.f32 %v4714_v22, %v4714_v22  ;;  %v3949_v11 = vld [vmem:[%s6120_s5] ss:$0 sm:$0xff] }
 0x2fa   : > { %v1134_v26 = vmul.f32 0.0625, %v1116_v1 }
 0x2fb   : > { %v4719_v3 = vsub.f32 %v4665_v16, %v1133_v12  ;;  %v1156_v17 = vsel %vm756_vm1, %v1148_v60, 0.0  ;;  %v3950_v60 = vld [vmem:[%s6121_s6] ss:$0 sm:$0xff] }
 0x2fc   : > { %v4723_v2 = vsub.f32 %v4670_v45, %v1134_v26  ;;  %1157 = vadd.xlane.f32.xlu0 %v1156_v17  ;;  %v1119_v24 = vpop.xlane.xlu1 %1118 }
 0x2fd   : > { %v1149_v18 = vmul.f32 %v4719_v3, %v4719_v3  ;;  %v1135_v5 = vmul.f32 0.0625, %v1119_v24  ;;  %v1122_v43 = vpop.xlane.xlu0 %1121 }
 0x2fe   : > { %v1150_v23 = vmul.f32 %v4723_v2, %v4723_v2  ;;  %v1136_v6 = vmul.f32 0.0625, %v1122_v43 }
 0x2ff   : > { %v1159_v25 = vsel %vm756_vm1, %v1149_v18, 0.0  ;;  %v4732_v19 = vsub.f32 %v4685_v38, %v1135_v5 }
 0x300   : > { %1160 = vadd.xlane.f32.xlu1 %v1159_v25  ;;  %v1162_v27 = vsel %vm756_vm1, %v1150_v23, 0.0  ;;  %v4735_v49 = vsub.f32 %v4687_v46, %v1136_v6 }
 0x301   : > { %1163 = vadd.xlane.f32.xlu0 %v1162_v27  ;;  %v1151_v28 = vmul.f32 %v4732_v19, %v4732_v19 }
 0x302   : > { %v1152_v29 = vmul.f32 %v4735_v49, %v4735_v49 }
 0x303   : > { %v1165_v31 = vsel %vm756_vm1, %v1151_v28, 0.0 }
 0x304   : > { %v1125_v53 = vpop.xlane.xlu1 %1124  ;;  %1166 = vadd.xlane.f32.xlu1 %v1165_v31  ;;  %v1168_v36 = vsel %vm756_vm1, %v1152_v29, 0.0 }
 0x305   : > { %v1137_v33 = vmul.f32 0.0625, %v1125_v53  ;;  %v1128_v37 = vpop.xlane.xlu0 %1127  ;;  %1169 = vadd.xlane.f32.xlu0 %v1168_v36 }
 0x306   : > { %v1138_v62 = vmul.f32 0.0625, %v1128_v37 }
 0x307   : > { %v4744_v58 = vsub.f32 %v4698_v39, %v1137_v33 }
 0x308   : > { %v4747_v41 = vsub.f32 %v4703_v7, %v1138_v62 }
 0x309   : > { %v1153_v14 = vmul.f32 %v4744_v58, %v4744_v58 }
 0x30a   : > { %v1154_v21 = vmul.f32 %v4747_v41, %v4747_v41 }
 0x30b   : > { %v1171_v20 = vsel %vm756_vm1, %v1153_v14, 0.0 }
 0x30c   : > { %1172 = vadd.xlane.f32.xlu1 %v1171_v20  ;;  %v1131_v47 = vpop.xlane.xlu1 %1130  ;;  %v1174_v48 = vsel %vm756_vm1, %v1154_v21, 0.0 }
 0x30d   : > { %v1139_v50 = vmul.f32 0.0625, %v1131_v47  ;;  %1175 = vadd.xlane.f32.xlu0 %v1174_v48 }
 0x30f   : > { %v4756_v15 = vsub.f32 %v4709_v8, %v1139_v50 }
 0x311   : > { %v1155_v52 = vmul.f32 %v4756_v15, %v4756_v15 }
 0x313   : > { %v1177_v55 = vsel %vm756_vm1, %v1155_v52, 0.0 }
 0x314   : > { %1178 = vadd.xlane.f32.xlu1 %v1177_v55 }
 0x389   : > { %v1158_v61 = vpop.xlane.xlu0 %1157 }
 0x38a   : > { %v1180_v51 = vmul.f32 0.0625, %v1158_v61 }
 0x38c   : > { %v1188_v63 = vadd.f32 1e-05, %v1180_v51 }
 0x38d   : > { %v1161_v0 = vpop.xlane.xlu1 %1160 }
 0x38e   : > { %4254 = vrsqrt.f32 %v1188_v63  ;;  %v1181_v4 = vmul.f32 0.0625, %v1161_v0  ;;  %v1164_v40 = vpop.xlane.xlu0 %1163 }
 0x38f   : > { %v1182_v59 = vmul.f32 0.0625, %v1164_v40 }
 0x390   : > { %v1189_v30 = vadd.f32 1e-05, %v1181_v4 }
 0x391   : > { %v1190_v42 = vadd.f32 1e-05, %v1182_v59  ;;  %v1167_v13 = vpop.xlane.xlu1 %1166  ;;  %v1440_v59 = vlaneseq }
 0x392   : > { %4256 = vrsqrt.f32 %v1189_v30  ;;  %v1183_v35 = vmul.f32 0.0625, %v1167_v13  ;;  %v1170_v34 = vpop.xlane.xlu0 %1169  ;;  %v1436_v13 = vld [vmem:[%s6124_s9] sm:$0xff] }
 0x393   : > { %4258 = vrsqrt.f32 %v1190_v42  ;;  %v1184_v32 = vmul.f32 0.0625, %v1170_v34  ;;  %v1441_v30 = vshrl.u32 %v1440_v59, 7 }
 0x394   : > { %v1191_v9 = vadd.f32 1e-05, %v1183_v35 }
 0x395   : > { %v1192_v12 = vadd.f32 1e-05, %v1184_v32  ;;  %v4819_v42 = vsub.s32 1, %v1441_v30  ;;  %v4827_v34 = vsub.s32 2, %v1441_v30 }
 0x396   : > { %4260 = vrsqrt.f32 %v1191_v9 }
 0x397   : > { %4262 = vrsqrt.f32 %v1192_v12  ;;  %v4825_v35 = vrot.slane %v1436_v13, %v4819_v42 }
 0x398   : > { %v4255_v10 = vpop.eup %4254 }
 0x399   : > { %v1204_v1 = vmul.f32 %v4255_v10, %v4714_v22  ;;  %v1173_v26 = vpop.xlane.xlu1 %1172  ;;  %v4829_v10 = vsub.s32 0, %v1441_v30 }
 0x39a   : > { %v1185_v23 = vmul.f32 0.0625, %v1173_v26  ;;  %v1176_v5 = vpop.xlane.xlu0 %1175 }
 0x39b   : > { %v1218_v17 = vmul.f32 %v3949_v11, %v1204_v1  ;;  %v1186_v6 = vmul.f32 0.0625, %v1176_v5  ;;  %v4834_v1 = vrot.slane %v1436_v13, %v4827_v34  ;;  %v4839_v26 = vrot.slane %v1436_v13, %v4829_v10 }
 0x39c   : > { %v4257_v18 = vpop.eup %4256  ;;  %v1193_v27 = vadd.f32 1e-05, %v1185_v23  ;;  %v4846_v5 = vsub.s32 4, %v1441_v30 }
 0x39d   : > { %v4259_v24 = vpop.eup %4258  ;;  %v1205_v25 = vmul.f32 %v4257_v18, %v4719_v3  ;;  %v1232_v43 = vadd.f32 %v3950_v60, %v1218_v17  ;;  %v1194_v22 = vadd.f32 1e-05, %v1186_v6  ;;  %6164 = vst [vmem:[#allocation11_spill] sm:$0xff] %v4839_v26 }
 0x39e   : > { %v1206_v28 = vmul.f32 %v4259_v24, %v4723_v2  ;;  %4264 = vrsqrt.f32 %v1193_v27 }
 0x39f   : > { %v1219_v29 = vmul.f32 %v3949_v11, %v1205_v25  ;;  %4083 = vmatprep.mubr.msk.f32.mxu0 %vm756_vm1, %v1232_v43  ;;  %4266 = vrsqrt.f32 %v1194_v22 }
 0x3a0   : > { %v1220_v53 = vmul.f32 %v3949_v11, %v1206_v28  ;;  %v4261_v36 = vpop.eup %4260 }
 0x3a1   : > { %v1233_v31 = vadd.f32 %v3950_v60, %v1219_v29  ;;  %v4263_v37 = vpop.eup %4262  ;;  %v1179_v3 = vpop.xlane.xlu1 %1178  ;;  %v1207_v62 = vmul.f32 %v4261_v36, %v4732_v19  ;;  %v4856_v36 = vsub.s32 6, %v1441_v30 }
 0x3a2   : > { %v1234_v33 = vadd.f32 %v3950_v60, %v1220_v53  ;;  %v1187_v14 = vmul.f32 0.0625, %v1179_v3  ;;  %v1208_v2 = vmul.f32 %v4263_v37, %v4735_v49  ;;  %v4853_v53 = vrot.slane %v1436_v13, %v4846_v5 }
 0x3a3   : > { %4084 = vmatmul.mubr.msk.f32.vlgmr.msra.gmra.mrb[8].mxu0 %vm756_vm1, %v1233_v31  ;;  %v1221_v20 = vmul.f32 %v3949_v11, %v1207_v62 }
 0x3a4   : > { %4086 = vmatprep.mubr.msk.f32.mxu1 %vm756_vm1, %v1234_v33  ;;  %v1195_v21 = vadd.f32 1e-05, %v1187_v14  ;;  %v1222_v47 = vmul.f32 %v3949_v11, %v1208_v2 }
 0x3a5   : > { %v1235_v48 = vadd.f32 %v3950_v60, %v1221_v20  ;;  %v4860_v20 = vsub.s32 5, %v1441_v30 }
 0x3a6   : > { %4268 = vrsqrt.f32 %v1195_v21  ;;  %v1236_v50 = vadd.f32 %v3950_v60, %v1222_v47  ;;  %v4863_v21 = vrot.slane %v1436_v13, %v4856_v36 }
 0x3a7   : > { %4087 = vmatmul.mubr.msk.f32.vlgmr.msra.gmra.mrb[0].mxu1 %vm756_vm1, %v1235_v48 }
 0x3a8   : > { %v4265_v52 = vpop.eup %4264  ;;  %4089 = vmatprep.mubr.msk.f32.mxu1 %vm756_vm1, %v1236_v50 }
 0x3a9   : > { %v1209_v55 = vmul.f32 %v4265_v52, %v4744_v58  ;;  %v4267_v56 = vpop.eup %4266  ;;  %v4328_v58 = vmov 0.0   ;;  %v4866_v52 = vsub.s32 7, %v1441_v30 }
 0x3aa   : > { %v1210_v19 = vmul.f32 %v4267_v56, %v4747_v41  ;;  %1380 = vst.msk [vmem:[#allocation2 + $0x8] sm:$0xf] %vm1379_vm10, %v4328_v58  ;;  %1382 = vst.msk [vmem:[#allocation2 + $0x18] sm:$0xf] %vm1379_vm10, %v4328_v58  ;;  %v3079_v41 = vld [vmem:[%s6126_s11] sm:$0xff] }
 0x3ab   : > { %v1223_v57 = vmul.f32 %v3949_v11, %v1209_v55  ;;  %1385 = vst.msk [vmem:[#allocation2 + $0x30] sm:$0xff] %vm756_vm1, %v4328_v58  ;;  %1378 = vst.msk [vmem:[#allocation2] sm:$0xff] %vm756_vm1, %v4328_v58 }
 0x3ac   : > { %v1224_v61 = vmul.f32 %v3949_v11, %v1210_v19  ;;  %1386 = vst.msk [vmem:[#allocation2 + $0x38] sm:$0xf] %vm1379_vm10, %v4328_v58  ;;  %1384 = vst.msk [vmem:[#allocation2 + $0x28] sm:$0xf] %vm1379_vm10, %v4328_v58 }
 0x3ad   : > { %v1237_v44 = vadd.f32 %v3950_v60, %v1223_v57  ;;  %1381 = vst.msk [vmem:[#allocation2 + $0x10] sm:$0xff] %vm756_vm1, %v4328_v58  ;;  %1383 = vst.msk [vmem:[#allocation2 + $0x20] sm:$0xff] %vm756_vm1, %v4328_v58  ;;  %v1437_v57 = vld [vmem:[%s6124_s9 + $0x8] sm:$0xff] }
 0x3ae   : > { %v1238_v49 = vadd.f32 %v3950_v60, %v1224_v61  ;;  %1387 = vst.msk [vmem:[#allocation2 + $0x40] sm:$0xff] %vm756_vm1, %v4328_v58  ;;  %1389 = vst.msk [vmem:[#allocation2 + $0x50] sm:$0xff] %vm756_vm1, %v4328_v58 }
 0x3af   : > { %4090 = vmatmul.mubr.msk.f32.gmra.mrb[2].mxu1 %vm756_vm1, %v1237_v44  ;;  %1388 = vst.msk [vmem:[#allocation2 + $0x48] sm:$0xf] %vm1379_vm10, %v4328_v58  ;;  %1390 = vst.msk [vmem:[#allocation2 + $0x58] sm:$0xf] %vm1379_vm10, %v4328_v58  ;;  %v4872_v44 = vrot.slane %v1436_v13, %v4860_v20 }
 0x3b0   : > { %v4269_v51 = vpop.eup %4268  ;;  %4092 = vmatprep.mubr.msk.f32.mxu1 %vm756_vm1, %v1238_v49  ;;  %1391 = vst.msk [vmem:[#allocation2 + $0x60] sm:$0xff] %vm756_vm1, %v4328_v58  ;;  %1393 = vst.msk [vmem:[#allocation2 + $0x70] sm:$0xff] %vm756_vm1, %v4328_v58 }
 0x3b1   : > { %v1211_v63 = vmul.f32 %v4269_v51, %v4756_v15  ;;  %1392 = vst.msk [vmem:[#allocation2 + $0x68] sm:$0xf] %vm1379_vm10, %v4328_v58  ;;  %1394 = vst.msk [vmem:[#allocation2 + $0x78] sm:$0xf] %vm1379_vm10, %v4328_v58  ;;  %v3080_v15 = vld [vmem:[%s6126_s11 + $0x8] sm:$0xff] }
 0x3b2   : > { %1395 = vst.msk [vmem:[#allocation2 + $0x80] sm:$0xff] %vm756_vm1, %v4328_v58  ;;  %1397 = vst.msk [vmem:[#allocation2 + $0x90] sm:$0xff] %vm756_vm1, %v4328_v58  ;;  %v4171_v40 = vpack.c.bf16 %v3080_v15, %v3079_v41  ;;  %v1412_v32 = vld [vmem:[#allocation2] sm:$0xff]  ;;  %v1413_v9 = vld [vmem:[#allocation2 + $0x8] sm:$0xf] }
 0x3b3   : > { %v1225_v0 = vmul.f32 %v3949_v11, %v1211_v63  ;;  %1396 = vst.msk [vmem:[#allocation2 + $0x88] sm:$0xf] %vm1379_vm10, %v4328_v58  ;;  %1398 = vst.msk [vmem:[#allocation2 + $0x98] sm:$0xf] %vm1379_vm10, %v4328_v58  ;;  %v1464_v11 = vmul.f32 %v4825_v35, %v1412_v32  ;;  %v1465_v12 = vmul.f32 %v4825_v35, %v1413_v9  ;;  %v1415_v56 = vld [vmem:[#allocation2 + $0x18] sm:$0xf] }
 0x3b4   : > { %1399 = vst.msk [vmem:[#allocation2 + $0xa0] sm:$0xff] %vm756_vm1, %v4328_v58  ;;  %1401 = vst.msk [vmem:[#allocation2 + $0xb0] sm:$0xff] %vm756_vm1, %v4328_v58  ;;  %4172 = vmatprep.subr.bf16.mxu1 %v4171_v40  ;;  %v1541_v23 = vmul.f32 %v4834_v1, %v1412_v32  ;;  %v1542_v24 = vmul.f32 %v4834_v1, %v1413_v9  ;;  %v1444_v43 = vmul.f32 %v4839_v26, %v1412_v32  ;;  %v1414_v55 = vld [vmem:[#allocation2 + $0x10] sm:$0xff] }
 0x3b5   : > { %v1239_v4 = vadd.f32 %v3950_v60, %v1225_v0  ;;  %1400 = vst.msk [vmem:[#allocation2 + $0xa8] sm:$0xf] %vm1379_vm10, %v4328_v58  ;;  %1402 = vst.msk [vmem:[#allocation2 + $0xb8] sm:$0xf] %vm1379_vm10, %v4328_v58  ;;  %4174 = vmatpush3.bf16.msra.mxu1 %v4171_v40  ;;  %v4836_v60 = vsub.s32 3, %v1441_v30  ;;  %v1497_v17 = vrot.slane %v1464_v11, 1  ;;  %v1695_v62 = vmul.f32 %v4853_v53, %v1412_v32 }
 0x3b6   : > { %v1498_v18 = vrot.slane %v1465_v12, 1  ;;  %v1574_v6 = vrot.slane %v1541_v23, 2  ;;  %v1575_v28 = vrot.slane %v1542_v24, 2  ;;  %v1696_v14 = vmul.f32 %v4853_v53, %v1413_v9 }
 0x3b7   : > { %4093 = vmatmul.mubr.msk.f32.gmra.mrb[4].mxu1 %vm756_vm1, %v1239_v4  ;;  %v4844_v25 = vrot.slane %v1436_v13, %v4836_v60  ;;  %v1728_v48 = vrot.slane %v1695_v62, 4  ;;  %v1792_v49 = vmul.f32 %v4863_v21, %v1414_v55  ;;  %v1793_v51 = vmul.f32 %v4863_v21, %v1415_v56 }
 0x3b8   : > { %v1499_v27 = vsel %vm1496_vm11, %v1497_v17, %v1498_v18  ;;  %v1576_v33 = vsel %vm1573_vm12, %v1574_v6, %v1575_v28  ;;  %v1729_v50 = vrot.slane %v1696_v14, 4  ;;  %v4878_v63 = vrot.slane %v1436_v13, %v4866_v52  ;;  %v4898_v6 = vld [vmem:[%s6123_s8] ss:$0 sm:$0xff] }
 0x3b9   : > { %6165 = vst [vmem:[#allocation12_spill] sm:$0xff] %v4844_v25  ;;  %v1618_v29 = vmul.f32 %v4844_v25, %v1412_v32  ;;  %v1619_v22 = vmul.f32 %v4844_v25, %v1413_v9  ;;  %v1529_v31 = vadd.f32 %v1499_v27, %v1444_v43  ;;  %v4881_v0 = vrot.slane %v1437_v57, %v4829_v10 }
 0x3ba   : > { %v1730_v61 = vsel %vm1727_vm14, %v1728_v48, %v1729_v50  ;;  %v1772_v58 = vmul.f32 %v4872_v44, %v1414_v55  ;;  %v1824_v41 = vrot.slane %v1792_v49, 1  ;;  %v1825_v15 = vrot.slane %v1793_v51, 1 }
 0x3bb   : > { %v1651_v37 = vrot.slane %v1618_v29, 3  ;;  %v1652_v3 = vrot.slane %v1619_v22, 3  ;;  %v1606_v2 = vadd.f32 %v1576_v33, %v1529_v31  ;;  %v1868_v40 = vmul.f32 %v4878_v63, %v1414_v55 }
 0x3bc   : > { %v1869_v59 = vmul.f32 %v4878_v63, %v1415_v56  ;;  %v1944_v30 = vmul.f32 %v4881_v0, %v1414_v55  ;;  %v1945_v32 = vmul.f32 %v4881_v0, %v1415_v56  ;;  %v4889_v9 = vrot.slane %v1437_v57, %v4819_v42 }
 0x3bd   : > { %v1653_v47 = vsel %vm1650_vm13, %v1651_v37, %v1652_v3  ;;  %v1826_v11 = vsel %vm1496_vm11, %v1824_v41, %v1825_v15  ;;  %v1900_v12 = vrot.slane %v1868_v40, 2  ;;  %v1466_v18 = vmul.f32 %v4825_v35, %v1414_v55 }
 0x3be   : > { %v1683_v19 = vadd.f32 %v1653_v47, %v1606_v2  ;;  %v1901_v17 = vrot.slane %v1869_v59, 2  ;;  %v1467_v23 = vmul.f32 %v4825_v35, %v1415_v56  ;;  %v1976_v24 = vrot.slane %v1944_v30, 3 }
 0x3bf   : > { %v1977_v43 = vrot.slane %v1945_v32, 3  ;;  %v2020_v27 = vmul.f32 %v4889_v9, %v1414_v55  ;;  %v2021_v22 = vmul.f32 %v4889_v9, %v1415_v56  ;;  %v1500_v33 = vrot.slane %v1466_v18, 1 }
 0x3c0   : > { %v1760_v4 = vadd.f32 %v1730_v61, %v1683_v19  ;;  %v1902_v29 = vsel %vm1573_vm12, %v1900_v12, %v1901_v17  ;;  %v1501_v37 = vrot.slane %v1467_v23, 1  ;;  %v1543_v3 = vmul.f32 %v4834_v1, %v1414_v55 }
 0x3c1   : > { %v1544_v62 = vmul.f32 %v4834_v1, %v1415_v56  ;;  %v1978_v47 = vsel %vm1650_vm13, %v1976_v24, %v1977_v43  ;;  %v2052_v48 = vrot.slane %v2020_v27, 4  ;;  %v1445_v50 = vmul.f32 %v4839_v26, %v1414_v55 }
 0x3c2   : > { %v1780_v13 = vadd.f32 %v1772_v58, %v1760_v4  ;;  %v1620_v49 = vmul.f32 %v4844_v25, %v1414_v55  ;;  %v1621_v51 = vmul.f32 %v4844_v25, %v1415_v56  ;;  %v1438_v4 = vld [vmem:[%s6124_s9 + $0x10] sm:$0xff]  ;;  %v2053_v58 = vrot.slane %v2021_v22, 4 }
 0x3c3   : > { %v4915_v41 = vrot.slane %v1437_v57, %v4827_v34  ;;  %v1697_v15 = vmul.f32 %v4853_v53, %v1414_v55  ;;  %v1698_v40 = vmul.f32 %v4853_v53, %v1415_v56  ;;  %v4921_v59 = vrot.slane %v1437_v57, %v4836_v60 }
 0x3c4   : > { %v1856_v28 = vadd.f32 %v1826_v11, %v1780_v13  ;;  %v1502_v30 = vsel %vm1496_vm11, %v1500_v33, %v1501_v37  ;;  %v1577_v32 = vrot.slane %v1543_v3, 2  ;;  %v1578_v13 = vrot.slane %v1544_v62, 2 }
 0x3c5   : > { %v4925_v11 = vrot.slane %v1437_v57, %v4846_v5  ;;  %v4928_v12 = vrot.slane %v1437_v57, %v4860_v20  ;;  %v4931_v17 = vrot.slane %v1437_v57, %v4856_v36  ;;  %v4934_v55 = vrot.slane %v1437_v57, %v4866_v52 }
 0x3c6   : > { %v1932_v61 = vadd.f32 %v1902_v29, %v1856_v28  ;;  %v4937_v18 = vrot.slane %v1438_v4, %v4829_v10  ;;  %v1654_v23 = vrot.slane %v1620_v49, 3  ;;  %v1655_v24 = vrot.slane %v1621_v51, 3 }
 0x3c7   : > { %v2054_v27 = vsel %vm1727_vm14, %v2052_v48, %v2053_v58  ;;  %v1530_v28 = vadd.f32 %v1502_v30, %v1445_v50  ;;  %v1731_v29 = vrot.slane %v1697_v15, 4  ;;  %v1732_v22 = vrot.slane %v1698_v40, 4 }
 0x3c8   : > { %v2008_v56 = vadd.f32 %v1978_v47, %v1932_v61  ;;  %v4942_v37 = vrot.slane %v1438_v4, %v4819_v42  ;;  %v4945_v57 = vrot.slane %v1438_v4, %v4827_v34  ;;  %v1579_v10 = vsel %vm1573_vm12, %v1577_v32, %v1578_v13 }
 0x3c9   : > { %v4950_v62 = vrot.slane %v1438_v4, %v4836_v60  ;;  %v4964_v48 = vrot.slane %v1438_v4, %v4856_v36  ;;  %v4967_v50 = vrot.slane %v1438_v4, %v4866_v52  ;;  %v1656_v60 = vsel %vm1650_vm13, %v1654_v23, %v1655_v24 }
 0x3ca   : > { %v2084_v34 = vadd.f32 %v2054_v27, %v2008_v56  ;;  %v1607_v49 = vadd.f32 %v1579_v10, %v1530_v28  ;;  %v1733_v36 = vsel %vm1727_vm14, %v1731_v29, %v1732_v22 }
 0x476   : > { %v4085_v31 = vpop.f32.mrb[8].mxu0 }
 0x477   : > { %v1345_v14 = vadd.f32 %v4085_v31, %v4898_v6  ;;  %v1339_v2 = vpop.f32.mrb[9].mxu0 }
 0x478   : > { %v1340_v19 = vadd.f32 %v4898_v6, %v1339_v2  ;;  %v4956_v2 = vrot.slane %v1438_v4, %v4860_v20 }
 0x479   : > { %1405 = vst.msk [vmem:[#allocation2 + $0x32] sm:$0xff] %vm756_vm1, %v1345_v14  ;;  %v4953_v14 = vrot.slane %v1438_v4, %v4846_v5 }
 0x47a   : > { %1404 = vst.msk [vmem:[#allocation2 + $0x22] sm:$0xff] %vm756_vm1, %v1340_v19  ;;  %v4088_v43 = vpop.f32.mrb[0].mxu1 }
 0x47b   : > { %v1355_v31 = vadd.f32 %v4088_v43, %v4898_v6  ;;  %v1349_v33 = vpop.f32.mrb[1].mxu1 }
 0x47c   : > { %v1350_v3 = vadd.f32 %v4898_v6, %v1349_v33 }
 0x47d   : > { %1407 = vst.msk [vmem:[#allocation2 + $0x52] sm:$0xff] %vm756_vm1, %v1355_v31  ;;  %v1684_v31 = vadd.f32 %v1656_v60, %v1607_v49 }
 0x47e   : > { %1406 = vst.msk [vmem:[#allocation2 + $0x42] sm:$0xff] %vm756_vm1, %v1350_v3 }
 0x480   : > { %v4958_v47 = vld [vmem:[#allocation2 + $0x30] sm:$0xff]  ;;  %v4960_v42 = vld [vmem:[#allocation2 + $0x38] sm:$0xf] }
 0x481   : > { %v4970_v5 = vld [vmem:[#allocation2 + $0x20] sm:$0xff]  ;;  %v4972_v19 = vld [vmem:[#allocation2 + $0x28] sm:$0xf]  ;;  %v2440_v20 = vmul.f32 %v4937_v18, %v4958_v47  ;;  %v2441_v61 = vmul.f32 %v4937_v18, %v4960_v42  ;;  %v1796_v16 = vmul.f32 %v4863_v21, %v4958_v47 }
 0x482   : > { %v2096_v52 = vmul.f32 %v4915_v41, %v4970_v5  ;;  %v2116_v51 = vmul.f32 %v4921_v59, %v4970_v5  ;;  %v2117_v4 = vmul.f32 %v4921_v59, %v4972_v19  ;;  %v2192_v58 = vmul.f32 %v4925_v11, %v4970_v5  ;;  %v4091_v13 = vpop.f32.mrb[2].mxu1 }
 0x483   : > { %v2193_v15 = vmul.f32 %v4925_v11, %v4972_v19  ;;  %v2268_v40 = vmul.f32 %v4928_v12, %v4970_v5  ;;  %v2269_v30 = vmul.f32 %v4928_v12, %v4972_v19  ;;  %v2344_v32 = vmul.f32 %v4931_v17, %v4970_v5  ;;  %v1359_v28 = vpop.f32.mrb[3].mxu1 }
 0x484   : > { %v2104_v56 = vadd.f32 %v2096_v52, %v2084_v34  ;;  %v2148_v23 = vrot.slane %v2116_v51, 1  ;;  %v2149_v24 = vrot.slane %v2117_v4, 1  ;;  %v2224_v43 = vrot.slane %v2192_v58, 2 }
 0x485   : > { %v1365_v27 = vadd.f32 %v4091_v13, %v4898_v6  ;;  %v2225_v29 = vrot.slane %v2193_v15, 2  ;;  %v2300_v22 = vrot.slane %v2268_v40, 3  ;;  %v1360_v33 = vadd.f32 %v4898_v6, %v1359_v28  ;;  %v5008_v40 = vld [vmem:[#allocation2 + $0x40] sm:$0xff] }
 0x486   : > { %v2150_v10 = vsel %vm1496_vm11, %v2148_v23, %v2149_v24  ;;  %v2301_v3 = vrot.slane %v2269_v30, 3  ;;  %v2345_v7 = vmul.f32 %v4931_v17, %v4972_v19  ;;  %v2376_v52 = vrot.slane %v2344_v32, 4 }
 0x487   : > { %1409 = vst.msk [vmem:[#allocation2 + $0x72] sm:$0xff] %vm756_vm1, %v1365_v27  ;;  %v2180_v34 = vadd.f32 %v2150_v10, %v2104_v56  ;;  %v2472_v51 = vrot.slane %v2440_v20, 1  ;;  %v2516_v4 = vmul.f32 %v4942_v37, %v4958_v47  ;;  %1408 = vst.msk [vmem:[#allocation2 + $0x62] sm:$0xff] %vm756_vm1, %v1360_v33  ;;  %v2226_v60 = vsel %vm1573_vm12, %v2224_v43, %v2225_v29  ;;  %v5016_v56 = vld [vmem:[#allocation2 + $0x48] sm:$0xf] }
 0x488   : > { %v2377_v49 = vrot.slane %v2345_v7, 4  ;;  %v2473_v58 = vrot.slane %v2441_v61, 1  ;;  %v2517_v15 = vmul.f32 %v4942_v37, %v4960_v42  ;;  %v2592_v13 = vmul.f32 %v4945_v57, %v4958_v47 }
 0x489   : > { %v2256_v30 = vadd.f32 %v2226_v60, %v2180_v34  ;;  %v2593_v20 = vmul.f32 %v4945_v57, %v4960_v42  ;;  %v2668_v32 = vmul.f32 %v4950_v62, %v4958_v47  ;;  %v2302_v7 = vsel %vm1650_vm13, %v2300_v22, %v2301_v3 }
 0x48a   : > { %v2420_v61 = vmul.f32 %v4934_v55, %v4958_v47  ;;  %v2669_v23 = vmul.f32 %v4950_v62, %v4960_v42  ;;  %v1761_v24 = vadd.f32 %v1733_v36, %v1684_v31  ;;  %v2378_v27 = vsel %vm1727_vm14, %v2376_v52, %v2377_v49  ;;  %v4094_v22 = vpop.f32.mrb[4].mxu1 }
 0x48b   : > { %v2332_v43 = vadd.f32 %v2302_v7, %v2256_v30  ;;  %v2474_v28 = vsel %vm1496_vm11, %v2472_v51, %v2473_v58  ;;  %v2548_v29 = vrot.slane %v2516_v4, 2  ;;  %v2549_v33 = vrot.slane %v2517_v15, 2  ;;  %v1369_v52 = vpop.f32.mrb[5].mxu1  ;;  %v5038_v15 = vld [vmem:[%s6124_s9 + $0x18] ss:$0 sm:$0xff] }
 0x48c   : > { %v2624_v10 = vrot.slane %v2592_v13, 3  ;;  %v2625_v34 = vrot.slane %v2593_v20, 3  ;;  %v2764_v60 = vmul.f32 %v4956_v2, %v5008_v40  ;;  %v2700_v8 = vrot.slane %v2668_v32, 4 }
 0x48d   : > { %v2408_v3 = vadd.f32 %v2378_v27, %v2332_v43  ;;  %v2765_v46 = vmul.f32 %v4956_v2, %v5016_v56  ;;  %v2840_v36 = vmul.f32 %v4964_v48, %v5008_v40  ;;  %v1375_v31 = vadd.f32 %v4094_v22, %v4898_v6 }
 0x48e   : > { %v2701_v51 = vrot.slane %v2669_v23, 4  ;;  %v2796_v4 = vrot.slane %v2764_v60, 1  ;;  %v2841_v49 = vmul.f32 %v4964_v48, %v5016_v56  ;;  %v1370_v58 = vadd.f32 %v4898_v6, %v1369_v52 }
 0x48f   : > { %v2428_v30 = vadd.f32 %v2420_v61, %v2408_v3  ;;  %v2797_v13 = vrot.slane %v2765_v46, 1  ;;  %v2872_v20 = vrot.slane %v2840_v36, 2  ;;  %1411 = vst.msk [vmem:[#allocation2 + $0x92] sm:$0xff] %vm756_vm1, %v1375_v31  ;;  %v2550_v32 = vsel %vm1573_vm12, %v2548_v29, %v2549_v33 }
 0x490   : > { %v2873_v7 = vrot.slane %v2841_v49, 2  ;;  %v2916_v23 = vmul.f32 %v4967_v50, %v5008_v40  ;;  %v2917_v43 = vmul.f32 %v4967_v50, %v5016_v56  ;;  %1410 = vst.msk [vmem:[#allocation2 + $0x82] sm:$0xff] %vm756_vm1, %v1370_v58  ;;  %v2626_v27 = vsel %vm1650_vm13, %v2624_v10, %v2625_v34 }
 0x491   : > { %v2504_v6 = vadd.f32 %v2474_v28, %v2428_v30  ;;  %v2744_v46 = vmul.f32 %v4953_v14, %v5008_v40  ;;  %v1773_v61 = vmul.f32 %v4872_v44, %v4970_v5  ;;  %v2702_v29 = vsel %vm1727_vm14, %v2700_v8, %v2701_v51 }
 0x492   : > { %v2798_v33 = vsel %vm1496_vm11, %v2796_v4, %v2797_v13  ;;  %v2992_v60 = vmul.f32 %v5038_v15, %v5008_v40  ;;  %v2993_v22 = vmul.f32 %v5038_v15, %v5016_v56  ;;  %v2874_v28 = vsel %vm1573_vm12, %v2872_v20, %v2873_v7 }
 0x493   : > { %v2580_v3 = vadd.f32 %v2550_v32, %v2504_v6  ;;  %v2948_v10 = vrot.slane %v2916_v23, 3  ;;  %v1794_v34 = vmul.f32 %v4863_v21, %v4970_v5  ;;  %v2949_v36 = vrot.slane %v2917_v43, 3 }
 0x494   : > { %v1795_v31 = vmul.f32 %v4863_v21, %v4972_v19  ;;  %v1870_v8 = vmul.f32 %v4878_v63, %v4970_v5  ;;  %v1871_v52 = vmul.f32 %v4878_v63, %v4972_v19  ;;  %v1781_v4 = vadd.f32 %v1773_v61, %v1761_v24 }
 0x495   : > { %v2656_v51 = vadd.f32 %v2626_v27, %v2580_v3  ;;  %v1827_v49 = vrot.slane %v1794_v34, 1  ;;  %v1946_v58 = vmul.f32 %v4881_v0, %v4970_v5  ;;  %v1947_v32 = vmul.f32 %v4881_v0, %v4972_v19 }
 0x496   : > { %v1828_v30 = vrot.slane %v1795_v31, 1  ;;  %v1903_v13 = vrot.slane %v1870_v8, 2  ;;  %v1904_v20 = vrot.slane %v1871_v52, 2  ;;  %v2022_v43 = vmul.f32 %v4889_v9, %v4970_v5 }
 0x497   : > { %v2732_v7 = vadd.f32 %v2702_v29, %v2656_v51  ;;  %v1979_v23 = vrot.slane %v1946_v58, 3  ;;  %v2023_v6 = vmul.f32 %v4889_v9, %v4972_v19  ;;  %v3024_v27 = vrot.slane %v2992_v60, 4 }
 0x498   : > { %v3025_v24 = vrot.slane %v2993_v22, 4  ;;  %v1829_v61 = vsel %vm1496_vm11, %v1827_v49, %v1828_v30  ;;  %v1980_v3 = vrot.slane %v1947_v32, 3  ;;  %v1905_v8 = vsel %vm1573_vm12, %v1903_v13, %v1904_v20 }
 0x499   : > { %v2752_v34 = vadd.f32 %v2744_v46, %v2732_v7  ;;  %v1857_v31 = vadd.f32 %v1829_v61, %v1781_v4  ;;  %v2055_v52 = vrot.slane %v2022_v43, 4  ;;  %v2056_v39 = vrot.slane %v2023_v6, 4 }
 0x49a   : > { %v2118_v29 = vmul.f32 %v4921_v59, %v4958_v47  ;;  %v2119_v51 = vmul.f32 %v4921_v59, %v4960_v42  ;;  %v2194_v58 = vmul.f32 %v4925_v11, %v4958_v47  ;;  %v1981_v49 = vsel %vm1650_vm13, %v1979_v23, %v1980_v3 }
 0x49b   : > { %v2828_v60 = vadd.f32 %v2798_v33, %v2752_v34  ;;  %v1933_v22 = vadd.f32 %v1905_v8, %v1857_v31  ;;  %v2195_v46 = vmul.f32 %v4925_v11, %v4960_v42  ;;  %v2270_v20 = vmul.f32 %v4928_v12, %v4958_v47 }
 0x49c   : > { %v2151_v4 = vrot.slane %v2118_v29, 1  ;;  %v2152_v30 = vrot.slane %v2119_v51, 1  ;;  %v2227_v13 = vrot.slane %v2194_v58, 2  ;;  %v2271_v6 = vmul.f32 %v4928_v12, %v4960_v42  ;;  %v5102_v29 = vld [vmem:[%s6125_s10] ss:$0 sm:$0xff] }
 0x49d   : > { %v2904_v32 = vadd.f32 %v2874_v28, %v2828_v60  ;;  %v2009_v7 = vadd.f32 %v1981_v49, %v1933_v22  ;;  %v2228_v43 = vrot.slane %v2195_v46, 2  ;;  %v2950_v33 = vsel %vm1650_vm13, %v2948_v10, %v2949_v36 }
 0x49e   : > { %v2057_v61 = vsel %vm1727_vm14, %v2055_v52, %v2056_v39  ;;  %v2346_v23 = vmul.f32 %v4931_v17, %v4958_v47  ;;  %v2347_v3 = vmul.f32 %v4931_v17, %v4960_v42  ;;  %v3026_v31 = vsel %vm1727_vm14, %v3024_v27, %v3025_v24 }
 0x49f   : > { %v2980_v34 = vadd.f32 %v2950_v33, %v2904_v32  ;;  %v2085_v8 = vadd.f32 %v2057_v61, %v2009_v7  ;;  %v2097_v28 = vmul.f32 %v4915_v41, %v4958_v47  ;;  %v2153_v39 = vsel %vm1496_vm11, %v2151_v4, %v2152_v30  ;;  %v5119_v32 = vld [vmem:[#allocation2 + $0x50] sm:$0xff]  ;;  %v5121_v7 = vld [vmem:[#allocation2 + $0x58] sm:$0xf] }
 0x4a0   : > { %v2303_v10 = vrot.slane %v2270_v20, 3  ;;  %v2304_v36 = vrot.slane %v2271_v6, 3  ;;  %v2442_v52 = vmul.f32 %v4937_v18, %v5008_v40  ;;  %v2229_v27 = vsel %vm1573_vm12, %v2227_v13, %v2228_v43 }
 0x4a1   : > { %v3056_v51 = vadd.f32 %v3026_v31, %v2980_v34  ;;  %v2105_v58 = vadd.f32 %v2097_v28, %v2085_v8  ;;  %v2443_v24 = vmul.f32 %v4937_v18, %v5016_v56  ;;  %v2379_v60 = vrot.slane %v2346_v23, 4 }
 0x4a2   : > { %v2380_v22 = vrot.slane %v2347_v3, 4  ;;  %v2518_v49 = vmul.f32 %v4942_v37, %v5008_v40  ;;  %v2519_v46 = vmul.f32 %v4942_v37, %v5016_v56  ;;  %v2421_v20 = vmul.f32 %v4934_v55, %v5008_v40 }
 0x4a3   : > { %v3071_v4 = vadd.f32 %v5102_v29, %v3056_v51  ;;  %v2181_v30 = vadd.f32 %v2153_v39, %v2105_v58  ;;  %v2594_v13 = vmul.f32 %v4945_v57, %v5008_v40  ;;  %v2305_v43 = vsel %vm1650_vm13, %v2303_v10, %v2304_v36 }
 0x4a4   : > { %v2475_v6 = vrot.slane %v2442_v52, 1  ;;  %v2595_v33 = vmul.f32 %v4945_v57, %v5016_v56  ;;  %v2670_v61 = vmul.f32 %v4950_v62, %v5008_v40  ;;  %v2476_v3 = vrot.slane %v2443_v24, 1 }
 0x4a5   : > { %4099 = vmatprep.mubr.msk.f32.mxu1 %vm756_vm1, %v3071_v4  ;;  %v2257_v23 = vadd.f32 %v2229_v27, %v2181_v30  ;;  %v2551_v34 = vrot.slane %v2518_v49, 2  ;;  %v2671_v31 = vmul.f32 %v4950_v62, %v5016_v56  ;;  %v2552_v8 = vrot.slane %v2519_v46, 2 }
 0x4a6   : > { %v2627_v28 = vrot.slane %v2594_v13, 3  ;;  %v2628_v39 = vrot.slane %v2595_v33, 3  ;;  %v2703_v51 = vrot.slane %v2670_v61, 4  ;;  %v2766_v52 = vmul.f32 %v4956_v2, %v5119_v32 }
 0x4a7   : > { %v2333_v10 = vadd.f32 %v2305_v43, %v2257_v23  ;;  %v2704_v36 = vrot.slane %v2671_v31, 4  ;;  %v2767_v58 = vmul.f32 %v4956_v2, %v5121_v7  ;;  %v2381_v4 = vsel %vm1727_vm14, %v2379_v60, %v2380_v22 }
 0x4a8   : > { %v2842_v27 = vmul.f32 %v4964_v48, %v5119_v32  ;;  %v2843_v24 = vmul.f32 %v4964_v48, %v5121_v7  ;;  %v5142_v49 = vmul.f32 %v4967_v50, %v5119_v32  ;;  %v2477_v30 = vsel %vm1496_vm11, %v2475_v6, %v2476_v3 }
 0x4a9   : > { %v2409_v46 = vadd.f32 %v2381_v4, %v2333_v10  ;;  %v2799_v13 = vrot.slane %v2766_v52, 1  ;;  %v2800_v43 = vrot.slane %v2767_v58, 1  ;;  %v2553_v33 = vsel %vm1573_vm12, %v2551_v34, %v2552_v8 }
 0x4aa   : > { %v2875_v61 = vrot.slane %v2842_v27, 2  ;;  %v2876_v23 = vrot.slane %v2843_v24, 2  ;;  %v2919_v60 = vmul.f32 %v4967_v50, %v5121_v7  ;;  %v2629_v31 = vsel %vm1650_vm13, %v2627_v28, %v2628_v39 }
 0x4ab   : > { %v2429_v22 = vadd.f32 %v2421_v20, %v2409_v46  ;;  %v2705_v45 = vsel %vm1727_vm14, %v2703_v51, %v2704_v36  ;;  %v2745_v38 = vmul.f32 %v4953_v14, %v5119_v32  ;;  %v2801_v10 = vsel %vm1496_vm11, %v2799_v13, %v2800_v43 }
 0x4ac   : > { %v2951_v6 = vrot.slane %v5142_v49, 3  ;;  %v2994_v3 = vmul.f32 %v5038_v15, %v5119_v32  ;;  %v1468_v34 = vmul.f32 %v4825_v35, %v4970_v5  ;;  %v2877_v20 = vsel %vm1573_vm12, %v2875_v61, %v2876_v23 }
 0x4ad   : > { %v2505_v8 = vadd.f32 %v2477_v30, %v2429_v22  ;;  %v2995_v28 = vmul.f32 %v5038_v15, %v5121_v7  ;;  %v1469_v39 = vmul.f32 %v4825_v35, %v4972_v19  ;;  %v2952_v51 = vrot.slane %v2919_v60, 3 }
 0x4ae   : > { %v1503_v36 = vrot.slane %v1468_v34, 1  ;;  %v1545_v52 = vmul.f32 %v4834_v1, %v4970_v5  ;;  %v1546_v58 = vmul.f32 %v4834_v1, %v4972_v19  ;;  %v1446_v27 = vmul.f32 %v4839_v26, %v4970_v5 }
 0x4af   : > { %v2581_v4 = vadd.f32 %v2553_v33, %v2505_v8  ;;  %v1504_v24 = vrot.slane %v1469_v39, 1  ;;  %v1622_v49 = vmul.f32 %v4844_v25, %v4970_v5  ;;  %v1623_v13 = vmul.f32 %v4844_v25, %v4972_v19 }
 0x4b0   : > { %v1580_v46 = vrot.slane %v1545_v52, 2  ;;  %v1581_v30 = vrot.slane %v1546_v58, 2  ;;  %v1699_v43 = vmul.f32 %v4853_v53, %v4970_v5  ;;  %v1700_v33 = vmul.f32 %v4853_v53, %v4972_v19 }
 0x4b1   : > { %v2657_v61 = vadd.f32 %v2629_v31, %v2581_v4  ;;  %v1505_v23 = vsel %vm1496_vm11, %v1503_v36, %v1504_v24  ;;  %v1657_v60 = vrot.slane %v1622_v49, 3  ;;  %v3027_v22 = vrot.slane %v2994_v3, 4 }
 0x4b2   : > { %v1531_v34 = vadd.f32 %v1505_v23, %v1446_v27  ;;  %v1658_v8 = vrot.slane %v1623_v13, 3  ;;  %v1734_v39 = vrot.slane %v1699_v43, 4  ;;  %v1582_v52 = vsel %vm1573_vm12, %v1580_v46, %v1581_v30 }
 0x4b3   : > { %v2733_v54 = vadd.f32 %v2705_v45, %v2657_v61  ;;  %v1735_v58 = vrot.slane %v1700_v33, 4  ;;  %v3028_v25 = vrot.slane %v2995_v28, 4  ;;  %v1797_v31 = vmul.f32 %v4863_v21, %v4960_v42 }
 0x4b4   : > { %v1608_v5 = vadd.f32 %v1582_v52, %v1531_v34  ;;  %v1872_v36 = vmul.f32 %v4878_v63, %v4958_v47  ;;  %v1659_v3 = vsel %vm1650_vm13, %v1657_v60, %v1658_v8  ;;  %v1830_v4 = vrot.slane %v1796_v16, 1 }
 0x4b5   : > { %v2753_v19 = vadd.f32 %v2745_v38, %v2733_v54  ;;  %v1873_v45 = vmul.f32 %v4878_v63, %v4960_v42  ;;  %v1736_v24 = vsel %vm1727_vm14, %v1734_v39, %v1735_v58  ;;  %v1831_v49 = vrot.slane %v1797_v31, 1 }
 0x4b6   : > { %v1685_v27 = vadd.f32 %v1659_v3, %v1608_v5  ;;  %v1948_v28 = vmul.f32 %v4881_v0, %v4958_v47  ;;  %v1906_v30 = vrot.slane %v1872_v36, 2  ;;  %v1949_v43 = vmul.f32 %v4881_v0, %v4960_v42 }
 0x4b7   : > { %v2829_v46 = vadd.f32 %v2801_v10, %v2753_v19  ;;  %v1907_v13 = vrot.slane %v1873_v45, 2  ;;  %v1774_v16 = vmul.f32 %v4872_v44, %v4958_v47  ;;  %v2024_v38 = vmul.f32 %v4889_v9, %v4958_v47 }
 0x4b8   : > { %v1762_v54 = vadd.f32 %v1736_v24, %v1685_v27  ;;  %v2025_v61 = vmul.f32 %v4889_v9, %v4960_v42  ;;  %v2953_v60 = vsel %vm1650_vm13, %v2951_v6, %v2952_v51  ;;  %v3029_v10 = vsel %vm1727_vm14, %v3027_v22, %v3028_v25 }
 0x4b9   : > { %v2905_v23 = vadd.f32 %v2877_v20, %v2829_v46  ;;  %v1832_v33 = vsel %vm1496_vm11, %v1830_v4, %v1831_v49  ;;  %v1982_v8 = vrot.slane %v1948_v28, 3  ;;  %v1983_v39 = vrot.slane %v1949_v43, 3 }
 0x4ba   : > { %v1782_v34 = vadd.f32 %v1774_v16, %v1762_v54  ;;  %v2120_v52 = vmul.f32 %v4921_v59, %v5008_v40  ;;  %v1908_v5 = vsel %vm1573_vm12, %v1906_v30, %v1907_v13  ;;  %v2121_v31 = vmul.f32 %v4921_v59, %v5016_v56 }
 0x4bb   : > { %v2981_v58 = vadd.f32 %v2953_v60, %v2905_v23  ;;  %v2196_v20 = vmul.f32 %v4925_v11, %v5008_v40  ;;  %v2058_v51 = vrot.slane %v2024_v38, 4  ;;  %v2059_v25 = vrot.slane %v2025_v61, 4 }
 0x4bc   : > { %v1858_v6 = vadd.f32 %v1832_v33, %v1782_v34  ;;  %v2197_v22 = vmul.f32 %v4925_v11, %v5016_v56  ;;  %v2154_v19 = vrot.slane %v2120_v52, 1  ;;  %v2155_v3 = vrot.slane %v2121_v31, 1  ;;  %v5237_v31 = vld [vmem:[#allocation2 + $0x60] sm:$0xff] }
 0x4bd   : > { %v3057_v36 = vadd.f32 %v3029_v10, %v2981_v58  ;;  %v2272_v4 = vmul.f32 %v4928_v12, %v5008_v40  ;;  %v1984_v27 = vsel %vm1650_vm13, %v1982_v8, %v1983_v39  ;;  %v2230_v24 = vrot.slane %v2196_v20, 2  ;;  %v5239_v20 = vld [vmem:[#allocation2 + $0x68] sm:$0xf] }
 0x4be   : > { %v1934_v45 = vadd.f32 %v1908_v5, %v1858_v6  ;;  %v2231_v49 = vrot.slane %v2197_v22, 2  ;;  %v2273_v46 = vmul.f32 %v4928_v12, %v5016_v56  ;;  %v2348_v30 = vmul.f32 %v4931_v17, %v5008_v40 }
 0x4bf   : > { %v3072_v28 = vadd.f32 %v5102_v29, %v3057_v36  ;;  %v2349_v13 = vmul.f32 %v4931_v17, %v5016_v56  ;;  %v2060_v54 = vsel %vm1727_vm14, %v2058_v51, %v2059_v25  ;;  %v2098_v16 = vmul.f32 %v4915_v41, %v5008_v40 }
 0x4c0   : > { %v2010_v43 = vadd.f32 %v1984_v27, %v1934_v45  ;;  %v2156_v38 = vsel %vm1496_vm11, %v2154_v19, %v2155_v3  ;;  %v2306_v61 = vrot.slane %v2272_v4, 3  ;;  %v2444_v23 = vmul.f32 %v4937_v18, %v5119_v32 }
 0x4c1   : > { %4100 = vmatmul.mubr.msk.f32.vlgmr.msra.gmra.mrb[6].mxu1 %vm756_vm1, %v3072_v28  ;;  %v2445_v60 = vmul.f32 %v4937_v18, %v5121_v7  ;;  %v2232_v33 = vsel %vm1573_vm12, %v2230_v24, %v2231_v49  ;;  %v2520_v34 = vmul.f32 %v4942_v37, %v5119_v32  ;;  %v2521_v8 = vmul.f32 %v4942_v37, %v5121_v7 }
 0x4c2   : > { %v2086_v10 = vadd.f32 %v2060_v54, %v2010_v43  ;;  %v2307_v39 = vrot.slane %v2273_v46, 3  ;;  %v2382_v52 = vrot.slane %v2348_v30, 4  ;;  %v2383_v58 = vrot.slane %v2349_v13, 4 }
 0x4c3   : > { %v2596_v5 = vmul.f32 %v4945_v57, %v5119_v32  ;;  %v2422_v51 = vmul.f32 %v4934_v55, %v5119_v32  ;;  %v2478_v25 = vrot.slane %v2444_v23, 1  ;;  %v2597_v22 = vmul.f32 %v4945_v57, %v5121_v7 }
 0x4c4   : > { %v2106_v6 = vadd.f32 %v2098_v16, %v2086_v10  ;;  %v2479_v36 = vrot.slane %v2445_v60, 1  ;;  %v2554_v19 = vrot.slane %v2520_v34, 2  ;;  %v2672_v3 = vmul.f32 %v4950_v62, %v5119_v32 }
 0x4c5   : > { %v2673_v4 = vmul.f32 %v4950_v62, %v5121_v7  ;;  %v2555_v27 = vrot.slane %v2521_v8, 2  ;;  %v2630_v24 = vrot.slane %v2596_v5, 3  ;;  %v2631_v49 = vrot.slane %v2597_v22, 3 }
 0x4c6   : > { %v2182_v45 = vadd.f32 %v2156_v38, %v2106_v6  ;;  %v2706_v28 = vrot.slane %v2672_v3, 4  ;;  %v2768_v30 = vmul.f32 %v4956_v2, %v5237_v31  ;;  %v2769_v13 = vmul.f32 %v4956_v2, %v5239_v20 }
 0x4c7   : > { %v2707_v46 = vrot.slane %v2673_v4, 4  ;;  %v2308_v54 = vsel %vm1650_vm13, %v2306_v61, %v2307_v39  ;;  %v2844_v16 = vmul.f32 %v4964_v48, %v5237_v31  ;;  %v2845_v38 = vmul.f32 %v4964_v48, %v5239_v20 }
 0x4c8   : > { %v2258_v43 = vadd.f32 %v2232_v33, %v2182_v45  ;;  %v2384_v23 = vsel %vm1727_vm14, %v2382_v52, %v2383_v58  ;;  %v2802_v60 = vrot.slane %v2768_v30, 1  ;;  %v2803_v10 = vrot.slane %v2769_v13, 1 }
 0x4c9   : > { %v5261_v34 = vmul.f32 %v4967_v50, %v5237_v31  ;;  %v2480_v5 = vsel %vm1496_vm11, %v2478_v25, %v2479_v36  ;;  %v2878_v33 = vrot.slane %v2844_v16, 2  ;;  %v2879_v6 = vrot.slane %v2845_v38, 2 }
 0x4ca   : > { %v2334_v8 = vadd.f32 %v2308_v54, %v2258_v43  ;;  %v2556_v61 = vsel %vm1573_vm12, %v2554_v19, %v2555_v27  ;;  %v2632_v39 = vsel %vm1650_vm13, %v2630_v24, %v2631_v49  ;;  %v2708_v22 = vsel %vm1727_vm14, %v2706_v28, %v2707_v46  ;;  %v6166_v54 = vld [vmem:[#allocation12_spill] sm:$0xff] }
 0x4cb   : > { %v2746_v52 = vmul.f32 %v4953_v14, %v5237_v31  ;;  %v2804_v3 = vsel %vm1496_vm11, %v2802_v60, %v2803_v10  ;;  %v2921_v4 = vmul.f32 %v4967_v50, %v5239_v20  ;;  %v2954_v45 = vrot.slane %v5261_v34, 3 }
 0x4cc   : > { %v2410_v58 = vadd.f32 %v2384_v23, %v2334_v8  ;;  %v5275_v25 = vmul.f32 %v5038_v15, %v5237_v31  ;;  %v5279_v36 = vmul.f32 %v5038_v15, %v5239_v20  ;;  %v1470_v19 = vmul.f32 %v4825_v35, %v4958_v47 }
 0x4cd   : > { %v1471_v27 = vmul.f32 %v4825_v35, %v4960_v42  ;;  %v2880_v49 = vsel %vm1573_vm12, %v2878_v33, %v2879_v6  ;;  %v1547_v28 = vmul.f32 %v4834_v1, %v4958_v47  ;;  %v1548_v46 = vmul.f32 %v4834_v1, %v4960_v42 }
 0x4ce   : > { %v2430_v24 = vadd.f32 %v2422_v51, %v2410_v58  ;;  %v1447_v30 = vmul.f32 %v4839_v26, %v4958_v47  ;;  %v1506_v13 = vrot.slane %v1470_v19, 1  ;;  %v1624_v16 = vmul.f32 %v6166_v54, %v4958_v47 }
 0x4cf   : > { %v1507_v43 = vrot.slane %v1471_v27, 1  ;;  %v1583_v23 = vrot.slane %v1547_v28, 2  ;;  %v1584_v60 = vrot.slane %v1548_v46, 2  ;;  %v1625_v51 = vmul.f32 %v6166_v54, %v4960_v42 }
 0x4d0   : > { %v2506_v38 = vadd.f32 %v2480_v5, %v2430_v24  ;;  %v1660_v34 = vrot.slane %v1624_v16, 3  ;;  %v1701_v8 = vmul.f32 %v4853_v53, %v4958_v47  ;;  %v1702_v33 = vmul.f32 %v4853_v53, %v4960_v42 }
 0x4d1   : > { %v1508_v10 = vsel %vm1496_vm11, %v1506_v13, %v1507_v43  ;;  %v2955_v58 = vrot.slane %v2921_v4, 3  ;;  %v1661_v27 = vrot.slane %v1625_v51, 3  ;;  %v1585_v5 = vsel %vm1573_vm12, %v1583_v23, %v1584_v60 }
 0x4d2   : > { %v2582_v6 = vadd.f32 %v2556_v61, %v2506_v38  ;;  %v1532_v19 = vadd.f32 %v1508_v10, %v1447_v30  ;;  %v1737_v24 = vrot.slane %v1701_v8, 4  ;;  %v1738_v28 = vrot.slane %v1702_v33, 4 }
 0x4d3   : > { %v1798_v46 = vmul.f32 %v4863_v21, %v5008_v40  ;;  %v3030_v13 = vrot.slane %v5275_v25, 4  ;;  %v1799_v47 = vmul.f32 %v4863_v21, %v5016_v56  ;;  %v1662_v42 = vsel %vm1650_vm13, %v1660_v34, %v1661_v27 }
 0x4d4   : > { %v2658_v26 = vadd.f32 %v2632_v39, %v2582_v6  ;;  %v1609_v43 = vadd.f32 %v1585_v5, %v1532_v19  ;;  %v1874_v4 = vmul.f32 %v4878_v63, %v5008_v40  ;;  %v1875_v30 = vmul.f32 %v4878_v63, %v5016_v56 }
 0x4d5   : > { %v1833_v61 = vrot.slane %v1798_v46, 1  ;;  %v1834_v23 = vrot.slane %v1799_v47, 1  ;;  %v1950_v39 = vmul.f32 %v4881_v0, %v5008_v40  ;;  %v1739_v25 = vsel %vm1727_vm14, %v1737_v24, %v1738_v28 }
 0x4d6   : > { %v2734_v16 = vadd.f32 %v2708_v22, %v2658_v26  ;;  %v1686_v38 = vadd.f32 %v1662_v42, %v1609_v43  ;;  %v1909_v60 = vrot.slane %v1874_v4, 2  ;;  %v1910_v51 = vrot.slane %v1875_v30, 2 }
 0x4d7   : > { %v1951_v10 = vmul.f32 %v4881_v0, %v5016_v56  ;;  %v1775_v33 = vmul.f32 %v4872_v44, %v5008_v40  ;;  %v2026_v26 = vmul.f32 %v4889_v9, %v5008_v40  ;;  %v2956_v22 = vsel %vm1650_vm13, %v2954_v45, %v2955_v58 }
 0x4d8   : > { %v2754_v34 = vadd.f32 %v2746_v52, %v2734_v16  ;;  %v1763_v8 = vadd.f32 %v1739_v25, %v1686_v38  ;;  %v3031_v6 = vrot.slane %v5279_v36, 4  ;;  %v1835_v19 = vsel %vm1496_vm11, %v1833_v61, %v1834_v23 }
 0x4d9   : > { %v2027_v27 = vmul.f32 %v4889_v9, %v5016_v56  ;;  %v1985_v28 = vrot.slane %v1950_v39, 3  ;;  %v2122_v52 = vmul.f32 %v4921_v59, %v5119_v32  ;;  %v1911_v46 = vsel %vm1573_vm12, %v1909_v60, %v1910_v51 }
 0x4da   : > { %v2830_v5 = vadd.f32 %v2804_v3, %v2754_v34  ;;  %v1783_v24 = vadd.f32 %v1775_v33, %v1763_v8  ;;  %v1986_v43 = vrot.slane %v1951_v10, 3  ;;  %v2123_v47 = vmul.f32 %v4921_v59, %v5121_v7 }
 0x4db   : > { %v2198_v45 = vmul.f32 %v4925_v11, %v5119_v32  ;;  %v2061_v42 = vrot.slane %v2026_v26, 4  ;;  %v2199_v3 = vmul.f32 %v4925_v11, %v5121_v7  ;;  %v2062_v61 = vrot.slane %v2027_v27, 4 }
 0x4dc   : > { %v2906_v36 = vadd.f32 %v2880_v49, %v2830_v5  ;;  %v1859_v58 = vadd.f32 %v1835_v19, %v1783_v24  ;;  %v2157_v4 = vrot.slane %v2122_v52, 1  ;;  %v2158_v30 = vrot.slane %v2123_v47, 1 }
 0x4dd   : > { %v2274_v16 = vmul.f32 %v4928_v12, %v5119_v32  ;;  %v3032_v23 = vsel %vm1727_vm14, %v3030_v13, %v3031_v6  ;;  %v2275_v25 = vmul.f32 %v4928_v12, %v5121_v7  ;;  %v1987_v49 = vsel %vm1650_vm13, %v1985_v28, %v1986_v43 }
 0x4de   : > { %v2982_v38 = vadd.f32 %v2956_v22, %v2906_v36  ;;  %v1935_v39 = vadd.f32 %v1911_v46, %v1859_v58  ;;  %v2233_v60 = vrot.slane %v2198_v45, 2  ;;  %v2234_v51 = vrot.slane %v2199_v3, 2  ;;  %v5364_v3 = vld [vmem:[#allocation2 + $0x70] sm:$0xff] }
 0x4df   : > { %v2350_v10 = vmul.f32 %v4931_v17, %v5119_v32  ;;  %v2099_v33 = vmul.f32 %v4915_v41, %v5119_v32  ;;  %v2351_v26 = vmul.f32 %v4931_v17, %v5121_v7  ;;  %v2063_v13 = vsel %vm1727_vm14, %v2061_v42, %v2062_v61  ;;  %v5366_v61 = vld [vmem:[#allocation2 + $0x78] sm:$0xf] }
 0x4e0   : > { %v3058_v34 = vadd.f32 %v3032_v23, %v2982_v38  ;;  %v2011_v8 = vadd.f32 %v1987_v49, %v1935_v39  ;;  %v2159_v22 = vsel %vm1496_vm11, %v2157_v4, %v2158_v30  ;;  %v2309_v6 = vrot.slane %v2274_v16, 3 }
 0x4e1   : > { %v2310_v19 = vrot.slane %v2275_v25, 3  ;;  %v2446_v24 = vmul.f32 %v4937_v18, %v5237_v31  ;;  %v2447_v28 = vmul.f32 %v4937_v18, %v5239_v20  ;;  %v2235_v52 = vsel %vm1573_vm12, %v2233_v60, %v2234_v51 }
 0x4e2   : > { %v3073_v27 = vadd.f32 %v5102_v29, %v3058_v34  ;;  %v2087_v5 = vadd.f32 %v2063_v13, %v2011_v8  ;;  %v2385_v46 = vrot.slane %v2350_v10, 4  ;;  %v2522_v43 = vmul.f32 %v4942_v37, %v5237_v31 }
 0x4e3   : > { %v2523_v47 = vmul.f32 %v4942_v37, %v5239_v20  ;;  %v2386_v36 = vrot.slane %v2351_v26, 4  ;;  %v2598_v58 = vmul.f32 %v4945_v57, %v5237_v31  ;;  %v2599_v42 = vmul.f32 %v4945_v57, %v5239_v20 }
 0x4e4   : > { %4102 = vmatprep.mubr.msk.f32.mxu1 %vm756_vm1, %v3073_v27  ;;  %v2107_v45 = vadd.f32 %v2099_v33, %v2087_v5  ;;  %v2311_v4 = vsel %vm1650_vm13, %v2309_v6, %v2310_v19  ;;  %v2423_v30 = vmul.f32 %v4934_v55, %v5237_v31  ;;  %v2674_v16 = vmul.f32 %v4950_v62, %v5237_v31 }
 0x4e5   : > { %v2675_v38 = vmul.f32 %v4950_v62, %v5239_v20  ;;  %v2481_v39 = vrot.slane %v2446_v24, 1  ;;  %v2482_v25 = vrot.slane %v2447_v28, 1  ;;  %v2557_v49 = vrot.slane %v2522_v43, 2 }
 0x4e6   : > { %v2183_v23 = vadd.f32 %v2159_v22, %v2107_v45  ;;  %v2558_v60 = vrot.slane %v2523_v47, 2  ;;  %v2633_v51 = vrot.slane %v2598_v58, 3  ;;  %v2634_v10 = vrot.slane %v2599_v42, 3 }
 0x4e7   : > { %v2709_v34 = vrot.slane %v2674_v16, 4  ;;  %v2710_v33 = vrot.slane %v2675_v38, 4  ;;  %v2770_v26 = vmul.f32 %v4956_v2, %v5364_v3  ;;  %v2771_v13 = vmul.f32 %v4956_v2, %v5366_v61 }
 0x4e8   : > { %v2259_v8 = vadd.f32 %v2235_v52, %v2183_v23  ;;  %v2387_v6 = vsel %vm1727_vm14, %v2385_v46, %v2386_v36  ;;  %v2846_v22 = vmul.f32 %v4964_v48, %v5364_v3  ;;  %v2847_v19 = vmul.f32 %v4964_v48, %v5366_v61 }
 0x4e9   : > { %v2922_v27 = vmul.f32 %v4967_v50, %v5364_v3  ;;  %v2805_v24 = vrot.slane %v2770_v26, 1  ;;  %v2806_v28 = vrot.slane %v2771_v13, 1  ;;  %v2923_v52 = vmul.f32 %v4967_v50, %v5366_v61 }
 0x4ea   : > { %v2335_v5 = vadd.f32 %v2311_v4, %v2259_v8  ;;  %v2483_v43 = vsel %vm1496_vm11, %v2481_v39, %v2482_v25  ;;  %v2559_v47 = vsel %vm1573_vm12, %v2557_v49, %v2558_v60  ;;  %v2635_v46 = vsel %vm1650_vm13, %v2633_v51, %v2634_v10 }
 0x4eb   : > { %v2747_v45 = vmul.f32 %v4953_v14, %v5364_v3  ;;  %v2711_v58 = vsel %vm1727_vm14, %v2709_v34, %v2710_v33  ;;  %v2881_v42 = vrot.slane %v2846_v22, 2  ;;  %v2882_v16 = vrot.slane %v2847_v19, 2 }
 0x4ec   : > { %v2411_v36 = vadd.f32 %v2387_v6, %v2335_v5  ;;  %v2807_v4 = vsel %vm1496_vm11, %v2805_v24, %v2806_v28  ;;  %v2957_v38 = vrot.slane %v2922_v27, 3  ;;  %v5397_v23 = vmul.f32 %v5038_v15, %v5364_v3 }
 0x4ed   : > { %v1472_v39 = vmul.f32 %v4825_v35, %v5008_v40  ;;  %v2958_v49 = vrot.slane %v2923_v52, 3  ;;  %v5403_v60 = vmul.f32 %v5038_v15, %v5366_v61  ;;  %v1473_v51 = vmul.f32 %v4825_v35, %v5016_v56 }
 0x4ee   : > { %v2431_v25 = vadd.f32 %v2423_v30, %v2411_v36  ;;  %v1549_v34 = vmul.f32 %v4834_v1, %v5008_v40  ;;  %v1550_v8 = vmul.f32 %v4834_v1, %v5016_v56  ;;  %v1626_v33 = vmul.f32 %v6166_v54, %v5008_v40  ;;  %v6167_v30 = vld [vmem:[#allocation11_spill] sm:$0xff] }
 0x4ef   : > { %v1509_v10 = vrot.slane %v1472_v39, 1  ;;  %v1448_v13 = vmul.f32 %v6167_v30, %v5008_v40  ;;  %v1510_v6 = vrot.slane %v1473_v51, 1  ;;  %v1627_v15 = vmul.f32 %v6166_v54, %v5016_v56 }
 0x4f0   : > { %v2507_v26 = vadd.f32 %v2483_v43, %v2431_v25  ;;  %v1586_v22 = vrot.slane %v1549_v34, 2  ;;  %v1587_v19 = vrot.slane %v1550_v8, 2  ;;  %v1663_v27 = vrot.slane %v1626_v33, 3 }
 0x4f1   : > { %v1703_v5 = vmul.f32 %v4853_v53, %v5008_v40  ;;  %v1511_v28 = vsel %vm1496_vm11, %v1509_v10, %v1510_v6  ;;  %v1664_v52 = vrot.slane %v1627_v15, 3  ;;  %v1704_v43 = vmul.f32 %v4853_v53, %v5016_v56 }
 0x4f2   : > { %v2583_v24 = vadd.f32 %v2559_v47, %v2507_v26  ;;  %v2883_v36 = vsel %vm1573_vm12, %v2881_v42, %v2882_v16  ;;  %v3033_v39 = vrot.slane %v5397_v23, 4  ;;  %v1533_v25 = vadd.f32 %v1511_v28, %v1448_v13 }
 0x4f3   : > { %v1588_v51 = vsel %vm1573_vm12, %v1586_v22, %v1587_v19  ;;  %v1740_v8 = vrot.slane %v1703_v5, 4  ;;  %v1741_v33 = vrot.slane %v1704_v43, 4  ;;  %v1800_v40 = vmul.f32 %v4863_v21, %v5119_v32 }
 0x4f4   : > { %v2659_v34 = vadd.f32 %v2635_v46, %v2583_v24  ;;  %v1610_v47 = vadd.f32 %v1588_v51, %v1533_v25  ;;  %v1665_v10 = vsel %vm1650_vm13, %v1663_v27, %v1664_v52  ;;  %v1801_v26 = vmul.f32 %v4863_v21, %v5121_v7 }
 0x4f5   : > { %v1876_v56 = vmul.f32 %v4878_v63, %v5119_v32  ;;  %v1836_v16 = vrot.slane %v1800_v40, 1  ;;  %v1877_v23 = vmul.f32 %v4878_v63, %v5121_v7  ;;  %v1952_v46 = vmul.f32 %v4881_v0, %v5119_v32 }
 0x4f6   : > { %v2735_v42 = vadd.f32 %v2711_v58, %v2659_v34  ;;  %v2959_v13 = vsel %vm1650_vm13, %v2957_v38, %v2958_v49  ;;  %v3034_v6 = vrot.slane %v5403_v60, 4  ;;  %v1687_v15 = vadd.f32 %v1665_v10, %v1610_v47 }
 0x4f7   : > { %v1837_v22 = vrot.slane %v1801_v26, 1  ;;  %v1742_v27 = vsel %vm1727_vm14, %v1740_v8, %v1741_v33  ;;  %v1953_v5 = vmul.f32 %v4881_v0, %v5121_v7  ;;  %v2028_v58 = vmul.f32 %v4889_v9, %v5119_v32 }
 0x4f8   : > { %v2755_v19 = vadd.f32 %v2747_v45, %v2735_v42  ;;  %v1764_v24 = vadd.f32 %v1742_v27, %v1687_v15  ;;  %v1776_v28 = vmul.f32 %v4872_v44, %v5119_v32  ;;  %v1912_v52 = vrot.slane %v1876_v56, 2 }
 0x4f9   : > { %v2029_v38 = vmul.f32 %v4889_v9, %v5121_v7  ;;  %v1838_v60 = vsel %vm1496_vm11, %v1836_v16, %v1837_v22  ;;  %v1913_v45 = vrot.slane %v1877_v23, 2  ;;  %v1988_v43 = vrot.slane %v1952_v46, 3 }
 0x4fa   : > { %v2831_v49 = vadd.f32 %v2807_v4, %v2755_v19  ;;  %v1784_v25 = vadd.f32 %v1776_v28, %v1764_v24  ;;  %v1989_v51 = vrot.slane %v1953_v5, 3  ;;  %v2124_v34 = vmul.f32 %v4921_v59, %v5237_v31 }
 0x4fb   : > { %v2125_v8 = vmul.f32 %v4921_v59, %v5239_v20  ;;  %v2064_v40 = vrot.slane %v2028_v58, 4  ;;  %v2200_v47 = vmul.f32 %v4925_v11, %v5237_v31  ;;  %v2201_v4 = vmul.f32 %v4925_v11, %v5239_v20 }
 0x4fc   : > { %v2907_v33 = vadd.f32 %v2883_v36, %v2831_v49  ;;  %v1860_v10 = vadd.f32 %v1838_v60, %v1784_v25  ;;  %v2065_v26 = vrot.slane %v2029_v38, 4  ;;  %v2160_v56 = vrot.slane %v2124_v34, 1 }
 0x4fd   : > { %v2161_v42 = vrot.slane %v2125_v8, 1  ;;  %v1914_v23 = vsel %vm1573_vm12, %v1912_v52, %v1913_v45  ;;  %v2236_v46 = vrot.slane %v2200_v47, 2  ;;  %v2237_v15 = vrot.slane %v2201_v4, 2  ;;  %v5486_v47 = vld [vmem:[#allocation2 + $0x80] sm:$0xff]  ;;  %v5488_v4 = vld [vmem:[#allocation2 + $0x88] sm:$0xf] }
 0x4fe   : > { %v2983_v16 = vadd.f32 %v2959_v13, %v2907_v33  ;;  %v3035_v22 = vsel %vm1727_vm14, %v3033_v39, %v3034_v6  ;;  %v1936_v19 = vadd.f32 %v1914_v23, %v1860_v10  ;;  %v2100_v36 = vmul.f32 %v4915_v41, %v5237_v31 }
 0x4ff   : > { %v2276_v27 = vmul.f32 %v4928_v12, %v5237_v31  ;;  %v1990_v58 = vsel %vm1650_vm13, %v1988_v43, %v1989_v51  ;;  %v2277_v24 = vmul.f32 %v4928_v12, %v5239_v20  ;;  %v2352_v13 = vmul.f32 %v4931_v17, %v5237_v31 }
 0x500   : > { %v3059_v5 = vadd.f32 %v3035_v22, %v2983_v16  ;;  %v2012_v28 = vadd.f32 %v1990_v58, %v1936_v19  ;;  %v2066_v52 = vsel %vm1727_vm14, %v2064_v40, %v2065_v26  ;;  %v2162_v39 = vsel %vm1496_vm11, %v2160_v56, %v2161_v42 }
 0x501   : > { %v2353_v6 = vmul.f32 %v4931_v17, %v5239_v20  ;;  %v2238_v49 = vsel %vm1573_vm12, %v2236_v46, %v2237_v15  ;;  %v2448_v60 = vmul.f32 %v4937_v18, %v5364_v3  ;;  %v2449_v45 = vmul.f32 %v4937_v18, %v5366_v61 }
 0x502   : > { %v3074_v38 = vadd.f32 %v5102_v29, %v3059_v5  ;;  %v2088_v43 = vadd.f32 %v2066_v52, %v2012_v28  ;;  %v2312_v25 = vrot.slane %v2276_v27, 3  ;;  %v2524_v51 = vmul.f32 %v4942_v37, %v5364_v3 }
 0x503   : > { %v2525_v34 = vmul.f32 %v4942_v37, %v5366_v61  ;;  %v2313_v8 = vrot.slane %v2277_v24, 3  ;;  %v2388_v29 = vrot.slane %v2352_v13, 4  ;;  %v2424_v33 = vmul.f32 %v4934_v55, %v5364_v3 }
 0x504   : > { %4103 = vmatmul.mubr.msk.f32.gmra.mrb[8].mxu1 %vm756_vm1, %v3074_v38  ;;  %v2600_v40 = vmul.f32 %v4945_v57, %v5364_v3  ;;  %v2108_v10 = vadd.f32 %v2100_v36, %v2088_v43  ;;  %v2389_v26 = vrot.slane %v2353_v6, 4  ;;  %v2484_v56 = vrot.slane %v2448_v60, 1 }
 0x505   : > { %v2601_v42 = vmul.f32 %v4945_v57, %v5366_v61  ;;  %v2485_v16 = vrot.slane %v2449_v45, 1  ;;  %v2560_v23 = vrot.slane %v2524_v51, 2  ;;  %v2676_v46 = vmul.f32 %v4950_v62, %v5364_v3 }
 0x506   : > { %v2677_v15 = vmul.f32 %v4950_v62, %v5366_v61  ;;  %v2184_v22 = vadd.f32 %v2162_v39, %v2108_v10  ;;  %v2561_v19 = vrot.slane %v2525_v34, 2  ;;  %v2636_v27 = vrot.slane %v2600_v40, 3 }
 0x507   : > { %v2637_v5 = vrot.slane %v2601_v42, 3  ;;  %v2712_v58 = vrot.slane %v2676_v46, 4  ;;  %v2772_v36 = vmul.f32 %v4956_v2, %v5486_v47  ;;  %v2773_v13 = vmul.f32 %v4956_v2, %v5488_v4 }
 0x508   : > { %v2713_v24 = vrot.slane %v2677_v15, 4  ;;  %v2260_v28 = vadd.f32 %v2238_v49, %v2184_v22  ;;  %v2314_v52 = vsel %vm1650_vm13, %v2312_v25, %v2313_v8  ;;  %v2848_v6 = vmul.f32 %v4964_v48, %v5486_v47 }
 0x509   : > { %v2849_v39 = vmul.f32 %v4964_v48, %v5488_v4  ;;  %v2390_v38 = vsel %vm1727_vm14, %v2388_v29, %v2389_v26  ;;  %v2808_v60 = vrot.slane %v2772_v36, 1  ;;  %v2809_v45 = vrot.slane %v2773_v13, 1 }
 0x50a   : > { %v5508_v43 = vmul.f32 %v4967_v50, %v5486_v47  ;;  %v2336_v51 = vadd.f32 %v2314_v52, %v2260_v28  ;;  %v2486_v34 = vsel %vm1496_vm11, %v2484_v56, %v2485_v16  ;;  %v2884_v49 = vrot.slane %v2848_v6, 2  ;;  %v5523_v56 = vld [vmem:[%s6124_s9 + $0x18] ss:$0 sm:$0xff] }
 0x50b   : > { %v2885_v40 = vrot.slane %v2849_v39, 2  ;;  %v2562_v25 = vsel %vm1573_vm12, %v2560_v23, %v2561_v19  ;;  %v2638_v8 = vsel %vm1650_vm13, %v2636_v27, %v2637_v5  ;;  %v2714_v10 = vsel %vm1727_vm14, %v2712_v58, %v2713_v24 }
 0x50c   : > { %v2748_v29 = vmul.f32 %v4953_v14, %v5486_v47  ;;  %v2412_v26 = vadd.f32 %v2390_v38, %v2336_v51  ;;  %v2810_v42 = vsel %vm1496_vm11, %v2808_v60, %v2809_v45  ;;  %v2925_v46 = vmul.f32 %v4967_v50, %v5488_v4 }
 0x50d   : > { %v2960_v15 = vrot.slane %v5508_v43, 3  ;;  %v5527_v16 = vmul.f32 %v5523_v56, %v5486_v47  ;;  %v5531_v23 = vmul.f32 %v5523_v56, %v5488_v4  ;;  %v1474_v22 = vmul.f32 %v4825_v35, %v5119_v32 }
 0x50e   : > { %v1475_v19 = vmul.f32 %v4825_v35, %v5121_v7  ;;  %v2432_v27 = vadd.f32 %v2424_v33, %v2412_v26  ;;  %v2886_v5 = vsel %vm1573_vm12, %v2884_v49, %v2885_v40  ;;  %v1551_v58 = vmul.f32 %v4834_v1, %v5119_v32 }
 0x50f   : > { %v1552_v24 = vmul.f32 %v4834_v1, %v5121_v7  ;;  %v1449_v36 = vmul.f32 %v6167_v30, %v5119_v32  ;;  %v1512_v13 = vrot.slane %v1474_v22, 1  ;;  %v1628_v52 = vmul.f32 %v6166_v54, %v5119_v32 }
 0x510   : > { %v1513_v28 = vrot.slane %v1475_v19, 1  ;;  %v2508_v6 = vadd.f32 %v2486_v34, %v2432_v27  ;;  %v1589_v39 = vrot.slane %v1551_v58, 2  ;;  %v1629_v33 = vmul.f32 %v6166_v54, %v5121_v7 }
 0x511   : > { %v1590_v38 = vrot.slane %v1552_v24, 2  ;;  %v1666_v45 = vrot.slane %v1628_v52, 3  ;;  %v1705_v43 = vmul.f32 %v4853_v53, %v5119_v32  ;;  %v1706_v51 = vmul.f32 %v4853_v53, %v5121_v7 }
 0x512   : > { %v1514_v60 = vsel %vm1496_vm11, %v1512_v13, %v1513_v28  ;;  %v2584_v49 = vadd.f32 %v2562_v25, %v2508_v6  ;;  %v2961_v40 = vrot.slane %v2925_v46, 3  ;;  %v1667_v22 = vrot.slane %v1629_v33, 3 }
 0x513   : > { %v1534_v26 = vadd.f32 %v1514_v60, %v1449_v36  ;;  %v1591_v34 = vsel %vm1573_vm12, %v1589_v39, %v1590_v38  ;;  %v1743_v19 = vrot.slane %v1705_v43, 4  ;;  %v1744_v27 = vrot.slane %v1706_v51, 4 }
 0x514   : > { %v1802_v58 = vmul.f32 %v4863_v21, %v5237_v31  ;;  %v2660_v24 = vadd.f32 %v2638_v8, %v2584_v49  ;;  %v3036_v13 = vrot.slane %v5527_v16, 4  ;;  %v1803_v32 = vmul.f32 %v4863_v21, %v5239_v20 }
 0x515   : > { %v1611_v28 = vadd.f32 %v1591_v34, %v1534_v26  ;;  %v1668_v7 = vsel %vm1650_vm13, %v1666_v45, %v1667_v22  ;;  %v1878_v46 = vmul.f32 %v4878_v63, %v5237_v31  ;;  %v1879_v36 = vmul.f32 %v4878_v63, %v5239_v20 }
 0x516   : > { %v1839_v25 = vrot.slane %v1802_v58, 1  ;;  %v2736_v52 = vadd.f32 %v2714_v10, %v2660_v24  ;;  %v1840_v39 = vrot.slane %v1803_v32, 1  ;;  %v1954_v8 = vmul.f32 %v4881_v0, %v5237_v31 }
 0x517   : > { %v1688_v6 = vadd.f32 %v1668_v7, %v1611_v28  ;;  %v1745_v16 = vsel %vm1727_vm14, %v1743_v19, %v1744_v27  ;;  %v1915_v38 = vrot.slane %v1878_v46, 2  ;;  %v1916_v33 = vrot.slane %v1879_v36, 2 }
 0x518   : > { %v1955_v60 = vmul.f32 %v4881_v0, %v5239_v20  ;;  %v2756_v45 = vadd.f32 %v2748_v29, %v2736_v52  ;;  %v1777_v51 = vmul.f32 %v4872_v44, %v5237_v31  ;;  %v2030_v10 = vmul.f32 %v4889_v9, %v5237_v31 }
 0x519   : > { %v1765_v43 = vadd.f32 %v1745_v16, %v1688_v6  ;;  %v2962_v49 = vsel %vm1650_vm13, %v2960_v15, %v2961_v40  ;;  %v3037_v26 = vrot.slane %v5531_v23, 4  ;;  %v1841_v22 = vsel %vm1496_vm11, %v1839_v25, %v1840_v39 }
 0x51a   : > { %v2031_v34 = vmul.f32 %v4889_v9, %v5239_v20  ;;  %v2832_v19 = vadd.f32 %v2810_v42, %v2756_v45  ;;  %v1991_v58 = vrot.slane %v1954_v8, 3  ;;  %v2126_v29 = vmul.f32 %v4921_v59, %v5364_v3 }
 0x51b   : > { %v1785_v27 = vadd.f32 %v1777_v51, %v1765_v43  ;;  %v1917_v24 = vsel %vm1573_vm12, %v1915_v38, %v1916_v33  ;;  %v1992_v28 = vrot.slane %v1955_v60, 3  ;;  %v2127_v32 = vmul.f32 %v4921_v59, %v5366_v61 }
 0x51c   : > { %v2202_v15 = vmul.f32 %v4925_v11, %v5364_v3  ;;  %v2908_v23 = vadd.f32 %v2886_v5, %v2832_v19  ;;  %v2067_v7 = vrot.slane %v2030_v10, 4  ;;  %v2203_v42 = vmul.f32 %v4925_v11, %v5366_v61 }
 0x51d   : > { %v1861_v40 = vadd.f32 %v1841_v22, %v1785_v27  ;;  %v2068_v25 = vrot.slane %v2031_v34, 4  ;;  %v2163_v46 = vrot.slane %v2126_v29, 1  ;;  %v2164_v36 = vrot.slane %v2127_v32, 1  ;;  %v5604_v22 = vld [vmem:[%s6125_s10] ss:$0 sm:$0xff] }
 0x51e   : > { %v2278_v52 = vmul.f32 %v4928_v12, %v5364_v3  ;;  %v2984_v6 = vadd.f32 %v2962_v49, %v2908_v23  ;;  %v3038_v39 = vsel %vm1727_vm14, %v3036_v13, %v3037_v26  ;;  %v1993_v16 = vsel %vm1650_vm13, %v1991_v58, %v1992_v28 }
 0x51f   : > { %v1937_v8 = vadd.f32 %v1917_v24, %v1861_v40  ;;  %v2239_v38 = vrot.slane %v2202_v15, 2  ;;  %v2240_v33 = vrot.slane %v2203_v42, 2  ;;  %v2279_v5 = vmul.f32 %v4928_v12, %v5366_v61  ;;  %v5621_v42 = vld [vmem:[#allocation2 + $0x90] sm:$0xff] }
 0x520   : > { %v3060_v60 = vadd.f32 %v3038_v39, %v2984_v6  ;;  %v2101_v43 = vmul.f32 %v4915_v41, %v5364_v3  ;;  %v2354_v51 = vmul.f32 %v4931_v17, %v5364_v3  ;;  %v2069_v10 = vsel %vm1727_vm14, %v2067_v7, %v2068_v25  ;;  %v5623_v25 = vld [vmem:[#allocation2 + $0x98] sm:$0xf] }
 0x521   : > { %v2013_v45 = vadd.f32 %v1993_v16, %v1937_v8  ;;  %v2165_v13 = vsel %vm1496_vm11, %v2163_v46, %v2164_v36  ;;  %v2315_v49 = vrot.slane %v2278_v52, 3  ;;  %v2355_v26 = vmul.f32 %v4931_v17, %v5366_v61 }
 0x522   : > { %v3075_v34 = vadd.f32 %v5604_v22, %v3060_v60  ;;  %v2450_v27 = vmul.f32 %v4937_v18, %v5486_v47  ;;  %v2451_v58 = vmul.f32 %v4937_v18, %v5488_v4  ;;  %v2241_v29 = vsel %vm1573_vm12, %v2239_v38, %v2240_v33 }
 0x523   : > { %v2089_v19 = vadd.f32 %v2069_v10, %v2013_v45  ;;  %v2316_v24 = vrot.slane %v2279_v5, 3  ;;  %v2526_v28 = vmul.f32 %v4942_v37, %v5486_v47  ;;  %v2527_v32 = vmul.f32 %v4942_v37, %v5488_v4 }
 0x524   : > { %4105 = vmatprep.mubr.msk.f32.mxu1 %vm756_vm1, %v3075_v34  ;;  %v2391_v23 = vrot.slane %v2354_v51, 4  ;;  %v2602_v40 = vmul.f32 %v4945_v57, %v5486_v47  ;;  %v2603_v7 = vmul.f32 %v4945_v57, %v5488_v4  ;;  %v2392_v46 = vrot.slane %v2355_v26, 4 }
 0x525   : > { %v2109_v15 = vadd.f32 %v2101_v43, %v2089_v19  ;;  %v2425_v36 = vmul.f32 %v4934_v55, %v5486_v47  ;;  %v2678_v52 = vmul.f32 %v4950_v62, %v5486_v47  ;;  %v2679_v6 = vmul.f32 %v4950_v62, %v5488_v4 }
 0x526   : > { %v2487_v8 = vrot.slane %v2450_v27, 1  ;;  %v2488_v16 = vrot.slane %v2451_v58, 1  ;;  %v2563_v38 = vrot.slane %v2526_v28, 2  ;;  %v2564_v33 = vrot.slane %v2527_v32, 2 }
 0x527   : > { %v2185_v39 = vadd.f32 %v2165_v13, %v2109_v15  ;;  %v2639_v5 = vrot.slane %v2602_v40, 3  ;;  %v2640_v60 = vrot.slane %v2603_v7, 3  ;;  %v2715_v45 = vrot.slane %v2678_v52, 4 }
 0x528   : > { %v2716_v51 = vrot.slane %v2679_v6, 4  ;;  %v2774_v10 = vmul.f32 %v4956_v2, %v5621_v42  ;;  %v2775_v26 = vmul.f32 %v4956_v2, %v5623_v25  ;;  %v2317_v34 = vsel %vm1650_vm13, %v2315_v49, %v2316_v24 }
 0x529   : > { %v2261_v43 = vadd.f32 %v2241_v29, %v2185_v39  ;;  %v2850_v13 = vmul.f32 %v4964_v48, %v5621_v42  ;;  %v2851_v19 = vmul.f32 %v4964_v48, %v5623_v25  ;;  %v2926_v27 = vmul.f32 %v4967_v50, %v5621_v42 }
 0x52a   : > { %v2811_v29 = vrot.slane %v2774_v10, 1  ;;  %v2812_v28 = vrot.slane %v2775_v26, 1  ;;  %v2927_v32 = vmul.f32 %v4967_v50, %v5623_v25  ;;  %v2393_v15 = vsel %vm1727_vm14, %v2391_v23, %v2392_v46 }
 0x52b   : > { %v2337_v58 = vadd.f32 %v2317_v34, %v2261_v43  ;;  %v2489_v40 = vsel %vm1496_vm11, %v2487_v8, %v2488_v16  ;;  %v2565_v49 = vsel %vm1573_vm12, %v2563_v38, %v2564_v33  ;;  %v2749_v24 = vmul.f32 %v4953_v14, %v5621_v42 }
 0x52c   : > { %v2641_v52 = vsel %vm1650_vm13, %v2639_v5, %v2640_v60  ;;  %v2717_v6 = vsel %vm1727_vm14, %v2715_v45, %v2716_v51  ;;  %v2887_v39 = vrot.slane %v2850_v13, 2  ;;  %v2888_v43 = vrot.slane %v2851_v19, 2 }
 0x52d   : > { %v2413_v7 = vadd.f32 %v2393_v15, %v2337_v58  ;;  %v2963_v10 = vrot.slane %v2926_v27, 3  ;;  %v5653_v26 = vmul.f32 %v5523_v56, %v5621_v42  ;;  %v1476_v23 = vmul.f32 %v4825_v35, %v5237_v31 }
 0x52e   : > { %v2813_v8 = vsel %vm1496_vm11, %v2811_v29, %v2812_v28  ;;  %v2964_v16 = vrot.slane %v2927_v32, 3  ;;  %v1477_v38 = vmul.f32 %v4825_v35, %v5239_v20  ;;  %v1553_v5 = vmul.f32 %v4834_v1, %v5237_v31 }
 0x52f   : > { %v2433_v46 = vadd.f32 %v2425_v36, %v2413_v7  ;;  %v1515_v33 = vrot.slane %v1476_v23, 1  ;;  %v1554_v60 = vmul.f32 %v4834_v1, %v5239_v20  ;;  %v1630_v45 = vmul.f32 %v6166_v54, %v5237_v31 }
 0x530   : > { %v1450_v36 = vmul.f32 %v6167_v30, %v5237_v31  ;;  %v1516_v34 = vrot.slane %v1477_v38, 1  ;;  %v1631_v13 = vmul.f32 %v6166_v54, %v5239_v20  ;;  %v1592_v19 = vrot.slane %v1553_v5, 2 }
 0x531   : > { %v2509_v51 = vadd.f32 %v2489_v40, %v2433_v46  ;;  %v1593_v27 = vrot.slane %v1554_v60, 2  ;;  %v1669_v58 = vrot.slane %v1630_v45, 3  ;;  %v1707_v29 = vmul.f32 %v4853_v53, %v5237_v31 }
 0x532   : > { %v1517_v32 = vsel %vm1496_vm11, %v1515_v33, %v1516_v34  ;;  %v1670_v15 = vrot.slane %v1631_v13, 3  ;;  %v1708_v40 = vmul.f32 %v4853_v53, %v5239_v20  ;;  %v2889_v7 = vsel %vm1573_vm12, %v2887_v39, %v2888_v43 }
 0x533   : > { %v2585_v28 = vadd.f32 %v2565_v49, %v2509_v51  ;;  %v3003_v23 = vmul.f32 %v5523_v56, %v5623_v25  ;;  %v1535_v46 = vadd.f32 %v1517_v32, %v1450_v36  ;;  %v1746_v38 = vrot.slane %v1707_v29, 4 }
 0x534   : > { %v1594_v60 = vsel %vm1573_vm12, %v1592_v19, %v1593_v27  ;;  %v1747_v45 = vrot.slane %v1708_v40, 4  ;;  %v1804_v31 = vmul.f32 %v4863_v21, %v5364_v3  ;;  %v3039_v49 = vrot.slane %v5653_v26, 4 }
 0x535   : > { %v2661_v5 = vadd.f32 %v2641_v52, %v2585_v28  ;;  %v1612_v33 = vadd.f32 %v1594_v60, %v1535_v46  ;;  %v1671_v51 = vsel %vm1650_vm13, %v1669_v58, %v1670_v15  ;;  %v1805_v20 = vmul.f32 %v4863_v21, %v5366_v61 }
 0x536   : > { %v1880_v43 = vmul.f32 %v4878_v63, %v5364_v3  ;;  %v1881_v52 = vmul.f32 %v4878_v63, %v5366_v61  ;;  %v1956_v36 = vmul.f32 %v4881_v0, %v5364_v3  ;;  %v2965_v34 = vsel %vm1650_vm13, %v2963_v10, %v2964_v16 }
 0x537   : > { %v2737_v39 = vadd.f32 %v2717_v6, %v2661_v5  ;;  %v3040_v13 = vrot.slane %v3003_v23, 4  ;;  %v1689_v26 = vadd.f32 %v1671_v51, %v1612_v33  ;;  %v1748_v19 = vsel %vm1727_vm14, %v1746_v38, %v1747_v45 }
 0x538   : > { %v1842_v58 = vrot.slane %v1804_v31, 1  ;;  %v1843_v29 = vrot.slane %v1805_v20, 1  ;;  %v1957_v6 = vmul.f32 %v4881_v0, %v5366_v61  ;;  %v1778_v32 = vmul.f32 %v4872_v44, %v5364_v3 }
 0x539   : > { %v2757_v27 = vadd.f32 %v2749_v24, %v2737_v39  ;;  %v1766_v28 = vadd.f32 %v1748_v19, %v1689_v26  ;;  %v2032_v15 = vmul.f32 %v4889_v9, %v5364_v3  ;;  %v2033_v10 = vmul.f32 %v4889_v9, %v5366_v61 }
 0x53a   : > { %v1918_v40 = vrot.slane %v1880_v43, 2  ;;  %v1919_v23 = vrot.slane %v1881_v52, 2  ;;  %v1994_v46 = vrot.slane %v1956_v36, 3  ;;  %v1995_v38 = vrot.slane %v1957_v6, 3 }
 0x53b   : > { %v2833_v16 = vadd.f32 %v2813_v8, %v2757_v27  ;;  %v1786_v24 = vadd.f32 %v1778_v32, %v1766_v28  ;;  %v2128_v5 = vmul.f32 %v4921_v59, %v5486_v47  ;;  %v2129_v60 = vmul.f32 %v4921_v59, %v5488_v4 }
 0x53c   : > { %v1844_v31 = vsel %vm1496_vm11, %v1842_v58, %v1843_v29  ;;  %v2204_v33 = vmul.f32 %v4925_v11, %v5486_v47  ;;  %v2205_v8 = vmul.f32 %v4925_v11, %v5488_v4  ;;  %v3041_v51 = vsel %vm1727_vm14, %v3039_v49, %v3040_v13 }
 0x53d   : > { %v2909_v45 = vadd.f32 %v2889_v7, %v2833_v16  ;;  %v1862_v20 = vadd.f32 %v1844_v31, %v1786_v24  ;;  %v2070_v39 = vrot.slane %v2032_v15, 4  ;;  %v2071_v43 = vrot.slane %v2033_v10, 4 }
 0x53e   : > { %v1920_v36 = vsel %vm1573_vm12, %v1918_v40, %v1919_v23  ;;  %v2166_v26 = vrot.slane %v2128_v5, 1  ;;  %v2167_v19 = vrot.slane %v2129_v60, 1  ;;  %v1996_v7 = vsel %vm1650_vm13, %v1994_v46, %v1995_v38 }
 0x53f   : > { %v2985_v52 = vadd.f32 %v2965_v34, %v2909_v45  ;;  %v1938_v27 = vadd.f32 %v1920_v36, %v1862_v20  ;;  %v2242_v58 = vrot.slane %v2204_v33, 2  ;;  %v2243_v29 = vrot.slane %v2205_v8, 2 }
 0x540   : > { %v2280_v28 = vmul.f32 %v4928_v12, %v5486_v47  ;;  %v2281_v49 = vmul.f32 %v4928_v12, %v5488_v4  ;;  %v2356_v13 = vmul.f32 %v4931_v17, %v5486_v47  ;;  %v2072_v32 = vsel %vm1727_vm14, %v2070_v39, %v2071_v43 }
 0x541   : > { %v3061_v6 = vadd.f32 %v3041_v51, %v2985_v52  ;;  %v2014_v34 = vadd.f32 %v1996_v7, %v1938_v27  ;;  %v2102_v15 = vmul.f32 %v4915_v41, %v5486_v47  ;;  %v2357_v10 = vmul.f32 %v4931_v17, %v5488_v4  ;;  %v5744_v27 = vld [vmem:[#allocation2 + $0xa0] sm:$0xff]  ;;  %v5746_v7 = vld [vmem:[#allocation2 + $0xa8] sm:$0xf] }
 0x542   : > { %v2168_v40 = vsel %vm1496_vm11, %v2166_v26, %v2167_v19  ;;  %v2452_v23 = vmul.f32 %v4937_v18, %v5621_v42  ;;  %v2453_v46 = vmul.f32 %v4937_v18, %v5623_v25  ;;  %v2244_v38 = vsel %vm1573_vm12, %v2242_v58, %v2243_v29 }
 0x543   : > { %v3076_v16 = vadd.f32 %v5604_v22, %v3061_v6  ;;  %v2090_v24 = vadd.f32 %v2072_v32, %v2014_v34  ;;  %v2528_v5 = vmul.f32 %v4942_v37, %v5621_v42  ;;  %v2529_v60 = vmul.f32 %v4942_v37, %v5623_v25 }
 0x544   : > { %v2318_v45 = vrot.slane %v2280_v28, 3  ;;  %v2319_v31 = vrot.slane %v2281_v49, 3  ;;  %v2394_v33 = vrot.slane %v2356_v13, 4  ;;  %v2604_v8 = vmul.f32 %v4945_v57, %v5621_v42 }
 0x545   : > { %4106 = vmatmul.mubr.msk.f32.gmra.mrb[10].mxu1 %vm756_vm1, %v3076_v16  ;;  %v2110_v51 = vadd.f32 %v2102_v15, %v2090_v24  ;;  %v2395_v20 = vrot.slane %v2357_v10, 4  ;;  %v2490_v39 = vrot.slane %v2452_v23, 1  ;;  %v2605_v43 = vmul.f32 %v4945_v57, %v5623_v25 }
 0x546   : > { %v2491_v52 = vrot.slane %v2453_v46, 1  ;;  %v2566_v36 = vrot.slane %v2528_v5, 2  ;;  %v2680_v26 = vmul.f32 %v4950_v62, %v5621_v42  ;;  %v2681_v19 = vmul.f32 %v4950_v62, %v5623_v25 }
 0x547   : > { %v2186_v58 = vadd.f32 %v2168_v40, %v2110_v51  ;;  %v2567_v29 = vrot.slane %v2529_v60, 2  ;;  %v2642_v6 = vrot.slane %v2604_v8, 3  ;;  %v2643_v28 = vrot.slane %v2605_v43, 3 }
 0x548   : > { %v2718_v49 = vrot.slane %v2680_v26, 4  ;;  %v2719_v13 = vrot.slane %v2681_v19, 4  ;;  %v2776_v34 = vmul.f32 %v4956_v2, %v5744_v27  ;;  %v2777_v32 = vmul.f32 %v4956_v2, %v5746_v7 }
 0x549   : > { %v2262_v15 = vadd.f32 %v2244_v38, %v2186_v58  ;;  %v2426_v10 = vmul.f32 %v4934_v55, %v5621_v42  ;;  %v5756_v16 = vmul.f32 %v4964_v48, %v5744_v27  ;;  %v5760_v40 = vmul.f32 %v4964_v48, %v5746_v7 }
 0x54a   : > { %v2320_v23 = vsel %vm1650_vm13, %v2318_v45, %v2319_v31  ;;  %v2814_v46 = vrot.slane %v2776_v34, 1  ;;  %v2815_v24 = vrot.slane %v2777_v32, 1  ;;  %v5765_v5 = vmul.f32 %v4967_v50, %v5744_v27 }
 0x54b   : > { %v2338_v38 = vadd.f32 %v2320_v23, %v2262_v15  ;;  %v2396_v60 = vsel %vm1727_vm14, %v2394_v33, %v2395_v20  ;;  %v2492_v8 = vsel %vm1496_vm11, %v2490_v39, %v2491_v52  ;;  %v2568_v51 = vsel %vm1573_vm12, %v2566_v36, %v2567_v29 }
 0x54c   : > { %v2644_v43 = vsel %vm1650_vm13, %v2642_v6, %v2643_v28  ;;  %v2720_v26 = vsel %vm1727_vm14, %v2718_v49, %v2719_v13  ;;  %v2750_v45 = vmul.f32 %v4953_v14, %v5744_v27  ;;  %v2890_v31 = vrot.slane %v5756_v16, 2 }
 0x54d   : > { %v2414_v19 = vadd.f32 %v2396_v60, %v2338_v38  ;;  %v2816_v58 = vsel %vm1496_vm11, %v2814_v46, %v2815_v24  ;;  %v2891_v34 = vrot.slane %v5760_v40, 2  ;;  %v2929_v33 = vmul.f32 %v4967_v50, %v5746_v7 }
 0x54e   : > { %v2966_v20 = vrot.slane %v5765_v5, 3  ;;  %v3004_v39 = vmul.f32 %v5523_v56, %v5744_v27  ;;  %v1478_v52 = vmul.f32 %v4825_v35, %v5364_v3  ;;  %v1479_v36 = vmul.f32 %v4825_v35, %v5366_v61 }
 0x54f   : > { %v2434_v29 = vadd.f32 %v2426_v10, %v2414_v19  ;;  %v3005_v6 = vmul.f32 %v5523_v56, %v5746_v7  ;;  %v1555_v28 = vmul.f32 %v4834_v1, %v5364_v3  ;;  %v1556_v49 = vmul.f32 %v4834_v1, %v5366_v61 }
 0x550   : > { %v1451_v13 = vmul.f32 %v6167_v30, %v5364_v3  ;;  %v1518_v32 = vrot.slane %v1478_v52, 1  ;;  %v1519_v15 = vrot.slane %v1479_v36, 1  ;;  %v1632_v16 = vmul.f32 %v6166_v54, %v5364_v3 }
 0x551   : > { %v2510_v40 = vadd.f32 %v2492_v8, %v2434_v29  ;;  %v1595_v35 = vrot.slane %v1555_v28, 2  ;;  %v1596_v10 = vrot.slane %v1556_v49, 2  ;;  %v1633_v23 = vmul.f32 %v6166_v54, %v5366_v61 }
 0x552   : > { %v1520_v46 = vsel %vm1496_vm11, %v1518_v32, %v1519_v15  ;;  %v1672_v24 = vrot.slane %v1632_v16, 3  ;;  %v1709_v1 = vmul.f32 %v4853_v53, %v5364_v3  ;;  %v1710_v30 = vmul.f32 %v4853_v53, %v5366_v61 }
 0x553   : > { %v2586_v5 = vadd.f32 %v2568_v51, %v2510_v40  ;;  %v2967_v38 = vrot.slane %v2929_v33, 3  ;;  %v1536_v60 = vadd.f32 %v1520_v46, %v1451_v13  ;;  %v1673_v19 = vrot.slane %v1633_v23, 3 }
 0x554   : > { %v1597_v8 = vsel %vm1573_vm12, %v1595_v35, %v1596_v10  ;;  %v1749_v52 = vrot.slane %v1709_v1, 4  ;;  %v1750_v36 = vrot.slane %v1710_v30, 4  ;;  %v1806_v54 = vmul.f32 %v4863_v21, %v5486_v47 }
 0x555   : > { %v2662_v29 = vadd.f32 %v2644_v43, %v2586_v5  ;;  %v3042_v28 = vrot.slane %v3004_v39, 4  ;;  %v1613_v49 = vadd.f32 %v1597_v8, %v1536_v60  ;;  %v1807_v3 = vmul.f32 %v4863_v21, %v5488_v4 }
 0x556   : > { %v3043_v32 = vrot.slane %v3005_v6, 4  ;;  %v1674_v53 = vsel %vm1650_vm13, %v1672_v24, %v1673_v19  ;;  %v1882_v61 = vmul.f32 %v4878_v63, %v5486_v47  ;;  %v1883_v51 = vmul.f32 %v4878_v63, %v5488_v4 }
 0x557   : > { %v2738_v33 = vadd.f32 %v2720_v26, %v2662_v29  ;;  %v1690_v13 = vadd.f32 %v1674_v53, %v1613_v49  ;;  %v1751_v15 = vsel %vm1727_vm14, %v1749_v52, %v1750_v36  ;;  %v1779_v43 = vmul.f32 %v4872_v44, %v5486_v47 }
 0x558   : > { %v1845_v39 = vrot.slane %v1806_v54, 1  ;;  %v1846_v16 = vrot.slane %v1807_v3, 1  ;;  %v1958_v21 = vmul.f32 %v4881_v0, %v5486_v47  ;;  %v1959_v6 = vmul.f32 %v4881_v0, %v5488_v4 }
 0x559   : > { %v2758_v40 = vadd.f32 %v2750_v45, %v2738_v33  ;;  %v1767_v35 = vadd.f32 %v1751_v15, %v1690_v13  ;;  %v1921_v10 = vrot.slane %v1882_v61, 2  ;;  %v1922_v23 = vrot.slane %v1883_v51, 2 }
 0x55a   : > { %v2892_v63 = vsel %vm1573_vm12, %v2890_v31, %v2891_v34  ;;  %v2034_v26 = vmul.f32 %v4889_v9, %v5486_v47  ;;  %v2035_v44 = vmul.f32 %v4889_v9, %v5488_v4  ;;  %v2968_v1 = vsel %vm1650_vm13, %v2966_v20, %v2967_v38 }
 0x55b   : > { %v2834_v46 = vadd.f32 %v2816_v58, %v2758_v40  ;;  %v1787_v24 = vadd.f32 %v1779_v43, %v1767_v35  ;;  %v1847_v30 = vsel %vm1496_vm11, %v1845_v39, %v1846_v16  ;;  %v1997_v5 = vrot.slane %v1958_v21, 3 }
 0x55c   : > { %v1998_v0 = vrot.slane %v1959_v6, 3  ;;  %v3044_v60 = vsel %vm1727_vm14, %v3042_v28, %v3043_v32  ;;  %v1923_v31 = vsel %vm1573_vm12, %v1921_v10, %v1922_v23  ;;  %v2073_v34 = vrot.slane %v2034_v26, 4 }
 0x55d   : > { %v2910_v45 = vadd.f32 %v2892_v63, %v2834_v46  ;;  %v1863_v19 = vadd.f32 %v1847_v30, %v1787_v24  ;;  %v2074_v8 = vrot.slane %v2035_v44, 4  ;;  %v2130_v47 = vmul.f32 %v4921_v59, %v5621_v42 }
 0x55e   : > { %v2131_v9 = vmul.f32 %v4921_v59, %v5623_v25  ;;  %v2206_v20 = vmul.f32 %v4925_v11, %v5621_v42  ;;  %v2207_v38 = vmul.f32 %v4925_v11, %v5623_v25  ;;  %v1999_v52 = vsel %vm1650_vm13, %v1997_v5, %v1998_v0  ;;  %v1434_v0 = vld [vmem:[#allocation2 + $0xb0] sm:$0xff] }
 0x55f   : > { %v2986_v4 = vadd.f32 %v2968_v1, %v2910_v45  ;;  %v1939_v58 = vadd.f32 %v1923_v31, %v1863_v19  ;;  %v2282_v29 = vmul.f32 %v4928_v12, %v5621_v42  ;;  %v2283_v28 = vmul.f32 %v4928_v12, %v5623_v25  ;;  %v1435_v45 = vld [vmem:[#allocation2 + $0xb8] sm:$0xf] }
 0x560   : > { %v2075_v59 = vsel %vm1727_vm14, %v2073_v34, %v2074_v8  ;;  %v2103_v49 = vmul.f32 %v4915_v41, %v5621_v42  ;;  %v2169_v3 = vrot.slane %v2130_v47, 1  ;;  %v2170_v32 = vrot.slane %v2131_v9, 1 }
 0x561   : > { %v3062_v36 = vadd.f32 %v3044_v60, %v2986_v4  ;;  %v2015_v54 = vadd.f32 %v1999_v52, %v1939_v58  ;;  %v2245_v61 = vrot.slane %v2206_v20, 2  ;;  %v2246_v51 = vrot.slane %v2207_v38, 2 }
 0x562   : > { %v2358_v33 = vmul.f32 %v4931_v17, %v5621_v42  ;;  %v2359_v13 = vmul.f32 %v4931_v17, %v5623_v25  ;;  %v2321_v15 = vrot.slane %v2282_v29, 3  ;;  %v2322_v43 = vrot.slane %v2283_v28, 3 }
 0x563   : > { %v3077_v53 = vadd.f32 %v5604_v22, %v3062_v36  ;;  %v2091_v11 = vadd.f32 %v2075_v59, %v2015_v54  ;;  %v2171_v41 = vsel %vm1496_vm11, %v2169_v3, %v2170_v32  ;;  %v2454_v39 = vmul.f32 %v4937_v18, %v5744_v27 }
 0x564   : > { %v2455_v16 = vmul.f32 %v4937_v18, %v5746_v7  ;;  %v2247_v6 = vsel %vm1573_vm12, %v2245_v61, %v2246_v51  ;;  %v2397_v42 = vrot.slane %v2358_v33, 4  ;;  %v2398_v40 = vrot.slane %v2359_v13, 4 }
 0x565   : > { %4108 = vmatprep.mubr.msk.f32.mxu1 %vm756_vm1, %v3077_v53  ;;  %v2111_v12 = vadd.f32 %v2103_v49, %v2091_v11  ;;  %v2530_v17 = vmul.f32 %v4942_v37, %v5744_v27  ;;  %v2531_v25 = vmul.f32 %v4942_v37, %v5746_v7  ;;  %v2323_v10 = vsel %vm1650_vm13, %v2321_v15, %v2322_v43 }
 0x566   : > { %v2493_v23 = vrot.slane %v2454_v39, 1  ;;  %v2494_v63 = vrot.slane %v2455_v16, 1  ;;  %v2606_v26 = vmul.f32 %v4945_v57, %v5744_v27  ;;  %v2607_v18 = vmul.f32 %v4945_v57, %v5746_v7  ;;  %v3962_v16 = vld [vmem:[%s6127_s12] ss:$0 sm:$0xff] }
 0x567   : > { %v2187_v21 = vadd.f32 %v2171_v41, %v2111_v12  ;;  %v2427_v46 = vmul.f32 %v4934_v55, %v5744_v27  ;;  %v2682_v24 = vmul.f32 %v4950_v62, %v5744_v27  ;;  %v2683_v37 = vmul.f32 %v4950_v62, %v5746_v7 }
 0x568   : > { %v2399_v1 = vsel %vm1727_vm14, %v2397_v42, %v2398_v40  ;;  %v2569_v30 = vrot.slane %v2530_v17, 2  ;;  %v2570_v5 = vrot.slane %v2531_v25, 2  ;;  %v2495_v19 = vsel %vm1496_vm11, %v2493_v23, %v2494_v63  ;;  %v6168_v17 = vld [vmem:[#allocation4_spill] sm:$0xff] }
 0x569   : > { %v2263_v35 = vadd.f32 %v2247_v6, %v2187_v21  ;;  %v2645_v57 = vrot.slane %v2606_v26, 3  ;;  %v2646_v31 = vrot.slane %v2607_v18, 3  ;;  %v2721_v8 = vrot.slane %v2682_v24, 4 }
 0x56a   : > { %v2722_v55 = vrot.slane %v2683_v37, 4  ;;  %v2571_v47 = vsel %vm1573_vm12, %v2569_v30, %v2570_v5  ;;  %v2778_v27 = vmul.f32 %v4956_v2, %v1434_v0  ;;  %v2779_v62 = vmul.f32 %v4956_v2, %v1435_v45  ;;  %v6171_v37 = vld [vmem:[#allocation5_spill] sm:$0xff] }
 0x56b   : > { %v2339_v44 = vadd.f32 %v2323_v10, %v2263_v35  ;;  %v2647_v9 = vsel %vm1650_vm13, %v2645_v57, %v2646_v31  ;;  %v2854_v4 = vmul.f32 %v4964_v48, %v1434_v0  ;;  %v2855_v58 = vmul.f32 %v4964_v48, %v1435_v45  ;;  %v6169_v35 = vld [vmem:[#allocation3_spill] sm:$0xff]  ;;  %v6172_v57 = vld [vmem:[#allocation8_spill] sm:$0xff] }
 0x56c   : > { %v2723_v38 = vsel %vm1727_vm14, %v2721_v8, %v2722_v55  ;;  %v2817_v52 = vrot.slane %v2778_v27, 1  ;;  %v2818_v36 = vrot.slane %v2779_v62, 1  ;;  %v2930_v54 = vmul.f32 %v4967_v50, %v1434_v0 }
 0x56d   : > { %v2415_v60 = vadd.f32 %v2399_v1, %v2339_v44  ;;  %v2931_v29 = vmul.f32 %v4967_v50, %v1435_v45  ;;  %v2751_v59 = vmul.f32 %v4953_v14, %v1434_v0  ;;  %v2893_v2 = vrot.slane %v2854_v4, 2 }
 0x56e   : > { %v2894_v49 = vrot.slane %v2855_v58, 2  ;;  %v3006_v3 = vmul.f32 %v5523_v56, %v1434_v0  ;;  %v3007_v32 = vmul.f32 %v5523_v56, %v1435_v45  ;;  %v2819_v48 = vsel %vm1496_vm11, %v2817_v52, %v2818_v36 }
 0x56f   : > { %v2435_v34 = vadd.f32 %v2427_v46, %v2415_v60  ;;  %v2969_v11 = vrot.slane %v2930_v54, 3  ;;  %v2970_v61 = vrot.slane %v2931_v29, 3  ;;  %v6170_v46 = vld [vmem:[#allocation6_spill] sm:$0xff] }
 0x570   : > { %v2895_v33 = vsel %vm1573_vm12, %v2893_v2, %v2894_v49  ;;  %v3045_v13 = vrot.slane %v3006_v3, 4  ;;  %v3046_v12 = vrot.slane %v3007_v32, 4  ;;  %v6174_v54 = vld [vmem:[#allocation10_spill] sm:$0xff] }
 0x571   : > { %v2511_v7 = vadd.f32 %v2495_v19, %v2435_v34  ;;  %v2971_v15 = vsel %vm1650_vm13, %v2969_v11, %v2970_v61  ;;  %v6173_v34 = vld [vmem:[#allocation7_spill] sm:$0xff] }
 0x572   : > { %v3047_v43 = vsel %vm1727_vm14, %v3045_v13, %v3046_v12 }
 0x573   : > { %v2587_v20 = vadd.f32 %v2571_v47, %v2511_v7 }
 0x575   : > { %v2663_v28 = vadd.f32 %v2647_v9, %v2587_v20 }
 0x577   : > { %v2739_v53 = vadd.f32 %v2723_v38, %v2663_v28 }
 0x579   : > { %v2759_v51 = vadd.f32 %v2751_v59, %v2739_v53  ;;  %v6175_v59 = vld [vmem:[#allocation9_spill] sm:$0xff] }
 0x57b   : > { %v2835_v50 = vadd.f32 %v2819_v48, %v2759_v51 }
 0x57d   : > { %v2911_v14 = vadd.f32 %v2895_v33, %v2835_v50 }
 0x57f   : > { %v2987_v41 = vadd.f32 %v2971_v15, %v2911_v14 }
 0x581   : > { %v3063_v39 = vadd.f32 %v3047_v43, %v2987_v41 }
 0x583   : > { %v3078_v56 = vadd.f32 %v5604_v22, %v3063_v39 }
 0x585   : > { %4109 = vmatmul.mubr.msk.f32.gmra.mrb[12].mxu1 %vm756_vm1, %v3078_v56 }
 0x594   : > { %v4101_v21 = vpop.f32.mrb[6].mxu1 }
 0x595   : > { %v3184_v6 = vadd.f32 %v4101_v21, %v3962_v16  ;;  %v3178_v42 = vpop.f32.mrb[7].mxu1 }
 0x596   : > { %v3179_v40 = vadd.f32 %v3962_v16, %v3178_v42 }
 0x597   : > { %v5896_v25 = vadd.f32 %v3184_v6, %v6168_v17 }
 0x598   : > { %v5899_v10 = vadd.f32 %v3179_v40, %v6169_v35 }
 0x599   : > { %v3230_v23 = vsel %vm756_vm1, %v5896_v25, 0.0 }
 0x59a   : > { %3231 = vadd.xlane.f32.xlu1 %v3230_v23  ;;  %v3227_v22 = vsel %vm756_vm1, %v5899_v10, 0.0 }
 0x59b   : > { %3228 = vadd.xlane.f32.xlu0 %v3227_v22 }
 0x5d7   : > { %v4104_v63 = vpop.f32.mrb[8].mxu1 }
 0x5d8   : > { %v3194_v26 = vadd.f32 %v4104_v63, %v3962_v16  ;;  %v3188_v18 = vpop.f32.mrb[9].mxu1 }
 0x5d9   : > { %v3189_v44 = vadd.f32 %v3962_v16, %v3188_v18 }
 0x5da   : > { %v5906_v24 = vadd.f32 %v3194_v26, %v6170_v46 }
 0x5db   : > { %v5909_v1 = vadd.f32 %v3189_v44, %v6171_v37 }
 0x5dc   : > { %v3236_v30 = vsel %vm756_vm1, %v5906_v24, 0.0 }
 0x5dd   : > { %3237 = vadd.xlane.f32.xlu1 %v3236_v30  ;;  %v3233_v5 = vsel %vm756_vm1, %v5909_v1, 0.0 }
 0x5de   : > { %3234 = vadd.xlane.f32.xlu0 %v3233_v5 }
 0x618   : > { %v4107_v0 = vpop.f32.mrb[10].mxu1 }
 0x619   : > { %v3204_v45 = vadd.f32 %v4107_v0, %v3962_v16  ;;  %v3198_v60 = vpop.f32.mrb[11].mxu1 }
 0x61a   : > { %v3199_v19 = vadd.f32 %v3962_v16, %v3198_v60 }
 0x61b   : > { %v5916_v31 = vadd.f32 %v3204_v45, %v6172_v57 }
 0x61c   : > { %v5919_v8 = vadd.f32 %v3199_v19, %v6173_v34 }
 0x61d   : > { %v3242_v55 = vsel %vm756_vm1, %v5916_v31, 0.0 }
 0x61e   : > { %3243 = vadd.xlane.f32.xlu1 %v3242_v55  ;;  %v3239_v47 = vsel %vm756_vm1, %v5919_v8, 0.0 }
 0x61f   : > { %3240 = vadd.xlane.f32.xlu0 %v3239_v47 }
 0x627   : > { %v3232_v27 = vpop.xlane.xlu1 %3231 }
 0x628   : > { %v3229_v62 = vpop.xlane.xlu0 %3228  ;;  %v3252_v7 = vmul.f32 0.0625, %v3232_v27 }
 0x629   : > { %v3251_v9 = vmul.f32 0.0625, %v3229_v62 }
 0x62a   : > { %v5926_v4 = vsub.f32 %v5896_v25, %v3252_v7 }
 0x62b   : > { %v5929_v20 = vsub.f32 %v5899_v10, %v3251_v9 }
 0x62c   : > { %v3268_v28 = vmul.f32 %v5926_v4, %v5926_v4 }
 0x62d   : > { %v3267_v49 = vmul.f32 %v5929_v20, %v5929_v20 }
 0x62e   : > { %v3278_v53 = vsel %vm756_vm1, %v3268_v28, 0.0 }
 0x62f   : > { %v3275_v48 = vsel %vm756_vm1, %v3267_v49, 0.0 }
 0x658   : > { %v4110_v58 = vpop.f32.mrb[12].mxu1 }
 0x659   : > { %v3214_v38 = vadd.f32 %v4110_v58, %v3962_v16  ;;  %v3208_v52 = vpop.f32.mrb[13].mxu1 }
 0x65a   : > { %v3209_v36 = vadd.f32 %v3962_v16, %v3208_v52 }
 0x65b   : > { %v5932_v29 = vadd.f32 %v3214_v38, %v6174_v54  ;;  %v3360_v54 = vld [vmem:[%s6130_s15 + $0x8] sm:$0xff] }
 0x65c   : > { %v5937_v2 = vadd.f32 %v3209_v36, %v6175_v59  ;;  %v3359_v36 = vld [vmem:[%s6130_s15] sm:$0xff] }
 0x65d   : > { %v3248_v3 = vsel %vm756_vm1, %v5932_v29, 0.0  ;;  %v4175_v28 = vpack.c.bf16 %v3360_v54, %v3359_v36  ;;  %v3971_v59 = vld [vmem:[%s6128_s13] ss:$0 sm:$0xff] }
 0x65e   : > { %3249 = vadd.xlane.f32.xlu1 %v3248_v3  ;;  %v3245_v32 = vsel %vm756_vm1, %v5937_v2, 0.0 }
 0x65f   : > { %3246 = vadd.xlane.f32.xlu0 %v3245_v32  ;;  %4176 = vmatprep.subr.bf16.mxu0 %v4175_v28 }
 0x660   : > { %4178 = vmatpush3.bf16.msra.mxu0 %v4175_v28 }
 0x662   : > { %3279 = vadd.xlane.f32.xlu1 %v3278_v53 }
 0x663   : > { %3276 = vadd.xlane.f32.xlu0 %v3275_v48 }
 0x66a   : > { %v3238_v11 = vpop.xlane.xlu1 %3237 }
 0x66b   : > { %v3254_v61 = vmul.f32 0.0625, %v3238_v11  ;;  %v3235_v51 = vpop.xlane.xlu0 %3234 }
 0x66c   : > { %v3253_v33 = vmul.f32 0.0625, %v3235_v51 }
 0x66d   : > { %v5948_v13 = vsub.f32 %v5906_v24, %v3254_v61 }
 0x66e   : > { %v5951_v12 = vsub.f32 %v5909_v1, %v3253_v33 }
 0x66f   : > { %v3270_v50 = vmul.f32 %v5948_v13, %v5948_v13 }
 0x670   : > { %v3269_v15 = vmul.f32 %v5951_v12, %v5951_v12 }
 0x671   : > { %v3284_v14 = vsel %vm756_vm1, %v3270_v50, 0.0 }
 0x672   : > { %3285 = vadd.xlane.f32.xlu1 %v3284_v14  ;;  %v3281_v43 = vsel %vm756_vm1, %v3269_v15, 0.0 }
 0x673   : > { %3282 = vadd.xlane.f32.xlu0 %v3281_v43 }
 0x6ab   : > { %v3244_v41 = vpop.xlane.xlu1 %3243 }
 0x6ac   : > { %v3256_v39 = vmul.f32 0.0625, %v3244_v41  ;;  %v3241_v56 = vpop.xlane.xlu0 %3240 }
 0x6ad   : > { %v3255_v16 = vmul.f32 0.0625, %v3241_v56 }
 0x6ae   : > { %v5960_v21 = vsub.f32 %v5916_v31, %v3256_v39 }
 0x6af   : > { %v5963_v6 = vsub.f32 %v5919_v8, %v3255_v16 }
 0x6b0   : > { %v3272_v42 = vmul.f32 %v5960_v21, %v5960_v21 }
 0x6b1   : > { %v3271_v40 = vmul.f32 %v5963_v6, %v5963_v6 }
 0x6b2   : > { %v3290_v17 = vsel %vm756_vm1, %v3272_v42, 0.0 }
 0x6b3   : > { %3291 = vadd.xlane.f32.xlu1 %v3290_v17  ;;  %v3287_v35 = vsel %vm756_vm1, %v3271_v40, 0.0 }
 0x6b4   : > { %3288 = vadd.xlane.f32.xlu0 %v3287_v35 }
 0x6eb   : > { %v3250_v23 = vpop.xlane.xlu1 %3249 }
 0x6ec   : > { %v3258_v22 = vmul.f32 0.0625, %v3250_v23  ;;  %v3247_v63 = vpop.xlane.xlu0 %3246 }
 0x6ed   : > { %v3257_v26 = vmul.f32 0.0625, %v3247_v63 }
 0x6ee   : > { %v5972_v18 = vsub.f32 %v5932_v29, %v3258_v22 }
 0x6ef   : > { %v5975_v44 = vsub.f32 %v5937_v2, %v3257_v26  ;;  %v3280_v46 = vpop.xlane.xlu1 %3279 }
 0x6f0   : > { %v3274_v37 = vmul.f32 %v5972_v18, %v5972_v18  ;;  %v3300_v30 = vmul.f32 0.0625, %v3280_v46  ;;  %v3277_v5 = vpop.xlane.xlu0 %3276 }
 0x6f1   : > { %v3273_v0 = vmul.f32 %v5975_v44, %v5975_v44  ;;  %v3299_v45 = vmul.f32 0.0625, %v3277_v5 }
 0x6f2   : > { %v3296_v60 = vsel %vm756_vm1, %v3274_v37, 0.0  ;;  %v3308_v19 = vadd.f32 1e-05, %v3300_v30 }
 0x6f3   : > { %3297 = vadd.xlane.f32.xlu1 %v3296_v60  ;;  %v3293_v57 = vsel %vm756_vm1, %v3273_v0, 0.0  ;;  %v3307_v34 = vadd.f32 1e-05, %v3299_v45 }
 0x6f4   : > { %3294 = vadd.xlane.f32.xlu0 %v3293_v57  ;;  %4270 = vrsqrt.f32 %v3308_v19 }
 0x6f5   : > { %4272 = vrsqrt.f32 %v3307_v34 }
 0x6fe   : > { %v4271_v62 = vpop.eup %4270 }
 0x6ff   : > { %v3286_v55 = vpop.xlane.xlu1 %3285  ;;  %v4273_v38 = vpop.eup %4272  ;;  %v3324_v52 = vmul.f32 %v4271_v62, %v5926_v4  ;;  %v3972_v4 = vld [vmem:[%s6129_s14] ss:$0 sm:$0xff] }
 0x700   : > { %v3302_v47 = vmul.f32 0.0625, %v3286_v55  ;;  %v3283_v27 = vpop.xlane.xlu0 %3282  ;;  %v3323_v49 = vmul.f32 %v4273_v38, %v5929_v20 }
 0x701   : > { %v3301_v7 = vmul.f32 0.0625, %v3283_v27  ;;  %v3338_v3 = vmul.f32 %v3971_v59, %v3324_v52 }
 0x702   : > { %v3310_v9 = vadd.f32 1e-05, %v3302_v47  ;;  %v3337_v32 = vmul.f32 %v3971_v59, %v3323_v49  ;;  %v6014_v47 = vld [vmem:[%s6131_s16] ss:$0 sm:$0xff] }
 0x703   : > { %v3309_v58 = vadd.f32 1e-05, %v3301_v7  ;;  %v3352_v48 = vadd.f32 %v3972_v4, %v3338_v3 }
 0x704   : > { %4274 = vrsqrt.f32 %v3310_v9  ;;  %v3351_v53 = vadd.f32 %v3972_v4, %v3337_v32 }
 0x705   : > { %4276 = vrsqrt.f32 %v3309_v58 }
 0x706   : > { %4115 = vmatprep.mubr.msk.f32.mxu0 %vm756_vm1, %v3351_v53 }
 0x707   : > { %4116 = vmatmul.mubr.msk.f32.vlgmr.msra.gmra.mrb[10].mxu0 %vm756_vm1, %v3352_v48 }
 0x70e   : > { %v4275_v11 = vpop.eup %4274 }
 0x70f   : > { %v4277_v61 = vpop.eup %4276  ;;  %v3326_v51 = vmul.f32 %v4275_v11, %v5948_v13 }
 0x710   : > { %v3325_v20 = vmul.f32 %v4277_v61, %v5951_v12 }
 0x711   : > { %v3340_v33 = vmul.f32 %v3971_v59, %v3326_v51 }
 0x712   : > { %v3339_v50 = vmul.f32 %v3971_v59, %v3325_v20 }
 0x713   : > { %v3354_v14 = vadd.f32 %v3972_v4, %v3340_v33 }
 0x714   : > { %v3353_v15 = vadd.f32 %v3972_v4, %v3339_v50 }
 0x716   : > { %4118 = vmatprep.mubr.msk.f32.mxu0 %vm756_vm1, %v3353_v15 }
 0x717   : > { %4119 = vmatmul.mubr.msk.f32.gmra.mrb[12].mxu0 %vm756_vm1, %v3354_v14 }
 0x740   : > { %v3292_v43 = vpop.xlane.xlu1 %3291 }
 0x741   : > { %v3304_v41 = vmul.f32 0.0625, %v3292_v43  ;;  %v3289_v39 = vpop.xlane.xlu0 %3288 }
 0x742   : > { %v3303_v56 = vmul.f32 0.0625, %v3289_v39 }
 0x743   : > { %v3312_v16 = vadd.f32 1e-05, %v3304_v41 }
 0x744   : > { %v3311_v42 = vadd.f32 1e-05, %v3303_v56 }
 0x745   : > { %4278 = vrsqrt.f32 %v3312_v16 }
 0x746   : > { %4280 = vrsqrt.f32 %v3311_v42 }
 0x74f   : > { %v4279_v40 = vpop.eup %4278 }
 0x750   : > { %v4281_v13 = vpop.eup %4280  ;;  %v3328_v12 = vmul.f32 %v4279_v40, %v5960_v21 }
 0x751   : > { %v3327_v17 = vmul.f32 %v4281_v13, %v5963_v6 }
 0x752   : > { %v3342_v35 = vmul.f32 %v3971_v59, %v3328_v12 }
 0x753   : > { %v3341_v23 = vmul.f32 %v3971_v59, %v3327_v17 }
 0x754   : > { %v3356_v63 = vadd.f32 %v3972_v4, %v3342_v35 }
 0x755   : > { %v3355_v22 = vadd.f32 %v3972_v4, %v3341_v23 }
 0x757   : > { %4121 = vmatprep.mubr.msk.f32.mxu0 %vm756_vm1, %v3355_v22 }
 0x758   : > { %4122 = vmatmul.mubr.msk.f32.gmra.mrb[14].mxu0 %vm756_vm1, %v3356_v63 }
 0x780   : > { %v3298_v26 = vpop.xlane.xlu1 %3297 }
 0x781   : > { %v3306_v46 = vmul.f32 0.0625, %v3298_v26  ;;  %v3295_v37 = vpop.xlane.xlu0 %3294 }
 0x782   : > { %v3305_v30 = vmul.f32 0.0625, %v3295_v37 }
 0x783   : > { %v3314_v5 = vadd.f32 1e-05, %v3306_v46 }
 0x784   : > { %v3313_v0 = vadd.f32 1e-05, %v3305_v30 }
 0x785   : > { %4282 = vrsqrt.f32 %v3314_v5 }
 0x786   : > { %4284 = vrsqrt.f32 %v3313_v0 }
 0x78f   : > { %v4283_v45 = vpop.eup %4282 }
 0x790   : > { %v4285_v21 = vpop.eup %4284  ;;  %v3330_v6 = vmul.f32 %v4283_v45, %v5972_v18 }
 0x791   : > { %v3329_v60 = vmul.f32 %v4285_v21, %v5975_v44 }
 0x792   : > { %v3344_v19 = vmul.f32 %v3971_v59, %v3330_v6 }
 0x793   : > { %v3343_v57 = vmul.f32 %v3971_v59, %v3329_v60 }
 0x794   : > { %v3358_v55 = vadd.f32 %v3972_v4, %v3344_v19 }
 0x795   : > { %v3357_v34 = vadd.f32 %v3972_v4, %v3343_v57 }
 0x797   : > { %4124 = vmatprep.mubr.msk.f32.mxu0 %vm756_vm1, %v3357_v34 }
 0x798   : > { %4125 = vmatmul.mubr.msk.f32.gmra.mrb[16].mxu0 %vm756_vm1, %v3358_v55 }
 0x7da   : > { %v4117_v27 = vpop.f32.mrb[10].mxu0 }
 0x7db   : > { %v6017_v62 = vadd.f32 %v4117_v27, %v6014_v47  ;;  %v3458_v18 = vpop.f32.mrb[11].mxu0 }
 0x7dc   : > { %v6020_v44 = vadd.f32 %v6014_v47, %v3458_v18 }
 0x7dd   : > { %v6023_v7 = vmul.f32 0.70710677, %v6017_v62 }
 0x7de   : > { %v6026_v9 = vmul.f32 0.70710677, %v6020_v44 }
 0x7df   : > { %v3506_v58 = vand.u32 2147483647, %v6023_v7  ;;  %vm3674_vm0 = vcmp.ge.f32.partialorder %v6023_v7, 0.0 }
 0x7e0   : > { %v3505_v38 = vand.u32 2147483647, %v6026_v9  ;;  %vm3673_vm15 = vcmp.ge.f32.partialorder %v6026_v9, 0.0 }
 0x7e1   : > { %v3514_v52 = vmul.f32 0.3275911, %v3506_v58  ;;  %v3618_v51 = vsub.f32 0.0, %v3506_v58 }
 0x7e2   : > { %v3513_v36 = vmul.f32 0.3275911, %v3505_v38  ;;  %v3617_v33 = vsub.f32 0.0, %v3505_v38 }
 0x7e3   : > { %v3522_v54 = vadd.f32 1.0, %v3514_v52  ;;  %v3626_v43 = vmul.f32 %v3618_v51, %v3506_v58 }
 0x7e4   : > { %v3521_v59 = vadd.f32 1.0, %v3513_v36  ;;  %v3625_v56 = vmul.f32 %v3617_v33, %v3505_v38 }
 0x7e5   : > { %4286 = vrcp.f32 %v3522_v54  ;;  %v3635_v40 = vmul.f32 1.442695, %v3626_v43 }
 0x7e6   : > { %4288 = vrcp.f32 %v3521_v59  ;;  %v3633_v17 = vmul.f32 1.442695, %v3625_v56 }
 0x7ea   : > { %v4120_v28 = vpop.f32.mrb[12].mxu0 }
 0x7eb   : > { %v6031_v49 = vadd.f32 %v4120_v28, %v6014_v47  ;;  %v3468_v4 = vpop.f32.mrb[13].mxu0 }
 0x7ec   : > { %v6034_v3 = vadd.f32 %v6014_v47, %v3468_v4 }
 0x7ed   : > { %v6037_v32 = vmul.f32 0.70710677, %v6031_v49 }
 0x7ee   : > { %v6040_v53 = vmul.f32 0.70710677, %v6034_v3 }
 0x7ef   : > { %v3508_v48 = vand.u32 2147483647, %v6037_v32  ;;  %v4287_v14 = vpop.eup %4286  ;;  %vm3676_vm2 = vcmp.ge.f32.partialorder %v6037_v32, 0.0  ;;  %v3668_v32 = vmul.f32 0.5, %v6031_v49 }
 0x7f0   : > { %v3507_v11 = vand.u32 2147483647, %v6040_v53  ;;  %v4289_v41 = vpop.eup %4288  ;;  %v3546_v39 = vmul.f32 1.0614054, %v4287_v14  ;;  %vm3675_vm3 = vcmp.ge.f32.partialorder %v6040_v53, 0.0 }
 0x7f1   : > { %v3516_v61 = vmul.f32 0.3275911, %v3508_v48  ;;  %v3545_v16 = vmul.f32 1.0614054, %v4289_v41  ;;  %v3620_v35 = vsub.f32 0.0, %v3508_v48 }
 0x7f2   : > { %v3515_v20 = vmul.f32 0.3275911, %v3507_v11  ;;  %v3554_v42 = vadd.f32 -1.4531521, %v3546_v39  ;;  %v3619_v22 = vsub.f32 0.0, %v3507_v11  ;;  %v3713_v39 = vld [vmem:[%s6132_s17] sm:$0xff] }
 0x7f3   : > { %v3524_v50 = vadd.f32 1.0, %v3516_v61  ;;  %v3553_v13 = vadd.f32 -1.4531521, %v3545_v16  ;;  %v3628_v30 = vmul.f32 %v3620_v35, %v3508_v48  ;;  %v3715_v35 = vld [vmem:[%s6132_s17 + $0x10] sm:$0xff] }
 0x7f4   : > { %v3523_v15 = vadd.f32 1.0, %v3515_v20  ;;  %v3562_v12 = vmul.f32 %v4287_v14, %v3554_v42  ;;  %v3627_v21 = vmul.f32 %v3619_v22, %v3507_v11 }
 0x7f5   : > { %4290 = vrcp.f32 %v3524_v50  ;;  %v3561_v23 = vmul.f32 %v4289_v41, %v3553_v13  ;;  %v3639_v55 = vmul.f32 1.442695, %v3628_v30 }
 0x7f6   : > { %4292 = vrcp.f32 %v3523_v15  ;;  %v3570_v63 = vadd.f32 1.4214138, %v3562_v12  ;;  %v3637_v38 = vmul.f32 1.442695, %v3627_v21 }
 0x7f7   : > { %4294 = vpow2.f32 %v3635_v40  ;;  %v3569_v26 = vadd.f32 1.4214138, %v3561_v23  ;;  %v3716_v23 = vld [vmem:[%s6132_s17 + $0x18] sm:$0xff] }
 0x7f8   : > { %v3578_v37 = vmul.f32 %v4287_v14, %v3570_v63  ;;  %4296 = vpow2.f32 %v3633_v17  ;;  %v4183_v63 = vpack.c.bf16 %v3716_v23, %v3715_v35 }
 0x7f9   : > { %v3577_v0 = vmul.f32 %v4289_v41, %v3569_v26  ;;  %4298 = vpow2.f32 %v3639_v55 }
 0x7fa   : > { %v3586_v6 = vadd.f32 -0.28449672, %v3578_v37  ;;  %4300 = vpow2.f32 %v3637_v38  ;;  %v3720_v38 = vld [vmem:[%s6132_s17 + $0x38] sm:$0xff] }
 0x7fb   : > { %v3585_v19 = vadd.f32 -0.28449672, %v3577_v0 }
 0x7fc   : > { %v3594_v34 = vmul.f32 %v4287_v14, %v3586_v6 }
 0x7fd   : > { %v3593_v18 = vmul.f32 %v4289_v41, %v3585_v19 }
 0x7fe   : > { %v3602_v52 = vadd.f32 0.2548296, %v3594_v34 }
 0x7ff   : > { %v4291_v46 = vpop.eup %4290  ;;  %v3601_v54 = vadd.f32 0.2548296, %v3593_v18 }
 0x800   : > { %v4293_v5 = vpop.eup %4292  ;;  %v3548_v45 = vmul.f32 1.0614054, %v4291_v46  ;;  %v3610_v59 = vmul.f32 %v4287_v14, %v3602_v52  ;;  %v3714_v14 = vld [vmem:[%s6132_s17 + $0x8] sm:$0xff] }
 0x801   : > { %v3547_v60 = vmul.f32 1.0614054, %v4293_v5  ;;  %v4295_v48 = vpop.eup %4294  ;;  %v3609_v61 = vmul.f32 %v4289_v41, %v3601_v54  ;;  %v4179_v42 = vpack.c.bf16 %v3714_v14, %v3713_v39 }
 0x802   : > { %v3556_v57 = vadd.f32 -1.4531521, %v3548_v45  ;;  %v4297_v51 = vpop.eup %4296  ;;  %v3650_v20 = vmul.f32 %v4295_v48, %v3610_v59  ;;  %v3667_v59 = vmul.f32 0.5, %v6034_v3 }
 0x803   : > { %v3555_v27 = vadd.f32 -1.4531521, %v3547_v60  ;;  %v3649_v50 = vmul.f32 %v4297_v51, %v3609_v61  ;;  %4180 = vmatprep.subr.bf16.mxu1 %v4179_v42  ;;  %v4299_v26 = vpop.eup %4298  ;;  %v3717_v60 = vld [vmem:[%s6132_s17 + $0x20] sm:$0xff] }
 0x804   : > { %v3564_v58 = vmul.f32 %v4291_v46, %v3556_v57  ;;  %v3658_v41 = vsub.f32 1.0, %v3650_v20  ;;  %4182 = vmatpush3.bf16.msra.mxu1 %v4179_v42  ;;  %v4301_v0 = vpop.eup %4300 }
 0x805   : > { %v3563_v36 = vmul.f32 %v4293_v5, %v3555_v27  ;;  %v3657_v56 = vsub.f32 1.0, %v3649_v50  ;;  %4184 = vmatprep.subr.bf16.mxu1 %v4183_v63  ;;  %v3665_v27 = vmul.f32 0.5, %v6020_v44  ;;  %v3666_v44 = vmul.f32 0.5, %v6017_v62 }
 0x806   : > { %v3572_v28 = vadd.f32 1.4214138, %v3564_v58  ;;  %v3682_v37 = vsub.f32 0.0, %v3658_v41  ;;  %v3719_v58 = vld [vmem:[%s6132_s17 + $0x30] sm:$0xff] }
 0x807   : > { %v3571_v4 = vadd.f32 1.4214138, %v3563_v36  ;;  %v3681_v13 = vsub.f32 0.0, %v3657_v56  ;;  %v4191_v52 = vpack.c.bf16 %v3720_v38, %v3719_v58 }
 0x808   : > { %v3580_v11 = vmul.f32 %v4291_v46, %v3572_v28  ;;  %4186 = vmatpush3.bf16.msra.mxu1 %v4183_v63  ;;  %v3690_v9 = vsel %vm3674_vm0, %v3658_v41, %v3682_v37 }
 0x809   : > { %v3579_v33 = vmul.f32 %v4293_v5, %v3571_v4  ;;  %v3689_v45 = vsel %vm3673_vm15, %v3657_v56, %v3681_v13  ;;  %v3698_v7 = vadd.f32 1.0, %v3690_v9 }
 0x80a   : > { %v3588_v15 = vadd.f32 -0.28449672, %v3580_v11 }
 0x80b   : > { %v3587_v43 = vadd.f32 -0.28449672, %v3579_v33  ;;  %v3706_v48 = vmul.f32 %v3698_v7, %v3666_v44 }
 0x80c   : > { %v3596_v16 = vmul.f32 %v4291_v46, %v3588_v15 }
 0x80d   : > { %v3595_v40 = vmul.f32 %v4293_v5, %v3587_v43 }
 0x80e   : > { %v3604_v12 = vadd.f32 0.2548296, %v3596_v16 }
 0x80f   : > { %v3603_v17 = vadd.f32 0.2548296, %v3595_v40 }
 0x810   : > { %v3612_v22 = vmul.f32 %v4291_v46, %v3604_v12  ;;  %v3718_v46 = vld [vmem:[%s6132_s17 + $0x28] sm:$0xff] }
 0x811   : > { %v3611_v30 = vmul.f32 %v4293_v5, %v3603_v17  ;;  %v4187_v57 = vpack.c.bf16 %v3718_v46, %v3717_v60  ;;  %v3697_v5 = vadd.f32 1.0, %v3689_v45 }
 0x812   : > { %v3652_v21 = vmul.f32 %v4299_v26, %v3612_v22 }
 0x813   : > { %v3651_v6 = vmul.f32 %v4301_v0, %v3611_v30  ;;  %4188 = vmatprep.subr.bf16.mxu1 %v4187_v57  ;;  %v3705_v36 = vmul.f32 %v3697_v5, %v3665_v27 }
 0x814   : > { %v3660_v19 = vsub.f32 1.0, %v3652_v21  ;;  %4190 = vmatpush3.bf16.msra.mxu1 %v4187_v57 }
 0x815   : > { %v3659_v34 = vsub.f32 1.0, %v3651_v6  ;;  %4192 = vmatprep.subr.bf16.mxu1 %v4191_v52  ;;  %4143 = vmatprep.mubr.msk.f32.mxu1 %vm3728_vm4, %v3705_v36 }
 0x816   : > { %v3684_v55 = vsub.f32 0.0, %v3660_v19 }
 0x817   : > { %v3683_v18 = vsub.f32 0.0, %v3659_v34 }
 0x818   : > { %v3692_v54 = vsel %vm3676_vm2, %v3660_v19, %v3684_v55  ;;  %4194 = vmatpush3.bf16.msra.mxu1 %v4191_v52 }
 0x819   : > { %v3691_v28 = vsel %vm3675_vm3, %v3659_v34, %v3683_v18  ;;  %v3700_v61 = vadd.f32 1.0, %v3692_v54 }
 0x81a   : > { %v3699_v4 = vadd.f32 1.0, %v3691_v28 }
 0x81b   : > { %4144 = vmatmul.mubr.msk.f32.vlgmr.msra.gmra.mrb[14].mxu1 %vm3728_vm4, %v3706_v48  ;;  %v3708_v53 = vmul.f32 %v3700_v61, %v3668_v32 }
 0x81c   : > { %v3707_v11 = vmul.f32 %v3699_v4, %v3667_v59 }
 0x81e   : > { %4146 = vmatprep.mubr.msk.f32.mxu1 %vm3728_vm4, %v3707_v11 }
 0x81f   : > { %4147 = vmatmul.mubr.msk.f32.gmra.mrb[16].mxu1 %vm3728_vm4, %v3708_v53 }
 0x82b   : > { %v4123_v62 = vpop.f32.mrb[14].mxu0 }
 0x82c   : > { %v3484_v3 = vadd.f32 %v4123_v62, %v6014_v47  ;;  %v3478_v51 = vpop.f32.mrb[15].mxu0 }
 0x82d   : > { %v3479_v20 = vadd.f32 %v6014_v47, %v3478_v51 }
 0x82e   : > { %v3502_v33 = vmul.f32 0.70710677, %v3484_v3  ;;  %v3670_v61 = vmul.f32 0.5, %v3484_v3 }
 0x82f   : > { %v3501_v50 = vmul.f32 0.70710677, %v3479_v20  ;;  %v3669_v4 = vmul.f32 0.5, %v3479_v20 }
 0x830   : > { %v3510_v15 = vand.u32 2147483647, %v3502_v33  ;;  %vm3678_vm5 = vcmp.ge.f32.partialorder %v3502_v33, 0.0 }
 0x831   : > { %v3509_v43 = vand.u32 2147483647, %v3501_v50  ;;  %vm3677_vm6 = vcmp.ge.f32.partialorder %v3501_v50, 0.0 }
 0x832   : > { %v3518_v39 = vmul.f32 0.3275911, %v3510_v15  ;;  %v3622_v16 = vsub.f32 0.0, %v3510_v15 }
 0x833   : > { %v3517_v14 = vmul.f32 0.3275911, %v3509_v43  ;;  %v3621_v42 = vsub.f32 0.0, %v3509_v43 }
 0x834   : > { %v3526_v49 = vadd.f32 1.0, %v3518_v39  ;;  %v3630_v40 = vmul.f32 %v3622_v16, %v3510_v15 }
 0x835   : > { %v3525_v56 = vadd.f32 1.0, %v3517_v14  ;;  %v3629_v17 = vmul.f32 %v3621_v42, %v3509_v43 }
 0x836   : > { %4302 = vrcp.f32 %v3526_v49  ;;  %v3643_v22 = vmul.f32 1.442695, %v3630_v40 }
 0x837   : > { %4304 = vrcp.f32 %v3525_v56  ;;  %v3641_v37 = vmul.f32 1.442695, %v3629_v17 }
 0x838   : > { %4306 = vpow2.f32 %v3643_v22 }
 0x839   : > { %4308 = vpow2.f32 %v3641_v37 }
 0x840   : > { %v4303_v41 = vpop.eup %4302 }
 0x841   : > { %v4305_v13 = vpop.eup %4304  ;;  %v3550_v12 = vmul.f32 1.0614054, %v4303_v41 }
 0x842   : > { %v3549_v35 = vmul.f32 1.0614054, %v4305_v13  ;;  %v4307_v55 = vpop.eup %4306 }
 0x843   : > { %v3558_v23 = vadd.f32 -1.4531521, %v3550_v12  ;;  %v4309_v18 = vpop.eup %4308 }
 0x844   : > { %v3557_v63 = vadd.f32 -1.4531521, %v3549_v35 }
 0x845   : > { %v3566_v26 = vmul.f32 %v4303_v41, %v3558_v23 }
 0x846   : > { %v3565_v30 = vmul.f32 %v4305_v13, %v3557_v63 }
 0x847   : > { %v3574_v0 = vadd.f32 1.4214138, %v3566_v26 }
 0x848   : > { %v3573_v45 = vadd.f32 1.4214138, %v3565_v30 }
 0x849   : > { %v3582_v21 = vmul.f32 %v4303_v41, %v3574_v0 }
 0x84a   : > { %v3581_v6 = vmul.f32 %v4305_v13, %v3573_v45 }
 0x84b   : > { %v3590_v60 = vadd.f32 -0.28449672, %v3582_v21 }
 0x84c   : > { %v3589_v46 = vadd.f32 -0.28449672, %v3581_v6 }
 0x84d   : > { %v3598_v19 = vmul.f32 %v4303_v41, %v3590_v60 }
 0x84e   : > { %v3597_v57 = vmul.f32 %v4305_v13, %v3589_v46 }
 0x84f   : > { %v3606_v9 = vadd.f32 0.2548296, %v3598_v19 }
 0x850   : > { %v3605_v5 = vadd.f32 0.2548296, %v3597_v57 }
 0x851   : > { %v3614_v34 = vmul.f32 %v4303_v41, %v3606_v9 }
 0x852   : > { %v3613_v27 = vmul.f32 %v4305_v13, %v3605_v5 }
 0x853   : > { %v3654_v58 = vmul.f32 %v4307_v55, %v3614_v34 }
 0x854   : > { %v3653_v38 = vmul.f32 %v4309_v18, %v3613_v27 }
 0x855   : > { %v3662_v7 = vsub.f32 1.0, %v3654_v58 }
 0x856   : > { %v3661_v52 = vsub.f32 1.0, %v3653_v38 }
 0x857   : > { %v3686_v36 = vsub.f32 0.0, %v3662_v7 }
 0x858   : > { %v3685_v54 = vsub.f32 0.0, %v3661_v52 }
 0x859   : > { %v3694_v28 = vsel %vm3678_vm5, %v3662_v7, %v3686_v36 }
 0x85a   : > { %v3702_v44 = vadd.f32 1.0, %v3694_v28  ;;  %v3693_v59 = vsel %vm3677_vm6, %v3661_v52, %v3685_v54 }
 0x85b   : > { %v3701_v48 = vadd.f32 1.0, %v3693_v59 }
 0x85c   : > { %v3710_v32 = vmul.f32 %v3702_v44, %v3670_v61 }
 0x85d   : > { %v3709_v11 = vmul.f32 %v3701_v48, %v3669_v4 }
 0x85f   : > { %4149 = vmatprep.mubr.msk.f32.mxu1 %vm3728_vm4, %v3709_v11  ;;  %v3982_v11 = vld [vmem:[%s6133_s18] ss:$0 sm:$0xff] }
 0x860   : > { %4150 = vmatmul.mubr.msk.f32.gmra.mrb[18].mxu1 %vm3728_vm4, %v3710_v32 }
 0x86b   : > { %v4126_v53 = vpop.f32.mrb[16].mxu0 }
 0x86c   : > { %v3494_v62 = vadd.f32 %v4126_v53, %v6014_v47  ;;  %v3488_v51 = vpop.f32.mrb[17].mxu0 }
 0x86d   : > { %v3489_v33 = vadd.f32 %v6014_v47, %v3488_v51 }
 0x86e   : > { %v3504_v15 = vmul.f32 0.70710677, %v3494_v62  ;;  %v3672_v4 = vmul.f32 0.5, %v3494_v62 }
 0x86f   : > { %v3503_v43 = vmul.f32 0.70710677, %v3489_v33  ;;  %v3671_v44 = vmul.f32 0.5, %v3489_v33 }
 0x870   : > { %v3512_v50 = vand.u32 2147483647, %v3504_v15  ;;  %vm3680_vm7 = vcmp.ge.f32.partialorder %v3504_v15, 0.0 }
 0x871   : > { %v3511_v39 = vand.u32 2147483647, %v3503_v43  ;;  %vm3679_vm8 = vcmp.ge.f32.partialorder %v3503_v43, 0.0 }
 0x872   : > { %v3520_v14 = vmul.f32 0.3275911, %v3512_v50  ;;  %v3624_v56 = vsub.f32 0.0, %v3512_v50 }
 0x873   : > { %v3519_v20 = vmul.f32 0.3275911, %v3511_v39  ;;  %v3623_v16 = vsub.f32 0.0, %v3511_v39 }
 0x874   : > { %v3528_v49 = vadd.f32 1.0, %v3520_v14  ;;  %v3632_v41 = vmul.f32 %v3624_v56, %v3512_v50 }
 0x875   : > { %v3527_v3 = vadd.f32 1.0, %v3519_v20  ;;  %v3631_v12 = vmul.f32 %v3623_v16, %v3511_v39 }
 0x876   : > { %4310 = vrcp.f32 %v3528_v49  ;;  %v3647_v47 = vmul.f32 1.442695, %v3632_v41 }
 0x877   : > { %4312 = vrcp.f32 %v3527_v3  ;;  %v3645_v63 = vmul.f32 1.442695, %v3631_v12 }
 0x878   : > { %4314 = vpow2.f32 %v3647_v47 }
 0x879   : > { %4316 = vpow2.f32 %v3645_v63 }
 0x880   : > { %v4311_v42 = vpop.eup %4310 }
 0x881   : > { %v4313_v40 = vpop.eup %4312  ;;  %v3552_v13 = vmul.f32 1.0614054, %v4311_v42 }
 0x882   : > { %v3551_v17 = vmul.f32 1.0614054, %v4313_v40  ;;  %v4315_v5 = vpop.eup %4314 }
 0x883   : > { %v3560_v35 = vadd.f32 -1.4531521, %v3552_v13  ;;  %v4317_v55 = vpop.eup %4316 }
 0x884   : > { %v3559_v23 = vadd.f32 -1.4531521, %v3551_v17 }
 0x885   : > { %v3568_v22 = vmul.f32 %v4311_v42, %v3560_v35 }
 0x886   : > { %v3567_v26 = vmul.f32 %v4313_v40, %v3559_v23 }
 0x887   : > { %v3576_v37 = vadd.f32 1.4214138, %v3568_v22 }
 0x888   : > { %v3575_v30 = vadd.f32 1.4214138, %v3567_v26 }
 0x889   : > { %v3584_v0 = vmul.f32 %v4311_v42, %v3576_v37 }
 0x88a   : > { %v3583_v45 = vmul.f32 %v4313_v40, %v3575_v30 }
 0x88b   : > { %v3592_v21 = vadd.f32 -0.28449672, %v3584_v0 }
 0x88c   : > { %v3591_v6 = vadd.f32 -0.28449672, %v3583_v45 }
 0x88d   : > { %v3600_v60 = vmul.f32 %v4311_v42, %v3592_v21 }
 0x88e   : > { %v3599_v46 = vmul.f32 %v4313_v40, %v3591_v6 }
 0x88f   : > { %v3608_v19 = vadd.f32 0.2548296, %v3600_v60 }
 0x890   : > { %v3607_v57 = vadd.f32 0.2548296, %v3599_v46 }
 0x891   : > { %v3616_v9 = vmul.f32 %v4311_v42, %v3608_v19 }
 0x892   : > { %v3615_v34 = vmul.f32 %v4313_v40, %v3607_v57 }
 0x893   : > { %v3656_v27 = vmul.f32 %v4315_v5, %v3616_v9 }
 0x894   : > { %v3655_v18 = vmul.f32 %v4317_v55, %v3615_v34 }
 0x895   : > { %v3664_v58 = vsub.f32 1.0, %v3656_v27 }
 0x896   : > { %v3663_v38 = vsub.f32 1.0, %v3655_v18 }
 0x897   : > { %v3688_v7 = vsub.f32 0.0, %v3664_v58 }
 0x898   : > { %v3687_v52 = vsub.f32 0.0, %v3663_v38 }
 0x899   : > { %v3696_v36 = vsel %vm3680_vm7, %v3664_v58, %v3688_v7 }
 0x89a   : > { %v3704_v54 = vadd.f32 1.0, %v3696_v36  ;;  %v3695_v28 = vsel %vm3679_vm8, %v3663_v38, %v3687_v52 }
 0x89b   : > { %v3703_v59 = vadd.f32 1.0, %v3695_v28 }
 0x89c   : > { %v3712_v61 = vmul.f32 %v3704_v54, %v3672_v4 }
 0x89d   : > { %v3711_v48 = vmul.f32 %v3703_v59, %v3671_v44 }
 0x89f   : > { %4152 = vmatprep.mubr.msk.f32.mxu1 %vm3728_vm4, %v3711_v48 }
 0x8a0   : > { %4153 = vmatmul.mubr.msk.f32.gmra.mrb[20].mxu1 %vm3728_vm4, %v3712_v61 }
 0x8ee   : > { %v4145_v32 = vpop.f32.mrb[14].mxu1 }
 0x8ef   : > { %v3825_v53 = vadd.f32 %v4145_v32, %v3982_v11  ;;  %v3819_v51 = vpop.f32.mrb[15].mxu1 }
 0x8f0   : > { %v3820_v33 = vadd.f32 %v3982_v11, %v3819_v51 }
 0x8f1   : > { %v3859_v62 = vadd.f32 %v3825_v53, %v5896_v25 }
 0x8f2   : > { %v3858_v15 = vadd.f32 %v3820_v33, %v5899_v10  ;;  %v4148_v43 = vpop.f32.mrb[16].mxu1 }
 0x8f3   : > { %3867 = vst.msk [vmem:[%s602_s3 + $0x8] sm:$0xff] %vm756_vm1, %v3859_v62  ;;  %v3835_v50 = vadd.f32 %v4148_v43, %v3982_v11  ;;  %v3829_v39 = vpop.f32.mrb[17].mxu1 }
 0x8f4   : > { %3866 = vst.msk [vmem:[%s602_s3] sm:$0xff] %vm756_vm1, %v3858_v15  ;;  %v3830_v14 = vadd.f32 %v3982_v11, %v3829_v39 }
 0x8f5   : > { %v3861_v20 = vadd.f32 %v3835_v50, %v5906_v24 }
 0x8f6   : > { %v3860_v49 = vadd.f32 %v3830_v14, %v5909_v1 }
 0x8f7   : > { %3869 = vst.msk [vmem:[%s602_s3 + $0x18] sm:$0xff] %vm756_vm1, %v3861_v20 }
 0x8f8   : > { %3868 = vst.msk [vmem:[%s602_s3 + $0x10] sm:$0xff] %vm756_vm1, %v3860_v49 }
 0x933   : > { %v4151_v3 = vpop.f32.mrb[18].mxu1 }
 0x934   : > { %v3845_v25 = vadd.f32 %v4151_v3, %v3982_v11  ;;  %v3839_v56 = vpop.f32.mrb[19].mxu1 }
 0x935   : > { %v3840_v10 = vadd.f32 %v3982_v11, %v3839_v56 }
 0x936   : > { %v3863_v16 = vadd.f32 %v3845_v25, %v5916_v31 }
 0x937   : > { %v3862_v42 = vadd.f32 %v3840_v10, %v5919_v8 }
 0x938   : > { %3871 = vst.msk [vmem:[%s602_s3 + $0x28] sm:$0xff] %vm756_vm1, %v3863_v16 }
 0x939   : > { %3870 = vst.msk [vmem:[%s602_s3 + $0x20] sm:$0xff] %vm756_vm1, %v3862_v42 }
 0x973   : > { %v4154_v41 = vpop.f32.mrb[20].mxu1 }
 0x974   : > { %v3855_v24 = vadd.f32 %v4154_v41, %v3982_v11  ;;  %v3849_v40 = vpop.f32.mrb[21].mxu1 }
 0x975   : > { %v3850_v1 = vadd.f32 %v3982_v11, %v3849_v40 }
 0x976   : > { %v3865_v13 = vadd.f32 %v3855_v24, %v5932_v29 }
 0x977   : > { %v3864_v12 = vadd.f32 %v3850_v1, %v5937_v2 }
 0x978   : > { %3873 = vst.msk [vmem:[%s602_s3 + $0x38] sm:$0xff] %vm756_vm1, %v3865_v13 }
 0x979   : > { %3872 = vst.msk [vmem:[%s602_s3 + $0x30] sm:$0xff] %vm756_vm1, %v3864_v12 }
 0x97a PF: > { %s29_s0 = sadd.s32 1, %s4326_s0  }
 0x97b   : > { %p26_p4 = scmp.ge.s32.totalorder %s29_s0, 4  }
 0x97d   :  { %28 = sbr.rel (!%p26_p4) target bundleno = 5 (0x5), region = 127 }

// kernel: convvit_forward.5
= control target key start
LH: loop header
LB: loop body
LE: loop exit
PB: predicated region body
PF: predicated region fallthrough
CT: control target
= control target key end

     0   :  { %s6066_s0 = inlined_call_operand.vmem [shape: f32[2,4,128], index: 0, kind: input, shape index: {}]   ;;  %s6067_s1 = inlined_call_operand.vmem [shape: f32[128,64], index: 1, kind: input, shape index: {}]   ;;  %s6068_s2 = inlined_call_operand.vmem [shape: f32[1,64], index: 2, kind: input, shape index: {}]   ;;  %s6069_s3 = inlined_call_operand.vmem [shape: f32[1,64], index: 3, kind: input, shape index: {}]   ;;  %s6070_s4 = inlined_call_operand.vmem [shape: f32[1,64], index: 4, kind: input, shape index: {}]   ;;  %s6071_s5 = inlined_call_operand.vmem [shape: f32[64,64], index: 5, kind: input, shape index: {}]   ;;  %s6072_s6 = inlined_call_operand.vmem [shape: f32[1,64], index: 6, kind: input, shape index: {}]   ;;  %s6073_s7 = inlined_call_operand.vmem [shape: f32[4,64], index: 7, kind: input, shape index: {}]   ;;  %s6074_s8 = inlined_call_operand.vmem [shape: f32[2,1,64], index: 8, kind: input, shape index: {}]   ;;  %s6075_s9 = inlined_call_operand.vmem [shape: f32[2,1,64], index: 9, kind: input, shape index: {}]   ;;  %s6076_s10 = inlined_call_operand.vmem [shape: f32[2,64,192], index: 10, kind: input, shape index: {}]   ;;  %s6077_s11 = inlined_call_operand.vmem [shape: f32[2,1,192], index: 11, kind: input, shape index: {}]   ;;  %s6078_s12 = inlined_call_operand.vmem [shape: f32[2,64,64], index: 12, kind: input, shape index: {}]   ;;  %s6079_s13 = inlined_call_operand.vmem [shape: f32[2,1,64], index: 13, kind: input, shape index: {}]   ;;  %s6080_s14 = inlined_call_operand.vmem [shape: f32[2,1,64], index: 14, kind: input, shape index: {}]   ;;  %s6081_s15 = inlined_call_operand.vmem [shape: f32[2,1,64], index: 15, kind: input, shape index: {}]   ;;  %s6082_s16 = inlined_call_operand.vmem [shape: f32[2,64,256], index: 16, kind: input, shape index: {}]   ;;  %s6083_s17 = inlined_call_operand.vmem [shape: f32[2,1,256], index: 17, kind: input, shape index: {}]   ;;  %s6084_s18 = inlined_call_operand.vmem [shape: f32[2,256,64], index: 18, kind: input, shape index: {}]   ;;  %s6085_s19 = inlined_call_operand.vmem [shape: f32[2,1,64], index: 19, kind: input, shape index: {}]   ;;  %s6086_s20 = inlined_call_operand.vmem [shape: f32[1,64], index: 20, kind: input, shape index: {}]   ;;  %s6087_s21 = inlined_call_operand.vmem [shape: f32[1,64], index: 21, kind: input, shape index: {}]   ;;  %s6088_s22 = inlined_call_operand.vmem [shape: f32[1,64], index: 22, kind: input, shape index: {}]   ;;  %s6089_s23 = inlined_call_operand.vmem [shape: f32[1,64], index: 23, kind: input, shape index: {}]   ;;  %s6090_s24 = inlined_call_operand.hbm [shape: f32[2,2,2,64], index: 24, kind: output, shape index: {0}]   ;;  %s6091_s25 = inlined_call_operand.hbm [shape: f32[2,1,1,64], index: 25, kind: output, shape index: {1}]  }
   0x1   :  { %6117 = sst [smem:[#allocation14_spill]] %s6066_s0 }
   0x2   :  { %6118 = sst [smem:[#allocation15_spill]] %s6067_s1 }
   0x3   :  { %6119 = sst [smem:[#allocation16_spill]] %s6068_s2 }
   0x4   :  { %6120 = sst [smem:[#allocation17_spill]] %s6069_s3 }
   0x5   :  { %6121 = sst [smem:[#allocation18_spill]] %s6070_s4 }
   0x6   :  { %6122 = sst [smem:[#allocation19_spill]] %s6071_s5 }
   0x7   :  { %6123 = sst [smem:[#allocation20_spill]] %s6072_s6 }
   0x8   :  { %6124 = sst [smem:[#allocation21_spill]] %s6073_s7 }
   0x9   :  { %6125 = sst [smem:[#allocation22_spill]] %s6074_s8 }
   0xa   :  { %6126 = sst [smem:[#allocation23_spill]] %s6075_s9 }
   0xb   :  { %6127 = sst [smem:[#allocation24_spill]] %s6076_s10 }
   0xc   :  { %6128 = sst [smem:[#allocation25_spill]] %s6077_s11 }
   0xd   :  { %6129 = sst [smem:[#allocation26_spill]] %s6078_s12 }
   0xe   :  { %31 = vsyncpa [#allocation3], 0 }
   0xf   :  { %33 = vsyncpa [#allocation3 + $0x1], 0 }
  0x10   :  { %34 = vsyncpa [#allocation5], 0 }
  0x11   :  { %36 = vsyncpa [#allocation5 + $0x1], 0  ;;  %s5079_s29 = smov 0   ;;  %s5081_s2 = smov 0  }
  0x12   :  { %s5083_s6 = smov 0   ;;  %s5085_s30 = smov 0  }
  0x13 LB: > { %6130 = sst [smem:[#allocation8_spill]] %s4921_s29  ;;  %s5100_s7 = sadd.s32 4294967295, %s4933_s30   ;;  %s4933_s30 = sphi %s5085_s30, %s6164_s30   ;;  %s4929_s6 = sphi %s5083_s6, %s6166_s6   ;;  %s4925_s2 = sphi %s5081_s2, %s6168_s2   ;;  %s4921_s29 = sphi %s5079_s29, %s6167_s29  }
  0x14   : > { %6131 = sst [smem:[#allocation9_spill]] %s4929_s6  ;;  %s4030_s3 = sadd.s32 4294967294, %s4933_s30  }
  0x15   : > { %6132 = sst [smem:[#allocation10_spill]] %s4933_s30  ;;  %s5104_s26 = sadd.s32 1, %s4933_s30  }
  0x16   : > { %6133 = sst [smem:[#allocation11_spill]] %s5104_s26  ;;  %s558_s1 = sadd.s32 1, %s4929_s6 }
  0x17   : > { %s555_s8 = ssub.s32 %s4933_s30, %s5104_s26  ;;  %p568_p0 = scmp.ne.s32.totalorder %s4929_s6, %s4925_s2 }
  0x18   : > { %p556_p1 = scmp.eq.s32.totalorder %s555_s8, 0  ;;  %p569_p2 = scmp.eq.s32.totalorder %s5100_s7, 1 }
  0x19   : > { %p574_p3 = scmp.ne.s32.totalorder %s4925_s2, %s4921_s29  ;;  %p575_p4 = scmp.eq.s32.totalorder %s4030_s3, 1 }
  0x1a   : > { %s5115_s27 = scalar_select %p556_p1, %s4929_s6, %s558_s1  }
  0x1b   : > { %p5117_p5 = por %p569_p2, %p568_p0  ;;  %p5121_p6 = por %p575_p4, %p574_p3 }
  0x1c   : > { %6134 = sst [smem:[#allocation12_spill]] %s5115_s27  ;;  %p4033_p7 = scmp.ge.s32.totalorder %s4933_s30, 1 }
  0x1d   : > { %s6136_s28 = scalar_select %p5121_p6, 1, 0 }
  0x1e   : > { %p695_p8 = scmp.lt.s32.totalorder %s4933_s30, 3 }
  0x1f   : > { %6137 = sst [smem:[#allocation13_spill]] %s6136_s28 }
  0x20   : > { %p696_p9 = pnand %p4033_p7, %p695_p8 }
  0x21   : > { %s6138_s0 = sld [smem:[#allocation15_spill]] (!%p696_p9)  ;;  %v4935_v3 = vmov (!%p696_p9), 0.0|0.0   ;;  %vm4936_vm0 = vmmov (!%p696_p9), 0   ;;  %v4937_v6 = vmov (!%p696_p9), 0.0   ;;  %p766_p10 = scmp.lt.s32.totalorder (!%p696_p9), %s5100_s7, 1  ;;  %vm866_vm1 = vcmask (!%p696_p9), 519168  }
  0x22   : > { %699 = sbr.rel (%p696_p9) target bundleno = 9092 (0x2384), region = 116  ;;  %4531 = vmatprep.subr.bf16.mxu0 (!%p696_p9), %v4935_v3  ;;  %4373 = vmatprep.mubr.msk.f32.mxu0 (!%p696_p9), %vm4936_vm0, %v4937_v6  ;;  %s6139_s6 = sld [smem:[#allocation14_spill]] (!%p696_p9)  ;;  %vm937_vm3 = vcmask (!%p696_p9), 523264   ;;  %vm1148_vm4 = vcmask (!%p696_p9), 130048   ;;  %vm1240_vm5 = vcmask (!%p696_p9), 1043456   ;;  %vm1224_vm6 = vcmask (!%p696_p9), 27648  }
  0x23   : > { %4555 = vmatprep.subr.bf16.mxu1 (!%p696_p9), %v4935_v3  ;;  %4392 = vmatprep.mubr.msk.f32.mxu1 (!%p696_p9), %vm4936_vm0, %v4937_v6  ;;  %s6140_s3 = sld [smem:[#allocation16_spill]] (!%p696_p9)  ;;  %s6141_s1 = sld [smem:[#allocation19_spill]] (!%p696_p9)  ;;  %vm1236_vm7 = vcmask (!%p696_p9), 31744   ;;  %vm3871_vm12 = vcmask (!%p696_p9), 517120  }
  0x24   : > { %s6143_s9 = sld [smem:[#allocation18_spill]] (!%p696_p9)  ;;  %s6144_s5 = sld [smem:[#allocation20_spill]] (!%p696_p9) }
  0x25   : > { %s6146_s10 = sld [smem:[#allocation24_spill]] (!%p696_p9)  ;;  %s6149_s11 = sld [smem:[#allocation25_spill]] (!%p696_p9) }
  0x26   : > { %s6106_s27 = smov (!%p696_p9), 112   ;;  %s6150_s12 = sld [smem:[#allocation26_spill]] (!%p696_p9) }
  0x27   : > { %v771_v0 = vld [vmem:[%s6138_s0] sm:$0xff] (!%p696_p9)  ;;  %v772_v1 = vld [vmem:[%s6138_s0 + $0x8] sm:$0xff] (!%p696_p9)  ;;  %v773_v2 = vld [vmem:[%s6138_s0 + $0x10] sm:$0xff] (!%p696_p9)  ;;  %s6157_s30 = smov (!%p696_p9), 16  }
  0x28   : > { %v4532_v4 = vpack.c.bf16 (!%p696_p9), %v772_v1, %v771_v0  ;;  %v774_v5 = vld [vmem:[%s6138_s0 + $0x18] sm:$0xff] (!%p696_p9)  ;;  %v775_v8 = vld [vmem:[%s6138_s0 + $0x20] sm:$0xff] (!%p696_p9)  ;;  %v776_v9 = vld [vmem:[%s6138_s0 + $0x28] sm:$0xff] (!%p696_p9) }
  0x29   : > { %v4535_v7 = vpack.c.bf16 %v774_v5, %v773_v2  ;;  %v4538_v10 = vpack.c.bf16 %v776_v9, %v775_v8  ;;  %v777_v11 = vld [vmem:[%s6138_s0 + $0x30] sm:$0xff]  ;;  %v778_v12 = vld [vmem:[%s6138_s0 + $0x38] sm:$0xff]  ;;  %v779_v14 = vld [vmem:[%s6138_s0 + $0x40] sm:$0xff]  ;;  %s767_s28 = scalar_select %p766_p10, %s5100_s7, 1 }
  0x2a   : > { %4533 = vmatpush3.bf16.msra.mxu0 %v4532_v4  ;;  %v4541_v13 = vpack.c.bf16 %v778_v12, %v777_v11  ;;  %v780_v15 = vld [vmem:[%s6138_s0 + $0x48] sm:$0xff]  ;;  %v781_v17 = vld [vmem:[%s6138_s0 + $0x50] sm:$0xff]  ;;  %v782_v18 = vld [vmem:[%s6138_s0 + $0x58] sm:$0xff] }
  0x2b   : > { %4534 = vmatprep.subr.bf16.mxu0 %v4935_v3  ;;  %v4544_v16 = vpack.c.bf16 %v780_v15, %v779_v14  ;;  %v4547_v19 = vpack.c.bf16 %v782_v18, %v781_v17  ;;  %v783_v20 = vld [vmem:[%s6138_s0 + $0x60] sm:$0xff]  ;;  %v784_v21 = vld [vmem:[%s6138_s0 + $0x68] sm:$0xff]  ;;  %v785_v23 = vld [vmem:[%s6138_s0 + $0x70] sm:$0xff]  ;;  %s4035_s29 = sshll.u32 %s767_s28, 2  ;;  %s6111_s28 = smov 64  }
  0x2c   : > { %v4550_v22 = vpack.c.bf16 %v784_v21, %v783_v20  ;;  %v786_v24 = vld [vmem:[%s6138_s0 + $0x78] sm:$0xff]  ;;  %s769_s26 = scalar_lea.vmem %s6139_s6, %s4035_s29  ;;  %v4036_v27 = vld [vmem:[%s6140_s3] ss:$0 sm:$0xff]  ;;  %v923_v38 = vld [vmem:[%s6141_s1 + $0x8] sm:$0xff]  ;;  %s6142_s29 = sld [smem:[#allocation17_spill]] }
  0x2d   : > { %v4553_v25 = vpack.c.bf16 %v786_v24, %v785_v23  ;;  %v770_v26 = vld [vmem:[%s769_s26] sm:$0xf]  ;;  %v924_v39 = vld [vmem:[%s6141_s1 + $0x10] sm:$0xff]  ;;  %v925_v41 = vld [vmem:[%s6141_s1 + $0x18] sm:$0xff]  ;;  %s6147_s26 = sld [smem:[#allocation22_spill]]  ;;  %s6148_s3 = sld [smem:[#allocation23_spill]] }
  0x2e   : > { %4536 = vmatpush3.bf16.msra.mxu0 %v4535_v7  ;;  %v922_v37 = vld [vmem:[%s6141_s1] sm:$0xff]  ;;  %v4559_v42 = vpack.c.bf16 %v925_v41, %v924_v39  ;;  %v927_v44 = vld [vmem:[%s6141_s1 + $0x28] sm:$0xff]  ;;  %v928_v46 = vld [vmem:[%s6141_s1 + $0x30] sm:$0xff]  ;;  %s6104_s6 = smov 96  }
  0x2f   : > { %4537 = vmatprep.subr.bf16.mxu0 %v4935_v3  ;;  %v4556_v40 = vpack.c.bf16 %v923_v38, %v922_v37  ;;  %v926_v43 = vld [vmem:[%s6141_s1 + $0x20] sm:$0xff]  ;;  %v929_v47 = vld [vmem:[%s6141_s1 + $0x38] sm:$0xff]  ;;  %v1044_v37 = vld [vmem:[%s6146_s10 + $0x10] sm:$0xff] }
  0x30   : > { %v4562_v45 = vpack.c.bf16 %v927_v44, %v926_v43  ;;  %v4565_v48 = vpack.c.bf16 %v929_v47, %v928_v46  ;;  %v4038_v55 = vld [vmem:[%s6143_s9] ss:$0 sm:$0xff]  ;;  %v1047_v39 = vld [vmem:[%s6146_s10 + $0x28] sm:$0xff]  ;;  %v1048_v43 = vld [vmem:[%s6146_s10 + $0x30] sm:$0xff]  ;;  %s6112_s9 = smov 48  }
  0x31   : > { %4557 = vmatpush3.bf16.msra.mxu1 %v4556_v40  ;;  %v4039_v21 = vld [vmem:[%s6144_s5] ss:$0 sm:$0xff]  ;;  %v1049_v40 = vld [vmem:[%s6146_s10 + $0x38] sm:$0xff]  ;;  %s6108_s5 = smov 16  }
  0x32   : > { %4539 = vmatpush3.bf16.msra.mxu0 %v4538_v10  ;;  %4558 = vmatprep.subr.bf16.mxu1 %v4935_v3  ;;  %v4037_v53 = vld [vmem:[%s6142_s29] ss:$0 sm:$0xff]  ;;  %s6145_s29 = sld [smem:[#allocation21_spill]]  ;;  %v4571_v41 = vpack.c.bf16 %v1049_v40, %v1047_v39  ;;  %v1053_v46 = vld [vmem:[%s6146_s10 + $0x58] sm:$0xff] }
  0x33   : > { %4540 = vmatprep.subr.bf16.mxu0 %v4935_v3 }
  0x35   : > { %4560 = vmatpush3.bf16.msra.mxu1 %v4559_v42  ;;  %v1046_v42 = vld [vmem:[%s6146_s10 + $0x20] sm:$0xff] }
  0x36   : > { %4542 = vmatpush3.bf16.msra.mxu0 %v4541_v13  ;;  %4561 = vmatprep.subr.bf16.mxu1 %v4935_v3  ;;  %v4573_v44 = vpack.c.bf16 %v1048_v43, %v1046_v42 }
  0x37   : > { %4543 = vmatprep.subr.bf16.mxu0 %v4935_v3 }
  0x38   : > { %v1011_v23 = vld [vmem:[%s6145_s29] sm:$0xf]  ;;  %s6102_s29 = smov 32  }
  0x39   : > { %4563 = vmatpush3.bf16.msra.mxu1 %v4562_v45  ;;  %v1051_v45 = vld [vmem:[%s6146_s10 + $0x48] sm:$0xff] }
  0x3a   : > { %4545 = vmatpush3.bf16.msra.mxu0 %v4544_v16  ;;  %4564 = vmatprep.subr.bf16.mxu1 %v4935_v3  ;;  %v4575_v47 = vpack.c.bf16 %v1053_v46, %v1051_v45 }
  0x3b   : > { %4546 = vmatprep.subr.bf16.mxu0 %v4935_v3 }
  0x3d   : > { %4566 = vmatpush3.bf16.msra.mxu1 %v4565_v48  ;;  %v1050_v48 = vld [vmem:[%s6146_s10 + $0x40] sm:$0xff] }
  0x3e   : > { %4548 = vmatpush3.bf16.msra.mxu0 %v4547_v19 }
  0x3f   : > { %4549 = vmatprep.subr.bf16.mxu0 %v4935_v3 }
  0x42   : > { %4551 = vmatpush3.bf16.msra.mxu0 %v4550_v22 }
  0x43   : > { %4552 = vmatprep.subr.bf16.mxu0 %v4935_v3 }
  0x46   : > { %4554 = vmatpush3.bf16.msra.mxu0 %v4553_v25 }
  0x47   : > { %4395 = vmatprep.subr.mxu0 %v4937_v6 }
  0x49   : > { %4374 = vmatmul.mubr.f32.vlgmr.msra.gmra.mrb[0].mxu0 %v770_v26 }
  0x4a   : > { %4397 = vmatprep.mubr.msk.f32.mxu0 %vm4936_vm0, %v4937_v6 }
 0x11c   : > { %v860_v28 = vpop.f32.mrb[0].mxu0 }
 0x11d   : > { %v861_v29 = vadd.f32 %v4036_v27, %v860_v28  ;;  %v4375_v30 = vpop.f32.mrb[1].mxu0 }
 0x11f   : > { %v867_v31 = vsel %vm866_vm1, %v861_v29, 0.0 }
 0x120   : > { %868 = vadd.xlane.f32.xlu0 %v867_v31 }
 0x1ad   : > { %v869_v32 = vpop.xlane.xlu0 %868 }
 0x1ae   : > { %v871_v33 = vmul.f32 0.015625, %v869_v32 }
 0x1b0   : > { %v872_v34 = vsub.f32 %v861_v29, %v871_v33  ;;  %v1043_v33 = vld [vmem:[%s6146_s10 + $0x8] sm:$0xff] }
 0x1b2   : > { %v873_v35 = vmul.f32 %v872_v34, %v872_v34 }
 0x1b4   : > { %v874_v36 = vsel %vm866_vm1, %v873_v35, 0.0 }
 0x1b5   : > { %875 = vadd.xlane.f32.xlu0 %v874_v36  ;;  %v1042_v36 = vld [vmem:[%s6146_s10] sm:$0xff] }
 0x1b6   : > { %v4569_v38 = vpack.c.bf16 %v1044_v37, %v1042_v36 }
 0x242   : > { %v876_v49 = vpop.xlane.xlu0 %875 }
 0x243   : > { %v877_v50 = vmul.f32 0.015625, %v876_v49  ;;  %v1052_v49 = vld [vmem:[%s6146_s10 + $0x50] sm:$0xff] }
 0x245   : > { %v878_v51 = vadd.f32 1e-05, %v877_v50  ;;  %v4577_v50 = vpack.c.bf16 %v1052_v49, %v1050_v48  ;;  %v1482_v48 = vld [vmem:[%s6150_s12 + $0x10] sm:$0xff]  ;;  %v1483_v49 = vld [vmem:[%s6150_s12 + $0x18] sm:$0xff] }
 0x247   : > { %4775 = vrsqrt.f32 %v878_v51  ;;  %v1055_v51 = vld [vmem:[%s6146_s10 + $0x68] sm:$0xff] }
 0x251   : > { %v4776_v52 = vpop.eup %4775 }
 0x252   : > { %v880_v54 = vmul.f32 %v4776_v52, %v872_v34  ;;  %v1045_v34 = vld [vmem:[%s6146_s10 + $0x18] sm:$0xff] }
 0x253   : > { %v4567_v35 = vpack.c.bf16 %v1045_v34, %v1043_v33  ;;  %v1057_v52 = vld [vmem:[%s6146_s10 + $0x78] sm:$0xff] }
 0x254   : > { %v887_v56 = vmul.f32 %v4037_v53, %v880_v54  ;;  %v4579_v53 = vpack.c.bf16 %v1057_v52, %v1055_v51  ;;  %v1054_v54 = vld [vmem:[%s6146_s10 + $0x60] sm:$0xff]  ;;  %v4584_v51 = vpack.c.bf16 %v1483_v49, %v1482_v48 }
 0x255   : > { %4568 = vmatprep.subr.bf16.mxu1 %v4567_v35 }
 0x256   : > { %v894_v57 = vadd.f32 %v4038_v55, %v887_v56  ;;  %v1056_v55 = vld [vmem:[%s6146_s10 + $0x70] sm:$0xff] }
 0x257   : > { %v4581_v56 = vpack.c.bf16 %v1056_v55, %v1054_v54 }
 0x258   : > { %v895_v58 = vmul.f32 0.70710677, %v894_v57  ;;  %v916_v18 = vmul.f32 0.5, %v894_v57 }
 0x25a   : > { %v896_v59 = vand.u32 2147483647, %v895_v58  ;;  %vm917_vm2 = vcmp.ge.f32.partialorder %v895_v58, 0.0 }
 0x25c   : > { %v897_v60 = vmul.f32 0.3275911, %v896_v59  ;;  %v910_v62 = vsub.f32 0.0, %v896_v59 }
 0x25e   : > { %v898_v61 = vadd.f32 1.0, %v897_v60  ;;  %v911_v0 = vmul.f32 %v910_v62, %v896_v59 }
 0x260   : > { %4777 = vrcp.f32 %v898_v61  ;;  %v912_v4 = vmul.f32 1.442695, %v911_v0  ;;  %v4041_v61 = vld [vmem:[%s6147_s26] ss:$0 sm:$0xff] }
 0x262   : > { %4779 = vpow2.f32 %v912_v4 }
 0x26a   : > { %v4778_v63 = vpop.eup %4777 }
 0x26b   : > { %v901_v1 = vmul.f32 1.0614054, %v4778_v63 }
 0x26c   : > { %v4780_v13 = vpop.eup %4779 }
 0x26d   : > { %v902_v2 = vadd.f32 -1.4531521, %v901_v1 }
 0x26f   : > { %v903_v5 = vmul.f32 %v4778_v63, %v902_v2  ;;  %v1060_v2 = vlaneseq }
 0x271   : > { %v904_v7 = vadd.f32 1.4214138, %v903_v5  ;;  %v5306_v4 = vshrl.u32 %v1060_v2, 7 }
 0x273   : > { %v905_v8 = vmul.f32 %v4778_v63, %v904_v7  ;;  %v5309_v5 = vsub.s32 0, %v5306_v4  ;;  %v1058_v7 = vld [vmem:[%s6149_s11] sm:$0x3] }
 0x275   : > { %v906_v9 = vadd.f32 -0.28449672, %v905_v8  ;;  %v1063_v8 = vrot.slane %v1058_v7, %v5309_v5 }
 0x277   : > { %v907_v10 = vmul.f32 %v4778_v63, %v906_v9 }
 0x279   : > { %v908_v11 = vadd.f32 0.2548296, %v907_v10 }
 0x27b   : > { %v909_v12 = vmul.f32 %v4778_v63, %v908_v11  ;;  %v4042_v63 = vld [vmem:[%s6148_s3] ss:$0 sm:$0xff] }
 0x27d   : > { %v914_v14 = vmul.f32 %v4780_v13, %v909_v12  ;;  %v5325_v13 = vsub.s32 1, %v5306_v4 }
 0x27f   : > { %v915_v15 = vsub.f32 1.0, %v914_v14  ;;  %v1067_v14 = vrot.slane %v1058_v7, %v5325_v13 }
 0x281   : > { %v918_v16 = vsub.f32 0.0, %v915_v15 }
 0x283   : > { %v919_v17 = vsel %vm917_vm2, %v915_v15, %v918_v16 }
 0x284   : > { %v920_v19 = vadd.f32 1.0, %v919_v17 }
 0x286   : > { %v921_v20 = vmul.f32 %v920_v19, %v916_v18 }
 0x288   : > { %4393 = vmatmul.mubr.msk.f32.vlgmr.msra.gmra.mrb[0].mxu1 %vm937_vm3, %v921_v20 }
 0x289   : > { %1137 = vmatprep.mubr.f32.mxu1 %v4937_v6  ;;  %4570 = vmatpush1.bf16.msra.mxu1 %v4569_v38 }
 0x28a   : > { %4572 = vmatprep.subr.bf16.mxu1 %v4571_v41 }
 0x28d   : > { %4574 = vmatpush1.bf16.msra.mxu1 %v4573_v44 }
 0x28e   : > { %4576 = vmatprep.subr.bf16.mxu1 %v4575_v47 }
 0x291   : > { %4578 = vmatpush1.bf16.msra.mxu1 %v4577_v50 }
 0x292   : > { %4580 = vmatprep.subr.bf16.mxu1 %v4579_v53 }
 0x295   : > { %4582 = vmatpush1.bf16.msra.mxu1 %v4581_v56 }
 0x296   : > { %4586 = vmatprep.subr.bf16.mxu1 %v4935_v3 }
 0x35b   : > { %v1007_v22 = vpop.f32.mrb[0].mxu1 }
 0x35c   : > { %v1008_v24 = vadd.f32 %v4039_v21, %v1007_v22  ;;  %v4394_v25 = vpop.f32.mrb[1].mxu1 }
 0x35d   : > { %v1314_v25 = vld [vmem:[%s6150_s12] sm:$0xff] }
 0x35e   : > { %v5242_v26 = vadd.f32 %v1011_v23, %v1008_v24 }
 0x360   : > { %v1015_v27 = vsel %vm866_vm1, %v5242_v26, 0.0 }
 0x361   : > { %1016 = vadd.xlane.f32.xlu1 %v1015_v27  ;;  %v1315_v27 = vld [vmem:[%s6150_s12 + $0x8] sm:$0xff] }
 0x3ee   : > { %v1017_v28 = vpop.xlane.xlu1 %1016 }
 0x3ef   : > { %v1018_v29 = vmul.f32 0.015625, %v1017_v28  ;;  %v4587_v28 = vpack.c.bf16 %v1315_v27, %v1314_v25 }
 0x3f1   : > { %v1019_v30 = vsub.f32 %v5242_v26, %v1018_v29 }
 0x3f3   : > { %v1020_v31 = vmul.f32 %v1019_v30, %v1019_v30 }
 0x3f5   : > { %v1021_v32 = vsel %vm866_vm1, %v1020_v31, 0.0 }
 0x3f6   : > { %1022 = vadd.xlane.f32.xlu1 %v1021_v32 }
 0x483   : > { %v1023_v57 = vpop.xlane.xlu1 %1022 }
 0x484   : > { %v1024_v58 = vmul.f32 0.015625, %v1023_v57 }
 0x486   : > { %v1025_v59 = vadd.f32 1e-05, %v1024_v58 }
 0x488   : > { %4781 = vrsqrt.f32 %v1025_v59 }
 0x492   : > { %v4782_v60 = vpop.eup %4781 }
 0x493   : > { %v1027_v62 = vmul.f32 %v4782_v60, %v1019_v30 }
 0x495   : > { %v1034_v0 = vmul.f32 %v4041_v61, %v1027_v62 }
 0x497   : > { %v1041_v1 = vadd.f32 %v4042_v63, %v1034_v0 }
 0x499   : > { %4043 = vmatmul.mubr.msk.f32.vlgmr.msra.gmra.mrb[2].mxu1 %vm937_vm3, %v1041_v1 }
 0x49a   : > { %4426 = vmatprep.mubr.msk.f32.mxu1 %vm4936_vm0, %v4937_v6  ;;  %4588 = vmatpush3.bf16.msra.mxu1 %v4587_v28 }
 0x49b   : > { %4434 = vmatprep.subr.mxu1 %v4937_v6 }
 0x56c   : > { %v1139_v9 = vpop.f32.mrb[2].mxu1 }
 0x56d   : > { %v5315_v10 = vadd.f32 %v1139_v9, %v1063_v8  ;;  %v1141_v11 = vpop.f32.mrb[3].mxu1  ;;  %v1796_v9 = vld [vmem:[%s6150_s12 + $0x20] sm:$0xff] }
 0x56e   : > { %v5330_v16 = vadd.f32 %v1141_v11, %v1067_v14  ;;  %v1797_v11 = vld [vmem:[%s6150_s12 + $0x28] sm:$0xff] }
 0x56f   : > { %1146 = vrot.lane.b32.xlu0 %v5315_v10, %s6111_s28  ;;  %v5320_v12 = vmul.f32 0.25, %v5315_v10  ;;  %s6155_s28 = smov 96  }
 0x573   : > { %1316 = vrot.lane.b32.xlu0 %v5320_v12, %s6106_s27 }
 0x5e1   : > { %v1147_v15 = vpop.permute.xlu0 %1146 }
 0x5e2   : > { %4396 = vmatpush3.xpose.msk.msra.mxu0 %vm1148_vm4, %v1147_v15 }
 0x5e3   : > { %4400 = vmatprep.subr.mxu0 %v4937_v6 }
 0x5e5   : > { %4398 = vmatmul.mubr.msk.f32.vlgmr.msra.gmra.mrb[2].mxu0 %vm1148_vm4, %v5320_v12  ;;  %v1317_v33 = vpop.permute.xlu0 %1316 }
 0x5e6   : > { %4401 = vmatpush3.msk.msra.mxu0 %vm1240_vm5, %v5330_v16  ;;  %4402 = vmatprep.mubr.msk.f32.mxu0 %vm4936_vm0, %v4937_v6 }
 0x5e7   : > { %4405 = vmatprep.subr.mxu0 %v4937_v6 }
 0x6b8   : > { %v1220_v17 = vpop.f32.mrb[2].mxu0 }
 0x6b9   : > { %v4399_v18 = vpop.f32.mrb[3].mxu0  ;;  %v1225_v19 = vsel %vm1224_vm6, %v1220_v17, -inf }
 0x6ba   : > { %1226 = vmax.xlane.f32.xlu1 %v1225_v19 }
 0x747   : > { %v1227_v20 = vpop.xlane.xlu1 %1226 }
 0x748   : > { %v1228_v21 = vsub.f32 %v1220_v17, %v1227_v20 }
 0x74a   : > { %v1229_v22 = vmul.f32 1.442695, %v1228_v21 }
 0x74c   : > { %4783 = vpow2.f32 %v1229_v22 }
 0x756   : > { %v4784_v23 = vpop.eup %4783 }
 0x757   : > { %v1231_v24 = vsel %vm1224_vm6, %v4784_v23, 0.0 }
 0x758   : > { %1232 = vadd.xlane.f32.xlu1 %v1231_v24 }
 0x769   : > { %1318 = vrot.lane.b32.xlu1 %v5315_v10, %s6112_s9  ;;  %s6156_s9 = smov 80  }
 0x7e5   : > { %v1233_v29 = vpop.xlane.xlu1 %1232 }
 0x7e6   : > { %4785 = vrcp.f32 %v1233_v29 }
 0x7e9   : > { %v1319_v32 = vpop.permute.xlu1 %1318 }
 0x7f0   : > { %v4786_v30 = vpop.eup %4785 }
 0x7f1   : > { %v1235_v31 = vmul.f32 %v4786_v30, %v4784_v23  ;;  %v2038_v30 = vld [vmem:[%s6150_s12 + $0x30] sm:$0xff] }
 0x7f3   : > { %4403 = vmatmul.mubr.msk.f32.vlgmr.msra.gmra.mrb[4].mxu0 %vm1236_vm7, %v1235_v31  ;;  %v2039_v31 = vld [vmem:[%s6150_s12 + $0x38] sm:$0xff] }
 0x7f4   : > { %4406 = vmatpush3.xpose.msk.msra.mxu0 %vm1148_vm4, %v1319_v32  ;;  %4407 = vmatprep.mubr.msk.f32.mxu0 %vm4936_vm0, %v4937_v6  ;;  %v4593_v32 = vpack.c.bf16 %v2039_v31, %v2038_v30  ;;  %v2308_v31 = vld [vmem:[%s6084_s18] sm:$0xff] }
 0x7f5   : > { %4410 = vmatprep.subr.mxu0 %v4937_v6 }
 0x7f7   : > { %4408 = vmatmul.mubr.msk.f32.vlgmr.msra.gmra.mrb[6].mxu0 %vm1148_vm4, %v1317_v33 }
 0x7f8   : > { %4412 = vmatprep.mubr.msk.f32.mxu0 %vm4936_vm0, %v4937_v6 }
 0x8c6   : > { %v1310_v34 = vpop.f32.mrb[4].mxu0 }
 0x8c7   : > { %v4404_v35 = vpop.f32.mrb[5].mxu0  ;;  %4427 = vmatmul.mubr.msk.f32.vlgmr.msra.gmra.mrb[4].mxu1 %vm1148_vm4, %v1310_v34 }
 0x8c8   : > { %4436 = vmatprep.mubr.msk.f32.mxu1 %vm4936_vm0, %v4937_v6 }
 0x8ca   : > { %v1390_v36 = vpop.f32.mrb[6].mxu0 }
 0x8cb   : > { %v4409_v37 = vpop.f32.mrb[7].mxu0  ;;  %v1394_v38 = vsel %vm1224_vm6, %v1390_v36, -inf }
 0x8cc   : > { %1395 = vmax.xlane.f32.xlu1 %v1394_v38 }
 0x8dd   : > { %1632 = vrot.lane.b32.xlu1 %v5315_v10, %s6102_s29  ;;  %s6109_s29 = smov 80  }
 0x8e1   : > { %1630 = vrot.lane.b32.xlu1 %v5320_v12, %s6104_s6 }
 0x959   : > { %v1396_v39 = vpop.xlane.xlu1 %1395 }
 0x95a   : > { %v1397_v40 = vsub.f32 %v1390_v36, %v1396_v39 }
 0x95c   : > { %v1398_v41 = vmul.f32 1.442695, %v1397_v40 }
 0x95d   : > { %v1633_v53 = vpop.permute.xlu1 %1632 }
 0x95e   : > { %4787 = vpow2.f32 %v1398_v41 }
 0x961   : > { %v1631_v56 = vpop.permute.xlu1 %1630 }
 0x968   : > { %v4788_v42 = vpop.eup %4787 }
 0x969   : > { %v1400_v43 = vsel %vm1224_vm6, %v4788_v42, 0.0 }
 0x96a   : > { %1401 = vadd.xlane.f32.xlu0 %v1400_v43 }
 0x980   : > { %1405 = vrot.lane.b32.xlu0 %v5330_v16, %s6106_s27  ;;  %s6151_s27 = smov 48  }
 0x99a   : > { %v1626_v44 = vpop.f32.mrb[4].mxu1 }
 0x99b   : > { %v4428_v45 = vpop.f32.mrb[5].mxu1 }
 0x9f7   : > { %v1402_v46 = vpop.xlane.xlu0 %1401 }
 0x9f8   : > { %4789 = vrcp.f32 %v1402_v46 }
 0x9fb   : > { %v1406_v47 = vpop.permute.xlu0 %1405 }
 0x9fc   : > { %4411 = vmatpush3.msk.msra.mxu0 %vm1240_vm5, %v1406_v47 }
 0x9fd   : > { %4583 = vmatprep.subr.bf16.mxu0 %v4935_v3 }
 0xa02   : > { %v4790_v50 = vpop.eup %4789 }
 0xa03   : > { %v1404_v52 = vmul.f32 %v4790_v50, %v4788_v42 }
 0xa05   : > { %4413 = vmatmul.mubr.msk.f32.vlgmr.msra.gmra.mrb[8].mxu0 %vm1236_vm7, %v1404_v52 }
 0xa06   : > { %4585 = vmatpush3.bf16.msra.mxu0 %v4584_v51  ;;  %4419 = vmatprep.mubr.msk.f32.mxu0 %vm4936_vm0, %v4937_v6 }
 0xa07   : > { %4429 = vmatprep.subr.mxu0 %v4937_v6 }
 0xad8   : > { %v1478_v54 = vpop.f32.mrb[8].mxu0 }
 0xad9   : > { %v4414_v55 = vpop.f32.mrb[9].mxu0  ;;  %4420 = vmatmul.mubr.msk.f32.vlgmr.msra.gmra.mrb[10].mxu0 %vm1148_vm4, %v1478_v54 }
 0xada   : > { %4430 = vmatpush3.xpose.msk.msra.mxu0 %vm1148_vm4, %v1633_v53  ;;  %4431 = vmatprep.mubr.msk.f32.mxu0 %vm4936_vm0, %v4937_v6  ;;  %v2153_v53 = vld [vmem:[%s6082_s16 + $0x8] sm:$0xff]  ;;  %v2152_v55 = vld [vmem:[%s6082_s16] sm:$0xff] }
 0xadb   : > { %4589 = vmatprep.subr.bf16.mxu0 %v4935_v3 }
 0xadd   : > { %4432 = vmatmul.mubr.msk.f32.vlgmr.msra.gmra.mrb[12].mxu0 %vm1148_vm4, %v1631_v56  ;;  %v2154_v56 = vld [vmem:[%s6082_s16 + $0x10] sm:$0xff] }
 0xade   : > { %4443 = vmatprep.mubr.msk.f32.mxu0 %vm4936_vm0, %v4937_v6 }
 0xbac   : > { %v1553_v57 = vpop.f32.mrb[10].mxu0 }
 0xbad   : > { %v1627_v58 = vadd.f32 %v1626_v44, %v1553_v57  ;;  %v4421_v59 = vpop.f32.mrb[11].mxu0  ;;  %v4064_v44 = vld [vmem:[%s6079_s13] ss:$0 sm:$0xff]  ;;  %v4597_v57 = vpack.c.bf16 %v2154_v56, %v2152_v55  ;;  %v2317_v55 = vld [vmem:[%s6084_s18 + $0x48] sm:$0xff] }
 0xbae   : > { %v2159_v59 = vld [vmem:[%s6082_s16 + $0x38] sm:$0xff] }
 0xbb0   : > { %v1704_v60 = vpop.f32.mrb[12].mxu0 }
 0xbb1   : > { %v4433_v61 = vpop.f32.mrb[13].mxu0  ;;  %v1708_v62 = vsel %vm1224_vm6, %v1704_v60, -inf }
 0xbb2   : > { %1709 = vmax.xlane.f32.xlu0 %v1708_v62  ;;  %v2156_v61 = vld [vmem:[%s6082_s16 + $0x20] sm:$0xff]  ;;  %v2158_v62 = vld [vmem:[%s6082_s16 + $0x30] sm:$0xff] }
 0xbc8   : > { %1719 = vrot.lane.b32.xlu0 %v5330_v16, %s6104_s6  ;;  %s6152_s6 = smov 64  }
 0xbcc   : > { %1872 = vrot.lane.b32.xlu0 %v5320_v12, %s6109_s29  ;;  %v4590_v12 = vpack.c.bf16 %v1797_v11, %v1796_v9  ;;  %v2165_v11 = vld [vmem:[%s6082_s16 + $0x68] sm:$0xff] }
 0xbce   : > { %4591 = vmatpush3.bf16.msra.mxu0 %v4590_v12  ;;  %v2167_v12 = vld [vmem:[%s6082_s16 + $0x78] sm:$0xff] }
 0xbcf   : > { %4451 = vmatprep.subr.mxu0 %v4937_v6 }
 0xc3f   : > { %v1710_v63 = vpop.xlane.xlu0 %1709 }
 0xc40   : > { %v1711_v0 = vsub.f32 %v1704_v60, %v1710_v63  ;;  %v4601_v63 = vpack.c.bf16 %v2158_v62, %v2156_v61  ;;  %v2319_v61 = vld [vmem:[%s6084_s18 + $0x58] sm:$0xff] }
 0xc42   : > { %v1712_v1 = vmul.f32 1.442695, %v1711_v0  ;;  %v2161_v0 = vld [vmem:[%s6082_s16 + $0x48] sm:$0xff] }
 0xc43   : > { %v1720_v2 = vpop.permute.xlu0 %1719 }
 0xc44   : > { %4791 = vpow2.f32 %v1712_v1  ;;  %4435 = vmatpush3.msk.msra.mxu1 %vm1240_vm5, %v1720_v2  ;;  %v2163_v1 = vld [vmem:[%s6082_s16 + $0x58] sm:$0xff] }
 0xc45   : > { %4446 = vmatprep.subr.mxu1 %v4937_v6  ;;  %v4603_v2 = vpack.c.bf16 %v2163_v1, %v2161_v0  ;;  %v2337_v0 = vld [vmem:[%s6084_s18 + $0xe8] sm:$0xff] }
 0xc4e   : > { %v4792_v7 = vpop.eup %4791 }
 0xc4f   : > { %v1714_v8 = vsel %vm1224_vm6, %v4792_v7, 0.0 }
 0xc50   : > { %1715 = vadd.xlane.f32.xlu1 %v1714_v8  ;;  %v2162_v8 = vld [vmem:[%s6082_s16 + $0x50] sm:$0xff] }
 0xc61   : > { %1874 = vrot.lane.b32.xlu1 %v5315_v10, %s6108_s5  ;;  %v1873_v10 = vpop.permute.xlu0 %1872  ;;  %s6154_s5 = smov 32  }
 0xcdd   : > { %v1716_v14 = vpop.xlane.xlu1 %1715 }
 0xcde   : > { %4793 = vrcp.f32 %v1716_v14  ;;  %v2164_v14 = vld [vmem:[%s6082_s16 + $0x60] sm:$0xff] }
 0xce1   : > { %v1875_v18 = vpop.permute.xlu1 %1874 }
 0xce8   : > { %v4794_v15 = vpop.eup %4793 }
 0xce9   : > { %v1718_v17 = vmul.f32 %v4794_v15, %v4792_v7  ;;  %v2160_v7 = vld [vmem:[%s6082_s16 + $0x40] sm:$0xff]  ;;  %v4607_v15 = vpack.c.bf16 %v2167_v12, %v2165_v11  ;;  %v2339_v11 = vld [vmem:[%s6084_s18 + $0xf8] sm:$0xff] }
 0xcea   : > { %v4605_v9 = vpack.c.bf16 %v2162_v8, %v2160_v7  ;;  %v2321_v7 = vld [vmem:[%s6084_s18 + $0x68] sm:$0xff] }
 0xceb   : > { %4437 = vmatmul.mubr.msk.f32.vlgmr.msra.gmra.mrb[6].mxu1 %vm1236_vm7, %v1718_v17  ;;  %v2166_v17 = vld [vmem:[%s6082_s16 + $0x70] sm:$0xff] }
 0xcec   : > { %4447 = vmatpush3.xpose.msk.msra.mxu1 %vm1148_vm4, %v1875_v18  ;;  %4448 = vmatprep.mubr.msk.f32.mxu1 %vm4936_vm0, %v4937_v6  ;;  %v4609_v18 = vpack.c.bf16 %v2166_v17, %v2164_v14  ;;  %v2322_v14 = vld [vmem:[%s6084_s18 + $0x70] sm:$0xff] }
 0xced   : > { %4592 = vmatprep.subr.bf16.mxu1 %v4935_v3 }
 0xcef   : > { %4449 = vmatmul.mubr.msk.f32.vlgmr.msra.gmra.mrb[8].mxu1 %vm1148_vm4, %v1873_v10 }
 0xcf0   : > { %4460 = vmatprep.mubr.msk.f32.mxu1 %vm4936_vm0, %v4937_v6  ;;  %4594 = vmatpush3.bf16.msra.mxu1 %v4593_v32  ;;  %v2309_v32 = vld [vmem:[%s6084_s18 + $0x8] sm:$0xff] }
 0xdbe   : > { %v1792_v19 = vpop.f32.mrb[6].mxu1 }
 0xdbf   : > { %v4438_v20 = vpop.f32.mrb[7].mxu1  ;;  %4444 = vmatmul.mubr.msk.f32.vlgmr.msra.gmra.mrb[14].mxu0 %vm1148_vm4, %v1792_v19 }
 0xdc0   : > { %4453 = vmatprep.mubr.msk.f32.mxu0 %vm4936_vm0, %v4937_v6 }
 0xdc2   : > { %v1946_v21 = vpop.f32.mrb[8].mxu1 }
 0xdc3   : > { %v4450_v22 = vpop.f32.mrb[9].mxu1  ;;  %v1950_v23 = vsel %vm1224_vm6, %v1946_v21, -inf }
 0xdc4   : > { %1951 = vmax.xlane.f32.xlu1 %v1950_v23  ;;  %v4065_v22 = vld [vmem:[%s6080_s14] ss:$0 sm:$0xff] }
 0xe51   : > { %v1952_v24 = vpop.xlane.xlu1 %1951 }
 0xe52   : > { %v1953_v25 = vsub.f32 %v1946_v21, %v1952_v24  ;;  %v4066_v24 = vld [vmem:[%s6081_s15] ss:$0 sm:$0xff] }
 0xe54   : > { %v1954_v27 = vmul.f32 1.442695, %v1953_v25 }
 0xe56   : > { %4795 = vpow2.f32 %v1954_v27 }
 0xe60   : > { %v4796_v28 = vpop.eup %4795 }
 0xe61   : > { %v1956_v29 = vsel %vm1224_vm6, %v4796_v28, 0.0 }
 0xe62   : > { %1957 = vadd.xlane.f32.xlu0 %v1956_v29  ;;  %v2325_v29 = vld [vmem:[%s6084_s18 + $0x88] sm:$0xff] }
 0xe78   : > { %1961 = vrot.lane.b32.xlu0 %v5330_v16, %s6109_s29  ;;  %s6153_s29 = smov 112  }
 0xe92   : > { %v1867_v33 = vpop.f32.mrb[14].mxu0 }
 0xe93   : > { %v1871_v34 = vadd.f32 %v1867_v33, %v1627_v58  ;;  %v4445_v35 = vpop.f32.mrb[15].mxu0  ;;  %v2157_v58 = vld [vmem:[%s6082_s16 + $0x28] sm:$0xff]  ;;  %v4613_v33 = vpack.c.bf16 %v2309_v32, %v2308_v31 }
 0xe94   : > { %v4599_v60 = vpack.c.bf16 %v2159_v59, %v2157_v58  ;;  %v2327_v35 = vld [vmem:[%s6084_s18 + $0x98] sm:$0xff] }
 0xe95   : > { %v2335_v58 = vld [vmem:[%s6084_s18 + $0xd8] sm:$0xff] }
 0xeef   : > { %v1958_v36 = vpop.xlane.xlu0 %1957 }
 0xef0   : > { %4797 = vrcp.f32 %v1958_v36 }
 0xef3   : > { %v1962_v37 = vpop.permute.xlu0 %1961 }
 0xef4   : > { %4452 = vmatpush3.msk.msra.mxu0 %vm1240_vm5, %v1962_v37  ;;  %v2310_v37 = vld [vmem:[%s6084_s18 + $0x10] sm:$0xff] }
 0xefa   : > { %v4798_v38 = vpop.eup %4797 }
 0xefb   : > { %v1960_v16 = vmul.f32 %v4798_v38, %v4796_v28  ;;  %v2324_v28 = vld [vmem:[%s6084_s18 + $0x80] sm:$0xff]  ;;  %v2311_v38 = vld [vmem:[%s6084_s18 + $0x18] sm:$0xff] }
 0xefc   : > { %v4611_v30 = vpack.c.bf16 %v2325_v29, %v2324_v28 }
 0xefd   : > { %4454 = vmatmul.mubr.msk.f32.vlgmr.msra.gmra.mrb[16].mxu0 %vm1236_vm7, %v1960_v16  ;;  %v4617_v16 = vpack.c.bf16 %v2311_v38, %v2310_v37 }
 0xefe   : > { %2247 = vmatprep.mubr.f32.mxu0 %v4937_v6  ;;  %4612 = vmatprep.subr.bf16.mxu1 %v4611_v30 }
 0xfd0   : > { %v2034_v39 = vpop.f32.mrb[16].mxu0 }
 0xfd1   : > { %v4455_v40 = vpop.f32.mrb[17].mxu0  ;;  %4461 = vmatmul.mubr.msk.f32.vlgmr.msra.gmra.mrb[10].mxu1 %vm1148_vm4, %v2034_v39  ;;  %v2328_v39 = vld [vmem:[%s6084_s18 + $0xa0] sm:$0xff] }
 0xfd2   : > { %4614 = vmatpush3.bf16.msra.mxu1 %v4613_v33  ;;  %v2329_v40 = vld [vmem:[%s6084_s18 + $0xa8] sm:$0xff] }
0x10a4   : > { %v2109_v41 = vpop.f32.mrb[10].mxu1 }
0x10a5   : > { %v2113_v42 = vadd.f32 %v2109_v41, %v1871_v34  ;;  %v4462_v43 = vpop.f32.mrb[11].mxu1  ;;  %v2326_v34 = vld [vmem:[%s6084_s18 + $0x90] sm:$0xff]  ;;  %v4619_v41 = vpack.c.bf16 %v2329_v40, %v2328_v39 }
0x10a6   : > { %v4615_v36 = vpack.c.bf16 %v2327_v35, %v2326_v34  ;;  %v2313_v43 = vld [vmem:[%s6084_s18 + $0x28] sm:$0xff] }
0x10a7   : > { %v2114_v45 = vadd.f32 %v2113_v42, %v5242_v26  ;;  %v2155_v26 = vld [vmem:[%s6082_s16 + $0x18] sm:$0xff]  ;;  %v2312_v42 = vld [vmem:[%s6084_s18 + $0x20] sm:$0xff] }
0x10a8   : > { %v4595_v54 = vpack.c.bf16 %v2155_v26, %v2153_v53  ;;  %4616 = vmatprep.subr.bf16.mxu1 %v4615_v36  ;;  %v2333_v53 = vld [vmem:[%s6084_s18 + $0xc8] sm:$0xff] }
0x10a9   : > { %v5435_v46 = vadd.f32 %v4064_v44, %v2114_v45  ;;  %4618 = vmatpush3.bf16.msra.mxu1 %v4617_v16  ;;  %v4621_v44 = vpack.c.bf16 %v2313_v43, %v2312_v42  ;;  %v2330_v45 = vld [vmem:[%s6084_s18 + $0xb0] sm:$0xff] }
0x10aa   : > { %4596 = vmatprep.subr.bf16.mxu0 %v4595_v54  ;;  %4620 = vmatprep.subr.bf16.mxu1 %v4619_v41  ;;  %v2316_v54 = vld [vmem:[%s6084_s18 + $0x40] sm:$0xff] }
0x10ab   : > { %v2125_v47 = vsel %vm866_vm1, %v5435_v46, 0.0  ;;  %4598 = vmatpush1.bf16.msra.mxu0 %v4597_v57  ;;  %v4629_v56 = vpack.c.bf16 %v2317_v55, %v2316_v54  ;;  %v2334_v57 = vld [vmem:[%s6084_s18 + $0xd0] sm:$0xff] }
0x10ac   : > { %2126 = vadd.xlane.f32.xlu1 %v2125_v47  ;;  %4600 = vmatprep.subr.bf16.mxu0 %v4599_v60  ;;  %v2331_v47 = vld [vmem:[%s6084_s18 + $0xb8] sm:$0xff]  ;;  %v4631_v59 = vpack.c.bf16 %v2335_v58, %v2334_v57  ;;  %v2318_v60 = vld [vmem:[%s6084_s18 + $0x50] sm:$0xff] }
0x10ad   : > { %4622 = vmatpush3.bf16.msra.mxu1 %v4621_v44  ;;  %v4633_v62 = vpack.c.bf16 %v2319_v61, %v2318_v60 }
0x10af   : > { %4602 = vmatpush1.bf16.msra.mxu0 %v4601_v63  ;;  %v2336_v63 = vld [vmem:[%s6084_s18 + $0xe0] sm:$0xff] }
0x10b0   : > { %4604 = vmatprep.subr.bf16.mxu0 %v4603_v2  ;;  %v4635_v1 = vpack.c.bf16 %v2337_v0, %v2336_v63  ;;  %v2320_v2 = vld [vmem:[%s6084_s18 + $0x60] sm:$0xff] }
0x10b1   : > { %v4637_v8 = vpack.c.bf16 %v2321_v7, %v2320_v2 }
0x10b3   : > { %4606 = vmatpush1.bf16.msra.mxu0 %v4605_v9  ;;  %v2338_v9 = vld [vmem:[%s6084_s18 + $0xf0] sm:$0xff] }
0x10b4   : > { %4608 = vmatprep.subr.bf16.mxu0 %v4607_v15  ;;  %v4639_v12 = vpack.c.bf16 %v2339_v11, %v2338_v9  ;;  %v2323_v15 = vld [vmem:[%s6084_s18 + $0x78] sm:$0xff] }
0x10b5   : > { %v4641_v17 = vpack.c.bf16 %v2323_v15, %v2322_v14 }
0x10b7   : > { %4610 = vmatpush1.bf16.msra.mxu0 %v4609_v18  ;;  %v2168_v18 = vld [vmem:[%s6083_s17] sm:$0x3] }
0x1139   : > { %v2127_v48 = vpop.xlane.xlu1 %2126 }
0x113a   : > { %v2128_v49 = vmul.f32 0.015625, %v2127_v48  ;;  %v4623_v48 = vpack.c.bf16 %v2331_v47, %v2330_v45 }
0x113c   : > { %v2129_v50 = vsub.f32 %v5435_v46, %v2128_v49  ;;  %v2314_v49 = vld [vmem:[%s6084_s18 + $0x30] sm:$0xff]  ;;  %4624 = vmatprep.subr.bf16.mxu1 %v4623_v48 }
0x113e   : > { %v2130_v51 = vmul.f32 %v2129_v50, %v2129_v50 }
0x1140   : > { %v2131_v52 = vsel %vm866_vm1, %v2130_v51, 0.0 }
0x1141   : > { %2132 = vadd.xlane.f32.xlu1 %v2131_v52  ;;  %v2332_v52 = vld [vmem:[%s6084_s18 + $0xc0] sm:$0xff] }
0x1142   : > { %v4627_v26 = vpack.c.bf16 %v2333_v53, %v2332_v52 }
0x11ce   : > { %v2133_v10 = vpop.xlane.xlu1 %2132 }
0x11cf   : > { %v2134_v19 = vmul.f32 0.015625, %v2133_v10  ;;  %v2173_v10 = vrot.slane %v2168_v18, %v5309_v5 }
0x11d1   : > { %v2135_v20 = vadd.f32 1e-05, %v2134_v19  ;;  %v2177_v19 = vrot.slane %v2168_v18, %v5325_v13  ;;  %v4068_v18 = vld [vmem:[%s6085_s19] ss:$0 sm:$0xff] }
0x11d3   : > { %4799 = vrsqrt.f32 %v2135_v20 }
0x11dd   : > { %v4800_v21 = vpop.eup %4799 }
0x11de   : > { %v2137_v23 = vmul.f32 %v4800_v21, %v2129_v50  ;;  %v2315_v50 = vld [vmem:[%s6084_s18 + $0x38] sm:$0xff] }
0x11df   : > { %v4625_v51 = vpack.c.bf16 %v2315_v50, %v2314_v49 }
0x11e0   : > { %v2144_v25 = vmul.f32 %v4065_v22, %v2137_v23 }
0x11e1   : > { %4626 = vmatpush3.bf16.msra.mxu1 %v4625_v51 }
0x11e2   : > { %v2151_v27 = vadd.f32 %v4066_v24, %v2144_v25  ;;  %4628 = vmatprep.subr.bf16.mxu1 %v4627_v26 }
0x11e4   : > { %4067 = vmatmul.mubr.msk.f32.vlgmr.msra.gmra.mrb[18].mxu0 %vm937_vm3, %v2151_v27 }
0x11e5   : > { %2546 = vmatprep.mubr.f32.mxu0 %v4937_v6  ;;  %4630 = vmatpush3.bf16.msra.mxu1 %v4629_v56 }
0x11e6   : > { %4632 = vmatprep.subr.bf16.mxu1 %v4631_v59 }
0x11e9   : > { %4634 = vmatpush3.bf16.msra.mxu1 %v4633_v62 }
0x11ea   : > { %4636 = vmatprep.subr.bf16.mxu1 %v4635_v1 }
0x11ed   : > { %4638 = vmatpush3.bf16.msra.mxu1 %v4637_v8 }
0x11ee   : > { %4640 = vmatprep.subr.bf16.mxu1 %v4639_v12 }
0x11f1   : > { %4642 = vmatpush3.bf16.msra.mxu1 %v4641_v17 }
0x11f2   : > { %4468 = vmatprep.subr.mxu1 %v4937_v6 }
0x12b7   : > { %v2249_v20 = vpop.f32.mrb[18].mxu0 }
0x12b8   : > { %v2250_v21 = vadd.f32 %v2249_v20, %v2173_v10  ;;  %v2251_v22 = vpop.f32.mrb[19].mxu0 }
0x12b9   : > { %v2252_v23 = vadd.f32 %v2251_v22, %v2177_v19 }
0x12ba   : > { %v2254_v24 = vmul.f32 0.70710677, %v2250_v21  ;;  %v2296_v12 = vmul.f32 0.5, %v2250_v21 }
0x12bb   : > { %v2255_v25 = vmul.f32 0.70710677, %v2252_v23  ;;  %v2297_v9 = vmul.f32 0.5, %v2252_v23 }
0x12bc   : > { %v2256_v27 = vand.u32 2147483647, %v2254_v24  ;;  %vm2298_vm8 = vcmp.ge.f32.partialorder %v2254_v24, 0.0 }
0x12bd   : > { %v2257_v28 = vand.u32 2147483647, %v2255_v25  ;;  %vm2299_vm9 = vcmp.ge.f32.partialorder %v2255_v25, 0.0 }
0x12be   : > { %v2258_v29 = vmul.f32 0.3275911, %v2256_v27  ;;  %v2284_v33 = vsub.f32 0.0, %v2256_v27 }
0x12bf   : > { %v2259_v30 = vmul.f32 0.3275911, %v2257_v28  ;;  %v2285_v34 = vsub.f32 0.0, %v2257_v28 }
0x12c0   : > { %v2260_v31 = vadd.f32 1.0, %v2258_v29  ;;  %v2286_v36 = vmul.f32 %v2284_v33, %v2256_v27  ;;  %v4074_v29 = vld [vmem:[%s6146_s10 + $0x88] sm:$0xff] }
0x12c1   : > { %v2261_v32 = vadd.f32 1.0, %v2259_v30  ;;  %v2287_v16 = vmul.f32 %v2285_v34, %v2257_v28  ;;  %v4078_v34 = vld [vmem:[%s6146_s10 + $0xa8] sm:$0xff] }
0x12c2   : > { %4801 = vrcp.f32 %v2260_v31  ;;  %v2288_v41 = vmul.f32 1.442695, %v2286_v36  ;;  %v4073_v31 = vld [vmem:[%s6146_s10 + $0x80] sm:$0xff] }
0x12c3   : > { %4803 = vrcp.f32 %v2261_v32  ;;  %v2290_v44 = vmul.f32 1.442695, %v2287_v16  ;;  %v4075_v32 = vld [vmem:[%s6146_s10 + $0x90] sm:$0xff] }
0x12c4   : > { %4805 = vpow2.f32 %v2288_v41  ;;  %v4645_v33 = vpack.c.bf16 %v4075_v32, %v4073_v31  ;;  %v4102_v31 = vld [vmem:[%s6150_s12 + $0x58] sm:$0xff] }
0x12c5   : > { %4807 = vpow2.f32 %v2290_v44 }
0x12cc   : > { %v4802_v35 = vpop.eup %4801 }
0x12cd   : > { %v4804_v37 = vpop.eup %4803  ;;  %v2266_v38 = vmul.f32 1.0614054, %v4802_v35 }
0x12ce   : > { %v2267_v39 = vmul.f32 1.0614054, %v4804_v37  ;;  %v4806_v57 = vpop.eup %4805 }
0x12cf   : > { %v2268_v40 = vadd.f32 -1.4531521, %v2266_v38  ;;  %v4808_v59 = vpop.eup %4807  ;;  %v4079_v38 = vld [vmem:[%s6146_s10 + $0xb0] sm:$0xff] }
0x12d0   : > { %v2269_v42 = vadd.f32 -1.4531521, %v2267_v39  ;;  %v4082_v39 = vld [vmem:[%s6146_s10 + $0xc8] sm:$0xff] }
0x12d1   : > { %v2270_v43 = vmul.f32 %v4802_v35, %v2268_v40  ;;  %v4084_v40 = vld [vmem:[%s6146_s10 + $0xd8] sm:$0xff] }
0x12d2   : > { %v2271_v45 = vmul.f32 %v4804_v37, %v2269_v42  ;;  %v4651_v41 = vpack.c.bf16 %v4084_v40, %v4082_v39  ;;  %v4081_v42 = vld [vmem:[%s6146_s10 + $0xc0] sm:$0xff] }
0x12d3   : > { %v2272_v47 = vadd.f32 1.4214138, %v2270_v43  ;;  %v4083_v43 = vld [vmem:[%s6146_s10 + $0xd0] sm:$0xff] }
0x12d4   : > { %v2273_v48 = vadd.f32 1.4214138, %v2271_v45  ;;  %v4653_v44 = vpack.c.bf16 %v4083_v43, %v4081_v42  ;;  %v4086_v45 = vld [vmem:[%s6146_s10 + $0xe8] sm:$0xff] }
0x12d5   : > { %v2274_v49 = vmul.f32 %v4802_v35, %v2272_v47  ;;  %v4088_v47 = vld [vmem:[%s6146_s10 + $0xf8] sm:$0xff] }
0x12d6   : > { %v2275_v50 = vmul.f32 %v4804_v37, %v2273_v48  ;;  %v4085_v48 = vld [vmem:[%s6146_s10 + $0xe0] sm:$0xff] }
0x12d7   : > { %v2276_v51 = vadd.f32 -0.28449672, %v2274_v49  ;;  %v4655_v49 = vpack.c.bf16 %v4088_v47, %v4086_v45 }
0x12d8   : > { %v2277_v52 = vadd.f32 -0.28449672, %v2275_v50  ;;  %v4087_v50 = vld [vmem:[%s6146_s10 + $0xf0] sm:$0xff] }
0x12d9   : > { %v2278_v53 = vmul.f32 %v4802_v35, %v2276_v51  ;;  %v4657_v51 = vpack.c.bf16 %v4087_v50, %v4085_v48 }
0x12da   : > { %v2279_v26 = vmul.f32 %v4804_v37, %v2277_v52 }
0x12db   : > { %v2280_v54 = vadd.f32 0.2548296, %v2278_v53 }
0x12dc   : > { %v2281_v55 = vadd.f32 0.2548296, %v2279_v26 }
0x12dd   : > { %v2282_v56 = vmul.f32 %v4802_v35, %v2280_v54  ;;  %v4080_v35 = vld [vmem:[%s6146_s10 + $0xb8] sm:$0xff] }
0x12de   : > { %v2283_v58 = vmul.f32 %v4804_v37, %v2281_v55  ;;  %v4647_v36 = vpack.c.bf16 %v4080_v35, %v4078_v34  ;;  %v4077_v37 = vld [vmem:[%s6146_s10 + $0xa0] sm:$0xff] }
0x12df   : > { %v2292_v60 = vmul.f32 %v4806_v57, %v2282_v56  ;;  %v4649_v16 = vpack.c.bf16 %v4079_v38, %v4077_v37  ;;  %v4071_v55 = vld [vmem:[%s6147_s26 + $0x1] ss:$0 sm:$0xff]  ;;  %v4096_v38 = vld [vmem:[%s6150_s12 + $0x48] sm:$0xff] }
0x12e0   : > { %v2293_v61 = vmul.f32 %v4808_v59, %v2283_v58  ;;  %v4072_v57 = vld [vmem:[%s6148_s3 + $0x1] ss:$0 sm:$0xff] }
0x12e1   : > { %v2294_v62 = vsub.f32 1.0, %v2292_v60  ;;  %v4089_v60 = vld [vmem:[%s6149_s11 + $0x2] sm:$0x3] }
0x12e2   : > { %v2295_v63 = vsub.f32 1.0, %v2293_v61  ;;  %v2472_v61 = vrot.slane %v4089_v60, %v5309_v5  ;;  %v4095_v37 = vld [vmem:[%s6150_s12 + $0x40] sm:$0xff] }
0x12e3   : > { %v2300_v0 = vsub.f32 0.0, %v2294_v62  ;;  %v4663_v40 = vpack.c.bf16 %v4096_v38, %v4095_v37  ;;  %v4120_v37 = vld [vmem:[%s6079_s13 + $0x1] ss:$0 sm:$0xff] }
0x12e4   : > { %v2301_v1 = vsub.f32 0.0, %v2295_v63 }
0x12e5   : > { %v2302_v2 = vsel %vm2298_vm8, %v2294_v62, %v2300_v0  ;;  %v2476_v62 = vrot.slane %v4089_v60, %v5325_v13 }
0x12e6   : > { %v2304_v7 = vadd.f32 1.0, %v2302_v2  ;;  %v2303_v8 = vsel %vm2299_vm9, %v2295_v63, %v2301_v1 }
0x12e7   : > { %v2305_v11 = vadd.f32 1.0, %v2303_v8 }
0x12e8   : > { %v2306_v15 = vmul.f32 %v2304_v7, %v2296_v12 }
0x12e9   : > { %v2307_v14 = vmul.f32 %v2305_v11, %v2297_v9 }
0x12eb   : > { %2411 = vmatprep.mubr.f32.mxu1 %v2307_v14 }
0x12ec   : > { %2412 = vmatmul.mubr.f32.vlgmr.msra.gmra.mrb[12].mxu1 %v2306_v15 }
0x12ed   : > { %4470 = vmatprep.mubr.msk.f32.mxu1 %vm4936_vm0, %v4937_v6 }
0x13bf   : > { %v4275_v17 = vpop.f32.mrb[12].mxu1 }
0x13c0   : > { %v4276_v10 = vpop.f32.mrb[13].mxu1 }
0x13c1   : > { %v4277_v19 = vadd.f32 %v4276_v10, %v4275_v17 }
0x13c3   : > { %v2414_v20 = vadd.f32 %v4277_v19, %v4068_v18 }
0x13c5   : > { %v5605_v22 = vadd.f32 %v2414_v20, %v5435_v46  ;;  %v4076_v46 = vld [vmem:[%s6146_s10 + $0x98] sm:$0xff] }
0x13c6   : > { %v4643_v30 = vpack.c.bf16 %v4076_v46, %v4074_v29 }
0x13c7   : > { %v2422_v21 = vsel %vm866_vm1, %v5605_v22, 0.0 }
0x13c8   : > { %2423 = vadd.xlane.f32.xlu1 %v2422_v21  ;;  %4644 = vmatprep.subr.bf16.mxu0 %v4643_v30  ;;  %v4101_v30 = vld [vmem:[%s6150_s12 + $0x50] sm:$0xff] }
0x13c9   : > { %4646 = vmatpush1.bf16.msra.mxu0 %v4645_v33  ;;  %v4660_v32 = vpack.c.bf16 %v4102_v31, %v4101_v30 }
0x13ca   : > { %4648 = vmatprep.subr.bf16.mxu0 %v4647_v36 }
0x13cd   : > { %4650 = vmatpush1.bf16.msra.mxu0 %v4649_v16 }
0x13ce   : > { %4652 = vmatprep.subr.bf16.mxu0 %v4651_v41 }
0x13d1   : > { %4654 = vmatpush1.bf16.msra.mxu0 %v4653_v44 }
0x13d2   : > { %4656 = vmatprep.subr.bf16.mxu0 %v4655_v49 }
0x13d5   : > { %4658 = vmatpush1.bf16.msra.mxu0 %v4657_v51 }
0x13d6   : > { %4463 = vmatprep.subr.mxu0 %v4937_v6 }
0x1455   : > { %v2424_v23 = vpop.xlane.xlu1 %2423 }
0x1456   : > { %v2425_v24 = vmul.f32 0.015625, %v2424_v23 }
0x1458   : > { %v2426_v25 = vsub.f32 %v5605_v22, %v2425_v24 }
0x145a   : > { %v2427_v27 = vmul.f32 %v2426_v25, %v2426_v25 }
0x145c   : > { %v2428_v28 = vsel %vm866_vm1, %v2427_v27, 0.0 }
0x145d   : > { %2429 = vadd.xlane.f32.xlu1 %v2428_v28 }
0x14ea   : > { %v2430_v52 = vpop.xlane.xlu1 %2429 }
0x14eb   : > { %v2431_v53 = vmul.f32 0.015625, %v2430_v52 }
0x14ed   : > { %v2432_v26 = vadd.f32 1e-05, %v2431_v53 }
0x14ef   : > { %4809 = vrsqrt.f32 %v2432_v26 }
0x14f9   : > { %v4810_v54 = vpop.eup %4809 }
0x14fa   : > { %v2434_v56 = vmul.f32 %v4810_v54, %v2426_v25 }
0x14fc   : > { %v2441_v58 = vmul.f32 %v4071_v55, %v2434_v56 }
0x14fe   : > { %v2448_v59 = vadd.f32 %v4072_v57, %v2441_v58 }
0x1500   : > { %4090 = vmatmul.mubr.msk.f32.vlgmr.msra.gmra.mrb[20].mxu0 %vm937_vm3, %v2448_v59 }
0x1501   : > { %4465 = vmatprep.mubr.msk.f32.mxu0 %vm4936_vm0, %v4937_v6 }
0x15d3   : > { %v2548_v63 = vpop.f32.mrb[20].mxu0 }
0x15d4   : > { %v5674_v0 = vadd.f32 %v2548_v63, %v2472_v61  ;;  %v2550_v1 = vpop.f32.mrb[21].mxu0  ;;  %v4110_v63 = vld [vmem:[%s6150_s12 + $0x68] sm:$0xff] }
0x15d5   : > { %v5676_v2 = vadd.f32 %v2550_v1, %v2476_v62  ;;  %v4109_v62 = vld [vmem:[%s6150_s12 + $0x60] sm:$0xff] }
0x15d6   : > { %2724 = vrot.lane.b32.xlu0 %v5674_v0, %s6151_s27  ;;  %2555 = vrot.lane.b32.xlu1 %v5674_v0, %s6152_s6  ;;  %v5685_v7 = vmul.f32 0.25, %v5674_v0  ;;  %v4666_v1 = vpack.c.bf16 %v4110_v63, %v4109_v62  ;;  %v4140_v62 = vld [vmem:[%s6082_s16 + $0xf8] sm:$0xff]  ;;  %v4137_v63 = vld [vmem:[%s6082_s16 + $0xe0] sm:$0xff]  ;;  %s5959_s6 = sand.u32 1, %s4925_s2  }
0x15d7   : > { %4469 = vmatpush3.msk.msra.mxu1 %vm1240_vm5, %v5676_v2  ;;  %s4034_s8 = sshll.u32 %s5959_s6, 2  ;;  %s6116_s0 = scalar_lea.vmem [#allocation4], %s5959_s6 }
0x15d8   : > { %4478 = vmatprep.subr.mxu1 %v4937_v6  ;;  %s5987_s27 = sshll.u32 %s6116_s0, 4  ;;  %s6023_s27 = int_to_ptr.vmem [resolvable:$true] %s5987_s27 }
0x15da   : > { %2722 = vrot.lane.b32.xlu0 %v5685_v7, %s6153_s29 }
0x1648   : > { %v2556_v8 = vpop.permute.xlu1 %2555  ;;  %v2725_v9 = vpop.permute.xlu0 %2724 }
0x1649   : > { %4464 = vmatpush3.xpose.msk.msra.mxu0 %vm1148_vm4, %v2556_v8 }
0x164a   : > { %4473 = vmatprep.subr.mxu0 %v4937_v6 }
0x164c   : > { %4466 = vmatmul.mubr.msk.f32.vlgmr.msra.gmra.mrb[22].mxu0 %vm1148_vm4, %v5685_v7  ;;  %v2723_v11 = vpop.permute.xlu0 %2722 }
0x164d   : > { %4474 = vmatpush3.xpose.msk.msra.mxu0 %vm1148_vm4, %v2725_v9  ;;  %4475 = vmatprep.mubr.msk.f32.mxu0 %vm4936_vm0, %v4937_v6 }
0x164e   : > { %4659 = vmatprep.subr.bf16.mxu0 %v4935_v3 }
0x1650   : > { %4476 = vmatmul.mubr.msk.f32.vlgmr.msra.gmra.mrb[24].mxu0 %vm1148_vm4, %v2723_v11 }
0x1651   : > { %4487 = vmatprep.mubr.msk.f32.mxu0 %vm4936_vm0, %v4937_v6  ;;  %4661 = vmatpush3.bf16.msra.mxu0 %v4660_v32 }
0x1652   : > { %4497 = vmatprep.subr.mxu0 %v4937_v6 }
0x171f   : > { %v2628_v12 = vpop.f32.mrb[22].mxu0 }
0x1720   : > { %v4467_v14 = vpop.f32.mrb[23].mxu0  ;;  %v2632_v15 = vsel %vm1224_vm6, %v2628_v12, -inf }
0x1721   : > { %2633 = vmax.xlane.f32.xlu0 %v2632_v15 }
0x1723   : > { %v2796_v17 = vpop.f32.mrb[24].mxu0 }
0x1724   : > { %v4477_v18 = vpop.f32.mrb[25].mxu0  ;;  %v2800_v10 = vsel %vm1224_vm6, %v2796_v17, -inf }
0x1725   : > { %2801 = vmax.xlane.f32.xlu1 %v2800_v10 }
0x1736   : > { %3038 = vrot.lane.b32.xlu1 %v5674_v0, %s6154_s5 }
0x173a   : > { %3036 = vrot.lane.b32.xlu1 %v5685_v7, %s6155_s28 }
0x17ae   : > { %v2634_v19 = vpop.xlane.xlu0 %2633 }
0x17af   : > { %v2635_v20 = vsub.f32 %v2628_v12, %v2634_v19 }
0x17b1   : > { %v2636_v21 = vmul.f32 1.442695, %v2635_v20 }
0x17b2   : > { %v2802_v23 = vpop.xlane.xlu1 %2801 }
0x17b3   : > { %4811 = vpow2.f32 %v2636_v21  ;;  %v2803_v24 = vsub.f32 %v2796_v17, %v2802_v23  ;;  %v4116_v23 = vld [vmem:[%s6150_s12 + $0x70] sm:$0xff] }
0x17b5   : > { %v2804_v25 = vmul.f32 1.442695, %v2803_v24  ;;  %v4117_v24 = vld [vmem:[%s6150_s12 + $0x78] sm:$0xff] }
0x17b6   : > { %v3039_v44 = vpop.permute.xlu1 %3038 }
0x17b7   : > { %4813 = vpow2.f32 %v2804_v25  ;;  %v4669_v25 = vpack.c.bf16 %v4117_v24, %v4116_v23  ;;  %v4144_v23 = vld [vmem:[%s6084_s18 + $0x108] sm:$0xff] }
0x17ba   : > { %v3037_v48 = vpop.permute.xlu1 %3036 }
0x17bd   : > { %v4812_v27 = vpop.eup %4811 }
0x17be   : > { %v2638_v28 = vsel %vm1224_vm6, %v4812_v27, 0.0 }
0x17bf   : > { %2639 = vadd.xlane.f32.xlu0 %v2638_v28 }
0x17c1   : > { %v4814_v29 = vpop.eup %4813 }
0x17c2   : > { %v2806_v46 = vsel %vm1224_vm6, %v4814_v29, 0.0 }
0x17c3   : > { %2807 = vadd.xlane.f32.xlu0 %v2806_v46 }
0x17d9   : > { %2811 = vrot.lane.b32.xlu0 %v5676_v2, %s6153_s29  ;;  %s4188_s29 = sshll.u32 %s5100_s7, 6 }
0x17da   : > { %s5979_s1 = scalar_lea.hbm %s6090_s24, %s4188_s29  ;;  %s4946_s29 = smov [#allocation2]  }
0x17db   : > { %s4843_s3 = sshll.u32 %s4946_s29, 4  ;;  %s4844_s3 = int_to_ptr.vmem [resolvable:$false] %s4843_s3 }
0x184c   : > { %v2640_v33 = vpop.xlane.xlu0 %2639 }
0x184d   : > { %4815 = vrcp.f32 %v2640_v33 }
0x1850   : > { %v2808_v34 = vpop.xlane.xlu0 %2807 }
0x1851   : > { %4817 = vrcp.f32 %v2808_v34 }
0x1854   : > { %v2812_v16 = vpop.permute.xlu0 %2811 }
0x1857   : > { %v4816_v35 = vpop.eup %4815 }
0x1858   : > { %v2642_v36 = vmul.f32 %v4816_v35, %v4812_v27 }
0x185a   : > { %4471 = vmatmul.mubr.msk.f32.vlgmr.msra.gmra.mrb[14].mxu1 %vm1236_vm7, %v2642_v36 }
0x185b   : > { %v4818_v39 = vpop.eup %4817  ;;  %4479 = vmatpush3.msk.msra.mxu1 %vm1240_vm5, %v2812_v16  ;;  %4480 = vmatprep.mubr.msk.f32.mxu1 %vm4936_vm0, %v4937_v6 }
0x185c   : > { %v2810_v41 = vmul.f32 %v4818_v39, %v4814_v29  ;;  %4662 = vmatprep.subr.bf16.mxu1 %v4935_v3 }
0x185e   : > { %4481 = vmatmul.mubr.msk.f32.vlgmr.msra.gmra.mrb[16].mxu1 %vm1236_vm7, %v2810_v41 }
0x185f   : > { %4664 = vmatpush3.bf16.msra.mxu1 %v4663_v40  ;;  %4494 = vmatprep.mubr.msk.f32.mxu1 %vm4936_vm0, %v4937_v6 }
0x1860   : > { %4502 = vmatprep.subr.mxu1 %v4937_v6 }
0x192d   : > { %v2715_v42 = vpop.f32.mrb[14].mxu1 }
0x192e   : > { %v4472_v43 = vpop.f32.mrb[15].mxu1  ;;  %4495 = vmatmul.mubr.msk.f32.vlgmr.msra.gmra.mrb[18].mxu1 %vm1148_vm4, %v2715_v42 }
0x192f   : > { %4504 = vmatprep.mubr.msk.f32.mxu1 %vm4936_vm0, %v4937_v6 }
0x1931   : > { %v2884_v45 = vpop.f32.mrb[16].mxu1 }
0x1932   : > { %v4482_v47 = vpop.f32.mrb[17].mxu1  ;;  %4488 = vmatmul.mubr.msk.f32.vlgmr.msra.gmra.mrb[26].mxu0 %vm1148_vm4, %v2884_v45 }
0x1933   : > { %4498 = vmatpush3.xpose.msk.msra.mxu0 %vm1148_vm4, %v3039_v44  ;;  %4499 = vmatprep.mubr.msk.f32.mxu0 %vm4936_vm0, %v4937_v6  ;;  %v4126_v44 = vld [vmem:[%s6082_s16 + $0x88] sm:$0xff]  ;;  %v4125_v47 = vld [vmem:[%s6082_s16 + $0x80] sm:$0xff] }
0x1934   : > { %4665 = vmatprep.subr.bf16.mxu0 %v4935_v3 }
0x1936   : > { %4500 = vmatmul.mubr.msk.f32.vlgmr.msra.gmra.mrb[28].mxu0 %vm1148_vm4, %v3037_v48  ;;  %v4127_v48 = vld [vmem:[%s6082_s16 + $0x90] sm:$0xff] }
0x1937   : > { %4511 = vmatprep.mubr.msk.f32.mxu0 %vm4936_vm0, %v4937_v6  ;;  %4667 = vmatpush3.bf16.msra.mxu0 %v4666_v1 }
0x1938   : > { %4519 = vmatprep.subr.mxu0 %v4937_v6 }
0x1a01   : > { %v3032_v49 = vpop.f32.mrb[18].mxu1 }
0x1a02   : > { %v4496_v50 = vpop.f32.mrb[19].mxu1 }
0x1a03   : > { %v4130_v50 = vld [vmem:[%s6082_s16 + $0xa8] sm:$0xff] }
0x1a05   : > { %v2959_v51 = vpop.f32.mrb[26].mxu0 }
0x1a06   : > { %v3033_v52 = vadd.f32 %v3032_v49, %v2959_v51  ;;  %v4489_v53 = vpop.f32.mrb[27].mxu0  ;;  %v4673_v49 = vpack.c.bf16 %v4127_v48, %v4125_v47  ;;  %v4132_v51 = vld [vmem:[%s6082_s16 + $0xb8] sm:$0xff]  ;;  %v4169_v47 = vld [vmem:[%s6084_s18 + $0x1d0] sm:$0xff] }
0x1a07   : > { %v4129_v53 = vld [vmem:[%s6082_s16 + $0xa0] sm:$0xff]  ;;  %v4170_v48 = vld [vmem:[%s6084_s18 + $0x1d8] sm:$0xff] }
0x1a09   : > { %v3110_v26 = vpop.f32.mrb[28].mxu0 }
0x1a0a   : > { %v4501_v54 = vpop.f32.mrb[29].mxu0  ;;  %v3114_v55 = vsel %vm1224_vm6, %v3110_v26, -inf }
0x1a0b   : > { %3115 = vmax.xlane.f32.xlu0 %v3114_v55  ;;  %v4134_v55 = vld [vmem:[%s6082_s16 + $0xc8] sm:$0xff] }
0x1a21   : > { %3125 = vrot.lane.b32.xlu0 %v5676_v2, %s6155_s28  ;;  %s4845_s28 = scalar_lea.vmem %s4844_s3, 128 }
0x1a25   : > { %3278 = vrot.lane.b32.xlu0 %v5685_v7, %s6156_s9 }
0x1a98   : > { %v3116_v56 = vpop.xlane.xlu0 %3115 }
0x1a99   : > { %v3117_v57 = vsub.f32 %v3110_v26, %v3116_v56  ;;  %v4131_v26 = vld [vmem:[%s6082_s16 + $0xb0] sm:$0xff]  ;;  %v4136_v56 = vld [vmem:[%s6082_s16 + $0xd8] sm:$0xff] }
0x1a9a   : > { %v4677_v54 = vpack.c.bf16 %v4131_v26, %v4129_v53  ;;  %v4171_v53 = vld [vmem:[%s6084_s18 + $0x1e0] sm:$0xff]  ;;  %v4172_v26 = vld [vmem:[%s6084_s18 + $0x1e8] sm:$0xff] }
0x1a9b   : > { %v3118_v58 = vmul.f32 1.442695, %v3117_v57  ;;  %v4679_v57 = vpack.c.bf16 %v4136_v56, %v4134_v55  ;;  %v4155_v55 = vld [vmem:[%s6084_s18 + $0x160] sm:$0xff]  ;;  %v4156_v56 = vld [vmem:[%s6084_s18 + $0x168] sm:$0xff] }
0x1a9c   : > { %v3126_v59 = vpop.permute.xlu0 %3125 }
0x1a9d   : > { %4819 = vpow2.f32 %v3118_v58  ;;  %4503 = vmatpush3.msk.msra.mxu1 %vm1240_vm5, %v3126_v59  ;;  %v4133_v58 = vld [vmem:[%s6082_s16 + $0xc0] sm:$0xff]  ;;  %v4135_v59 = vld [vmem:[%s6082_s16 + $0xd0] sm:$0xff] }
0x1a9e   : > { %4514 = vmatprep.subr.mxu1 %v4937_v6 }
0x1aa7   : > { %v4820_v60 = vpop.eup %4819 }
0x1aa8   : > { %v3120_v61 = vsel %vm1224_vm6, %v4820_v60, 0.0 }
0x1aa9   : > { %3121 = vadd.xlane.f32.xlu1 %v3120_v61  ;;  %v4138_v61 = vld [vmem:[%s6082_s16 + $0xe8] sm:$0xff] }
0x1aaa   : > { %v4683_v1 = vpack.c.bf16 %v4140_v62, %v4138_v61  ;;  %v4157_v61 = vld [vmem:[%s6084_s18 + $0x170] sm:$0xff]  ;;  %v4158_v62 = vld [vmem:[%s6084_s18 + $0x178] sm:$0xff] }
0x1aba   : > { %3280 = vrot.lane.b32.xlu1 %v5674_v0, %s6157_s30  ;;  %v3279_v0 = vpop.permute.xlu0 %3278  ;;  %s759_s30 = scalar_lea.vmem [#allocation2], %s4034_s8 }
0x1b36   : > { %v3122_v7 = vpop.xlane.xlu1 %3121 }
0x1b37   : > { %4821 = vrcp.f32 %v3122_v7  ;;  %v4139_v7 = vld [vmem:[%s6082_s16 + $0xf0] sm:$0xff] }
0x1b3a   : > { %v3281_v11 = vpop.permute.xlu1 %3280 }
0x1b41   : > { %v4822_v8 = vpop.eup %4821 }
0x1b42   : > { %v3124_v9 = vmul.f32 %v4822_v8, %v4820_v60  ;;  %v4681_v60 = vpack.c.bf16 %v4135_v59, %v4133_v58  ;;  %v4685_v8 = vpack.c.bf16 %v4139_v7, %v4137_v63  ;;  %v4173_v58 = vld [vmem:[%s6084_s18 + $0x1f0] sm:$0xff]  ;;  %v4174_v59 = vld [vmem:[%s6084_s18 + $0x1f8] sm:$0xff]  ;;  %v4717_v63 = vpack.c.bf16 %v4158_v62, %v4157_v61 }
0x1b44   : > { %4505 = vmatmul.mubr.msk.f32.vlgmr.msra.gmra.mrb[20].mxu1 %vm1236_vm7, %v3124_v9 }
0x1b45   : > { %4515 = vmatpush3.xpose.msk.msra.mxu1 %vm1148_vm4, %v3281_v11  ;;  %4516 = vmatprep.mubr.msk.f32.mxu1 %vm4936_vm0, %v4937_v6 }
0x1b46   : > { %4668 = vmatprep.subr.bf16.mxu1 %v4935_v3 }
0x1b48   : > { %4517 = vmatmul.mubr.msk.f32.vlgmr.msra.gmra.mrb[22].mxu1 %vm1148_vm4, %v3279_v0 }
0x1b49   : > { %4528 = vmatprep.mubr.msk.f32.mxu1 %vm4936_vm0, %v4937_v6  ;;  %4670 = vmatpush3.bf16.msra.mxu1 %v4669_v25  ;;  %v4161_v25 = vld [vmem:[%s6084_s18 + $0x190] sm:$0xff] }
0x1c17   : > { %v3198_v12 = vpop.f32.mrb[20].mxu1 }
0x1c18   : > { %v4506_v14 = vpop.f32.mrb[21].mxu1  ;;  %4512 = vmatmul.mubr.msk.f32.vlgmr.msra.gmra.mrb[30].mxu0 %vm1148_vm4, %v3198_v12 }
0x1c19   : > { %4521 = vmatprep.mubr.msk.f32.mxu0 %vm4936_vm0, %v4937_v6  ;;  %v4123_v14 = vld [vmem:[%s6080_s14 + $0x1] ss:$0 sm:$0xff] }
0x1c1b   : > { %v3352_v15 = vpop.f32.mrb[22].mxu1 }
0x1c1c   : > { %v4518_v17 = vpop.f32.mrb[23].mxu1  ;;  %v3356_v18 = vsel %vm1224_vm6, %v3352_v15, -inf }
0x1c1d   : > { %3357 = vmax.xlane.f32.xlu1 %v3356_v18  ;;  %v4124_v17 = vld [vmem:[%s6081_s15 + $0x1] ss:$0 sm:$0xff] }
0x1caa   : > { %v3358_v10 = vpop.xlane.xlu1 %3357 }
0x1cab   : > { %v3359_v3 = vsub.f32 %v3352_v15, %v3358_v10 }
0x1cad   : > { %v3360_v19 = vmul.f32 1.442695, %v3359_v3  ;;  %v4159_v3 = vld [vmem:[%s6084_s18 + $0x180] sm:$0xff] }
0x1caf   : > { %4823 = vpow2.f32 %v3360_v19  ;;  %v4160_v19 = vld [vmem:[%s6084_s18 + $0x188] sm:$0xff] }
0x1cb9   : > { %v4824_v20 = vpop.eup %4823 }
0x1cba   : > { %v3362_v21 = vsel %vm1224_vm6, %v4824_v20, 0.0 }
0x1cbb   : > { %3363 = vadd.xlane.f32.xlu0 %v3362_v21  ;;  %v4143_v21 = vld [vmem:[%s6084_s18 + $0x100] sm:$0xff] }
0x1cbc   : > { %v4689_v24 = vpack.c.bf16 %v4144_v23, %v4143_v21 }
0x1cd1   : > { %3367 = vrot.lane.b32.xlu0 %v5676_v2, %s6156_s9  ;;  %s3927_s9 = sshll.u32 %s759_s30, 4  ;;  %s5981_s9 = int_to_ptr.vmem [resolvable:$true] %s3927_s9 }
0x1cd2   : > { %s4839_s11 = scalar_lea.vmem %s5981_s9, 64  ;;  %p4846_p0 = scmp.lt.s32.totalorder %s5981_s9, %s4844_s3 }
0x1cd3   : > { %p4840_p11 = scmp.ne.s32.totalorder %s5981_s9, %s4839_s11  ;;  %p4847_p1 = scmp.lt.s32.totalorder %s4845_s28, %s4839_s11 }
0x1cd5   : > { %p4841_p12 = pnand %p4840_p11, %p5117_p5  ;;  %p4848_p2 = por %p4847_p1, %p4846_p0 }
0x1cd7   : > { %p4842_p13 = pneg %p4841_p12 }
0x1cd9   : > { %p4849_p3 = pnand %p4848_p2, %p4842_p13 }
0x1ceb   : > { %v3273_v27 = vpop.f32.mrb[30].mxu0 }
0x1cec   : > { %v3277_v28 = vadd.f32 %v3273_v27, %v3033_v52  ;;  %v4513_v29 = vpop.f32.mrb[31].mxu0  ;;  %v4675_v52 = vpack.c.bf16 %v4132_v51, %v4130_v50  ;;  %v4162_v27 = vld [vmem:[%s6084_s18 + $0x198] sm:$0xff]  ;;  %v4153_v50 = vld [vmem:[%s6084_s18 + $0x150] sm:$0xff] }
0x1ced   : > { %v4145_v29 = vld [vmem:[%s6084_s18 + $0x110] sm:$0xff]  ;;  %v4154_v51 = vld [vmem:[%s6084_s18 + $0x158] sm:$0xff] }
0x1d48   : > { %v3364_v46 = vpop.xlane.xlu0 %3363 }
0x1d49   : > { %4825 = vrcp.f32 %v3364_v46  ;;  %v4146_v46 = vld [vmem:[%s6084_s18 + $0x118] sm:$0xff] }
0x1d4c   : > { %v3368_v30 = vpop.permute.xlu0 %3367 }
0x1d4d   : > { %4520 = vmatpush3.msk.msra.mxu0 %vm1240_vm5, %v3368_v30  ;;  %v4693_v30 = vpack.c.bf16 %v4146_v46, %v4145_v29 }
0x1d53   : > { %v4826_v31 = vpop.eup %4825 }
0x1d54   : > { %v3366_v2 = vmul.f32 %v4826_v31, %v4824_v20  ;;  %v4687_v20 = vpack.c.bf16 %v4160_v19, %v4159_v3  ;;  %v4163_v31 = vld [vmem:[%s6084_s18 + $0x1a0] sm:$0xff] }
0x1d56   : > { %4522 = vmatmul.mubr.msk.f32.vlgmr.msra.gmra.mrb[32].mxu0 %vm1236_vm7, %v3366_v2  ;;  %4688 = vmatprep.subr.bf16.mxu1 %v4687_v20  ;;  %v4164_v2 = vld [vmem:[%s6084_s18 + $0x1a8] sm:$0xff] }
0x1d57   : > { %3658 = vmatprep.mubr.f32.mxu0 %v4937_v6 }
0x1e29   : > { %v3440_v32 = vpop.f32.mrb[32].mxu0 }
0x1e2a   : > { %v4523_v33 = vpop.f32.mrb[33].mxu0  ;;  %4529 = vmatmul.mubr.msk.f32.vlgmr.msra.gmra.mrb[24].mxu1 %vm1148_vm4, %v3440_v32  ;;  %v4695_v32 = vpack.c.bf16 %v4164_v2, %v4163_v31 }
0x1e2b   : > { %4690 = vmatpush3.bf16.msra.mxu1 %v4689_v24  ;;  %v4147_v33 = vld [vmem:[%s6084_s18 + $0x120] sm:$0xff] }
0x1efd   : > { %v3515_v34 = vpop.f32.mrb[24].mxu1 }
0x1efe   : > { %v3519_v35 = vadd.f32 %v3515_v34, %v3277_v28  ;;  %v4530_v36 = vpop.f32.mrb[25].mxu1  ;;  %v4691_v28 = vpack.c.bf16 %v4162_v27, %v4161_v25  ;;  %v4148_v34 = vld [vmem:[%s6084_s18 + $0x128] sm:$0xff] }
0x1eff   : > { %v4165_v36 = vld [vmem:[%s6084_s18 + $0x1b0] sm:$0xff] }
0x1f00   : > { %v3520_v38 = vadd.f32 %v3519_v35, %v5605_v22  ;;  %v4128_v22 = vld [vmem:[%s6082_s16 + $0x98] sm:$0xff]  ;;  %4692 = vmatprep.subr.bf16.mxu1 %v4691_v28  ;;  %v4697_v35 = vpack.c.bf16 %v4148_v34, %v4147_v33 }
0x1f01   : > { %v4671_v45 = vpack.c.bf16 %v4128_v22, %v4126_v44  ;;  %4694 = vmatpush3.bf16.msra.mxu1 %v4693_v30  ;;  %v4151_v44 = vld [vmem:[%s6084_s18 + $0x140] sm:$0xff]  ;;  %v4152_v22 = vld [vmem:[%s6084_s18 + $0x148] sm:$0xff] }
0x1f02   : > { %v5790_v16 = vadd.f32 %v4120_v37, %v3520_v38  ;;  %4696 = vmatprep.subr.bf16.mxu1 %v4695_v32  ;;  %v4166_v37 = vld [vmem:[%s6084_s18 + $0x1b8] sm:$0xff] }
0x1f03   : > { %4672 = vmatprep.subr.bf16.mxu0 %v4671_v45  ;;  %v4699_v38 = vpack.c.bf16 %v4166_v37, %v4165_v36  ;;  %v4705_v45 = vpack.c.bf16 %v4152_v22, %v4151_v44 }
0x1f04   : > { %v3534_v39 = vsel %vm866_vm1, %v5790_v16, 0.0  ;;  %4674 = vmatpush1.bf16.msra.mxu0 %v4673_v49  ;;  %v4707_v49 = vpack.c.bf16 %v4170_v48, %v4169_v47 }
0x1f05   : > { %3535 = vadd.xlane.f32.xlu1 %v3534_v39  ;;  %4676 = vmatprep.subr.bf16.mxu0 %v4675_v52  ;;  %v4149_v39 = vld [vmem:[%s6084_s18 + $0x130] sm:$0xff]  ;;  %v4709_v52 = vpack.c.bf16 %v4154_v51, %v4153_v50 }
0x1f06   : > { %4698 = vmatpush3.bf16.msra.mxu1 %v4697_v35 }
0x1f07   : > { %4700 = vmatprep.subr.bf16.mxu1 %v4699_v38 }
0x1f08   : > { %4678 = vmatpush1.bf16.msra.mxu0 %v4677_v54  ;;  %v4711_v54 = vpack.c.bf16 %v4172_v26, %v4171_v53 }
0x1f09   : > { %4680 = vmatprep.subr.bf16.mxu0 %v4679_v57  ;;  %v4713_v57 = vpack.c.bf16 %v4156_v56, %v4155_v55 }
0x1f0c   : > { %4682 = vmatpush1.bf16.msra.mxu0 %v4681_v60  ;;  %v4715_v60 = vpack.c.bf16 %v4174_v59, %v4173_v58 }
0x1f0d   : > { %4684 = vmatprep.subr.bf16.mxu0 %v4683_v1  ;;  %v4141_v1 = vld [vmem:[%s6083_s17 + $0x2] sm:$0x3] }
0x1f0e   : > { %v3584_v7 = vrot.slane %v4141_v1, %v5309_v5 }
0x1f10   : > { %4686 = vmatpush1.bf16.msra.mxu0 %v4685_v8  ;;  %v3588_v8 = vrot.slane %v4141_v1, %v5325_v13 }
0x1f92   : > { %v3536_v6 = vpop.xlane.xlu1 %3535 }
0x1f93   : > { %v3537_v40 = vmul.f32 0.015625, %v3536_v6  ;;  %v4150_v6 = vld [vmem:[%s6084_s18 + $0x138] sm:$0xff] }
0x1f95   : > { %v3538_v41 = vsub.f32 %v5790_v16, %v3537_v40  ;;  %v4701_v40 = vpack.c.bf16 %v4150_v6, %v4149_v39 }
0x1f97   : > { %v3539_v42 = vmul.f32 %v3538_v41, %v3538_v41  ;;  %4702 = vmatpush3.bf16.msra.mxu1 %v4701_v40 }
0x1f99   : > { %v3540_v43 = vsel %vm866_vm1, %v3539_v42, 0.0  ;;  %v4168_v42 = vld [vmem:[%s6084_s18 + $0x1c8] sm:$0xff] }
0x1f9a   : > { %3541 = vadd.xlane.f32.xlu1 %v3540_v43 }
0x2027   : > { %v3542_v9 = vpop.xlane.xlu1 %3541 }
0x2028   : > { %v3543_v11 = vmul.f32 0.015625, %v3542_v9 }
0x202a   : > { %v3544_v0 = vadd.f32 1e-05, %v3543_v11 }
0x202c   : > { %4827 = vrsqrt.f32 %v3544_v0 }
0x2036   : > { %v4828_v12 = vpop.eup %4827 }
0x2037   : > { %v3546_v15 = vmul.f32 %v4828_v12, %v3538_v41  ;;  %v4167_v41 = vld [vmem:[%s6084_s18 + $0x1c0] sm:$0xff] }
0x2038   : > { %v4703_v43 = vpack.c.bf16 %v4168_v42, %v4167_v41 }
0x2039   : > { %v3553_v18 = vmul.f32 %v4123_v14, %v3546_v15 }
0x203a   : > { %4704 = vmatprep.subr.bf16.mxu1 %v4703_v43 }
0x203b   : > { %v3560_v10 = vadd.f32 %v4124_v17, %v3553_v18  ;;  %4706 = vmatpush3.bf16.msra.mxu1 %v4705_v45 }
0x203c   : > { %4708 = vmatprep.subr.bf16.mxu1 %v4707_v49 }
0x203d   : > { %4142 = vmatmul.mubr.msk.f32.vlgmr.msra.gmra.mrb[34].mxu0 %vm937_vm3, %v3560_v10 }
0x203f   : > { %4710 = vmatpush3.bf16.msra.mxu1 %v4709_v52 }
0x2040   : > { %4712 = vmatprep.subr.bf16.mxu1 %v4711_v54 }
0x2043   : > { %4714 = vmatpush3.bf16.msra.mxu1 %v4713_v57 }
0x2044   : > { %4716 = vmatprep.subr.bf16.mxu1 %v4715_v60  ;;  %v4176_v60 = vld [vmem:[%s6085_s19 + $0x1] ss:$0 sm:$0xff] }
0x2047   : > { %4718 = vmatpush3.bf16.msra.mxu1 %v4717_v63 }
0x2110   : > { %v3660_v9 = vpop.f32.mrb[34].mxu0 }
0x2111   : > { %v3661_v11 = vadd.f32 %v3660_v9, %v3584_v7  ;;  %v3662_v0 = vpop.f32.mrb[35].mxu0 }
0x2112   : > { %v3663_v12 = vadd.f32 %v3662_v0, %v3588_v8 }
0x2113   : > { %v3665_v14 = vmul.f32 0.70710677, %v3661_v11  ;;  %v3707_v56 = vmul.f32 0.5, %v3661_v11 }
0x2114   : > { %v3666_v15 = vmul.f32 0.70710677, %v3663_v12  ;;  %v3708_v54 = vmul.f32 0.5, %v3663_v12 }
0x2115   : > { %v3667_v17 = vand.u32 2147483647, %v3665_v14  ;;  %vm3709_vm10 = vcmp.ge.f32.partialorder %v3665_v14, 0.0 }
0x2116   : > { %v3668_v18 = vand.u32 2147483647, %v3666_v15  ;;  %vm3710_vm11 = vcmp.ge.f32.partialorder %v3666_v15, 0.0 }
0x2117   : > { %v3669_v10 = vmul.f32 0.3275911, %v3667_v17  ;;  %v3695_v21 = vsub.f32 0.0, %v3667_v17 }
0x2118   : > { %v3670_v3 = vmul.f32 0.3275911, %v3668_v18  ;;  %v3696_v23 = vsub.f32 0.0, %v3668_v18 }
0x2119   : > { %v3671_v19 = vadd.f32 1.0, %v3669_v10  ;;  %v3697_v5 = vmul.f32 %v3695_v21, %v3667_v17 }
0x211a   : > { %v3672_v20 = vadd.f32 1.0, %v3670_v3  ;;  %v3698_v27 = vmul.f32 %v3696_v23, %v3668_v18  ;;  %v4945_v18 = vmov 1983009808   ;;  %v4178_v23 = vld [vmem:[%s6087_s21] ss:$0 sm:$0xff] }
0x211b   : > { %4829 = vrcp.f32 %v3671_v19  ;;  %v3699_v46 = vmul.f32 1.442695, %v3697_v5  ;;  %v3862_v10 = vunpack.c.l.s4 %v4945_v18  ;;  %v4177_v19 = vld [vmem:[%s6086_s20] ss:$0 sm:$0xff] }
0x211c   : > { %4831 = vrcp.f32 %v3672_v20  ;;  %v3701_v2 = vmul.f32 1.442695, %v3698_v27  ;;  %v4179_v20 = vld [vmem:[%s6088_s22] ss:$0 sm:$0xff] }
0x211d   : > { %4833 = vpow2.f32 %v3699_v46 }
0x211e   : > { %4835 = vpow2.f32 %v3701_v2 }
0x2125   : > { %v4830_v24 = vpop.eup %4829 }
0x2126   : > { %v4832_v25 = vpop.eup %4831  ;;  %v3677_v13 = vmul.f32 1.0614054, %v4830_v24 }
0x2127   : > { %v3678_v28 = vmul.f32 1.0614054, %v4832_v25  ;;  %v4834_v43 = vpop.eup %4833 }
0x2128   : > { %v3679_v29 = vadd.f32 -1.4531521, %v3677_v13  ;;  %v4836_v22 = vpop.eup %4835 }
0x2129   : > { %v3680_v30 = vadd.f32 -1.4531521, %v3678_v28 }
0x212a   : > { %v3681_v31 = vmul.f32 %v4830_v24, %v3679_v29 }
0x212b   : > { %v3682_v32 = vmul.f32 %v4832_v25, %v3680_v30 }
0x212c   : > { %v3683_v33 = vadd.f32 1.4214138, %v3681_v31 }
0x212d   : > { %v3684_v34 = vadd.f32 1.4214138, %v3682_v32 }
0x212e   : > { %v3685_v35 = vmul.f32 %v4830_v24, %v3683_v33 }
0x212f   : > { %v3686_v36 = vmul.f32 %v4832_v25, %v3684_v34 }
0x2130   : > { %v3687_v37 = vadd.f32 -0.28449672, %v3685_v35 }
0x2131   : > { %v3688_v38 = vadd.f32 -0.28449672, %v3686_v36 }
0x2132   : > { %v3689_v39 = vmul.f32 %v4830_v24, %v3687_v37 }
0x2133   : > { %v3690_v6 = vmul.f32 %v4832_v25, %v3688_v38 }
0x2134   : > { %v3691_v40 = vadd.f32 0.2548296, %v3689_v39 }
0x2135   : > { %v3692_v41 = vadd.f32 0.2548296, %v3690_v6 }
0x2136   : > { %v3693_v42 = vmul.f32 %v4830_v24, %v3691_v40  ;;  %v4180_v24 = vld [vmem:[%s6089_s23] ss:$0 sm:$0xff] }
0x2137   : > { %v3694_v44 = vmul.f32 %v4832_v25, %v3692_v41 }
0x2138   : > { %v3703_v45 = vmul.f32 %v4834_v43, %v3693_v42 }
0x2139   : > { %v3704_v47 = vmul.f32 %v4836_v22, %v3694_v44 }
0x213a   : > { %v3705_v48 = vsub.f32 1.0, %v3703_v45 }
0x213b   : > { %v3706_v49 = vsub.f32 1.0, %v3704_v47 }
0x213c   : > { %v3711_v50 = vsub.f32 0.0, %v3705_v48 }
0x213d   : > { %v3712_v51 = vsub.f32 0.0, %v3706_v49 }
0x213e   : > { %v3713_v52 = vsel %vm3709_vm10, %v3705_v48, %v3711_v50 }
0x213f   : > { %v3715_v53 = vadd.f32 1.0, %v3713_v52  ;;  %v3714_v26 = vsel %vm3710_vm11, %v3706_v49, %v3712_v51 }
0x2140   : > { %v3716_v55 = vadd.f32 1.0, %v3714_v26 }
0x2141   : > { %v3717_v58 = vmul.f32 %v3715_v53, %v3707_v56 }
0x2142   : > { %v3718_v57 = vmul.f32 %v3716_v55, %v3708_v54 }
0x2144   : > { %3824 = vmatprep.mubr.f32.mxu1 %v3718_v57 }
0x2145   : > { %3825 = vmatmul.mubr.f32.vlgmr.msra.gmra.mrb[26].mxu1 %v3717_v58 }
0x2218   : > { %v4338_v59 = vpop.f32.mrb[26].mxu1 }
0x2219   : > { %v4339_v61 = vpop.f32.mrb[27].mxu1 }
0x221a   : > { %v4340_v62 = vadd.f32 %v4339_v61, %v4338_v59 }
0x221c   : > { %v3827_v63 = vadd.f32 %v4340_v62, %v4176_v60 }
0x221e   : > { %v3830_v1 = vadd.f32 %v3827_v63, %v5790_v16  ;;  %v3863_v16 = vunpack.c.0.s8 %v3862_v10 }
0x2220   : > { %v3833_v7 = vsel %vm866_vm1, %v3830_v1, 0.0  ;;  %v3866_v13 = vsub.s32 %v3863_v16, %v5306_v4 }
0x2221   : > { %3834 = vadd.xlane.f32.xlu1 %v3833_v7 }
0x22ae   : > { %v3835_v8 = vpop.xlane.xlu1 %3834 }
0x22af   : > { %v3836_v9 = vmul.f32 0.015625, %v3835_v8 }
0x22b1   : > { %v3837_v11 = vsub.f32 %v3830_v1, %v3836_v9 }
0x22b3   : > { %v3838_v0 = vmul.f32 %v3837_v11, %v3837_v11 }
0x22b5   : > { %v3839_v12 = vsel %vm866_vm1, %v3838_v0, 0.0 }
0x22b6   : > { %3840 = vadd.xlane.f32.xlu1 %v3839_v12 }
0x2343   : > { %v3841_v14 = vpop.xlane.xlu1 %3840 }
0x2344   : > { %v3842_v15 = vmul.f32 0.015625, %v3841_v14 }
0x2346   : > { %v3843_v17 = vadd.f32 1e-05, %v3842_v15 }
0x2348   : > { %4837 = vrsqrt.f32 %v3843_v17 }
0x2352   : > { %v4838_v3 = vpop.eup %4837 }
0x2353   : > { %v3845_v21 = vmul.f32 %v4838_v3, %v3837_v11 }
0x2355   : > { %v3852_v5 = vmul.f32 %v4177_v19, %v3845_v21  ;;  %v3882_v25 = vmul.f32 %v4179_v20, %v3845_v21 }
0x2357   : > { %v3859_v27 = vadd.f32 %v4178_v23, %v3852_v5  ;;  %v3889_v28 = vadd.f32 %v4180_v24, %v3882_v25 }
0x2359   : > { %v3867_v29 = vrot.slane %v3859_v27, %v3866_v13  ;;  %v3897_v46 = vrot.slane %v3889_v28, %v3866_v13 }
0x235b   : > { %v3868_v30 = vcombine.high %v3867_v29, %v3867_v29  ;;  %3872 = vst.msk [vmem:[%s759_s30] sm:$0x3] %vm3871_vm12, %v3867_v29  ;;  %v3898_v4 = vcombine.high %v3897_v46, %v3897_v46 }
0x235d   : > { %3873 = vst.msk [vmem:[%s759_s30 + $0x2] sm:$0x3] %vm3871_vm12, %v3868_v30  ;;  %v3901_v31 = vmax.f32 %v3897_v46, %v3898_v4 }
0x235e   : > { %4852 = shalt.err (!%p4849_p3)
}
0x235f   : > { %s4853_s30 = scalar_lea.hbm %s5979_s1, 64  ;;  %s4857_s29 = scalar_lea.hbm %s6090_s24, 128 }
0x2360   : > { %p4854_p4 = scmp.ne.s32.totalorder %s5979_s1, %s4853_s30  ;;  %p4858_p9 = scmp.lt.u32.totalorder %s5979_s1, %s6090_s24 }
0x2361   : > { %p4859_p10 = scmp.lt.u32.totalorder %s4857_s29, %s4853_s30  ;;  %p4861_p12 = scmp.lt.u32.totalorder %s4853_s30, %s5979_s1 }
0x2362   : > { %p4855_p7 = pnand %p4854_p4, %p5117_p5 }
0x2363   : > { %p4860_p11 = por %p4859_p10, %p4858_p9 }
0x2364   : > { %p4856_p8 = pneg %p4855_p7 }
0x2365   : > { %p4862_p13 = por %p4861_p12, %p4860_p11 }
0x2367   : > { %p4863_p0 = pnand %p4862_p13, %p4856_p8 }
0x2369   : > { %4866 = shalt.err (!%p4863_p0)
}
0x236a   : > { %s4947_s11 = smov 2   ;;  %s6158_s28 = scalar_lea.sflag [#allocation3], %s5959_s6  ;;  %v4181_v2 = vrot.slane %v3901_v31, 9  ;;  %vm3907_vm13 = vcmask 516096  }
0x236b   : > { %4719 = dma.vmem_to_hbm [thread:$0]  (%p5117_p5), %s5981_s9, 64, %s5979_s1, %s6158_s28, %s6154_s5, %s6154_s5, %s4947_s11  }
0x236c   : > { %v3906_v32 = vmax.f32 %v3901_v31, %v4181_v2  ;;  %s6159_s10 = sshll.u32 %s5100_s7, 4  ;;  %s6160_s29 = scalar_lea.vmem [#allocation4], %s5959_s6 }
0x236d   : > { %s6020_s30 = scalar_lea.hbm %s6091_s25, %s6159_s10  ;;  %s3915_s3 = scalar_lea.sflag [#allocation5], %s5959_s6 }
0x236e   : > { %3908 = vst.msk [vmem:[%s6160_s29] sm:$0x1] %vm3907_vm13, %v3906_v32  ;;  %s4867_s12 = scalar_lea.vmem %s6023_s27, 16  ;;  %s4948_s5 = smov [#allocation4]  }
0x236f   : > { %p4868_p1 = scmp.ne.s32.totalorder %s6023_s27, %s4867_s12  ;;  %s4871_s7 = sshll.u32 %s4948_s5, 4  ;;  %s4872_s7 = int_to_ptr.vmem [resolvable:$false] %s4871_s7 }
0x2370   : > { %s4873_s9 = scalar_lea.vmem %s4872_s7, 32  ;;  %p4874_p4 = scmp.lt.s32.totalorder %s6023_s27, %s4872_s7 }
0x2371   : > { %p4869_p2 = pnand %p4868_p1, %p5117_p5  ;;  %p4875_p7 = scmp.lt.s32.totalorder %s4873_s9, %s4867_s12 }
0x2373   : > { %p4870_p3 = pneg %p4869_p2  ;;  %p4876_p8 = por %p4875_p7, %p4874_p4 }
0x2375   : > { %p4877_p9 = pnand %p4876_p8, %p4870_p3 }
0x2377   : > { %4880 = shalt.err (!%p4877_p9)
}
0x2378   : > { %s4881_s6 = scalar_lea.hbm %s6020_s30, 16  ;;  %s4885_s28 = scalar_lea.hbm %s6091_s25, 32 }
0x2379   : > { %p4882_p10 = scmp.ne.s32.totalorder %s6020_s30, %s4881_s6  ;;  %p4886_p13 = scmp.lt.u32.totalorder %s6020_s30, %s6091_s25 }
0x237a   : > { %p4887_p0 = scmp.lt.u32.totalorder %s4885_s28, %s4881_s6  ;;  %p4889_p2 = scmp.lt.u32.totalorder %s4881_s6, %s6020_s30 }
0x237b   : > { %p4883_p11 = pnand %p4882_p10, %p5117_p5 }
0x237c   : > { %p4888_p1 = por %p4887_p0, %p4886_p13 }
0x237d   : > { %p4884_p12 = pneg %p4883_p11 }
0x237e   : > { %p4890_p3 = por %p4889_p2, %p4888_p1 }
0x2380   : > { %p4891_p4 = pnand %p4890_p3, %p4884_p12 }
0x2382   : > { %4894 = shalt.err (!%p4891_p4)
}
0x2383   : > { %4720 = dma.vmem_to_hbm [thread:$0]  (%p5117_p5), %s6023_s27, 16, %s6020_s30, %s3915_s3  }
0x2384 PF: > { %s6161_s12 = sld [smem:[#allocation10_spill]]  ;;  %s6162_s0 = sld [smem:[#allocation8_spill]] }
0x238a   : > { %p4730_p7 = scmp.ge.s32.totalorder %s6161_s12, 2  ;;  %s3955_s5 = sand.u32 1, %s6162_s0  }
0x238b   : > { %s3956_s7 = scalar_lea.sflag [#allocation3], %s3955_s5 }
0x238c   : > { %p4724_p8 = pnand %p4730_p7, %p5121_p6 }
0x238e   : > { %4912 = dma.done.wait (!%p4724_p8), %s3956_s7, 64  }
0x238f   : > { %4914 = vsyncadd (!%p4724_p8), %s3956_s7, 4294967232  ;;  %s3965_s9 = scalar_lea.sflag [#allocation5], %s3955_s5 }
0x2390   : > { %4916 = dma.done.wait (!%p4724_p8), %s3965_s9, 16  }
0x2391   : > { %4918 = vsyncadd (!%p4724_p8), %s3965_s9, 4294967280  ;;  %s6164_s30 = sld [smem:[#allocation11_spill]]  ;;  %s6165_s4 = sld [smem:[#allocation9_spill]] }
0x2392   : > { %s6166_s6 = sld [smem:[#allocation12_spill]]  ;;  %s6167_s29 = smov %s4925_s2 }
0x2397   : > { %p39_p5 = scmp.ge.s32.totalorder %s6164_s30, 4   ;;  %s6168_s2 = smov %s6165_s4 }
0x2399   :  { %41 = sbr.rel (!%p39_p5) target bundleno = 19 (0x13), region = 180 }
0x23a0   :  { %3969 = vsyncpa [#allocation3], 1 }
0x23a1   :  { %3971 = vsyncpa [#allocation3 + $0x1], 1 }
0x23a2   :  { %3972 = vsyncpa [#allocation5], 1 }
0x23a3   :  { %3974 = vsyncpa [#allocation5 + $0x1], 1 }

</bundles_post_ra>
